<compile_context>
chip_gen: v7x
topology: tpu7x:2x2x1
jax: 0.10.0
libtpu: 0.0.40
codegen_flags: <defaults>
</compile_context>

<pallas_src>
import jax
import jax.numpy as jnp
from jax.experimental import pallas as pl
from jax.experimental.pallas import tpu as pltpu

# ---------------- fixed geometry for this VGG config (16x16 input) ----------
CIN_PAD = 8              # conv1 input channels padded 3 -> 8 (sublane quantum)
C1 = 32                  # conv1 output channels
C2 = 128                 # conv2 output channels
H1, W1 = 16, 16          # conv1 output spatial size
WP1 = 24                 # conv1 padded row width (16 + 2 halo, rounded up to 8)
R1 = H1 * WP1            # 384 "wide" conv1 output rows (cols >= 16 discarded)
NROW1 = 440              # conv1 flat input rows: 18*24 = 432 real + 8 zero tail
H2, W2 = 8, 8            # conv2 output spatial size (after 2x2/2 maxpool)
WP2 = 16                 # conv2 padded row width (8 + 2 halo, rounded up to 8)
R2 = H2 * WP2            # 128 wide conv2 output rows
NROW2 = 168              # conv2 flat input rows: 10*16 = 160 real + 8 zero tail
HP, WPO = 7, 7           # AdaptiveAvgPool2d target
FC1_IN = HP * WPO * C2   # 6272
FC1_OUT = 128
NUM_CLASSES = 10


def _vgg_fused_kernel(x_ref, w1_ref, b1_ref, w2_ref, b2_ref,
                      wf1_ref, bf1_ref, wf2_ref, bf2_ref,
                      o_ref, x2_ref, flat_ref):
    # ---------------- conv1 (3x3, pad=1) + bias + ReLU ----------------------
    # x_ref[0] is the zero-haloed input flattened to (row, channel): padded
    # pixel (i, j) lives at flat row i*WP1 + j, so the (kh, kw) tap of every
    # output is one contiguous row slice at offset kh*WP1 + kw.  Columns
    # w >= 16 of the wide output are wrap-around garbage and are dropped.
    acc1 = jnp.zeros((R1, C1), jnp.float32)
    for kh in range(3):
        for kw in range(3):
            off = kh * WP1 + kw
            acc1 = acc1 + jnp.dot(x_ref[0, off:off + R1, :],
                                  w1_ref[kh * 3 + kw],
                                  preferred_element_type=jnp.float32)
    acc1 = jnp.maximum(acc1 + b1_ref[...], 0.0)

    # ---------------- 2x2 / stride-2 maxpool -> (8, 8, 32) ------------------
    v = acc1.reshape(H1, WP1, C1)[:, :W1, :].reshape(H1 * W1, C1)      # (256,32)
    r = jnp.max(v.reshape(H1 * (W1 // 2), 2, C1), axis=1)              # W pairs
    r = r.reshape(H1 // 2, W1, C1)                                     # h=2i | 2i+1
    pooled = jnp.maximum(r[:, :W1 // 2, :], r[:, W1 // 2:, :])         # (8,8,32)

    # -------- build conv2's zero-haloed, row-flattened input in VMEM --------
    x2_ref[...] = jnp.zeros((NROW2, C1), x2_ref.dtype)
    for h in range(H2):
        x2_ref[(h + 1) * WP2 + 1:(h + 1) * WP2 + 1 + W2, :] = (
            pooled[h].astype(x2_ref.dtype))

    # ---------------- conv2 (3x3, pad=1) + bias + ReLU -----------------------
    acc2 = jnp.zeros((R2, C2), jnp.float32)
    for kh in range(3):
        for kw in range(3):
            off = kh * WP2 + kw
            acc2 = acc2 + jnp.dot(x2_ref[off:off + R2, :],
                                  w2_ref[kh * 3 + kw],
                                  preferred_element_type=jnp.float32)
    acc2 = jnp.maximum(acc2 + b2_ref[...], 0.0)
    y = acc2.reshape(H2, WP2, C2)[:, :W2, :]                           # (8,8,128)

    # ------ AdaptiveAvgPool2d((7,7)) on an 8x8 map == 2x2 / stride-1 mean ---
    s = y[:, :WPO, :] + y[:, 1:, :]                                    # (8,7,128)
    p = (s[:HP] + s[1:]) * 0.25                                        # (7,7,128)

    # ------ flatten to a (*, 6272) row; fc1 weight rows were pre-permuted to
    # this NHWC order at init, so no transpose is needed ---------------------
    flat_ref[...] = jnp.zeros((8, FC1_IN), flat_ref.dtype)
    for h in range(HP):
        row = p[h]                                                     # (7, 128)
        for w in range(WPO):
            base = (h * WPO + w) * C2
            flat_ref[0:1, base:base + C2] = row[w:w + 1, :].astype(flat_ref.dtype)

    # ---------------- classifier: fc1 + ReLU (+ Dropout=id) + fc2 -----------
    h1 = jnp.dot(flat_ref[...], wf1_ref[...],
                 preferred_element_type=jnp.float32) + bf1_ref[...]
    h1 = jnp.maximum(h1, 0.0)                        # (8, 128); only row 0 real
    logits = jnp.dot(h1.astype(jnp.bfloat16), wf2_ref[...],
                     preferred_element_type=jnp.float32) + bf2_ref[...]
    o_ref[0] = logits[0:1, :].astype(o_ref.dtype)


class VGGPallas:
    """CIFAR-style VGG matching the reference spec:
       features = Conv3x3(Cin->32)+ReLU, MaxPool2x2, Conv3x3(32->128)+ReLU,
       then AdaptiveAvgPool2d((7,7)), Flatten,
       classifier = Linear(6272,128) -> ReLU -> Dropout -> Linear(128,10).
       Dropout is identity (eval mode).  Whole forward = one pallas_call."""

    def __init__(self, key, in_channels=3):
        assert in_channels <= CIN_PAD
        ks = jax.random.split(key, 4)
        self.cin = in_channels

        def conv_params(k, cout, cin):
            # kaiming_normal_(mode='fan_out', nonlinearity='relu'), bias = 0
            fan_out = cout * 9
            std = (2.0 / fan_out) ** 0.5
            w = std * jax.random.normal(k, (cout, cin, 3, 3), jnp.float32)
            return w, jnp.zeros((cout,), jnp.float32)

        def pack_conv(w, cin_pad):
            cout, cin = w.shape[0], w.shape[1]
            taps = jnp.transpose(w, (2, 3, 1, 0)).reshape(9, cin, cout)
            taps = jnp.pad(taps, ((0, 0), (0, cin_pad - cin), (0, 0)))
            return taps.astype(jnp.bfloat16)

        w1, b1 = conv_params(ks[0], C1, in_channels)
        w2, b2 = conv_params(ks[1], C2, C1)
        self.w1p = pack_conv(w1, CIN_PAD)                  # (9, 8, 32) bf16
        self.b1p = b1.reshape(1, C1)                       # (1, 32) f32
        self.w2p = pack_conv(w2, C1)                       # (9, 32, 128) bf16
        self.b2p = b2.reshape(1, C2)                       # (1, 128) f32

        # classifier: normal(0, 0.01), bias 0.  fc1 weight is transposed and
        # its rows pre-permuted from torch's NCHW-flatten (c*49 + h*7 + w) to
        # the kernel's NHWC-flatten ((h*7 + w)*128 + c) order, once at init.
        fc1_w = 0.01 * jax.random.normal(ks[2], (FC1_OUT, FC1_IN), jnp.float32)
        fc2_w = 0.01 * jax.random.normal(ks[3], (NUM_CLASSES, FC1_OUT), jnp.float32)
        wm = fc1_w.reshape(FC1_OUT, C2, HP, WPO)           # (out, c, h, w)
        wm = jnp.transpose(wm, (2, 3, 1, 0))               # (h, w, c, out)
        self.fc1_wp = wm.reshape(FC1_IN, FC1_OUT).astype(jnp.bfloat16)
        self.fc1_bp = jnp.zeros((1, FC1_OUT), jnp.float32)
        self.fc2_wp = jnp.transpose(fc2_w).astype(jnp.bfloat16)    # (128, 10)
        self.fc2_bp = jnp.zeros((1, NUM_CLASSES), jnp.float32)

    def __call__(self, x_nchw):
        n = x_nchw.shape[0]
        assert x_nchw.shape[1] == self.cin
        assert x_nchw.shape[2] == H1 and x_nchw.shape[3] == W1
        # NCHW -> NHWC bf16, halo-pad H by 1, pad W by 1 (left) / 7 (right),
        # channels 3->8 (NOT 128), then flatten rows so padded pixel (i, j)
        # sits at flat row i*24 + j; 8 zero tail rows cover the last tap
        # offsets.  Per-image input is ~7 KB of HBM traffic.
        x = jnp.transpose(x_nchw, (0, 2, 3, 1)).astype(jnp.bfloat16)
        x = jnp.pad(x, ((0, 0), (1, 1), (1, WP1 - 1 - W1),
                        (0, CIN_PAD - self.cin)))
        x = x.reshape(n, (H1 + 2) * WP1, CIN_PAD)
        x = jnp.pad(x, ((0, 0), (0, NROW1 - (H1 + 2) * WP1), (0, 0)))

        out = pl.pallas_call(
            _vgg_fused_kernel,
            out_shape=jax.ShapeDtypeStruct((n, 1, NUM_CLASSES), jnp.float32),
            grid=(n,),
            in_specs=[
                pl.BlockSpec((1, NROW1, CIN_PAD), lambda i: (i, 0, 0)),
                pl.BlockSpec((9, CIN_PAD, C1), lambda i: (0, 0, 0)),
                pl.BlockSpec((1, C1), lambda i: (0, 0)),
                pl.BlockSpec((9, C1, C2), lambda i: (0, 0, 0)),
                pl.BlockSpec((1, C2), lambda i: (0, 0)),
                pl.BlockSpec((FC1_IN, FC1_OUT), lambda i: (0, 0)),
                pl.BlockSpec((1, FC1_OUT), lambda i: (0, 0)),
                pl.BlockSpec((FC1_OUT, NUM_CLASSES), lambda i: (0, 0)),
                pl.BlockSpec((1, NUM_CLASSES), lambda i: (0, 0)),
            ],
            out_specs=pl.BlockSpec((1, 1, NUM_CLASSES), lambda i: (i, 0, 0)),
            scratch_shapes=[
                pltpu.VMEM((NROW2, C1), jnp.bfloat16),   # conv2 haloed input
                pltpu.VMEM((8, FC1_IN), jnp.bfloat16),   # flattened fc1 input
            ],
            compiler_params=pltpu.CompilerParams(
                dimension_semantics=("parallel",)),
        )(x, self.w1p, self.b1p, self.w2p, self.b2p,
          self.fc1_wp, self.fc1_bp, self.fc2_wp, self.fc2_bp)
        return out.reshape(n, NUM_CLASSES)


if __name__ == "__main__":
    key = jax.random.PRNGKey(0)
    k_param, k_input = jax.random.split(key)
    model = VGGPallas(k_param, in_channels=3)
    x = jax.random.normal(k_input, (2, 3, 16, 16), jnp.float32)   # NCHW input
    fwd = jax.jit(model.__call__)
    out = jax.block_until_ready(fwd(x))
    assert out.shape == (2, 10) and out.dtype == jnp.float32
    print("KERNEL_OK")
</pallas_src>

<mosaic_0001>
module attributes {stable_mosaic.version = 11 : i64} {
  func.func @_vgg_fused_kernel(%arg0: i32, %arg1: memref<1x440x8xbf16, #tpu.memory_space<vmem>>, %arg2: memref<9x8x32xbf16, #tpu.memory_space<vmem>>, %arg3: memref<1x32xf32, #tpu.memory_space<vmem>>, %arg4: memref<9x32x128xbf16, #tpu.memory_space<vmem>>, %arg5: memref<1x128xf32, #tpu.memory_space<vmem>>, %arg6: memref<6272x128xbf16, #tpu.memory_space<vmem>>, %arg7: memref<1x128xf32, #tpu.memory_space<vmem>>, %arg8: memref<128x10xbf16, #tpu.memory_space<vmem>>, %arg9: memref<1x10xf32, #tpu.memory_space<vmem>>, %arg10: memref<1x1x10xf32, #tpu.memory_space<vmem>>, %arg11: memref<168x32xbf16, #tpu.memory_space<vmem>>, %arg12: memref<8x6272xbf16, #tpu.memory_space<vmem>>) attributes {dimension_semantics = [#tpu.dimension_semantics<parallel>], iteration_bounds = array<i64: 2>, scalar_prefetch = 0 : i64, scratch_operands = 2 : i64, tpu.core_type = #tpu.core_type<tc>, window_params = [{transform_indices = @transform_0, window_bounds = array<i64: 1, 440, 8>}, {pipeline_mode = #tpu.pipeline_mode<synchronous>, transform_indices = @transform_1, window_bounds = array<i64: 9, 8, 32>}, {pipeline_mode = #tpu.pipeline_mode<synchronous>, transform_indices = @transform_2, window_bounds = array<i64: 1, 32>}, {pipeline_mode = #tpu.pipeline_mode<synchronous>, transform_indices = @transform_3, window_bounds = array<i64: 9, 32, 128>}, {pipeline_mode = #tpu.pipeline_mode<synchronous>, transform_indices = @transform_4, window_bounds = array<i64: 1, 128>}, {pipeline_mode = #tpu.pipeline_mode<synchronous>, transform_indices = @transform_5, window_bounds = array<i64: 6272, 128>}, {pipeline_mode = #tpu.pipeline_mode<synchronous>, transform_indices = @transform_6, window_bounds = array<i64: 1, 128>}, {pipeline_mode = #tpu.pipeline_mode<synchronous>, transform_indices = @transform_7, window_bounds = array<i64: 128, 10>}, {pipeline_mode = #tpu.pipeline_mode<synchronous>, transform_indices = @transform_8, window_bounds = array<i64: 1, 10>}, {transform_indices = @transform_9, window_bounds = array<i64: 1, 1, 10>}]} {
    %cst = arith.constant 0.000000e+00 : f32
    %0 = vector.broadcast %cst : f32 to vector<384x32xf32>
    %c0 = arith.constant 0 : index
    %c0_0 = arith.constant 0 : index
    %c0_1 = arith.constant 0 : index
    %1 = vector.load %arg1[%c0, %c0_0, %c0_1] : memref<1x440x8xbf16, #tpu.memory_space<vmem>>, vector<1x384x8xbf16>
    %2 = vector.shape_cast %1 : vector<1x384x8xbf16> to vector<384x8xbf16>
    %c0_2 = arith.constant 0 : index
    %c0_3 = arith.constant 0 : index
    %c0_4 = arith.constant 0 : index
    %3 = vector.load %arg2[%c0_2, %c0_3, %c0_4] : memref<9x8x32xbf16, #tpu.memory_space<vmem>>, vector<1x8x32xbf16>
    %4 = vector.shape_cast %3 : vector<1x8x32xbf16> to vector<8x32xbf16>
    %cst_5 = arith.constant dense<0.000000e+00> : vector<384x32xf32>
    %5 = tpu.matmul %2, %4, %cst_5 {dimension_numbers = #tpu.dot_dimension_numbers<[1], [0], [0], [1], [0, 0, 1, 1], [], []>} : vector<384x8xbf16>, vector<8x32xbf16>, vector<384x32xf32> -> vector<384x32xf32>
    %6 = arith.addf %0, %5 : vector<384x32xf32>
    %c0_6 = arith.constant 0 : index
    %c1 = arith.constant 1 : index
    %c0_7 = arith.constant 0 : index
    %7 = vector.load %arg1[%c0_6, %c1, %c0_7] : memref<1x440x8xbf16, #tpu.memory_space<vmem>>, vector<1x384x8xbf16>
    %8 = vector.shape_cast %7 : vector<1x384x8xbf16> to vector<384x8xbf16>
    %c1_8 = arith.constant 1 : index
    %c0_9 = arith.constant 0 : index
    %c0_10 = arith.constant 0 : index
    %9 = vector.load %arg2[%c1_8, %c0_9, %c0_10] : memref<9x8x32xbf16, #tpu.memory_space<vmem>>, vector<1x8x32xbf16>
    %10 = vector.shape_cast %9 : vector<1x8x32xbf16> to vector<8x32xbf16>
    %cst_11 = arith.constant dense<0.000000e+00> : vector<384x32xf32>
    %11 = tpu.matmul %8, %10, %cst_11 {dimension_numbers = #tpu.dot_dimension_numbers<[1], [0], [0], [1], [0, 0, 1, 1], [], []>} : vector<384x8xbf16>, vector<8x32xbf16>, vector<384x32xf32> -> vector<384x32xf32>
    %12 = arith.addf %6, %11 : vector<384x32xf32>
    %c0_12 = arith.constant 0 : index
    %c2 = arith.constant 2 : index
    %c0_13 = arith.constant 0 : index
    %13 = vector.load %arg1[%c0_12, %c2, %c0_13] : memref<1x440x8xbf16, #tpu.memory_space<vmem>>, vector<1x384x8xbf16>
    %14 = vector.shape_cast %13 : vector<1x384x8xbf16> to vector<384x8xbf16>
    %c2_14 = arith.constant 2 : index
    %c0_15 = arith.constant 0 : index
    %c0_16 = arith.constant 0 : index
    %15 = vector.load %arg2[%c2_14, %c0_15, %c0_16] : memref<9x8x32xbf16, #tpu.memory_space<vmem>>, vector<1x8x32xbf16>
    %16 = vector.shape_cast %15 : vector<1x8x32xbf16> to vector<8x32xbf16>
    %cst_17 = arith.constant dense<0.000000e+00> : vector<384x32xf32>
    %17 = tpu.matmul %14, %16, %cst_17 {dimension_numbers = #tpu.dot_dimension_numbers<[1], [0], [0], [1], [0, 0, 1, 1], [], []>} : vector<384x8xbf16>, vector<8x32xbf16>, vector<384x32xf32> -> vector<384x32xf32>
    %18 = arith.addf %12, %17 : vector<384x32xf32>
    %c0_18 = arith.constant 0 : index
    %c24 = arith.constant 24 : index
    %c0_19 = arith.constant 0 : index
    %19 = vector.load %arg1[%c0_18, %c24, %c0_19] : memref<1x440x8xbf16, #tpu.memory_space<vmem>>, vector<1x384x8xbf16>
    %20 = vector.shape_cast %19 : vector<1x384x8xbf16> to vector<384x8xbf16>
    %c3 = arith.constant 3 : index
    %c0_20 = arith.constant 0 : index
    %c0_21 = arith.constant 0 : index
    %21 = vector.load %arg2[%c3, %c0_20, %c0_21] : memref<9x8x32xbf16, #tpu.memory_space<vmem>>, vector<1x8x32xbf16>
    %22 = vector.shape_cast %21 : vector<1x8x32xbf16> to vector<8x32xbf16>
    %cst_22 = arith.constant dense<0.000000e+00> : vector<384x32xf32>
    %23 = tpu.matmul %20, %22, %cst_22 {dimension_numbers = #tpu.dot_dimension_numbers<[1], [0], [0], [1], [0, 0, 1, 1], [], []>} : vector<384x8xbf16>, vector<8x32xbf16>, vector<384x32xf32> -> vector<384x32xf32>
    %24 = arith.addf %18, %23 : vector<384x32xf32>
    %c0_23 = arith.constant 0 : index
    %c25 = arith.constant 25 : index
    %c0_24 = arith.constant 0 : index
    %25 = vector.load %arg1[%c0_23, %c25, %c0_24] : memref<1x440x8xbf16, #tpu.memory_space<vmem>>, vector<1x384x8xbf16>
    %26 = vector.shape_cast %25 : vector<1x384x8xbf16> to vector<384x8xbf16>
    %c4 = arith.constant 4 : index
    %c0_25 = arith.constant 0 : index
    %c0_26 = arith.constant 0 : index
    %27 = vector.load %arg2[%c4, %c0_25, %c0_26] : memref<9x8x32xbf16, #tpu.memory_space<vmem>>, vector<1x8x32xbf16>
    %28 = vector.shape_cast %27 : vector<1x8x32xbf16> to vector<8x32xbf16>
    %cst_27 = arith.constant dense<0.000000e+00> : vector<384x32xf32>
    %29 = tpu.matmul %26, %28, %cst_27 {dimension_numbers = #tpu.dot_dimension_numbers<[1], [0], [0], [1], [0, 0, 1, 1], [], []>} : vector<384x8xbf16>, vector<8x32xbf16>, vector<384x32xf32> -> vector<384x32xf32>
    %30 = arith.addf %24, %29 : vector<384x32xf32>
    %c0_28 = arith.constant 0 : index
    %c26 = arith.constant 26 : index
    %c0_29 = arith.constant 0 : index
    %31 = vector.load %arg1[%c0_28, %c26, %c0_29] : memref<1x440x8xbf16, #tpu.memory_space<vmem>>, vector<1x384x8xbf16>
    %32 = vector.shape_cast %31 : vector<1x384x8xbf16> to vector<384x8xbf16>
    %c5 = arith.constant 5 : index
    %c0_30 = arith.constant 0 : index
    %c0_31 = arith.constant 0 : index
    %33 = vector.load %arg2[%c5, %c0_30, %c0_31] : memref<9x8x32xbf16, #tpu.memory_space<vmem>>, vector<1x8x32xbf16>
    %34 = vector.shape_cast %33 : vector<1x8x32xbf16> to vector<8x32xbf16>
    %cst_32 = arith.constant dense<0.000000e+00> : vector<384x32xf32>
    %35 = tpu.matmul %32, %34, %cst_32 {dimension_numbers = #tpu.dot_dimension_numbers<[1], [0], [0], [1], [0, 0, 1, 1], [], []>} : vector<384x8xbf16>, vector<8x32xbf16>, vector<384x32xf32> -> vector<384x32xf32>
    %36 = arith.addf %30, %35 : vector<384x32xf32>
    %c0_33 = arith.constant 0 : index
    %c48 = arith.constant 48 : index
    %c0_34 = arith.constant 0 : index
    %37 = vector.load %arg1[%c0_33, %c48, %c0_34] : memref<1x440x8xbf16, #tpu.memory_space<vmem>>, vector<1x384x8xbf16>
    %38 = vector.shape_cast %37 : vector<1x384x8xbf16> to vector<384x8xbf16>
    %c6 = arith.constant 6 : index
    %c0_35 = arith.constant 0 : index
    %c0_36 = arith.constant 0 : index
    %39 = vector.load %arg2[%c6, %c0_35, %c0_36] : memref<9x8x32xbf16, #tpu.memory_space<vmem>>, vector<1x8x32xbf16>
    %40 = vector.shape_cast %39 : vector<1x8x32xbf16> to vector<8x32xbf16>
    %cst_37 = arith.constant dense<0.000000e+00> : vector<384x32xf32>
    %41 = tpu.matmul %38, %40, %cst_37 {dimension_numbers = #tpu.dot_dimension_numbers<[1], [0], [0], [1], [0, 0, 1, 1], [], []>} : vector<384x8xbf16>, vector<8x32xbf16>, vector<384x32xf32> -> vector<384x32xf32>
    %42 = arith.addf %36, %41 : vector<384x32xf32>
    %c0_38 = arith.constant 0 : index
    %c49 = arith.constant 49 : index
    %c0_39 = arith.constant 0 : index
    %43 = vector.load %arg1[%c0_38, %c49, %c0_39] : memref<1x440x8xbf16, #tpu.memory_space<vmem>>, vector<1x384x8xbf16>
    %44 = vector.shape_cast %43 : vector<1x384x8xbf16> to vector<384x8xbf16>
    %c7 = arith.constant 7 : index
    %c0_40 = arith.constant 0 : index
    %c0_41 = arith.constant 0 : index
    %45 = vector.load %arg2[%c7, %c0_40, %c0_41] : memref<9x8x32xbf16, #tpu.memory_space<vmem>>, vector<1x8x32xbf16>
    %46 = vector.shape_cast %45 : vector<1x8x32xbf16> to vector<8x32xbf16>
    %cst_42 = arith.constant dense<0.000000e+00> : vector<384x32xf32>
    %47 = tpu.matmul %44, %46, %cst_42 {dimension_numbers = #tpu.dot_dimension_numbers<[1], [0], [0], [1], [0, 0, 1, 1], [], []>} : vector<384x8xbf16>, vector<8x32xbf16>, vector<384x32xf32> -> vector<384x32xf32>
    %48 = arith.addf %42, %47 : vector<384x32xf32>
    %c0_43 = arith.constant 0 : index
    %c50 = arith.constant 50 : index
    %c0_44 = arith.constant 0 : index
    %49 = vector.load %arg1[%c0_43, %c50, %c0_44] : memref<1x440x8xbf16, #tpu.memory_space<vmem>>, vector<1x384x8xbf16>
    %50 = vector.shape_cast %49 : vector<1x384x8xbf16> to vector<384x8xbf16>
    %c8 = arith.constant 8 : index
    %c0_45 = arith.constant 0 : index
    %c0_46 = arith.constant 0 : index
    %51 = vector.load %arg2[%c8, %c0_45, %c0_46] : memref<9x8x32xbf16, #tpu.memory_space<vmem>>, vector<1x8x32xbf16>
    %52 = vector.shape_cast %51 : vector<1x8x32xbf16> to vector<8x32xbf16>
    %cst_47 = arith.constant dense<0.000000e+00> : vector<384x32xf32>
    %53 = tpu.matmul %50, %52, %cst_47 {dimension_numbers = #tpu.dot_dimension_numbers<[1], [0], [0], [1], [0, 0, 1, 1], [], []>} : vector<384x8xbf16>, vector<8x32xbf16>, vector<384x32xf32> -> vector<384x32xf32>
    %54 = arith.addf %48, %53 : vector<384x32xf32>
    %c0_48 = arith.constant 0 : index
    %c0_49 = arith.constant 0 : index
    %55 = vector.load %arg3[%c0_48, %c0_49] : memref<1x32xf32, #tpu.memory_space<vmem>>, vector<1x32xf32>
    %56 = vector.broadcast %55 : vector<1x32xf32> to vector<384x32xf32>
    %57 = arith.addf %54, %56 : vector<384x32xf32>
    %cst_50 = arith.constant 0.000000e+00 : f32
    %58 = vector.broadcast %cst_50 : f32 to vector<384x32xf32>
    %59 = arith.maximumf %57, %58 : vector<384x32xf32>
    %60 = vector.shape_cast %59 : vector<384x32xf32> to vector<16x24x32xf32>
    %61 = vector.extract_strided_slice %60 {offsets = [0, 0, 0], sizes = [16, 16, 32], strides = [1, 1, 1]} : vector<16x24x32xf32> to vector<16x16x32xf32>
    %62 = vector.shape_cast %61 : vector<16x16x32xf32> to vector<256x32xf32>
    %63 = vector.shape_cast %62 : vector<256x32xf32> to vector<128x2x32xf32>
    %cst_51 = arith.constant dense<0xFF800000> : vector<128x32xf32>
    %64 = vector.multi_reduction <maximumf>, %63, %cst_51 [1] : vector<128x2x32xf32> to vector<128x32xf32>
    %65 = vector.shape_cast %64 : vector<128x32xf32> to vector<8x16x32xf32>
    %66 = vector.extract_strided_slice %65 {offsets = [0, 0, 0], sizes = [8, 8, 32], strides = [1, 1, 1]} : vector<8x16x32xf32> to vector<8x8x32xf32>
    %67 = vector.extract_strided_slice %65 {offsets = [0, 8, 0], sizes = [8, 8, 32], strides = [1, 1, 1]} : vector<8x16x32xf32> to vector<8x8x32xf32>
    %68 = arith.maximumf %66, %67 : vector<8x8x32xf32>
    %cst_52 = arith.constant 0.000000e+00 : bf16
    %69 = vector.broadcast %cst_52 : bf16 to vector<168x32xbf16>
    %c0_53 = arith.constant 0 : index
    %c0_54 = arith.constant 0 : index
    %70 = vector.load %arg11[%c0_53, %c0_54] : memref<168x32xbf16, #tpu.memory_space<vmem>>, vector<168x32xbf16>
    tpu.vector_store %arg11[%c0_53, %c0_54], %69 {strides = array<i32>} : memref<168x32xbf16, #tpu.memory_space<vmem>>, vector<168x32xbf16>,
    %71 = vector.extract_strided_slice %68 {offsets = [0, 0, 0], sizes = [1, 8, 32], strides = [1, 1, 1]} : vector<8x8x32xf32> to vector<1x8x32xf32>
    %72 = vector.shape_cast %71 : vector<1x8x32xf32> to vector<8x32xf32>
    %73 = arith.truncf %72 : vector<8x32xf32> to vector<8x32xbf16>
    %c17 = arith.constant 17 : index
    %c0_55 = arith.constant 0 : index
    %74 = vector.load %arg11[%c17, %c0_55] : memref<168x32xbf16, #tpu.memory_space<vmem>>, vector<8x32xbf16>
    tpu.vector_store %arg11[%c17, %c0_55], %73 {strides = array<i32>} : memref<168x32xbf16, #tpu.memory_space<vmem>>, vector<8x32xbf16>,
    %75 = vector.extract_strided_slice %68 {offsets = [1, 0, 0], sizes = [1, 8, 32], strides = [1, 1, 1]} : vector<8x8x32xf32> to vector<1x8x32xf32>
    %76 = vector.shape_cast %75 : vector<1x8x32xf32> to vector<8x32xf32>
    %77 = arith.truncf %76 : vector<8x32xf32> to vector<8x32xbf16>
    %c33 = arith.constant 33 : index
    %c0_56 = arith.constant 0 : index
    %78 = vector.load %arg11[%c33, %c0_56] : memref<168x32xbf16, #tpu.memory_space<vmem>>, vector<8x32xbf16>
    tpu.vector_store %arg11[%c33, %c0_56], %77 {strides = array<i32>} : memref<168x32xbf16, #tpu.memory_space<vmem>>, vector<8x32xbf16>,
    %79 = vector.extract_strided_slice %68 {offsets = [2, 0, 0], sizes = [1, 8, 32], strides = [1, 1, 1]} : vector<8x8x32xf32> to vector<1x8x32xf32>
    %80 = vector.shape_cast %79 : vector<1x8x32xf32> to vector<8x32xf32>
    %81 = arith.truncf %80 : vector<8x32xf32> to vector<8x32xbf16>
    %c49_57 = arith.constant 49 : index
    %c0_58 = arith.constant 0 : index
    %82 = vector.load %arg11[%c49_57, %c0_58] : memref<168x32xbf16, #tpu.memory_space<vmem>>, vector<8x32xbf16>
    tpu.vector_store %arg11[%c49_57, %c0_58], %81 {strides = array<i32>} : memref<168x32xbf16, #tpu.memory_space<vmem>>, vector<8x32xbf16>,
    %83 = vector.extract_strided_slice %68 {offsets = [3, 0, 0], sizes = [1, 8, 32], strides = [1, 1, 1]} : vector<8x8x32xf32> to vector<1x8x32xf32>
    %84 = vector.shape_cast %83 : vector<1x8x32xf32> to vector<8x32xf32>
    %85 = arith.truncf %84 : vector<8x32xf32> to vector<8x32xbf16>
    %c65 = arith.constant 65 : index
    %c0_59 = arith.constant 0 : index
    %86 = vector.load %arg11[%c65, %c0_59] : memref<168x32xbf16, #tpu.memory_space<vmem>>, vector<8x32xbf16>
    tpu.vector_store %arg11[%c65, %c0_59], %85 {strides = array<i32>} : memref<168x32xbf16, #tpu.memory_space<vmem>>, vector<8x32xbf16>,
    %87 = vector.extract_strided_slice %68 {offsets = [4, 0, 0], sizes = [1, 8, 32], strides = [1, 1, 1]} : vector<8x8x32xf32> to vector<1x8x32xf32>
    %88 = vector.shape_cast %87 : vector<1x8x32xf32> to vector<8x32xf32>
    %89 = arith.truncf %88 : vector<8x32xf32> to vector<8x32xbf16>
    %c81 = arith.constant 81 : index
    %c0_60 = arith.constant 0 : index
    %90 = vector.load %arg11[%c81, %c0_60] : memref<168x32xbf16, #tpu.memory_space<vmem>>, vector<8x32xbf16>
    tpu.vector_store %arg11[%c81, %c0_60], %89 {strides = array<i32>} : memref<168x32xbf16, #tpu.memory_space<vmem>>, vector<8x32xbf16>,
    %91 = vector.extract_strided_slice %68 {offsets = [5, 0, 0], sizes = [1, 8, 32], strides = [1, 1, 1]} : vector<8x8x32xf32> to vector<1x8x32xf32>
    %92 = vector.shape_cast %91 : vector<1x8x32xf32> to vector<8x32xf32>
    %93 = arith.truncf %92 : vector<8x32xf32> to vector<8x32xbf16>
    %c97 = arith.constant 97 : index
    %c0_61 = arith.constant 0 : index
    %94 = vector.load %arg11[%c97, %c0_61] : memref<168x32xbf16, #tpu.memory_space<vmem>>, vector<8x32xbf16>
    tpu.vector_store %arg11[%c97, %c0_61], %93 {strides = array<i32>} : memref<168x32xbf16, #tpu.memory_space<vmem>>, vector<8x32xbf16>,
    %95 = vector.extract_strided_slice %68 {offsets = [6, 0, 0], sizes = [1, 8, 32], strides = [1, 1, 1]} : vector<8x8x32xf32> to vector<1x8x32xf32>
    %96 = vector.shape_cast %95 : vector<1x8x32xf32> to vector<8x32xf32>
    %97 = arith.truncf %96 : vector<8x32xf32> to vector<8x32xbf16>
    %c113 = arith.constant 113 : index
    %c0_62 = arith.constant 0 : index
    %98 = vector.load %arg11[%c113, %c0_62] : memref<168x32xbf16, #tpu.memory_space<vmem>>, vector<8x32xbf16>
    tpu.vector_store %arg11[%c113, %c0_62], %97 {strides = array<i32>} : memref<168x32xbf16, #tpu.memory_space<vmem>>, vector<8x32xbf16>,
    %99 = vector.extract_strided_slice %68 {offsets = [7, 0, 0], sizes = [1, 8, 32], strides = [1, 1, 1]} : vector<8x8x32xf32> to vector<1x8x32xf32>
    %100 = vector.shape_cast %99 : vector<1x8x32xf32> to vector<8x32xf32>
    %101 = arith.truncf %100 : vector<8x32xf32> to vector<8x32xbf16>
    %c129 = arith.constant 129 : index
    %c0_63 = arith.constant 0 : index
    %102 = vector.load %arg11[%c129, %c0_63] : memref<168x32xbf16, #tpu.memory_space<vmem>>, vector<8x32xbf16>
    tpu.vector_store %arg11[%c129, %c0_63], %101 {strides = array<i32>} : memref<168x32xbf16, #tpu.memory_space<vmem>>, vector<8x32xbf16>,
    %cst_64 = arith.constant 0.000000e+00 : f32
    %103 = vector.broadcast %cst_64 : f32 to vector<128x128xf32>
    %c0_65 = arith.constant 0 : index
    %c0_66 = arith.constant 0 : index
    %104 = vector.load %arg11[%c0_65, %c0_66] : memref<168x32xbf16, #tpu.memory_space<vmem>>, vector<128x32xbf16>
    %c0_67 = arith.constant 0 : index
    %c0_68 = arith.constant 0 : index
    %c0_69 = arith.constant 0 : index
    %105 = vector.load %arg4[%c0_67, %c0_68, %c0_69] : memref<9x32x128xbf16, #tpu.memory_space<vmem>>, vector<1x32x128xbf16>
    %106 = vector.shape_cast %105 : vector<1x32x128xbf16> to vector<32x128xbf16>
    %cst_70 = arith.constant dense<0.000000e+00> : vector<128x128xf32>
    %107 = tpu.matmul %104, %106, %cst_70 {dimension_numbers = #tpu.dot_dimension_numbers<[1], [0], [0], [1], [0, 0, 1, 1], [], []>} : vector<128x32xbf16>, vector<32x128xbf16>, vector<128x128xf32> -> vector<128x128xf32>
    %108 = arith.addf %103, %107 : vector<128x128xf32>
    %c1_71 = arith.constant 1 : index
    %c0_72 = arith.constant 0 : index
    %109 = vector.load %arg11[%c1_71, %c0_72] : memref<168x32xbf16, #tpu.memory_space<vmem>>, vector<128x32xbf16>
    %c1_73 = arith.constant 1 : index
    %c0_74 = arith.constant 0 : index
    %c0_75 = arith.constant 0 : index
    %110 = vector.load %arg4[%c1_73, %c0_74, %c0_75] : memref<9x32x128xbf16, #tpu.memory_space<vmem>>, vector<1x32x128xbf16>
    %111 = vector.shape_cast %110 : vector<1x32x128xbf16> to vector<32x128xbf16>
    %cst_76 = arith.constant dense<0.000000e+00> : vector<128x128xf32>
    %112 = tpu.matmul %109, %111, %cst_76 {dimension_numbers = #tpu.dot_dimension_numbers<[1], [0], [0], [1], [0, 0, 1, 1], [], []>} : vector<128x32xbf16>, vector<32x128xbf16>, vector<128x128xf32> -> vector<128x128xf32>
    %113 = arith.addf %108, %112 : vector<128x128xf32>
    %c2_77 = arith.constant 2 : index
    %c0_78 = arith.constant 0 : index
    %114 = vector.load %arg11[%c2_77, %c0_78] : memref<168x32xbf16, #tpu.memory_space<vmem>>, vector<128x32xbf16>
    %c2_79 = arith.constant 2 : index
    %c0_80 = arith.constant 0 : index
    %c0_81 = arith.constant 0 : index
    %115 = vector.load %arg4[%c2_79, %c0_80, %c0_81] : memref<9x32x128xbf16, #tpu.memory_space<vmem>>, vector<1x32x128xbf16>
    %116 = vector.shape_cast %115 : vector<1x32x128xbf16> to vector<32x128xbf16>
    %cst_82 = arith.constant dense<0.000000e+00> : vector<128x128xf32>
    %117 = tpu.matmul %114, %116, %cst_82 {dimension_numbers = #tpu.dot_dimension_numbers<[1], [0], [0], [1], [0, 0, 1, 1], [], []>} : vector<128x32xbf16>, vector<32x128xbf16>, vector<128x128xf32> -> vector<128x128xf32>
    %118 = arith.addf %113, %117 : vector<128x128xf32>
    %c16 = arith.constant 16 : index
    %c0_83 = arith.constant 0 : index
    %119 = vector.load %arg11[%c16, %c0_83] : memref<168x32xbf16, #tpu.memory_space<vmem>>, vector<128x32xbf16>
    %c3_84 = arith.constant 3 : index
    %c0_85 = arith.constant 0 : index
    %c0_86 = arith.constant 0 : index
    %120 = vector.load %arg4[%c3_84, %c0_85, %c0_86] : memref<9x32x128xbf16, #tpu.memory_space<vmem>>, vector<1x32x128xbf16>
    %121 = vector.shape_cast %120 : vector<1x32x128xbf16> to vector<32x128xbf16>
    %cst_87 = arith.constant dense<0.000000e+00> : vector<128x128xf32>
    %122 = tpu.matmul %119, %121, %cst_87 {dimension_numbers = #tpu.dot_dimension_numbers<[1], [0], [0], [1], [0, 0, 1, 1], [], []>} : vector<128x32xbf16>, vector<32x128xbf16>, vector<128x128xf32> -> vector<128x128xf32>
    %123 = arith.addf %118, %122 : vector<128x128xf32>
    %c17_88 = arith.constant 17 : index
    %c0_89 = arith.constant 0 : index
    %124 = vector.load %arg11[%c17_88, %c0_89] : memref<168x32xbf16, #tpu.memory_space<vmem>>, vector<128x32xbf16>
    %c4_90 = arith.constant 4 : index
    %c0_91 = arith.constant 0 : index
    %c0_92 = arith.constant 0 : index
    %125 = vector.load %arg4[%c4_90, %c0_91, %c0_92] : memref<9x32x128xbf16, #tpu.memory_space<vmem>>, vector<1x32x128xbf16>
    %126 = vector.shape_cast %125 : vector<1x32x128xbf16> to vector<32x128xbf16>
    %cst_93 = arith.constant dense<0.000000e+00> : vector<128x128xf32>
    %127 = tpu.matmul %124, %126, %cst_93 {dimension_numbers = #tpu.dot_dimension_numbers<[1], [0], [0], [1], [0, 0, 1, 1], [], []>} : vector<128x32xbf16>, vector<32x128xbf16>, vector<128x128xf32> -> vector<128x128xf32>
    %128 = arith.addf %123, %127 : vector<128x128xf32>
    %c18 = arith.constant 18 : index
    %c0_94 = arith.constant 0 : index
    %129 = vector.load %arg11[%c18, %c0_94] : memref<168x32xbf16, #tpu.memory_space<vmem>>, vector<128x32xbf16>
    %c5_95 = arith.constant 5 : index
    %c0_96 = arith.constant 0 : index
    %c0_97 = arith.constant 0 : index
    %130 = vector.load %arg4[%c5_95, %c0_96, %c0_97] : memref<9x32x128xbf16, #tpu.memory_space<vmem>>, vector<1x32x128xbf16>
    %131 = vector.shape_cast %130 : vector<1x32x128xbf16> to vector<32x128xbf16>
    %cst_98 = arith.constant dense<0.000000e+00> : vector<128x128xf32>
    %132 = tpu.matmul %129, %131, %cst_98 {dimension_numbers = #tpu.dot_dimension_numbers<[1], [0], [0], [1], [0, 0, 1, 1], [], []>} : vector<128x32xbf16>, vector<32x128xbf16>, vector<128x128xf32> -> vector<128x128xf32>
    %133 = arith.addf %128, %132 : vector<128x128xf32>
    %c32 = arith.constant 32 : index
    %c0_99 = arith.constant 0 : index
    %134 = vector.load %arg11[%c32, %c0_99] : memref<168x32xbf16, #tpu.memory_space<vmem>>, vector<128x32xbf16>
    %c6_100 = arith.constant 6 : index
    %c0_101 = arith.constant 0 : index
    %c0_102 = arith.constant 0 : index
    %135 = vector.load %arg4[%c6_100, %c0_101, %c0_102] : memref<9x32x128xbf16, #tpu.memory_space<vmem>>, vector<1x32x128xbf16>
    %136 = vector.shape_cast %135 : vector<1x32x128xbf16> to vector<32x128xbf16>
    %cst_103 = arith.constant dense<0.000000e+00> : vector<128x128xf32>
    %137 = tpu.matmul %134, %136, %cst_103 {dimension_numbers = #tpu.dot_dimension_numbers<[1], [0], [0], [1], [0, 0, 1, 1], [], []>} : vector<128x32xbf16>, vector<32x128xbf16>, vector<128x128xf32> -> vector<128x128xf32>
    %138 = arith.addf %133, %137 : vector<128x128xf32>
    %c33_104 = arith.constant 33 : index
    %c0_105 = arith.constant 0 : index
    %139 = vector.load %arg11[%c33_104, %c0_105] : memref<168x32xbf16, #tpu.memory_space<vmem>>, vector<128x32xbf16>
    %c7_106 = arith.constant 7 : index
    %c0_107 = arith.constant 0 : index
    %c0_108 = arith.constant 0 : index
    %140 = vector.load %arg4[%c7_106, %c0_107, %c0_108] : memref<9x32x128xbf16, #tpu.memory_space<vmem>>, vector<1x32x128xbf16>
    %141 = vector.shape_cast %140 : vector<1x32x128xbf16> to vector<32x128xbf16>
    %cst_109 = arith.constant dense<0.000000e+00> : vector<128x128xf32>
    %142 = tpu.matmul %139, %141, %cst_109 {dimension_numbers = #tpu.dot_dimension_numbers<[1], [0], [0], [1], [0, 0, 1, 1], [], []>} : vector<128x32xbf16>, vector<32x128xbf16>, vector<128x128xf32> -> vector<128x128xf32>
    %143 = arith.addf %138, %142 : vector<128x128xf32>
    %c34 = arith.constant 34 : index
    %c0_110 = arith.constant 0 : index
    %144 = vector.load %arg11[%c34, %c0_110] : memref<168x32xbf16, #tpu.memory_space<vmem>>, vector<128x32xbf16>
    %c8_111 = arith.constant 8 : index
    %c0_112 = arith.constant 0 : index
    %c0_113 = arith.constant 0 : index
    %145 = vector.load %arg4[%c8_111, %c0_112, %c0_113] : memref<9x32x128xbf16, #tpu.memory_space<vmem>>, vector<1x32x128xbf16>
    %146 = vector.shape_cast %145 : vector<1x32x128xbf16> to vector<32x128xbf16>
    %cst_114 = arith.constant dense<0.000000e+00> : vector<128x128xf32>
    %147 = tpu.matmul %144, %146, %cst_114 {dimension_numbers = #tpu.dot_dimension_numbers<[1], [0], [0], [1], [0, 0, 1, 1], [], []>} : vector<128x32xbf16>, vector<32x128xbf16>, vector<128x128xf32> -> vector<128x128xf32>
    %148 = arith.addf %143, %147 : vector<128x128xf32>
    %c0_115 = arith.constant 0 : index
    %c0_116 = arith.constant 0 : index
    %149 = vector.load %arg5[%c0_115, %c0_116] : memref<1x128xf32, #tpu.memory_space<vmem>>, vector<1x128xf32>
    %150 = vector.broadcast %149 : vector<1x128xf32> to vector<128x128xf32>
    %151 = arith.addf %148, %150 : vector<128x128xf32>
    %cst_117 = arith.constant 0.000000e+00 : f32
    %152 = vector.broadcast %cst_117 : f32 to vector<128x128xf32>
    %153 = arith.maximumf %151, %152 : vector<128x128xf32>
    %154 = vector.shape_cast %153 : vector<128x128xf32> to vector<8x16x128xf32>
    %155 = vector.extract_strided_slice %154 {offsets = [0, 0, 0], sizes = [8, 8, 128], strides = [1, 1, 1]} : vector<8x16x128xf32> to vector<8x8x128xf32>
    %156 = vector.extract_strided_slice %155 {offsets = [0, 0, 0], sizes = [8, 7, 128], strides = [1, 1, 1]} : vector<8x8x128xf32> to vector<8x7x128xf32>
    %157 = vector.extract_strided_slice %155 {offsets = [0, 1, 0], sizes = [8, 7, 128], strides = [1, 1, 1]} : vector<8x8x128xf32> to vector<8x7x128xf32>
    %158 = arith.addf %156, %157 : vector<8x7x128xf32>
    %159 = vector.extract_strided_slice %158 {offsets = [0, 0, 0], sizes = [7, 7, 128], strides = [1, 1, 1]} : vector<8x7x128xf32> to vector<7x7x128xf32>
    %160 = vector.extract_strided_slice %158 {offsets = [1, 0, 0], sizes = [7, 7, 128], strides = [1, 1, 1]} : vector<8x7x128xf32> to vector<7x7x128xf32>
    %161 = arith.addf %159, %160 : vector<7x7x128xf32>
    %cst_118 = arith.constant 2.500000e-01 : f32
    %162 = vector.broadcast %cst_118 : f32 to vector<7x7x128xf32>
    %163 = arith.mulf %161, %162 : vector<7x7x128xf32>
    %cst_119 = arith.constant 0.000000e+00 : bf16
    %164 = vector.broadcast %cst_119 : bf16 to vector<8x6272xbf16>
    %c0_120 = arith.constant 0 : index
    %c0_121 = arith.constant 0 : index
    %165 = vector.load %arg12[%c0_120, %c0_121] : memref<8x6272xbf16, #tpu.memory_space<vmem>>, vector<8x6272xbf16>
    tpu.vector_store %arg12[%c0_120, %c0_121], %164 {strides = array<i32>} : memref<8x6272xbf16, #tpu.memory_space<vmem>>, vector<8x6272xbf16>,
    %166 = vector.extract_strided_slice %163 {offsets = [0, 0, 0], sizes = [1, 7, 128], strides = [1, 1, 1]} : vector<7x7x128xf32> to vector<1x7x128xf32>
    %167 = vector.shape_cast %166 : vector<1x7x128xf32> to vector<7x128xf32>
    %168 = vector.extract_strided_slice %167 {offsets = [0, 0], sizes = [1, 128], strides = [1, 1]} : vector<7x128xf32> to vector<1x128xf32>
    %169 = arith.truncf %168 : vector<1x128xf32> to vector<1x128xbf16>
    %c0_122 = arith.constant 0 : index
    %c0_123 = arith.constant 0 : index
    %170 = vector.load %arg12[%c0_122, %c0_123] : memref<8x6272xbf16, #tpu.memory_space<vmem>>, vector<1x128xbf16>
    tpu.vector_store %arg12[%c0_122, %c0_123], %169 {strides = array<i32>} : memref<8x6272xbf16, #tpu.memory_space<vmem>>, vector<1x128xbf16>,
    %171 = vector.extract_strided_slice %167 {offsets = [1, 0], sizes = [1, 128], strides = [1, 1]} : vector<7x128xf32> to vector<1x128xf32>
    %172 = arith.truncf %171 : vector<1x128xf32> to vector<1x128xbf16>
    %c0_124 = arith.constant 0 : index
    %c128 = arith.constant 128 : index
    %173 = vector.load %arg12[%c0_124, %c128] : memref<8x6272xbf16, #tpu.memory_space<vmem>>, vector<1x128xbf16>
    tpu.vector_store %arg12[%c0_124, %c128], %172 {strides = array<i32>} : memref<8x6272xbf16, #tpu.memory_space<vmem>>, vector<1x128xbf16>,
    %174 = vector.extract_strided_slice %167 {offsets = [2, 0], sizes = [1, 128], strides = [1, 1]} : vector<7x128xf32> to vector<1x128xf32>
    %175 = arith.truncf %174 : vector<1x128xf32> to vector<1x128xbf16>
    %c0_125 = arith.constant 0 : index
    %c256 = arith.constant 256 : index
    %176 = vector.load %arg12[%c0_125, %c256] : memref<8x6272xbf16, #tpu.memory_space<vmem>>, vector<1x128xbf16>
    tpu.vector_store %arg12[%c0_125, %c256], %175 {strides = array<i32>} : memref<8x6272xbf16, #tpu.memory_space<vmem>>, vector<1x128xbf16>,
    %177 = vector.extract_strided_slice %167 {offsets = [3, 0], sizes = [1, 128], strides = [1, 1]} : vector<7x128xf32> to vector<1x128xf32>
    %178 = arith.truncf %177 : vector<1x128xf32> to vector<1x128xbf16>
    %c0_126 = arith.constant 0 : index
    %c384 = arith.constant 384 : index
    %179 = vector.load %arg12[%c0_126, %c384] : memref<8x6272xbf16, #tpu.memory_space<vmem>>, vector<1x128xbf16>
    tpu.vector_store %arg12[%c0_126, %c384], %178 {strides = array<i32>} : memref<8x6272xbf16, #tpu.memory_space<vmem>>, vector<1x128xbf16>,
    %180 = vector.extract_strided_slice %167 {offsets = [4, 0], sizes = [1, 128], strides = [1, 1]} : vector<7x128xf32> to vector<1x128xf32>
    %181 = arith.truncf %180 : vector<1x128xf32> to vector<1x128xbf16>
    %c0_127 = arith.constant 0 : index
    %c512 = arith.constant 512 : index
    %182 = vector.load %arg12[%c0_127, %c512] : memref<8x6272xbf16, #tpu.memory_space<vmem>>, vector<1x128xbf16>
    tpu.vector_store %arg12[%c0_127, %c512], %181 {strides = array<i32>} : memref<8x6272xbf16, #tpu.memory_space<vmem>>, vector<1x128xbf16>,
    %183 = vector.extract_strided_slice %167 {offsets = [5, 0], sizes = [1, 128], strides = [1, 1]} : vector<7x128xf32> to vector<1x128xf32>
    %184 = arith.truncf %183 : vector<1x128xf32> to vector<1x128xbf16>
    %c0_128 = arith.constant 0 : index
    %c640 = arith.constant 640 : index
    %185 = vector.load %arg12[%c0_128, %c640] : memref<8x6272xbf16, #tpu.memory_space<vmem>>, vector<1x128xbf16>
    tpu.vector_store %arg12[%c0_128, %c640], %184 {strides = array<i32>} : memref<8x6272xbf16, #tpu.memory_space<vmem>>, vector<1x128xbf16>,
    %186 = vector.extract_strided_slice %167 {offsets = [6, 0], sizes = [1, 128], strides = [1, 1]} : vector<7x128xf32> to vector<1x128xf32>
    %187 = arith.truncf %186 : vector<1x128xf32> to vector<1x128xbf16>
    %c0_129 = arith.constant 0 : index
    %c768 = arith.constant 768 : index
    %188 = vector.load %arg12[%c0_129, %c768] : memref<8x6272xbf16, #tpu.memory_space<vmem>>, vector<1x128xbf16>
    tpu.vector_store %arg12[%c0_129, %c768], %187 {strides = array<i32>} : memref<8x6272xbf16, #tpu.memory_space<vmem>>, vector<1x128xbf16>,
    %189 = vector.extract_strided_slice %163 {offsets = [1, 0, 0], sizes = [1, 7, 128], strides = [1, 1, 1]} : vector<7x7x128xf32> to vector<1x7x128xf32>
    %190 = vector.shape_cast %189 : vector<1x7x128xf32> to vector<7x128xf32>
    %191 = vector.extract_strided_slice %190 {offsets = [0, 0], sizes = [1, 128], strides = [1, 1]} : vector<7x128xf32> to vector<1x128xf32>
    %192 = arith.truncf %191 : vector<1x128xf32> to vector<1x128xbf16>
    %c0_130 = arith.constant 0 : index
    %c896 = arith.constant 896 : index
    %193 = vector.load %arg12[%c0_130, %c896] : memref<8x6272xbf16, #tpu.memory_space<vmem>>, vector<1x128xbf16>
    tpu.vector_store %arg12[%c0_130, %c896], %192 {strides = array<i32>} : memref<8x6272xbf16, #tpu.memory_space<vmem>>, vector<1x128xbf16>,
    %194 = vector.extract_strided_slice %190 {offsets = [1, 0], sizes = [1, 128], strides = [1, 1]} : vector<7x128xf32> to vector<1x128xf32>
    %195 = arith.truncf %194 : vector<1x128xf32> to vector<1x128xbf16>
    %c0_131 = arith.constant 0 : index
    %c1024 = arith.constant 1024 : index
    %196 = vector.load %arg12[%c0_131, %c1024] : memref<8x6272xbf16, #tpu.memory_space<vmem>>, vector<1x128xbf16>
    tpu.vector_store %arg12[%c0_131, %c1024], %195 {strides = array<i32>} : memref<8x6272xbf16, #tpu.memory_space<vmem>>, vector<1x128xbf16>,
    %197 = vector.extract_strided_slice %190 {offsets = [2, 0], sizes = [1, 128], strides = [1, 1]} : vector<7x128xf32> to vector<1x128xf32>
    %198 = arith.truncf %197 : vector<1x128xf32> to vector<1x128xbf16>
    %c0_132 = arith.constant 0 : index
    %c1152 = arith.constant 1152 : index
    %199 = vector.load %arg12[%c0_132, %c1152] : memref<8x6272xbf16, #tpu.memory_space<vmem>>, vector<1x128xbf16>
    tpu.vector_store %arg12[%c0_132, %c1152], %198 {strides = array<i32>} : memref<8x6272xbf16, #tpu.memory_space<vmem>>, vector<1x128xbf16>,
    %200 = vector.extract_strided_slice %190 {offsets = [3, 0], sizes = [1, 128], strides = [1, 1]} : vector<7x128xf32> to vector<1x128xf32>
    %201 = arith.truncf %200 : vector<1x128xf32> to vector<1x128xbf16>
    %c0_133 = arith.constant 0 : index
    %c1280 = arith.constant 1280 : index
    %202 = vector.load %arg12[%c0_133, %c1280] : memref<8x6272xbf16, #tpu.memory_space<vmem>>, vector<1x128xbf16>
    tpu.vector_store %arg12[%c0_133, %c1280], %201 {strides = array<i32>} : memref<8x6272xbf16, #tpu.memory_space<vmem>>, vector<1x128xbf16>,
    %203 = vector.extract_strided_slice %190 {offsets = [4, 0], sizes = [1, 128], strides = [1, 1]} : vector<7x128xf32> to vector<1x128xf32>
    %204 = arith.truncf %203 : vector<1x128xf32> to vector<1x128xbf16>
    %c0_134 = arith.constant 0 : index
    %c1408 = arith.constant 1408 : index
    %205 = vector.load %arg12[%c0_134, %c1408] : memref<8x6272xbf16, #tpu.memory_space<vmem>>, vector<1x128xbf16>
    tpu.vector_store %arg12[%c0_134, %c1408], %204 {strides = array<i32>} : memref<8x6272xbf16, #tpu.memory_space<vmem>>, vector<1x128xbf16>,
    %206 = vector.extract_strided_slice %190 {offsets = [5, 0], sizes = [1, 128], strides = [1, 1]} : vector<7x128xf32> to vector<1x128xf32>
    %207 = arith.truncf %206 : vector<1x128xf32> to vector<1x128xbf16>
    %c0_135 = arith.constant 0 : index
    %c1536 = arith.constant 1536 : index
    %208 = vector.load %arg12[%c0_135, %c1536] : memref<8x6272xbf16, #tpu.memory_space<vmem>>, vector<1x128xbf16>
    tpu.vector_store %arg12[%c0_135, %c1536], %207 {strides = array<i32>} : memref<8x6272xbf16, #tpu.memory_space<vmem>>, vector<1x128xbf16>,
    %209 = vector.extract_strided_slice %190 {offsets = [6, 0], sizes = [1, 128], strides = [1, 1]} : vector<7x128xf32> to vector<1x128xf32>
    %210 = arith.truncf %209 : vector<1x128xf32> to vector<1x128xbf16>
    %c0_136 = arith.constant 0 : index
    %c1664 = arith.constant 1664 : index
    %211 = vector.load %arg12[%c0_136, %c1664] : memref<8x6272xbf16, #tpu.memory_space<vmem>>, vector<1x128xbf16>
    tpu.vector_store %arg12[%c0_136, %c1664], %210 {strides = array<i32>} : memref<8x6272xbf16, #tpu.memory_space<vmem>>, vector<1x128xbf16>,
    %212 = vector.extract_strided_slice %163 {offsets = [2, 0, 0], sizes = [1, 7, 128], strides = [1, 1, 1]} : vector<7x7x128xf32> to vector<1x7x128xf32>
    %213 = vector.shape_cast %212 : vector<1x7x128xf32> to vector<7x128xf32>
    %214 = vector.extract_strided_slice %213 {offsets = [0, 0], sizes = [1, 128], strides = [1, 1]} : vector<7x128xf32> to vector<1x128xf32>
    %215 = arith.truncf %214 : vector<1x128xf32> to vector<1x128xbf16>
    %c0_137 = arith.constant 0 : index
    %c1792 = arith.constant 1792 : index
    %216 = vector.load %arg12[%c0_137, %c1792] : memref<8x6272xbf16, #tpu.memory_space<vmem>>, vector<1x128xbf16>
    tpu.vector_store %arg12[%c0_137, %c1792], %215 {strides = array<i32>} : memref<8x6272xbf16, #tpu.memory_space<vmem>>, vector<1x128xbf16>,
    %217 = vector.extract_strided_slice %213 {offsets = [1, 0], sizes = [1, 128], strides = [1, 1]} : vector<7x128xf32> to vector<1x128xf32>
    %218 = arith.truncf %217 : vector<1x128xf32> to vector<1x128xbf16>
    %c0_138 = arith.constant 0 : index
    %c1920 = arith.constant 1920 : index
    %219 = vector.load %arg12[%c0_138, %c1920] : memref<8x6272xbf16, #tpu.memory_space<vmem>>, vector<1x128xbf16>
    tpu.vector_store %arg12[%c0_138, %c1920], %218 {strides = array<i32>} : memref<8x6272xbf16, #tpu.memory_space<vmem>>, vector<1x128xbf16>,
    %220 = vector.extract_strided_slice %213 {offsets = [2, 0], sizes = [1, 128], strides = [1, 1]} : vector<7x128xf32> to vector<1x128xf32>
    %221 = arith.truncf %220 : vector<1x128xf32> to vector<1x128xbf16>
    %c0_139 = arith.constant 0 : index
    %c2048 = arith.constant 2048 : index
    %222 = vector.load %arg12[%c0_139, %c2048] : memref<8x6272xbf16, #tpu.memory_space<vmem>>, vector<1x128xbf16>
    tpu.vector_store %arg12[%c0_139, %c2048], %221 {strides = array<i32>} : memref<8x6272xbf16, #tpu.memory_space<vmem>>, vector<1x128xbf16>,
    %223 = vector.extract_strided_slice %213 {offsets = [3, 0], sizes = [1, 128], strides = [1, 1]} : vector<7x128xf32> to vector<1x128xf32>
    %224 = arith.truncf %223 : vector<1x128xf32> to vector<1x128xbf16>
    %c0_140 = arith.constant 0 : index
    %c2176 = arith.constant 2176 : index
    %225 = vector.load %arg12[%c0_140, %c2176] : memref<8x6272xbf16, #tpu.memory_space<vmem>>, vector<1x128xbf16>
    tpu.vector_store %arg12[%c0_140, %c2176], %224 {strides = array<i32>} : memref<8x6272xbf16, #tpu.memory_space<vmem>>, vector<1x128xbf16>,
    %226 = vector.extract_strided_slice %213 {offsets = [4, 0], sizes = [1, 128], strides = [1, 1]} : vector<7x128xf32> to vector<1x128xf32>
    %227 = arith.truncf %226 : vector<1x128xf32> to vector<1x128xbf16>
    %c0_141 = arith.constant 0 : index
    %c2304 = arith.constant 2304 : index
    %228 = vector.load %arg12[%c0_141, %c2304] : memref<8x6272xbf16, #tpu.memory_space<vmem>>, vector<1x128xbf16>
    tpu.vector_store %arg12[%c0_141, %c2304], %227 {strides = array<i32>} : memref<8x6272xbf16, #tpu.memory_space<vmem>>, vector<1x128xbf16>,
    %229 = vector.extract_strided_slice %213 {offsets = [5, 0], sizes = [1, 128], strides = [1, 1]} : vector<7x128xf32> to vector<1x128xf32>
    %230 = arith.truncf %229 : vector<1x128xf32> to vector<1x128xbf16>
    %c0_142 = arith.constant 0 : index
    %c2432 = arith.constant 2432 : index
    %231 = vector.load %arg12[%c0_142, %c2432] : memref<8x6272xbf16, #tpu.memory_space<vmem>>, vector<1x128xbf16>
    tpu.vector_store %arg12[%c0_142, %c2432], %230 {strides = array<i32>} : memref<8x6272xbf16, #tpu.memory_space<vmem>>, vector<1x128xbf16>,
    %232 = vector.extract_strided_slice %213 {offsets = [6, 0], sizes = [1, 128], strides = [1, 1]} : vector<7x128xf32> to vector<1x128xf32>
    %233 = arith.truncf %232 : vector<1x128xf32> to vector<1x128xbf16>
    %c0_143 = arith.constant 0 : index
    %c2560 = arith.constant 2560 : index
    %234 = vector.load %arg12[%c0_143, %c2560] : memref<8x6272xbf16, #tpu.memory_space<vmem>>, vector<1x128xbf16>
    tpu.vector_store %arg12[%c0_143, %c2560], %233 {strides = array<i32>} : memref<8x6272xbf16, #tpu.memory_space<vmem>>, vector<1x128xbf16>,
    %235 = vector.extract_strided_slice %163 {offsets = [3, 0, 0], sizes = [1, 7, 128], strides = [1, 1, 1]} : vector<7x7x128xf32> to vector<1x7x128xf32>
    %236 = vector.shape_cast %235 : vector<1x7x128xf32> to vector<7x128xf32>
    %237 = vector.extract_strided_slice %236 {offsets = [0, 0], sizes = [1, 128], strides = [1, 1]} : vector<7x128xf32> to vector<1x128xf32>
    %238 = arith.truncf %237 : vector<1x128xf32> to vector<1x128xbf16>
    %c0_144 = arith.constant 0 : index
    %c2688 = arith.constant 2688 : index
    %239 = vector.load %arg12[%c0_144, %c2688] : memref<8x6272xbf16, #tpu.memory_space<vmem>>, vector<1x128xbf16>
    tpu.vector_store %arg12[%c0_144, %c2688], %238 {strides = array<i32>} : memref<8x6272xbf16, #tpu.memory_space<vmem>>, vector<1x128xbf16>,
    %240 = vector.extract_strided_slice %236 {offsets = [1, 0], sizes = [1, 128], strides = [1, 1]} : vector<7x128xf32> to vector<1x128xf32>
    %241 = arith.truncf %240 : vector<1x128xf32> to vector<1x128xbf16>
    %c0_145 = arith.constant 0 : index
    %c2816 = arith.constant 2816 : index
    %242 = vector.load %arg12[%c0_145, %c2816] : memref<8x6272xbf16, #tpu.memory_space<vmem>>, vector<1x128xbf16>
    tpu.vector_store %arg12[%c0_145, %c2816], %241 {strides = array<i32>} : memref<8x6272xbf16, #tpu.memory_space<vmem>>, vector<1x128xbf16>,
    %243 = vector.extract_strided_slice %236 {offsets = [2, 0], sizes = [1, 128], strides = [1, 1]} : vector<7x128xf32> to vector<1x128xf32>
    %244 = arith.truncf %243 : vector<1x128xf32> to vector<1x128xbf16>
    %c0_146 = arith.constant 0 : index
    %c2944 = arith.constant 2944 : index
    %245 = vector.load %arg12[%c0_146, %c2944] : memref<8x6272xbf16, #tpu.memory_space<vmem>>, vector<1x128xbf16>
    tpu.vector_store %arg12[%c0_146, %c2944], %244 {strides = array<i32>} : memref<8x6272xbf16, #tpu.memory_space<vmem>>, vector<1x128xbf16>,
    %246 = vector.extract_strided_slice %236 {offsets = [3, 0], sizes = [1, 128], strides = [1, 1]} : vector<7x128xf32> to vector<1x128xf32>
    %247 = arith.truncf %246 : vector<1x128xf32> to vector<1x128xbf16>
    %c0_147 = arith.constant 0 : index
    %c3072 = arith.constant 3072 : index
    %248 = vector.load %arg12[%c0_147, %c3072] : memref<8x6272xbf16, #tpu.memory_space<vmem>>, vector<1x128xbf16>
    tpu.vector_store %arg12[%c0_147, %c3072], %247 {strides = array<i32>} : memref<8x6272xbf16, #tpu.memory_space<vmem>>, vector<1x128xbf16>,
    %249 = vector.extract_strided_slice %236 {offsets = [4, 0], sizes = [1, 128], strides = [1, 1]} : vector<7x128xf32> to vector<1x128xf32>
    %250 = arith.truncf %249 : vector<1x128xf32> to vector<1x128xbf16>
    %c0_148 = arith.constant 0 : index
    %c3200 = arith.constant 3200 : index
    %251 = vector.load %arg12[%c0_148, %c3200] : memref<8x6272xbf16, #tpu.memory_space<vmem>>, vector<1x128xbf16>
    tpu.vector_store %arg12[%c0_148, %c3200], %250 {strides = array<i32>} : memref<8x6272xbf16, #tpu.memory_space<vmem>>, vector<1x128xbf16>,
    %252 = vector.extract_strided_slice %236 {offsets = [5, 0], sizes = [1, 128], strides = [1, 1]} : vector<7x128xf32> to vector<1x128xf32>
    %253 = arith.truncf %252 : vector<1x128xf32> to vector<1x128xbf16>
    %c0_149 = arith.constant 0 : index
    %c3328 = arith.constant 3328 : index
    %254 = vector.load %arg12[%c0_149, %c3328] : memref<8x6272xbf16, #tpu.memory_space<vmem>>, vector<1x128xbf16>
    tpu.vector_store %arg12[%c0_149, %c3328], %253 {strides = array<i32>} : memref<8x6272xbf16, #tpu.memory_space<vmem>>, vector<1x128xbf16>,
    %255 = vector.extract_strided_slice %236 {offsets = [6, 0], sizes = [1, 128], strides = [1, 1]} : vector<7x128xf32> to vector<1x128xf32>
    %256 = arith.truncf %255 : vector<1x128xf32> to vector<1x128xbf16>
    %c0_150 = arith.constant 0 : index
    %c3456 = arith.constant 3456 : index
    %257 = vector.load %arg12[%c0_150, %c3456] : memref<8x6272xbf16, #tpu.memory_space<vmem>>, vector<1x128xbf16>
    tpu.vector_store %arg12[%c0_150, %c3456], %256 {strides = array<i32>} : memref<8x6272xbf16, #tpu.memory_space<vmem>>, vector<1x128xbf16>,
    %258 = vector.extract_strided_slice %163 {offsets = [4, 0, 0], sizes = [1, 7, 128], strides = [1, 1, 1]} : vector<7x7x128xf32> to vector<1x7x128xf32>
    %259 = vector.shape_cast %258 : vector<1x7x128xf32> to vector<7x128xf32>
    %260 = vector.extract_strided_slice %259 {offsets = [0, 0], sizes = [1, 128], strides = [1, 1]} : vector<7x128xf32> to vector<1x128xf32>
    %261 = arith.truncf %260 : vector<1x128xf32> to vector<1x128xbf16>
    %c0_151 = arith.constant 0 : index
    %c3584 = arith.constant 3584 : index
    %262 = vector.load %arg12[%c0_151, %c3584] : memref<8x6272xbf16, #tpu.memory_space<vmem>>, vector<1x128xbf16>
    tpu.vector_store %arg12[%c0_151, %c3584], %261 {strides = array<i32>} : memref<8x6272xbf16, #tpu.memory_space<vmem>>, vector<1x128xbf16>,
    %263 = vector.extract_strided_slice %259 {offsets = [1, 0], sizes = [1, 128], strides = [1, 1]} : vector<7x128xf32> to vector<1x128xf32>
    %264 = arith.truncf %263 : vector<1x128xf32> to vector<1x128xbf16>
    %c0_152 = arith.constant 0 : index
    %c3712 = arith.constant 3712 : index
    %265 = vector.load %arg12[%c0_152, %c3712] : memref<8x6272xbf16, #tpu.memory_space<vmem>>, vector<1x128xbf16>
    tpu.vector_store %arg12[%c0_152, %c3712], %264 {strides = array<i32>} : memref<8x6272xbf16, #tpu.memory_space<vmem>>, vector<1x128xbf16>,
    %266 = vector.extract_strided_slice %259 {offsets = [2, 0], sizes = [1, 128], strides = [1, 1]} : vector<7x128xf32> to vector<1x128xf32>
    %267 = arith.truncf %266 : vector<1x128xf32> to vector<1x128xbf16>
    %c0_153 = arith.constant 0 : index
    %c3840 = arith.constant 3840 : index
    %268 = vector.load %arg12[%c0_153, %c3840] : memref<8x6272xbf16, #tpu.memory_space<vmem>>, vector<1x128xbf16>
    tpu.vector_store %arg12[%c0_153, %c3840], %267 {strides = array<i32>} : memref<8x6272xbf16, #tpu.memory_space<vmem>>, vector<1x128xbf16>,
    %269 = vector.extract_strided_slice %259 {offsets = [3, 0], sizes = [1, 128], strides = [1, 1]} : vector<7x128xf32> to vector<1x128xf32>
    %270 = arith.truncf %269 : vector<1x128xf32> to vector<1x128xbf16>
    %c0_154 = arith.constant 0 : index
    %c3968 = arith.constant 3968 : index
    %271 = vector.load %arg12[%c0_154, %c3968] : memref<8x6272xbf16, #tpu.memory_space<vmem>>, vector<1x128xbf16>
    tpu.vector_store %arg12[%c0_154, %c3968], %270 {strides = array<i32>} : memref<8x6272xbf16, #tpu.memory_space<vmem>>, vector<1x128xbf16>,
    %272 = vector.extract_strided_slice %259 {offsets = [4, 0], sizes = [1, 128], strides = [1, 1]} : vector<7x128xf32> to vector<1x128xf32>
    %273 = arith.truncf %272 : vector<1x128xf32> to vector<1x128xbf16>
    %c0_155 = arith.constant 0 : index
    %c4096 = arith.constant 4096 : index
    %274 = vector.load %arg12[%c0_155, %c4096] : memref<8x6272xbf16, #tpu.memory_space<vmem>>, vector<1x128xbf16>
    tpu.vector_store %arg12[%c0_155, %c4096], %273 {strides = array<i32>} : memref<8x6272xbf16, #tpu.memory_space<vmem>>, vector<1x128xbf16>,
    %275 = vector.extract_strided_slice %259 {offsets = [5, 0], sizes = [1, 128], strides = [1, 1]} : vector<7x128xf32> to vector<1x128xf32>
    %276 = arith.truncf %275 : vector<1x128xf32> to vector<1x128xbf16>
    %c0_156 = arith.constant 0 : index
    %c4224 = arith.constant 4224 : index
    %277 = vector.load %arg12[%c0_156, %c4224] : memref<8x6272xbf16, #tpu.memory_space<vmem>>, vector<1x128xbf16>
    tpu.vector_store %arg12[%c0_156, %c4224], %276 {strides = array<i32>} : memref<8x6272xbf16, #tpu.memory_space<vmem>>, vector<1x128xbf16>,
    %278 = vector.extract_strided_slice %259 {offsets = [6, 0], sizes = [1, 128], strides = [1, 1]} : vector<7x128xf32> to vector<1x128xf32>
    %279 = arith.truncf %278 : vector<1x128xf32> to vector<1x128xbf16>
    %c0_157 = arith.constant 0 : index
    %c4352 = arith.constant 4352 : index
    %280 = vector.load %arg12[%c0_157, %c4352] : memref<8x6272xbf16, #tpu.memory_space<vmem>>, vector<1x128xbf16>
    tpu.vector_store %arg12[%c0_157, %c4352], %279 {strides = array<i32>} : memref<8x6272xbf16, #tpu.memory_space<vmem>>, vector<1x128xbf16>,
    %281 = vector.extract_strided_slice %163 {offsets = [5, 0, 0], sizes = [1, 7, 128], strides = [1, 1, 1]} : vector<7x7x128xf32> to vector<1x7x128xf32>
    %282 = vector.shape_cast %281 : vector<1x7x128xf32> to vector<7x128xf32>
    %283 = vector.extract_strided_slice %282 {offsets = [0, 0], sizes = [1, 128], strides = [1, 1]} : vector<7x128xf32> to vector<1x128xf32>
    %284 = arith.truncf %283 : vector<1x128xf32> to vector<1x128xbf16>
    %c0_158 = arith.constant 0 : index
    %c4480 = arith.constant 4480 : index
    %285 = vector.load %arg12[%c0_158, %c4480] : memref<8x6272xbf16, #tpu.memory_space<vmem>>, vector<1x128xbf16>
    tpu.vector_store %arg12[%c0_158, %c4480], %284 {strides = array<i32>} : memref<8x6272xbf16, #tpu.memory_space<vmem>>, vector<1x128xbf16>,
    %286 = vector.extract_strided_slice %282 {offsets = [1, 0], sizes = [1, 128], strides = [1, 1]} : vector<7x128xf32> to vector<1x128xf32>
    %287 = arith.truncf %286 : vector<1x128xf32> to vector<1x128xbf16>
    %c0_159 = arith.constant 0 : index
    %c4608 = arith.constant 4608 : index
    %288 = vector.load %arg12[%c0_159, %c4608] : memref<8x6272xbf16, #tpu.memory_space<vmem>>, vector<1x128xbf16>
    tpu.vector_store %arg12[%c0_159, %c4608], %287 {strides = array<i32>} : memref<8x6272xbf16, #tpu.memory_space<vmem>>, vector<1x128xbf16>,
    %289 = vector.extract_strided_slice %282 {offsets = [2, 0], sizes = [1, 128], strides = [1, 1]} : vector<7x128xf32> to vector<1x128xf32>
    %290 = arith.truncf %289 : vector<1x128xf32> to vector<1x128xbf16>
    %c0_160 = arith.constant 0 : index
    %c4736 = arith.constant 4736 : index
    %291 = vector.load %arg12[%c0_160, %c4736] : memref<8x6272xbf16, #tpu.memory_space<vmem>>, vector<1x128xbf16>
    tpu.vector_store %arg12[%c0_160, %c4736], %290 {strides = array<i32>} : memref<8x6272xbf16, #tpu.memory_space<vmem>>, vector<1x128xbf16>,
    %292 = vector.extract_strided_slice %282 {offsets = [3, 0], sizes = [1, 128], strides = [1, 1]} : vector<7x128xf32> to vector<1x128xf32>
    %293 = arith.truncf %292 : vector<1x128xf32> to vector<1x128xbf16>
    %c0_161 = arith.constant 0 : index
    %c4864 = arith.constant 4864 : index
    %294 = vector.load %arg12[%c0_161, %c4864] : memref<8x6272xbf16, #tpu.memory_space<vmem>>, vector<1x128xbf16>
    tpu.vector_store %arg12[%c0_161, %c4864], %293 {strides = array<i32>} : memref<8x6272xbf16, #tpu.memory_space<vmem>>, vector<1x128xbf16>,
    %295 = vector.extract_strided_slice %282 {offsets = [4, 0], sizes = [1, 128], strides = [1, 1]} : vector<7x128xf32> to vector<1x128xf32>
    %296 = arith.truncf %295 : vector<1x128xf32> to vector<1x128xbf16>
    %c0_162 = arith.constant 0 : index
    %c4992 = arith.constant 4992 : index
    %297 = vector.load %arg12[%c0_162, %c4992] : memref<8x6272xbf16, #tpu.memory_space<vmem>>, vector<1x128xbf16>
    tpu.vector_store %arg12[%c0_162, %c4992], %296 {strides = array<i32>} : memref<8x6272xbf16, #tpu.memory_space<vmem>>, vector<1x128xbf16>,
    %298 = vector.extract_strided_slice %282 {offsets = [5, 0], sizes = [1, 128], strides = [1, 1]} : vector<7x128xf32> to vector<1x128xf32>
    %299 = arith.truncf %298 : vector<1x128xf32> to vector<1x128xbf16>
    %c0_163 = arith.constant 0 : index
    %c5120 = arith.constant 5120 : index
    %300 = vector.load %arg12[%c0_163, %c5120] : memref<8x6272xbf16, #tpu.memory_space<vmem>>, vector<1x128xbf16>
    tpu.vector_store %arg12[%c0_163, %c5120], %299 {strides = array<i32>} : memref<8x6272xbf16, #tpu.memory_space<vmem>>, vector<1x128xbf16>,
    %301 = vector.extract_strided_slice %282 {offsets = [6, 0], sizes = [1, 128], strides = [1, 1]} : vector<7x128xf32> to vector<1x128xf32>
    %302 = arith.truncf %301 : vector<1x128xf32> to vector<1x128xbf16>
    %c0_164 = arith.constant 0 : index
    %c5248 = arith.constant 5248 : index
    %303 = vector.load %arg12[%c0_164, %c5248] : memref<8x6272xbf16, #tpu.memory_space<vmem>>, vector<1x128xbf16>
    tpu.vector_store %arg12[%c0_164, %c5248], %302 {strides = array<i32>} : memref<8x6272xbf16, #tpu.memory_space<vmem>>, vector<1x128xbf16>,
    %304 = vector.extract_strided_slice %163 {offsets = [6, 0, 0], sizes = [1, 7, 128], strides = [1, 1, 1]} : vector<7x7x128xf32> to vector<1x7x128xf32>
    %305 = vector.shape_cast %304 : vector<1x7x128xf32> to vector<7x128xf32>
    %306 = vector.extract_strided_slice %305 {offsets = [0, 0], sizes = [1, 128], strides = [1, 1]} : vector<7x128xf32> to vector<1x128xf32>
    %307 = arith.truncf %306 : vector<1x128xf32> to vector<1x128xbf16>
    %c0_165 = arith.constant 0 : index
    %c5376 = arith.constant 5376 : index
    %308 = vector.load %arg12[%c0_165, %c5376] : memref<8x6272xbf16, #tpu.memory_space<vmem>>, vector<1x128xbf16>
    tpu.vector_store %arg12[%c0_165, %c5376], %307 {strides = array<i32>} : memref<8x6272xbf16, #tpu.memory_space<vmem>>, vector<1x128xbf16>,
    %309 = vector.extract_strided_slice %305 {offsets = [1, 0], sizes = [1, 128], strides = [1, 1]} : vector<7x128xf32> to vector<1x128xf32>
    %310 = arith.truncf %309 : vector<1x128xf32> to vector<1x128xbf16>
    %c0_166 = arith.constant 0 : index
    %c5504 = arith.constant 5504 : index
    %311 = vector.load %arg12[%c0_166, %c5504] : memref<8x6272xbf16, #tpu.memory_space<vmem>>, vector<1x128xbf16>
    tpu.vector_store %arg12[%c0_166, %c5504], %310 {strides = array<i32>} : memref<8x6272xbf16, #tpu.memory_space<vmem>>, vector<1x128xbf16>,
    %312 = vector.extract_strided_slice %305 {offsets = [2, 0], sizes = [1, 128], strides = [1, 1]} : vector<7x128xf32> to vector<1x128xf32>
    %313 = arith.truncf %312 : vector<1x128xf32> to vector<1x128xbf16>
    %c0_167 = arith.constant 0 : index
    %c5632 = arith.constant 5632 : index
    %314 = vector.load %arg12[%c0_167, %c5632] : memref<8x6272xbf16, #tpu.memory_space<vmem>>, vector<1x128xbf16>
    tpu.vector_store %arg12[%c0_167, %c5632], %313 {strides = array<i32>} : memref<8x6272xbf16, #tpu.memory_space<vmem>>, vector<1x128xbf16>,
    %315 = vector.extract_strided_slice %305 {offsets = [3, 0], sizes = [1, 128], strides = [1, 1]} : vector<7x128xf32> to vector<1x128xf32>
    %316 = arith.truncf %315 : vector<1x128xf32> to vector<1x128xbf16>
    %c0_168 = arith.constant 0 : index
    %c5760 = arith.constant 5760 : index
    %317 = vector.load %arg12[%c0_168, %c5760] : memref<8x6272xbf16, #tpu.memory_space<vmem>>, vector<1x128xbf16>
    tpu.vector_store %arg12[%c0_168, %c5760], %316 {strides = array<i32>} : memref<8x6272xbf16, #tpu.memory_space<vmem>>, vector<1x128xbf16>,
    %318 = vector.extract_strided_slice %305 {offsets = [4, 0], sizes = [1, 128], strides = [1, 1]} : vector<7x128xf32> to vector<1x128xf32>
    %319 = arith.truncf %318 : vector<1x128xf32> to vector<1x128xbf16>
    %c0_169 = arith.constant 0 : index
    %c5888 = arith.constant 5888 : index
    %320 = vector.load %arg12[%c0_169, %c5888] : memref<8x6272xbf16, #tpu.memory_space<vmem>>, vector<1x128xbf16>
    tpu.vector_store %arg12[%c0_169, %c5888], %319 {strides = array<i32>} : memref<8x6272xbf16, #tpu.memory_space<vmem>>, vector<1x128xbf16>,
    %321 = vector.extract_strided_slice %305 {offsets = [5, 0], sizes = [1, 128], strides = [1, 1]} : vector<7x128xf32> to vector<1x128xf32>
    %322 = arith.truncf %321 : vector<1x128xf32> to vector<1x128xbf16>
    %c0_170 = arith.constant 0 : index
    %c6016 = arith.constant 6016 : index
    %323 = vector.load %arg12[%c0_170, %c6016] : memref<8x6272xbf16, #tpu.memory_space<vmem>>, vector<1x128xbf16>
    tpu.vector_store %arg12[%c0_170, %c6016], %322 {strides = array<i32>} : memref<8x6272xbf16, #tpu.memory_space<vmem>>, vector<1x128xbf16>,
    %324 = vector.extract_strided_slice %305 {offsets = [6, 0], sizes = [1, 128], strides = [1, 1]} : vector<7x128xf32> to vector<1x128xf32>
    %325 = arith.truncf %324 : vector<1x128xf32> to vector<1x128xbf16>
    %c0_171 = arith.constant 0 : index
    %c6144 = arith.constant 6144 : index
    %326 = vector.load %arg12[%c0_171, %c6144] : memref<8x6272xbf16, #tpu.memory_space<vmem>>, vector<1x128xbf16>
    tpu.vector_store %arg12[%c0_171, %c6144], %325 {strides = array<i32>} : memref<8x6272xbf16, #tpu.memory_space<vmem>>, vector<1x128xbf16>,
    %c0_172 = arith.constant 0 : index
    %c0_173 = arith.constant 0 : index
    %327 = vector.load %arg12[%c0_172, %c0_173] : memref<8x6272xbf16, #tpu.memory_space<vmem>>, vector<8x6272xbf16>
    %c0_174 = arith.constant 0 : index
    %c0_175 = arith.constant 0 : index
    %328 = vector.load %arg6[%c0_174, %c0_175] : memref<6272x128xbf16, #tpu.memory_space<vmem>>, vector<6272x128xbf16>
    %cst_176 = arith.constant dense<0.000000e+00> : vector<8x128xf32>
    %329 = tpu.matmul %327, %328, %cst_176 {dimension_numbers = #tpu.dot_dimension_numbers<[1], [0], [0], [1], [0, 0, 1, 1], [], []>} : vector<8x6272xbf16>, vector<6272x128xbf16>, vector<8x128xf32> -> vector<8x128xf32>
    %c0_177 = arith.constant 0 : index
    %c0_178 = arith.constant 0 : index
    %330 = vector.load %arg7[%c0_177, %c0_178] : memref<1x128xf32, #tpu.memory_space<vmem>>, vector<1x128xf32>
    %331 = vector.broadcast %330 : vector<1x128xf32> to vector<8x128xf32>
    %332 = arith.addf %329, %331 : vector<8x128xf32>
    %cst_179 = arith.constant 0.000000e+00 : f32
    %333 = vector.broadcast %cst_179 : f32 to vector<8x128xf32>
    %334 = arith.maximumf %332, %333 : vector<8x128xf32>
    %335 = arith.truncf %334 : vector<8x128xf32> to vector<8x128xbf16>
    %c0_180 = arith.constant 0 : index
    %c0_181 = arith.constant 0 : index
    %336 = vector.load %arg8[%c0_180, %c0_181] : memref<128x10xbf16, #tpu.memory_space<vmem>>, vector<128x10xbf16>
    %cst_182 = arith.constant dense<0.000000e+00> : vector<8x10xf32>
    %337 = tpu.matmul %335, %336, %cst_182 {dimension_numbers = #tpu.dot_dimension_numbers<[1], [0], [0], [1], [0, 0, 1, 1], [], []>} : vector<8x128xbf16>, vector<128x10xbf16>, vector<8x10xf32> -> vector<8x10xf32>
    %c0_183 = arith.constant 0 : index
    %c0_184 = arith.constant 0 : index
    %338 = vector.load %arg9[%c0_183, %c0_184] : memref<1x10xf32, #tpu.memory_space<vmem>>, vector<1x10xf32>
    %339 = vector.broadcast %338 : vector<1x10xf32> to vector<8x10xf32>
    %340 = arith.addf %337, %339 : vector<8x10xf32>
    %341 = vector.extract_strided_slice %340 {offsets = [0, 0], sizes = [1, 10], strides = [1, 1]} : vector<8x10xf32> to vector<1x10xf32>
    %c0_185 = arith.constant 0 : index
    %c0_186 = arith.constant 0 : index
    %c0_187 = arith.constant 0 : index
    %342 = vector.load %arg10[%c0_185, %c0_186, %c0_187] : memref<1x1x10xf32, #tpu.memory_space<vmem>>, vector<1x1x10xf32>
    %343 = vector.shape_cast %342 : vector<1x1x10xf32> to vector<1x10xf32>
    %344 = vector.shape_cast %341 : vector<1x10xf32> to vector<1x1x10xf32>
    tpu.vector_store %arg10[%c0_185, %c0_186, %c0_187], %344 {strides = array<i32>} : memref<1x1x10xf32, #tpu.memory_space<vmem>>, vector<1x1x10xf32>,
    return
  }
  func.func @transform_0(%arg0: i32) -> (i32, i32, i32) {
    %c0_i32 = arith.constant 0 : i32
    %c0_i32_0 = arith.constant 0 : i32
    %c0_i32_1 = arith.constant 0 : i32
    return %arg0, %c0_i32, %c0_i32_0 : i32, i32, i32
  }
  func.func @transform_1(%arg0: i32) -> (i32, i32, i32) {
    %c0_i32 = arith.constant 0 : i32
    %c0_i32_0 = arith.constant 0 : i32
    %c0_i32_1 = arith.constant 0 : i32
    %c0_i32_2 = arith.constant 0 : i32
    return %c0_i32, %c0_i32_0, %c0_i32_1 : i32, i32, i32
  }
  func.func @transform_2(%arg0: i32) -> (i32, i32) {
    %c0_i32 = arith.constant 0 : i32
    %c0_i32_0 = arith.constant 0 : i32
    %c0_i32_1 = arith.constant 0 : i32
    return %c0_i32, %c0_i32_0 : i32, i32
  }
  func.func @transform_3(%arg0: i32) -> (i32, i32, i32) {
    %c0_i32 = arith.constant 0 : i32
    %c0_i32_0 = arith.constant 0 : i32
    %c0_i32_1 = arith.constant 0 : i32
    %c0_i32_2 = arith.constant 0 : i32
    return %c0_i32, %c0_i32_0, %c0_i32_1 : i32, i32, i32
  }
  func.func @transform_4(%arg0: i32) -> (i32, i32) {
    %c0_i32 = arith.constant 0 : i32
    %c0_i32_0 = arith.constant 0 : i32
    %c0_i32_1 = arith.constant 0 : i32
    return %c0_i32, %c0_i32_0 : i32, i32
  }
  func.func @transform_5(%arg0: i32) -> (i32, i32) {
    %c0_i32 = arith.constant 0 : i32
    %c0_i32_0 = arith.constant 0 : i32
    %c0_i32_1 = arith.constant 0 : i32
    return %c0_i32, %c0_i32_0 : i32, i32
  }
  func.func @transform_6(%arg0: i32) -> (i32, i32) {
    %c0_i32 = arith.constant 0 : i32
    %c0_i32_0 = arith.constant 0 : i32
    %c0_i32_1 = arith.constant 0 : i32
    return %c0_i32, %c0_i32_0 : i32, i32
  }
  func.func @transform_7(%arg0: i32) -> (i32, i32) {
    %c0_i32 = arith.constant 0 : i32
    %c0_i32_0 = arith.constant 0 : i32
    %c0_i32_1 = arith.constant 0 : i32
    return %c0_i32, %c0_i32_0 : i32, i32
  }
  func.func @transform_8(%arg0: i32) -> (i32, i32) {
    %c0_i32 = arith.constant 0 : i32
    %c0_i32_0 = arith.constant 0 : i32
    %c0_i32_1 = arith.constant 0 : i32
    return %c0_i32, %c0_i32_0 : i32, i32
  }
  func.func @transform_9(%arg0: i32) -> (i32, i32, i32) {
    %c0_i32 = arith.constant 0 : i32
    %c0_i32_0 = arith.constant 0 : i32
    %c0_i32_1 = arith.constant 0 : i32
    return %arg0, %c0_i32, %c0_i32_0 : i32, i32, i32
  }
}

</mosaic_0001>

<bundles_post_ra>
// kernel: a_call__.1
= control target key start
LH: loop header
LB: loop body
LE: loop exit
PB: predicated region body
PF: predicated region fallthrough
CT: control target
= control target key end

     0   :  { %14 = vsyncpa [#allocation5], 0  ;;  %s20691_s0 = inlined_call_operand.vmem [shape: bf16[2,440,8], index: 0, kind: input, shape index: {}]   ;;  %s20692_s1 = inlined_call_operand.hbm [shape: bf16[9,8,32], index: 1, kind: input, shape index: {}]   ;;  %s20693_s2 = inlined_call_operand.vmem [shape: f32[1,32], index: 2, kind: input, shape index: {}]   ;;  %s20694_s3 = inlined_call_operand.hbm [shape: bf16[9,32,128], index: 3, kind: input, shape index: {}]   ;;  %s20695_s4 = inlined_call_operand.vmem [shape: f32[1,128], index: 4, kind: input, shape index: {}, may-alias: {4,6}]   ;;  %s20696_s5 = inlined_call_operand.hbm [shape: bf16[6272,128], index: 5, kind: input, shape index: {}]   ;;  %s20697_s6 = inlined_call_operand.vmem [shape: f32[1,128], index: 6, kind: input, shape index: {}, may-alias: {4,6}]   ;;  %s20698_s7 = inlined_call_operand.hbm [shape: bf16[128,10], index: 7, kind: input, shape index: {}]   ;;  %s20699_s8 = inlined_call_operand.vmem [shape: f32[1,10], index: 8, kind: input, shape index: {}]   ;;  %s20700_s9 = inlined_call_operand.hbm [shape: f32[2,1,10], index: 9, kind: output, shape index: {}]  }
   0x1   :  { %15 = vsyncpa [#allocation8], 0 }
   0x2   :  { %16 = vsyncpa [#allocation11], 0 }
   0x3   :  { %17 = vsyncpa [#allocation6], 0 }
   0x4   :  { %19 = vsyncpa [#allocation6 + $0x1], 0  ;;  %s17436_s30 = smov 0   ;;  %s17438_s10 = smov 0  }
   0x5   :  { %s17440_s11 = smov 0   ;;  %s17442_s12 = smov 0  }
   0x6 LB: > { %20709 = sst [smem:[#allocation17_spill]] %s17361_s30  ;;  %s17457_s13 = sadd.s32 4294967295, %s17373_s12   ;;  %s17373_s12 = sphi %s17442_s12, %s20771_s12   ;;  %s17369_s11 = sphi %s17440_s11, %s20776_s11   ;;  %s17365_s10 = sphi %s17438_s10, %s20775_s10   ;;  %s17361_s30 = sphi %s17436_s30, %s20774_s30  }
   0x7   : > { %20710 = sst [smem:[#allocation18_spill]] %s17369_s11  ;;  %s13743_s14 = sadd.s32 4294967294, %s17373_s12  }
   0x8   : > { %s17461_s15 = sadd.s32 1, %s17373_s12   ;;  %s226_s16 = sadd.s32 1, %s17369_s11 }
   0x9   : > { %20711 = sst [smem:[#allocation19_spill]] %s17461_s15  ;;  %s223_s17 = ssub.s32 %s17373_s12, %s17461_s15 }
   0xa   : > { %p236_p0 = scmp.ne.s32.totalorder %s17369_s11, %s17365_s10  ;;  %p224_p1 = scmp.eq.s32.totalorder %s223_s17, 0 }
   0xb   : > { %p237_p2 = scmp.eq.s32.totalorder %s17457_s13, 1  ;;  %p242_p3 = scmp.ne.s32.totalorder %s17365_s10, %s17361_s30 }
   0xc   : > { %p243_p4 = scmp.eq.s32.totalorder %s13743_s14, 1  ;;  %p13744_p7 = scmp.ge.s32.totalorder %s17373_s12, 1 }
   0xd   : > { %s17472_s18 = scalar_select %p224_p1, %s17369_s11, %s226_s16  }
   0xe   : > { %p17474_p5 = por %p237_p2, %p236_p0  ;;  %p17478_p6 = por %p243_p4, %p242_p3 }
   0xf   : > { %20712 = sst [smem:[#allocation20_spill]] %s17472_s18  ;;  %p250_p8 = scmp.lt.s32.totalorder %s17373_s12, 3 }
  0x10   : > { %s20713_s19 = scalar_select %p17474_p5, 1, 0 }
  0x11   : > { %s20714_s20 = scalar_select %p17478_p6, 1, 0 }
  0x12   : > { %p20701_p9 = scmp.eq.s32.totalorder %s17457_s13, 0  ;;  %p17485_p10 = pnand %p13744_p7, %p250_p8 }
  0x13   : > { %20715 = sst [smem:[#allocation21_spill]] %s20714_s20  ;;  %s17375_s22 = smov [#allocation7]  }
  0x14   : > { %s20716_s21 = scalar_select %p17485_p10, 1, 0 }
  0x15   : > { %p16449_p11 = pneg %p17485_p10  ;;  %s278_s23 = sshll.u32 %s17375_s22, 4  ;;  %s17491_s23 = int_to_ptr.vmem [resolvable:$true] %s278_s23 }
  0x16   : > { %s17376_s25 = smov [#allocation4]   ;;  %s17377_s27 = smov [#allocation9]  }
  0x17   : > { %p17495_p12 = pnand %p20701_p9, %p16449_p11  ;;  %s262_s26 = sshll.u32 %s17376_s25, 4  ;;  %s17499_s26 = int_to_ptr.vmem [resolvable:$true] %s262_s26 }
  0x18   : > { %s17501_s28 = sshll.u32 %s17377_s27, 4  ;;  %s17187_s16 = scalar_lea.hbm %s20694_s3, 2304  ;;  %s295_s28 = int_to_ptr.vmem [resolvable:$true] %s17501_s28 }
  0x19   : > { %p17188_p13 = scmp.ne.s32.totalorder %s20694_s3, %s17187_s16  ;;  %p17511_p0 = pneg %p17495_p12 }
  0x1a   : > { %p17194_p3 = scmp.lt.u32.totalorder %s17187_s16, %s20694_s3 }
  0x1b   : > { %p17190_p1 = pnand %p17511_p0, %p17188_p13 }
  0x1d   : > { %p17191_p2 = pneg %p17190_p1 }
  0x1f   : > { %p17196_p4 = pnand %p17194_p3, %p17191_p2 }
  0x21   : > { %17199 = shalt.err (!%p17196_p4)
}
  0x22   : > { %s17200_s29 = scalar_lea.vmem %s17491_s23, 2304  ;;  %p17208_p9 = scmp.lt.s32.totalorder %s17491_s23, %s17491_s23 }
  0x23   : > { %p17201_p7 = scmp.ne.s32.totalorder %s17491_s23, %s17200_s29  ;;  %p17209_p6 = scmp.lt.s32.totalorder %s17200_s29, %s17200_s29 }
  0x25   : > { %p17203_p8 = pnand %p17201_p7, %p17511_p0  ;;  %p17210_p13 = por %p17209_p6, %p17208_p9 }
  0x27   : > { %p17204_p11 = pneg %p17203_p8 }
  0x29   : > { %p17211_p1 = pnand %p17210_p13, %p17204_p11 }
  0x2b   : > { %17214 = shalt.err (!%p17211_p1)
}
  0x2c   : > { %s17378_s14 = smov 64   ;;  %s17379_s16 = smov 4  }
  0x2d   : > { %16455 = dma.hbm_to_vmem [thread:$0]  (!%p17495_p12), %s20694_s3, 2304, %s17491_s23, [#allocation8], %s17378_s14, %s17378_s14, %s17379_s16  }
  0x2e   : > { %s17215_s29 = scalar_lea.hbm %s20692_s1, 576 }
  0x2f   : > { %p17216_p6 = scmp.ne.s32.totalorder %s20692_s1, %s17215_s29  ;;  %p17222_p3 = scmp.lt.u32.totalorder %s17215_s29, %s20692_s1 }
  0x31   : > { %p17218_p9 = pnand %p17216_p6, %p17511_p0 }
  0x33   : > { %p17219_p2 = pneg %p17218_p9 }
  0x35   : > { %p17224_p4 = pnand %p17222_p3, %p17219_p2 }
  0x37   : > { %17227 = shalt.err (!%p17224_p4)
}
  0x38   : > { %s17228_s23 = scalar_lea.vmem %s17499_s26, 576  ;;  %p17236_p13 = scmp.lt.s32.totalorder %s17499_s26, %s17499_s26 }
  0x39   : > { %p17229_p7 = scmp.ne.s32.totalorder %s17499_s26, %s17228_s23  ;;  %p17237_p1 = scmp.lt.s32.totalorder %s17228_s23, %s17228_s23 }
  0x3b   : > { %p17231_p8 = pnand %p17229_p7, %p17511_p0  ;;  %p17238_p6 = por %p17237_p1, %p17236_p13 }
  0x3d   : > { %p17232_p11 = pneg %p17231_p8 }
  0x3f   : > { %p17239_p9 = pnand %p17238_p6, %p17232_p11 }
  0x41   : > { %17242 = shalt.err (!%p17239_p9)
}
  0x42   : > { %16452 = dma.hbm_to_vmem [thread:$0]  (!%p17495_p12), %s20692_s1, 576, %s17499_s26, [#allocation5], %s17378_s14, %s17378_s14, %s17379_s16  }
  0x43   : > { %s17243_s17 = scalar_lea.hbm %s20696_s5, 50176 }
  0x44   : > { %p17244_p2 = scmp.ne.s32.totalorder %s20696_s5, %s17243_s17  ;;  %p17250_p7 = scmp.lt.u32.totalorder %s17243_s17, %s20696_s5 }
  0x46   : > { %p17246_p3 = pnand %p17244_p2, %p17511_p0 }
  0x48   : > { %p17247_p4 = pneg %p17246_p3 }
  0x4a   : > { %p17252_p8 = pnand %p17250_p7, %p17247_p4 }
  0x4c   : > { %17255 = shalt.err (!%p17252_p8)
}
  0x4d   : > { %s17256_s23 = scalar_lea.vmem %s295_s28, 50176  ;;  %p17264_p6 = scmp.lt.s32.totalorder %s295_s28, %s295_s28 }
  0x4e   : > { %p17257_p11 = scmp.ne.s32.totalorder %s295_s28, %s17256_s23  ;;  %p17265_p9 = scmp.lt.s32.totalorder %s17256_s23, %s17256_s23 }
  0x50   : > { %p17259_p13 = pnand %p17257_p11, %p17511_p0  ;;  %p17266_p5 = por %p17265_p9, %p17264_p6 }
  0x52   : > { %p17260_p1 = pneg %p17259_p13 }
  0x54   : > { %p17267_p10 = pnand %p17266_p5, %p17260_p1 }
  0x56   : > { %17270 = shalt.err (!%p17267_p10)
}
  0x57   : > { %16458 = dma.hbm_to_vmem [thread:$0]  (!%p17495_p12), %s20696_s5, 50176, %s295_s28, [#allocation8], %s17378_s14, %s17378_s14, %s17379_s16  }
  0x58   : > { %s17380_s11 = smov [#allocation10]   ;;  %s17271_s22 = scalar_lea.hbm %s20698_s7, 1024 }
  0x59   : > { %s310_s15 = sshll.u32 %s17380_s11, 4  ;;  %p17272_p5 = scmp.ne.s32.totalorder %s20698_s7, %s17271_s22  ;;  %s311_s15 = int_to_ptr.vmem [resolvable:$true] %s310_s15 }
  0x5a   : > { %p17278_p3 = scmp.lt.u32.totalorder %s17271_s22, %s20698_s7 }
  0x5b   : > { %p17274_p10 = pnand %p17272_p5, %p17511_p0 }
  0x5d   : > { %p17275_p2 = pneg %p17274_p10 }
  0x5f   : > { %p17280_p4 = pnand %p17278_p3, %p17275_p2 }
  0x61   : > { %17283 = shalt.err (!%p17280_p4)
}
  0x62   : > { %s17284_s28 = scalar_lea.vmem %s311_s15, 1024  ;;  %p17292_p13 = scmp.lt.s32.totalorder %s311_s15, %s311_s15 }
  0x63   : > { %p17285_p7 = scmp.ne.s32.totalorder %s311_s15, %s17284_s28  ;;  %p17293_p1 = scmp.lt.s32.totalorder %s17284_s28, %s17284_s28 }
  0x65   : > { %p17287_p8 = pnand %p17285_p7, %p17511_p0  ;;  %p17294_p6 = por %p17293_p1, %p17292_p13 }
  0x67   : > { %p17288_p11 = pneg %p17287_p8 }
  0x69   : > { %p17295_p9 = pnand %p17294_p6, %p17288_p11 }
  0x6b   : > { %17298 = shalt.err (!%p17295_p9)
}
  0x6c   : > { %16461 = dma.hbm_to_vmem [thread:$0]  (!%p17495_p12), %s20698_s7, 1024, %s311_s15, [#allocation11], %s17378_s14, %s17378_s14, %s17379_s16  }
  0x6d   : > { %p20719_p5 = scmp.ne.s32.totalorder %s20716_s21, 0 }
  0x6f   : > { %337 = sbr.rel (%p20719_p5) target bundleno = 2348 (0x92c), region = 56 }
  0x76   : > { %p20720_p0 = scmp.eq.s32.totalorder %s17457_s13, 0 }
  0x78   : > { %17344 = dma.done.wait (%p20720_p0), [#allocation5], 576   ;;  %p20721_p10 = pmov %p20720_p0 }
  0x79   : > { %p20722_p2 = pmov %p20720_p0 }
  0x7a   : > { %17346 = vsyncadd (%p20721_p10), [#allocation5], 4294966720 }
  0x7b   : > { %17348 = dma.done.wait (%p20722_p2), [#allocation8], 52480   ;;  %p20723_p3 = pmov %p20720_p0 }
  0x7c   : > { %p20724_p4 = pmov %p20720_p0 }
  0x7d   : > { %17350 = vsyncadd (%p20723_p3), [#allocation8], 4294914816 }
  0x7e   : > { %17352 = dma.done.wait (%p20724_p4), [#allocation11], 1024   ;;  %p20725_p12 = pmov %p20720_p0 }
  0x7f   : > { %p384_p7 = scmp.lt.s32.totalorder %s17457_s13, 1  ;;  %vm835_vm0 = vcmask 1043456   ;;  %vm762_vm1 = vcmask 64512   ;;  %v441_v0 = vld [vmem:[#allocation4 + $0x4] sm:$0xf]  ;;  %vm1314_vm3 = vcmask 1046528  }
  0x80   : > { %17354 = vsyncadd (%p20725_p12), [#allocation11], 4294966272  ;;  %v438_v1 = vld [vmem:[#allocation4] sm:$0xf]  ;;  %16421 = vmatprep.subr.msk.bf16.mxu0 %vm835_vm0, %v441_v0  ;;  %v837_v3 = vsel %vm835_vm0, %v441_v0, 0  ;;  %vm6502_vm4 = vcmask 257024  }
  0x81   : > { %s385_s18 = scalar_select %p384_p7, %s17457_s13, 1  ;;  %16422 = vmatprep.subr.msk.bf16.mxu1 %vm835_vm0, %v438_v1  ;;  %v1097_v4 = vsel %vm835_vm0, %v438_v1, 0  ;;  %15752 = vmatpush3.bf16.msra.mxu0 %v837_v3  ;;  %v1310_v8 = vld [vmem:[#allocation4 + $0x8] sm:$0xf]  ;;  %vm565_vm2 = vsmask.f32 7424 }
  0x82   : > { %15802 = vmatpush3.bf16.msra.mxu1 %v1097_v4  ;;  %16423 = vmatprep.subr.msk.bf16.mxu0 %vm835_vm0, %v1310_v8  ;;  %v1437_v26 = vsel %vm835_vm0, %v1310_v8, 0  ;;  %vm5541_vm5 = vcmask 254976   ;;  %vm6564_vm6 = vcmask 1042434   ;;  %vm6566_vm7 = vcmask 1043459   ;;  %s382_s26 = sand.u32 1, %s17365_s10   ;;  %p20767_p11 = scmp.ne.s32.totalorder %s20713_s19, 0 }
  0x83   : > { %s16430_s21 = smul.u32 220, %s385_s18  ;;  %vm6568_vm8 = vcmask 1044484   ;;  %vm6586_vm9 = vcmask 253952   ;;  %vm6587_vm10 = vsmask.f32 256  ;;  %vm6570_vm11 = vcmask 1045509  }
  0x84   : > { %vm6572_vm12 = vcmask 1046534   ;;  %vm6574_vm13 = vcmask 1047559   ;;  %vm6581_vm14 = vsmask.f32 7938  ;;  %vm19341_vm15 = vmand %vm6586_vm9, %vm6587_vm10  ;;  %s383_s24 = scalar_lea.vmem [#allocation12], %s382_s26  ;;  %s17385_s17 = smov [#allocation12]  }
  0x85   : > { %s17623_s16 = scalar_lea.vmem %s20691_s0, %s16430_s21  ;;  %s14808_s21 = sshll.u32 %s17457_s13, 4 }
  0x86   : > { %v390_v2 = vld [vmem:[%s17623_s16] sm:$0xf]  ;;  %v17631_v5 = vld [vmem:[%s17623_s16 + $0x4] sm:$0xf]  ;;  %v17635_v7 = vld [vmem:[%s17623_s16 + $0x8] sm:$0xff]   ;;  %s13647_s14 = sshll.u32 %s383_s24, 4  ;;  %s20649_s15 = scalar_lea.hbm %s20700_s9, %s14808_s21  ;;  %s20651_s14 = int_to_ptr.vmem [resolvable:$true] %s13647_s14 }
  0x87   : > { %v13756_v6 = vcombine.low %v390_v2, %v17631_v5  ;;  %v17639_v9 = vld [vmem:[%s17623_s16 + $0x10] sm:$0xff]   ;;  %v574_v12 = vshll.u32 %v17635_v7, 16  ;;  %v578_v13 = vshrl.u32 %v17635_v7, 16  ;;  %v17648_v15 = vld [vmem:[%s17623_s16 + $0x18] sm:$0xff]   ;;  %v17652_v17 = vld [vmem:[%s17623_s16 + $0x20] sm:$0xff]   ;;  %s13635_s13 = scalar_lea.sflag [#allocation6], %s382_s26 }
  0x88   : > { %v582_v14 = vshll.u32 %v17639_v9, 16  ;;  %v586_v16 = vshrl.u32 %v17639_v9, 16  ;;  %v590_v21 = vshll.u32 %v17648_v15, 16  ;;  %v598_v24 = vshll.u32 %v17652_v17, 16  ;;  %v17659_v25 = vld [vmem:[%s17623_s16 + $0x28] sm:$0xff]   ;;  %v17671_v36 = vld [vmem:[%s17623_s16 + $0x30] sm:$0xff]  }
  0x89   : > { %v567_v10 = vshrl.u32 %v13756_v6, 16  ;;  %v569_v11 = vshll.u32 %v13756_v6, 16  ;;  %15803 = vmatprep.mubr.msk.bf16.mxu1 %vm762_vm1, %v13756_v6  ;;  %v576_v19 = vrot.slane %v574_v12, 1  ;;  %v594_v29 = vshrl.u32 %v17648_v15, 16  ;;  %v17677_v40 = vld [vmem:[%s17623_s16 + $0x38] sm:$0xff]   ;;  %v17689_v48 = vld [vmem:[%s17623_s16 + $0x40] sm:$0xff]  }
  0x8a   : > { %15804 = vmatmul.mubr.msk.bf16.vlgmr.msra.gmra.mrb[0].mxu1 %vm762_vm1, %v17635_v7  ;;  %v584_v20 = vrot.slane %v582_v14, 1  ;;  %v592_v28 = vrot.slane %v590_v21, 1  ;;  %v602_v32 = vshrl.u32 %v17652_v17, 16  ;;  %v606_v33 = vshll.u32 %v17659_v25, 16  ;;  %v17693_v50 = vld [vmem:[%s17623_s16 + $0x48] sm:$0xff]   ;;  %v17702_v55 = vld [vmem:[%s17623_s16 + $0x50] sm:$0xff]  }
  0x8b   : > { %v571_v18 = vrot.slane %v569_v11, 1  ;;  %15807 = vmatprep.mubr.msk.bf16.mxu1 %vm762_vm1, %v17639_v9  ;;  %v580_v23 = vor.u32 %v578_v13, %v576_v19  ;;  %v600_v35 = vrot.slane %v598_v24, 1  ;;  %v614_v41 = vshll.u32 %v17671_v36, 16  ;;  %v17707_v58 = vld [vmem:[%s17623_s16 + $0x58] sm:$0xff]   ;;  %v17712_v61 = vld [vmem:[%s17623_s16 + $0x60] sm:$0xff]   ;;  %v17715_v62 = vld [vmem:[%s17623_s16 + $0x68] sm:$0xff]  }
  0x8c   : > { %v588_v27 = vor.u32 %v586_v16, %v584_v20  ;;  %v596_v37 = vor.u32 %v594_v29, %v592_v28  ;;  %v608_v39 = vrot.slane %v606_v33, 1  ;;  %v610_v43 = vshrl.u32 %v17659_v25, 16  ;;  %v17722_v4 = vld [vmem:[%s17623_s16 + $0x70] sm:$0xff]   ;;  %v17733_v13 = vld [vmem:[%s17623_s16 + $0x78] sm:$0xff]   ;;  %v1308_v29 = vld [vmem:[%s17623_s16] sm:$0xe] }
  0x8d   : > { %v572_v22 = vor.u32 %v571_v18, %v567_v10  ;;  %v585_v31 = vsel %vm565_vm2, %v580_v23, %v584_v20  ;;  %v604_v38 = vor.u32 %v602_v32, %v600_v35  ;;  %v618_v45 = vshrl.u32 %v17671_v36, 16  ;;  %v17741_v23 = vld [vmem:[%s17623_s16 + $0x80] sm:$0xff]   ;;  %s17299_s20 = scalar_lea.vmem %s20651_s14, 16  ;;  %s17303_s22 = sshll.u32 %s17385_s17, 4  ;;  %s17304_s22 = int_to_ptr.vmem [resolvable:$false] %s17303_s22 }
  0x8e   : > { %v593_v34 = vsel %vm565_vm2, %v588_v27, %v592_v28  ;;  %v601_v42 = vsel %vm565_vm2, %v596_v37, %v600_v35  ;;  %v622_v46 = vshll.u32 %v17677_v40, 16  ;;  %v616_v47 = vrot.slane %v614_v41, 1  ;;  %v1729_v28 = vld [vmem:[#allocation4 + $0xc] sm:$0xf]  ;;  %v17750_v33 = vld [vmem:[#allocation4 + $0x10] sm:$0xf]  ;;  %p17300_p8 = scmp.ne.s32.totalorder %s20651_s14, %s17299_s20  ;;  %p17306_p6 = scmp.lt.s32.totalorder %s20651_s14, %s17304_s22 }
  0x8f   : > { %v577_v30 = vsel %vm565_vm2, %v572_v22, %v576_v19  ;;  %v609_v44 = vsel %vm565_vm2, %v604_v38, %v608_v39  ;;  %v612_v49 = vor.u32 %v610_v43, %v608_v39  ;;  %v626_v53 = vshrl.u32 %v17677_v40, 16  ;;  %16424 = vmatprep.subr.msk.bf16.mxu1 %vm835_vm0, %v1729_v28  ;;  %s17305_s25 = scalar_lea.vmem %s17304_s22, 32 }
  0x90   : > { %15753 = vmatprep.mubr.msk.bf16.mxu0 %vm762_vm1, %v577_v30  ;;  %v620_v51 = vor.u32 %v618_v45, %v616_v47  ;;  %v624_v52 = vrot.slane %v622_v46, 1  ;;  %v630_v54 = vshll.u32 %v17689_v48, 16  ;;  %v638_v57 = vshll.u32 %v17693_v50, 16  ;;  %p17301_p13 = pnand %p17300_p8, %p20767_p11  ;;  %p17307_p9 = scmp.lt.s32.totalorder %s17305_s25, %s17299_s20 }
  0x91   : > { %15754 = vmatmul.mubr.msk.bf16.vlgmr.msra.gmra.mrb[0].mxu0 %vm762_vm1, %v585_v31  ;;  %v617_v56 = vsel %vm565_vm2, %v612_v49, %v616_v47  ;;  %v634_v60 = vshrl.u32 %v17689_v48, 16  ;;  %v646_v1 = vshll.u32 %v17702_v55, 16  ;;  %v654_v3 = vshll.u32 %v17707_v58, 16 }
  0x92   : > { %15852 = vmatpush3.bf16.msra.mxu0 %v1437_v26  ;;  %15757 = vmatprep.mubr.msk.bf16.mxu0 %vm762_vm1, %v593_v34  ;;  %v625_v59 = vsel %vm565_vm2, %v620_v51, %v624_v52  ;;  %v628_v63 = vor.u32 %v626_v53, %v624_v52  ;;  %v632_v0 = vrot.slane %v630_v54, 1  ;;  %v640_v2 = vrot.slane %v638_v57, 1  ;;  %p17302_p1 = pneg %p17301_p13  ;;  %p17308_p5 = por %p17307_p9, %p17306_p6 }
  0x93   : > { %15808 = vmatmul.mubr.msk.bf16.gmra.mrb[4].mxu1 %vm762_vm1, %v17648_v15  ;;  %v662_v8 = vshll.u32 %v17712_v61, 16  ;;  %v670_v10 = vshll.u32 %v17715_v62, 16  ;;  %v642_v11 = vshrl.u32 %v17693_v50, 16  ;;  %v650_v12 = vshrl.u32 %v17702_v55, 16  ;;  %16425 = vmatprep.subr.msk.bf16.mxu0 %vm835_vm0, %v17750_v33 }
  0x94   : > { %15811 = vmatprep.mubr.msk.bf16.mxu1 %vm762_vm1, %v17652_v17  ;;  %v636_v6 = vor.u32 %v634_v60, %v632_v0  ;;  %v633_v14 = vsel %vm565_vm2, %v628_v63, %v632_v0  ;;  %v648_v16 = vrot.slane %v646_v1, 1  ;;  %v658_v18 = vshrl.u32 %v17707_v58, 16  ;;  %p17309_p0 = pnand %p17308_p5, %p17302_p1 }
  0x95   : > { %v656_v19 = vrot.slane %v654_v3, 1  ;;  %v666_v20 = vshrl.u32 %v17712_v61, 16  ;;  %v674_v21 = vshrl.u32 %v17715_v62, 16  ;;  %v678_v22 = vshll.u32 %v17722_v4, 16 }
  0x96   : > { %v641_v24 = vsel %vm565_vm2, %v636_v6, %v640_v2  ;;  %v664_v26 = vrot.slane %v662_v8, 1  ;;  %v17744_v27 = vrot.slane %v670_v10, 1  ;;  %v644_v30 = vor.u32 %v642_v11, %v640_v2 }
  0x97   : > { %v682_v31 = vshrl.u32 %v17722_v4, 16  ;;  %v686_v32 = vshll.u32 %v17733_v13, 16  ;;  %v652_v34 = vor.u32 %v650_v12, %v648_v16  ;;  %v1923_v35 = vsel %vm835_vm0, %v1729_v28, 0 }
  0x98   : > { %v13829_v37 = vcombine.low %v1308_v29, %v17631_v5  ;;  %v1316_v38 = vrot.slane %v17635_v7, 1  ;;  %v17759_v39 = vrot.slane %v678_v22, 1  ;;  %v690_v41 = vshrl.u32 %v17733_v13, 16  ;;  %15902 = vmatpush3.bf16.msra.mxu1 %v1923_v35  ;;  %v17767_v5 = vld [vmem:[%s17623_s16 + $0x88] sm:$0xff]   ;;  %v17848_v22 = vld [vmem:[%s17623_s16 + $0xa0] sm:$0xff]   ;;  %v17870_v35 = vld [vmem:[%s17623_s16 + $0xb0] sm:$0xff]  }
  0x99   : > { %15758 = vmatmul.mubr.msk.bf16.gmra.mrb[4].mxu0 %vm762_vm1, %v601_v42  ;;  %v694_v42 = vshll.u32 %v17741_v23, 16  ;;  %v1318_v43 = vrot.slane %v17639_v9, 1  ;;  %v698_v7 = vshrl.u32 %v17741_v23, 16  ;;  %v1320_v45 = vrot.slane %v17648_v15, 1 }
  0x9a   : > { %15761 = vmatprep.mubr.msk.bf16.mxu0 %vm762_vm1, %v609_v44  ;;  %v1315_v44 = vrot.slane %v13829_v37, 1  ;;  %v1322_v47 = vrot.slane %v17652_v17, 1  ;;  %v1324_v9 = vrot.slane %v17659_v25, 1  ;;  %v17778_v49 = vrot.slane %v686_v32, 1 }
  0x9b   : > { %15812 = vmatmul.mubr.msk.bf16.gmra.mrb[8].mxu1 %vm762_vm1, %v17659_v25  ;;  %v17774_v46 = vsel %vm1314_vm3, %v1316_v38, %v1318_v43  ;;  %v17784_v52 = vsel %vm1314_vm3, %v1318_v43, %v1320_v45  ;;  %v1326_v15 = vrot.slane %v17671_v36, 1  ;;  %v649_v53 = vsel %vm565_vm2, %v644_v30, %v648_v16 }
  0x9c   : > { %15815 = vmatprep.mubr.msk.bf16.mxu1 %vm762_vm1, %v17671_v36  ;;  %v17781_v51 = vsel %vm1314_vm3, %v1315_v44, %v1316_v38  ;;  %v657_v54 = vsel %vm565_vm2, %v652_v34, %v656_v19  ;;  %v17793_v17 = vsel %vm1314_vm3, %v1322_v47, %v1324_v9  ;;  %v702_v25 = vshll.u32 %v17767_v5, 16  ;;  %v17867_v34 = vld [vmem:[%s17623_s16 + $0xa8] sm:$0xff]  }
  0x9d   : > { %v17797_v57 = vsel %vm1314_vm3, %v1324_v9, %v1326_v15  ;;  %v1330_v60 = vrot.slane %v17689_v48, 1  ;;  %v1332_v0 = vrot.slane %v17693_v50, 1  ;;  %v1334_v1 = vrot.slane %v17702_v55, 1  ;;  %v17896_v9 = vld [vmem:[%s17623_s16 + $0xc0] ss:$0 sps:$4 sm:$0x11]  }
  0x9e   : > { %v660_v2 = vor.u32 %v658_v18, %v656_v19  ;;  %v668_v3 = vor.u32 %v666_v20, %v664_v26  ;;  %v1336_v6 = vrot.slane %v17707_v58, 1  ;;  %v1340_v10 = vrot.slane %v17715_v62, 1  ;;  %v17845_v20 = vld [vmem:[%s17623_s16 + $0x98] sm:$0xff]  }
  0x9f   : > { %v1342_v11 = vrot.slane %v17722_v4, 1  ;;  %v1344_v18 = vrot.slane %v17733_v13, 1  ;;  %v1346_v19 = vrot.slane %v17741_v23, 1  ;;  %v1348_v28 = vrot.slane %v17767_v5, 1 }
  0xa0   : > { %v665_v12 = vsel %vm565_vm2, %v660_v2, %v664_v26  ;;  %v676_v30 = vor.u32 %v674_v21, %v17744_v27  ;;  %v684_v32 = vor.u32 %v682_v31, %v17759_v39  ;;  %v1352_v21 = vrot.slane %v17845_v20, 1  ;;  %v17883_v31 = vld [vmem:[%s17623_s16 + $0xb8] sm:$0xff]  }
  0xa1   : > { %15762 = vmatmul.mubr.msk.bf16.gmra.mrb[8].mxu0 %vm762_vm1, %v617_v56  ;;  %v17790_v56 = vsel %vm1314_vm3, %v1320_v45, %v1322_v47  ;;  %v17854_v26 = vsel %vm1314_vm3, %v1344_v18, %v1346_v19  ;;  %v17873_v37 = vsel %vm1314_vm3, %v1346_v19, %v1348_v28  ;;  %v1356_v44 = vrot.slane %v17867_v34, 1 }
  0xa2   : > { %15765 = vmatprep.mubr.msk.bf16.mxu0 %vm762_vm1, %v625_v59  ;;  %v1328_v59 = vrot.slane %v17677_v40, 1  ;;  %v1358_v45 = vrot.slane %v17870_v35, 1  ;;  %v681_v47 = vsel %vm565_vm2, %v676_v30, %v17759_v39  ;;  %v692_v39 = vor.u32 %v690_v41, %v17778_v49 }
  0xa3   : > { %15816 = vmatmul.mubr.msk.bf16.gmra.mrb[12].mxu1 %vm762_vm1, %v17677_v40  ;;  %v17814_v40 = vsel %vm1314_vm3, %v1330_v60, %v1332_v0  ;;  %v734_v19 = vshll.u32 %v17867_v34, 16 }
  0xa4   : > { %15819 = vmatprep.mubr.msk.bf16.mxu1 %vm762_vm1, %v17689_v48  ;;  %v17803_v36 = vsel %vm1314_vm3, %v1326_v15, %v1328_v59  ;;  %v17806_v63 = vsel %vm1314_vm3, %v1328_v59, %v1330_v60  ;;  %v17817_v48 = vsel %vm1314_vm3, %v1332_v0, %v1334_v1  ;;  %v1360_v60 = vrot.slane %v17883_v31, 1 }
  0xa5   : > { %v704_v0 = vrot.slane %v702_v25, 1 }
  0xa6   : > { %v17922_v2 = vsel %vm1314_vm3, %v1358_v45, %v1360_v60 }
  0xa9   : > { %15766 = vmatmul.mubr.msk.bf16.gmra.mrb[12].mxu0 %vm762_vm1, %v633_v14  ;;  %v16535_v14 = vld [vmem:[%s17623_s16 + $0x90] sm:$0xff]  }
  0xaa   : > { %15769 = vmatprep.mubr.msk.bf16.mxu0 %vm762_vm1, %v641_v24  ;;  %v17851_v24 = vsel %vm1314_vm3, %v1342_v11, %v1344_v18  ;;  %v1350_v29 = vrot.slane %v16535_v14, 1  ;;  %v710_v59 = vshll.u32 %v16535_v14, 16  ;;  %v714_v25 = vshrl.u32 %v16535_v14, 16 }
  0xab   : > { %15820 = vmatmul.mubr.msk.bf16.gmra.mrb[16].mxu1 %vm762_vm1, %v17693_v50  ;;  %v1338_v50 = vrot.slane %v17712_v61, 1  ;;  %v722_v18 = vshrl.u32 %v17845_v20, 16 }
  0xac   : > { %15823 = vmatprep.mubr.msk.bf16.mxu1 %vm762_vm1, %v17702_v55  ;;  %v17824_v55 = vsel %vm1314_vm3, %v1334_v1, %v1336_v6  ;;  %v17876_v38 = vsel %vm1314_vm3, %v1348_v28, %v1350_v29  ;;  %v1362_v1 = vrot.slane %v17896_v9, 1 }
  0xad   : > { %v17827_v8 = vsel %vm1314_vm3, %v1336_v6, %v1338_v50  ;;  %v17836_v16 = vsel %vm1314_vm3, %v1338_v50, %v1340_v10  ;;  %v718_v6 = vshll.u32 %v17845_v20, 16  ;;  %v2854_v50 = vld [vmem:[#allocation4 + $0x14] sm:$0xf] }
  0xae   : > { %16426 = vmatprep.subr.msk.bf16.mxu1 %vm835_vm0, %v2854_v50 }
  0xb1   : > { %15770 = vmatmul.mubr.msk.bf16.gmra.mrb[16].mxu0 %vm762_vm1, %v649_v53  ;;  %v17904_v53 = vsel %vm1314_vm3, %v1356_v44, %v1358_v45  ;;  %v750_v45 = vshll.u32 %v17883_v31, 16 }
  0xb2   : > { %15773 = vmatprep.mubr.msk.bf16.mxu0 %vm762_vm1, %v657_v54  ;;  %v696_v54 = vrot.slane %v694_v42, 1 }
  0xb3   : > { %15824 = vmatmul.mubr.msk.bf16.gmra.mrb[20].mxu1 %vm762_vm1, %v17707_v58  ;;  %v673_v58 = vsel %vm565_vm2, %v668_v3, %v17744_v27  ;;  %v1354_v27 = vrot.slane %v17848_v22, 1  ;;  %v17927_v3 = vsel %vm1314_vm3, %v1360_v60, %v1362_v1 }
  0xb4   : > { %15827 = vmatprep.mubr.msk.bf16.mxu1 %vm762_vm1, %v17712_v61  ;;  %v17839_v61 = vsel %vm1314_vm3, %v1340_v10, %v1342_v11  ;;  %v700_v42 = vor.u32 %v698_v7, %v696_v54  ;;  %v697_v41 = vsel %vm565_vm2, %v692_v39, %v696_v54  ;;  %v712_v7 = vrot.slane %v710_v59, 1 }
  0xb5   : > { %v17889_v43 = vsel %vm1314_vm3, %v1352_v21, %v1354_v27  ;;  %v17901_v15 = vsel %vm1314_vm3, %v1354_v27, %v1356_v44  ;;  %v720_v11 = vrot.slane %v718_v6, 1  ;;  %v738_v44 = vshrl.u32 %v17867_v34, 16 }
  0xb6   : > { %v754_v39 = vshrl.u32 %v17883_v31, 16  ;;  %v2609_v6 = vsel %vm835_vm0, %v17750_v33, 0  ;;  %v16548_v33 = vld [vmem:[%s17623_s16 + $0x34] sm:$0xff]  }
  0xb9   : > { %15774 = vmatmul.mubr.msk.bf16.gmra.mrb[20].mxu0 %vm762_vm1, %v665_v12  ;;  %v726_v12 = vshll.u32 %v17848_v22, 16 }
  0xba   : > { %15777 = vmatprep.mubr.msk.bf16.mxu0 %vm762_vm1, %v673_v58 }
  0xbb   : > { %15828 = vmatmul.mubr.msk.bf16.gmra.mrb[24].mxu1 %vm762_vm1, %v17715_v62  ;;  %v17886_v62 = vsel %vm1314_vm3, %v1350_v29, %v1352_v21  ;;  %v730_v29 = vshrl.u32 %v17848_v22, 16  ;;  %v728_v30 = vrot.slane %v726_v12, 1  ;;  %v742_v21 = vshll.u32 %v17870_v35, 16  ;;  %v2852_v12 = vld [vmem:[%s17623_s16 + $0xc] sm:$0xe] }
  0xbc   : > { %15831 = vmatprep.mubr.msk.bf16.mxu1 %vm762_vm1, %v17722_v4  ;;  %v689_v4 = vsel %vm565_vm2, %v684_v32, %v17778_v49  ;;  %v706_v49 = vshrl.u32 %v17767_v5, 16  ;;  %v736_v32 = vrot.slane %v734_v19, 1 }
  0xbe   : > { %v708_v10 = vor.u32 %v706_v49, %v704_v0  ;;  %v740_v54 = vor.u32 %v738_v44, %v736_v32  ;;  %v16544_v49 = vld [vmem:[%s17623_s16 + $0x14] sm:$0xff]   ;;  %v16572_v44 = vld [vmem:[%s17623_s16 + $0x2c] sm:$0xff]  }
  0xc0   : > { %v713_v58 = vsel %vm565_vm2, %v708_v10, %v712_v7  ;;  %v2166_v10 = vld [vmem:[%s17623_s16 + $0xc] sm:$0xf] }
  0xc1   : > { %15778 = vmatmul.mubr.msk.bf16.gmra.mrb[24].mxu0 %vm762_vm1, %v681_v47 }
  0xc2   : > { %15781 = vmatprep.mubr.msk.bf16.mxu0 %vm762_vm1, %v689_v4  ;;  %v746_v4 = vshrl.u32 %v17870_v35, 16 }
  0xc3   : > { %15832 = vmatmul.mubr.msk.bf16.gmra.mrb[28].mxu1 %vm762_vm1, %v17733_v13  ;;  %v705_v13 = vsel %vm565_vm2, %v700_v42, %v704_v0  ;;  %v758_v0 = vshll.u32 %v17896_v9, 16  ;;  %v16543_v42 = vld [vmem:[%s17623_s16 + $0xc] sm:$0xff]   ;;  %v16545_v9 = vld [vmem:[%s17623_s16 + $0x1c] sm:$0xff]  }
  0xc4   : > { %15835 = vmatprep.mubr.msk.bf16.mxu1 %vm762_vm1, %v17741_v23  ;;  %v716_v23 = vor.u32 %v714_v25, %v712_v7  ;;  %v2980_v25 = vsel %vm835_vm0, %v2854_v50, 0  ;;  %v17986_v7 = vld [vmem:[#allocation4 + $0x18] sm:$0xf]  ;;  %v16563_v50 = vld [vmem:[%s17623_s16 + $0xac] sm:$0xff]  }
  0xc6   : > { %v721_v28 = vsel %vm565_vm2, %v716_v23, %v720_v11  ;;  %v16568_v23 = vld [vmem:[%s17623_s16 + $0x14] sm:$0xff]  }
  0xc9   : > { %15782 = vmatmul.mubr.msk.bf16.gmra.mrb[28].mxu0 %vm762_vm1, %v697_v41  ;;  %v760_v41 = vrot.slane %v758_v0, 1 }
  0xca   : > { %15785 = vmatprep.mubr.msk.bf16.mxu0 %vm762_vm1, %v705_v13  ;;  %v16547_v13 = vld [vmem:[%s17623_s16 + $0x2c] sm:$0xff]  }
  0xcb   : > { %15836 = vmatmul.mubr.msk.bf16.gmra.mrb[32].mxu1 %vm762_vm1, %v17767_v5  ;;  %v724_v5 = vor.u32 %v722_v18, %v720_v11  ;;  %v16569_v11 = vld [vmem:[%s17623_s16 + $0x1c] sm:$0xff]  }
  0xcc   : > { %15839 = vmatprep.mubr.msk.bf16.mxu1 %vm762_vm1, %v16535_v14  ;;  %v732_v14 = vor.u32 %v730_v29, %v728_v30  ;;  %v16565_v18 = vld [vmem:[%s17623_s16 + $0xbc] sm:$0xff]  }
  0xcd   : > { %v729_v27 = vsel %vm565_vm2, %v724_v5, %v728_v30  ;;  %v18075_v30 = vld [vmem:[%s17623_s16 + $0x24] sm:$0xff]  }
  0xce   : > { %v737_v47 = vsel %vm565_vm2, %v732_v14, %v736_v32  ;;  %v16566_v5 = vld [vmem:[%s17623_s16 + $0xc4] sm:$0xff]   ;;  %v2859_v14 = vrot.slane %v16568_v23, 1  ;;  %v2368_v0 = vshrl.u32 %v18075_v30, 16 }
  0xd1   : > { %15786 = vmatmul.mubr.msk.bf16.gmra.mrb[32].mxu0 %vm762_vm1, %v713_v58  ;;  %v16564_v58 = vld [vmem:[%s17623_s16 + $0xb4] sm:$0xff]  }
  0xd2   : > { %15789 = vmatprep.mubr.msk.bf16.mxu0 %vm762_vm1, %v721_v28  ;;  %v2356_v28 = vshll.u32 %v16569_v11, 16 }
  0xd3   : > { %15840 = vmatmul.mubr.msk.bf16.gmra.mrb[36].mxu1 %vm762_vm1, %v17845_v20  ;;  %v744_v20 = vrot.slane %v742_v21, 1 }
  0xd4   : > { %15843 = vmatprep.mubr.msk.bf16.mxu1 %vm762_vm1, %v17848_v22  ;;  %v752_v22 = vrot.slane %v750_v45, 1  ;;  %v2358_v45 = vrot.slane %v2356_v28, 1  ;;  %v18151_v28 = vld [vmem:[%s17623_s16 + $0x6c] sm:$0xff]  }
  0xd5   : > { %v748_v59 = vor.u32 %v746_v4, %v744_v20  ;;  %v745_v60 = vsel %vm565_vm2, %v740_v54, %v744_v20  ;;  %v2364_v4 = vshll.u32 %v18075_v30, 16  ;;  %v2372_v54 = vshll.u32 %v16572_v44, 16 }
  0xd7   : > { %v753_v1 = vsel %vm565_vm2, %v748_v59, %v752_v22 }
  0xd9   : > { %15790 = vmatmul.mubr.msk.bf16.gmra.mrb[36].mxu0 %vm762_vm1, %v729_v27 }
  0xda   : > { %15793 = vmatprep.mubr.msk.bf16.mxu0 %vm762_vm1, %v737_v47  ;;  %v3466_v47 = vsel %vm835_vm0, %v17986_v7, 0 }
  0xdb   : > { %15844 = vmatmul.mubr.msk.bf16.gmra.mrb[40].mxu1 %vm762_vm1, %v17867_v34  ;;  %v756_v34 = vor.u32 %v754_v39, %v752_v22  ;;  %v18088_v22 = vld [vmem:[%s17623_s16 + $0x34] sm:$0xff]   ;;  %v18093_v39 = vld [vmem:[%s17623_s16 + $0x3c] sm:$0xff]  }
  0xdc   : > { %15847 = vmatprep.mubr.msk.bf16.mxu1 %vm762_vm1, %v17870_v35 }
  0xdd   : > { %v761_v35 = vsel %vm565_vm2, %v756_v34, %v760_v41  ;;  %v2865_v34 = vrot.slane %v16572_v44, 1 }
  0xe1   : > { %15794 = vmatmul.mubr.msk.bf16.gmra.mrb[40].mxu0 %vm762_vm1, %v745_v60  ;;  %v2360_v60 = vshrl.u32 %v16569_v11, 16 }
  0xe2   : > { %15797 = vmatprep.mubr.msk.bf16.mxu0 %vm762_vm1, %v753_v1  ;;  %v2366_v1 = vrot.slane %v2364_v4, 1 }
  0xe3   : > { %15848 = vmatmul.mubr.msk.bf16.gmra.mrb[44].mxu1 %vm762_vm1, %v17883_v31  ;;  %v16546_v31 = vld [vmem:[%s17623_s16 + $0x24] sm:$0xff]  }
  0xe4   : > { %15903 = vmatprep.mubr.msk.bf16.mxu1 %vm762_vm1, %v16543_v42  ;;  %v2374_v42 = vrot.slane %v2372_v54, 1 }
  0xe9   : > { %15798 = vmatmul.mubr.msk.bf16.gmra.mrb[44].mxu0 %vm762_vm1, %v761_v35  ;;  %v2376_v35 = vshrl.u32 %v16572_v44, 16  ;;  %v2436_v44 = vshll.u32 %v18151_v28, 16 }
  0xea   : > { %15853 = vmatprep.mubr.msk.bf16.mxu0 %vm762_vm1, %v17781_v51  ;;  %v16549_v51 = vld [vmem:[%s17623_s16 + $0x3c] sm:$0xff]  }
  0xeb   : > { %15904 = vmatmul.mubr.msk.bf16.vlgmr.msra.gmra.mrb[48].mxu1 %vm762_vm1, %v16544_v49  ;;  %v2380_v49 = vshll.u32 %v18088_v22, 16 }
  0xec   : > { %15907 = vmatprep.mubr.msk.bf16.mxu1 %vm762_vm1, %v16545_v9  ;;  %16002 = vmatpush3.bf16.msra.mxu1 %v2980_v25  ;;  %v2388_v25 = vshll.u32 %v18093_v39, 16 }
  0xf1   : > { %15854 = vmatmul.mubr.msk.bf16.vlgmr.msra.gmra.mrb[48].mxu0 %vm762_vm1, %v17774_v46  ;;  %v16550_v46 = vld [vmem:[%s17623_s16 + $0x44] sm:$0xff]  }
  0xf2   : > { %15952 = vmatpush3.bf16.msra.mxu0 %v2609_v6  ;;  %15857 = vmatprep.mubr.msk.bf16.mxu0 %vm762_vm1, %v17784_v52  ;;  %v16551_v52 = vld [vmem:[%s17623_s16 + $0x4c] sm:$0xff]  }
  0xf3   : > { %15908 = vmatmul.mubr.msk.bf16.gmra.mrb[52].mxu1 %vm762_vm1, %v16546_v31  ;;  %16427 = vmatprep.subr.msk.bf16.mxu0 %vm835_vm0, %v17986_v7 }
  0xf4   : > { %15911 = vmatprep.mubr.msk.bf16.mxu1 %vm762_vm1, %v16547_v13 }
  0xf9   : > { %15858 = vmatmul.mubr.msk.bf16.gmra.mrb[52].mxu0 %vm762_vm1, %v17790_v56  ;;  %v16552_v56 = vld [vmem:[%s17623_s16 + $0x54] sm:$0xff]  }
  0xfa   : > { %15861 = vmatprep.mubr.msk.bf16.mxu0 %vm762_vm1, %v17793_v17  ;;  %v16553_v17 = vld [vmem:[%s17623_s16 + $0x5c] sm:$0xff]  }
  0xfb   : > { %15912 = vmatmul.mubr.msk.bf16.gmra.mrb[56].mxu1 %vm762_vm1, %v16548_v33  ;;  %v18111_v33 = vld [vmem:[%s17623_s16 + $0x4c] sm:$0xff]  }
  0xfc   : > { %15915 = vmatprep.mubr.msk.bf16.mxu1 %vm762_vm1, %v16549_v51  ;;  %v2362_v51 = vor.u32 %v2360_v60, %v2358_v45 }
 0x101   : > { %15862 = vmatmul.mubr.msk.bf16.gmra.mrb[56].mxu0 %vm762_vm1, %v17797_v57  ;;  %v16554_v57 = vld [vmem:[%s17623_s16 + $0x64] sm:$0xff]  }
 0x102   : > { %15865 = vmatprep.mubr.msk.bf16.mxu0 %vm762_vm1, %v17803_v36  ;;  %v16555_v36 = vld [vmem:[%s17623_s16 + $0x6c] sm:$0xff]  }
 0x103   : > { %15916 = vmatmul.mubr.msk.bf16.gmra.mrb[60].mxu1 %vm762_vm1, %v16550_v46  ;;  %v2382_v46 = vrot.slane %v2380_v49, 1  ;;  %v18186_v49 = vld [vmem:[%s17623_s16 + $0x84] sm:$0xff]  }
 0x104   : > { %15919 = vmatprep.mubr.msk.bf16.mxu1 %vm762_vm1, %v16551_v52  ;;  %v2384_v52 = vshrl.u32 %v18088_v22, 16 }
 0x109   : > { %15866 = vmatmul.mubr.msk.bf16.gmra.mrb[60].mxu0 %vm762_vm1, %v17806_v63  ;;  %v16556_v63 = vld [vmem:[%s17623_s16 + $0x74] sm:$0xff]  }
 0x10a   : > { %15869 = vmatprep.mubr.msk.bf16.mxu0 %vm762_vm1, %v17814_v40  ;;  %v16557_v40 = vld [vmem:[%s17623_s16 + $0x7c] sm:$0xff]  }
 0x10b   : > { %15920 = vmatmul.mubr.msk.bf16.gmra.mrb[64].mxu1 %vm762_vm1, %v16552_v56  ;;  %v2867_v56 = vrot.slane %v18088_v22, 1 }
 0x10c   : > { %15923 = vmatprep.mubr.msk.bf16.mxu1 %vm762_vm1, %v16553_v17 }
 0x111   : > { %15870 = vmatmul.mubr.msk.bf16.gmra.mrb[64].mxu0 %vm762_vm1, %v17817_v48  ;;  %v16558_v48 = vld [vmem:[%s17623_s16 + $0x84] sm:$0xff]  }
 0x112   : > { %15873 = vmatprep.mubr.msk.bf16.mxu0 %vm762_vm1, %v17824_v55  ;;  %v16559_v55 = vld [vmem:[%s17623_s16 + $0x8c] sm:$0xff]  }
 0x113   : > { %15924 = vmatmul.mubr.msk.bf16.gmra.mrb[68].mxu1 %vm762_vm1, %v16554_v57  ;;  %v2869_v57 = vrot.slane %v18093_v39, 1 }
 0x114   : > { %15927 = vmatprep.mubr.msk.bf16.mxu1 %vm762_vm1, %v16555_v36  ;;  %v2392_v36 = vshrl.u32 %v18093_v39, 16  ;;  %v18175_v39 = vrot.slane %v2436_v44, 1 }
 0x119   : > { %15874 = vmatmul.mubr.msk.bf16.gmra.mrb[68].mxu0 %vm762_vm1, %v17827_v8  ;;  %v16560_v8 = vld [vmem:[%s17623_s16 + $0x94] sm:$0xff]  }
 0x11a   : > { %15877 = vmatprep.mubr.msk.bf16.mxu0 %vm762_vm1, %v17836_v16  ;;  %v16561_v16 = vld [vmem:[%s17623_s16 + $0x9c] sm:$0xff]  }
 0x11b   : > { %15928 = vmatmul.mubr.msk.bf16.gmra.mrb[72].mxu1 %vm762_vm1, %v16556_v63  ;;  %v18121_v63 = vld [vmem:[%s17623_s16 + $0x54] sm:$0xff]  }
 0x11c   : > { %15931 = vmatprep.mubr.msk.bf16.mxu1 %vm762_vm1, %v16557_v40  ;;  %v18124_v40 = vld [vmem:[%s17623_s16 + $0x5c] sm:$0xff]  }
 0x11d   : > { %v2424_v4 = vshrl.u32 %v18124_v40, 16 }
 0x121   : > { %15878 = vmatmul.mubr.msk.bf16.gmra.mrb[72].mxu0 %vm762_vm1, %v17839_v61  ;;  %v3759_v61 = vld [vmem:[#allocation4 + $0x1c] sm:$0xf] }
 0x122   : > { %15881 = vmatprep.mubr.msk.bf16.mxu0 %vm762_vm1, %v17851_v24  ;;  %v16562_v24 = vld [vmem:[%s17623_s16 + $0xa4] sm:$0xff]   ;;  %16428 = vmatprep.subr.msk.bf16.mxu1 %vm835_vm0, %v3759_v61  ;;  %v4152_v31 = vsel %vm835_vm0, %v3759_v61, 0  ;;  %v18129_v61 = vld [vmem:[#allocation4 + $0x20] sm:$0xf] }
 0x123   : > { %15932 = vmatmul.mubr.msk.bf16.gmra.mrb[76].mxu1 %vm762_vm1, %v16558_v48  ;;  %v2367_v48 = vsel %vm565_vm2, %v2362_v51, %v2366_v1 }
 0x124   : > { %15935 = vmatprep.mubr.msk.bf16.mxu1 %vm762_vm1, %v16559_v55 }
 0x129   : > { %15882 = vmatmul.mubr.msk.bf16.gmra.mrb[76].mxu0 %vm762_vm1, %v17854_v26  ;;  %v2167_v26 = vld [vmem:[%s17623_s16 + $0x10] sm:$0xf] }
 0x12a   : > { %15885 = vmatprep.mubr.msk.bf16.mxu0 %vm762_vm1, %v17873_v37  ;;  %v13902_v37 = vcombine.low %v2166_v10, %v2167_v26  ;;  %v2412_v10 = vshll.u32 %v18121_v63, 16 }
 0x12b   : > { %15936 = vmatmul.mubr.msk.bf16.gmra.mrb[80].mxu1 %vm762_vm1, %v16560_v8  ;;  %v2404_v8 = vshll.u32 %v18111_v33, 16 }
 0x12c   : > { %15939 = vmatprep.mubr.msk.bf16.mxu1 %vm762_vm1, %v16561_v16  ;;  %v2343_v19 = vshll.u32 %v13902_v37, 16  ;;  %v2341_v29 = vshrl.u32 %v13902_v37, 16  ;;  %v2378_v37 = vor.u32 %v2376_v35, %v2374_v42 }
 0x12e   : > { %v2345_v21 = vrot.slane %v2343_v19, 1  ;;  %v2873_v19 = vrot.slane %v18111_v33, 1 }
 0x130   : > { %v2346_v59 = vor.u32 %v2345_v21, %v2341_v29  ;;  %v2383_v29 = vsel %vm565_vm2, %v2378_v37, %v2382_v46 }
 0x131   : > { %15886 = vmatmul.mubr.msk.bf16.gmra.mrb[80].mxu0 %vm762_vm1, %v17876_v38  ;;  %v13951_v38 = vcombine.low %v2852_v12, %v2167_v26  ;;  %v2420_v26 = vshll.u32 %v18124_v40, 16  ;;  %v2406_v12 = vrot.slane %v2404_v8, 1  ;;  %v18212_v8 = vld [vmem:[%s17623_s16 + $0x9c] sm:$0xff]  }
 0x132   : > { %15889 = vmatprep.mubr.msk.bf16.mxu0 %vm762_vm1, %v17886_v62  ;;  %v2348_v62 = vshll.u32 %v16568_v23, 16 }
 0x133   : > { %15940 = vmatmul.mubr.msk.bf16.gmra.mrb[84].mxu1 %vm762_vm1, %v16562_v24  ;;  %v2858_v32 = vrot.slane %v13951_v38, 1  ;;  %v2868_v24 = vsel %vm1314_vm3, %v2865_v34, %v2867_v56  ;;  %v2408_v38 = vshrl.u32 %v18111_v33, 16 }
 0x134   : > { %15943 = vmatprep.mubr.msk.bf16.mxu1 %vm762_vm1, %v16563_v50  ;;  %v2350_v27 = vrot.slane %v2348_v62, 1  ;;  %v2370_v50 = vor.u32 %v2368_v0, %v2366_v1  ;;  %v18148_v62 = vrot.slane %v2412_v10, 1  ;;  %v18180_v1 = vld [vmem:[%s17623_s16 + $0x7c] sm:$0xff]  }
 0x135   : > { %v2860_v20 = vsel %vm1314_vm3, %v2858_v32, %v2859_v14  ;;  %v2870_v32 = vsel %vm1314_vm3, %v2867_v56, %v2869_v57  ;;  %v2456_v37 = vshrl.u32 %v18180_v1, 16 }
 0x136   : > { %v2351_v41 = vsel %vm565_vm2, %v2346_v59, %v2350_v27 }
 0x139   : > { %15890 = vmatmul.mubr.msk.bf16.gmra.mrb[84].mxu0 %vm762_vm1, %v17889_v43  ;;  %v2352_v43 = vshrl.u32 %v16568_v23, 16 }
 0x13a   : > { %15893 = vmatprep.mubr.msk.bf16.mxu0 %vm762_vm1, %v17901_v15  ;;  %v2861_v15 = vrot.slane %v16569_v11, 1  ;;  %v18142_v11 = vld [vmem:[%s17623_s16 + $0x64] sm:$0xff]  }
 0x13b   : > { %15944 = vmatmul.mubr.msk.bf16.gmra.mrb[88].mxu1 %vm762_vm1, %v16564_v58  ;;  %v2354_v13 = vor.u32 %v2352_v43, %v2350_v27  ;;  %v2428_v21 = vshll.u32 %v18142_v11, 16  ;;  %v2386_v27 = vor.u32 %v2384_v52, %v2382_v46  ;;  %v2432_v60 = vshrl.u32 %v18142_v11, 16  ;;  %v18199_v46 = vld [vmem:[%s17623_s16 + $0x8c] sm:$0xff]  }
 0x13c   : > { %15947 = vmatprep.mubr.msk.bf16.mxu1 %vm762_vm1, %v16565_v18  ;;  %v2862_v9 = vsel %vm1314_vm3, %v2859_v14, %v2861_v15  ;;  %v2375_v18 = vsel %vm565_vm2, %v2370_v50, %v2374_v42  ;;  %v2875_v14 = vrot.slane %v18121_v63, 1  ;;  %v2879_v0 = vrot.slane %v18142_v11, 1 }
 0x13d   : > { %v2359_v17 = vsel %vm565_vm2, %v2354_v13, %v2358_v45  ;;  %v18165_v45 = vld [vmem:[%s17623_s16 + $0x74] sm:$0xff]   ;;  %v18172_v22 = vrot.slane %v2428_v21, 1  ;;  %v2410_v13 = vor.u32 %v2408_v38, %v2406_v12  ;;  %v2484_v21 = vshll.u32 %v18212_v8, 16 }
 0x13e   : > { %v2448_v51 = vshrl.u32 %v18165_v45, 16 }
 0x13f   : > { %v2415_v10 = vsel %vm565_vm2, %v2410_v13, %v18148_v62  ;;  %v18264_v13 = vrot.slane %v2484_v21, 1 }
 0x141   : > { %15894 = vmatmul.mubr.msk.bf16.gmra.mrb[88].mxu0 %vm762_vm1, %v17904_v53  ;;  %v2863_v53 = vrot.slane %v18075_v30, 1  ;;  %v2416_v30 = vshrl.u32 %v18121_v63, 16 }
 0x142   : > { %15897 = vmatprep.mubr.msk.bf16.mxu0 %vm762_vm1, %v17922_v2  ;;  %v18098_v2 = vld [vmem:[%s17623_s16 + $0x44] sm:$0xff]  }
 0x143   : > { %15948 = vmatmul.mubr.msk.bf16.gmra.mrb[92].mxu1 %vm762_vm1, %v16566_v5  ;;  %v2864_v6 = vsel %vm1314_vm3, %v2861_v15, %v2863_v53  ;;  %v2396_v7 = vshll.u32 %v18098_v2, 16  ;;  %v2866_v16 = vsel %vm1314_vm3, %v2863_v53, %v2865_v34  ;;  %v2400_v23 = vshrl.u32 %v18098_v2, 16 }
 0x144   : > { %16003 = vmatprep.mubr.msk.bf16.mxu1 %vm762_vm1, %v2860_v20  ;;  %v2871_v58 = vrot.slane %v18098_v2, 1  ;;  %v18155_v5 = vrot.slane %v2420_v26, 1  ;;  %v2881_v53 = vrot.slane %v18151_v28, 1  ;;  %v2444_v2 = vshll.u32 %v18165_v45, 16 }
 0x145   : > { %v2398_v55 = vrot.slane %v2396_v7, 1  ;;  %v2885_v26 = vrot.slane %v18180_v1, 1 }
 0x146   : > { %v2872_v43 = vsel %vm1314_vm3, %v2869_v57, %v2871_v58  ;;  %v2874_v35 = vsel %vm1314_vm3, %v2871_v58, %v2873_v19  ;;  %v18195_v33 = vrot.slane %v2444_v2, 1 }
 0x149   : > { %15898 = vmatmul.mubr.msk.bf16.gmra.mrb[92].mxu0 %vm762_vm1, %v17927_v3  ;;  %v2390_v3 = vrot.slane %v2388_v25, 1  ;;  %v2402_v25 = vor.u32 %v2400_v23, %v2398_v55 }
 0x14a   : > { %15953 = vmatprep.mubr.msk.bf16.mxu0 %vm762_vm1, %v2351_v41 }
 0x14b   : > { %16004 = vmatmul.mubr.msk.bf16.vlgmr.msra.gmra.mrb[96].mxu1 %vm762_vm1, %v2862_v9  ;;  %v2394_v15 = vor.u32 %v2392_v36, %v2390_v3  ;;  %v2391_v20 = vsel %vm565_vm2, %v2386_v27, %v2390_v3  ;;  %v2876_v9 = vsel %vm1314_vm3, %v2873_v19, %v2875_v14  ;;  %v2460_v3 = vshll.u32 %v18186_v49, 16 }
 0x14c   : > { %16007 = vmatprep.mubr.msk.bf16.mxu1 %vm762_vm1, %v2864_v6  ;;  %16102 = vmatpush3.bf16.msra.mxu1 %v4152_v31  ;;  %v2440_v31 = vshrl.u32 %v18151_v28, 16  ;;  %v2452_v6 = vshll.u32 %v18180_v1, 16  ;;  %v2407_v57 = vsel %vm565_vm2, %v2402_v25, %v2406_v12  ;;  %v2418_v19 = vor.u32 %v2416_v30, %v18148_v62 }
 0x14d   : > { %v2399_v34 = vsel %vm565_vm2, %v2394_v15, %v2398_v55  ;;  %v18209_v55 = vld [vmem:[%s17623_s16 + $0x94] sm:$0xff]   ;;  %v2426_v27 = vor.u32 %v2424_v4, %v18155_v5  ;;  %v2464_v62 = vshrl.u32 %v18186_v49, 16 }
 0x14e   : > { %v2442_v11 = vor.u32 %v2440_v31, %v18175_v39 }
 0x151   : > { %15954 = vmatmul.mubr.msk.bf16.vlgmr.msra.gmra.mrb[96].mxu0 %vm762_vm1, %v2359_v17 }
 0x152   : > { %16052 = vmatpush3.bf16.msra.mxu0 %v3466_v47  ;;  %15957 = vmatprep.mubr.msk.bf16.mxu0 %vm762_vm1, %v2367_v48  ;;  %v2877_v47 = vrot.slane %v18124_v40, 1  ;;  %v18205_v40 = vrot.slane %v2452_v6, 1  ;;  %v2883_v48 = vrot.slane %v18165_v45, 1  ;;  %v2480_v6 = vshrl.u32 %v18209_v55, 16 }
 0x153   : > { %16008 = vmatmul.mubr.msk.bf16.gmra.mrb[100].mxu1 %vm762_vm1, %v2866_v16  ;;  %16429 = vmatprep.subr.msk.bf16.mxu0 %vm835_vm0, %v18129_v61 }
 0x154   : > { %16011 = vmatprep.mubr.msk.bf16.mxu1 %vm762_vm1, %v2868_v24  ;;  %v2878_v58 = vsel %vm1314_vm3, %v2875_v14, %v2877_v47  ;;  %v2476_v14 = vshll.u32 %v18209_v55, 16  ;;  %v2458_v45 = vor.u32 %v2456_v37, %v18205_v40 }
 0x156   : > { %v18254_v2 = vrot.slane %v2476_v14, 1 }
 0x159   : > { %15958 = vmatmul.mubr.msk.bf16.gmra.mrb[100].mxu0 %vm762_vm1, %v2375_v18  ;;  %v2468_v18 = vshll.u32 %v18199_v46, 16 }
 0x15a   : > { %15961 = vmatprep.mubr.msk.bf16.mxu0 %vm762_vm1, %v2383_v29  ;;  %v2880_v29 = vsel %vm1314_vm3, %v2877_v47, %v2879_v0  ;;  %v2423_v47 = vsel %vm565_vm2, %v2418_v19, %v18155_v5  ;;  %v2431_v5 = vsel %vm565_vm2, %v2426_v27, %v18172_v22 }
 0x15b   : > { %16012 = vmatmul.mubr.msk.bf16.gmra.mrb[104].mxu1 %vm762_vm1, %v2870_v32  ;;  %v18231_v32 = vrot.slane %v2460_v3, 1  ;;  %v18240_v30 = vrot.slane %v2468_v18, 1  ;;  %v2891_v3 = vrot.slane %v18209_v55, 1 }
 0x15c   : > { %16015 = vmatprep.mubr.msk.bf16.mxu1 %vm762_vm1, %v2872_v43  ;;  %v2887_v43 = vrot.slane %v18186_v49, 1 }
 0x15d   : > { %v15805_v54 = vpop.f32.mrb[0].mxu1 }
 0x15e   : > { %v1133_v59 = vpop.f32.mrb[1].mxu1 }
 0x15f   : > { %v15806_v42 = vpop.f32.mrb[2].mxu1 }
 0x160   : > { %v1136_v41 = vpop.f32.mrb[3].mxu1 }
 0x161   : > { %15962 = vmatmul.mubr.msk.bf16.gmra.mrb[104].mxu0 %vm762_vm1, %v2391_v20  ;;  %v18248_v20 = vld [vmem:[%s17623_s16 + $0xa4] sm:$0xff]  }
 0x162   : > { %15965 = vmatprep.mubr.msk.bf16.mxu0 %vm762_vm1, %v2399_v34  ;;  %v2472_v34 = vshrl.u32 %v18199_v46, 16  ;;  %v2496_v31 = vshrl.u32 %v18248_v20, 16  ;;  %v2895_v14 = vrot.slane %v18248_v20, 1 }
 0x163   : > { %16016 = vmatmul.mubr.msk.bf16.gmra.mrb[108].mxu1 %vm762_vm1, %v2874_v35 }
 0x164   : > { %v15755_v7 = vpop.f32.mrb[0].mxu0  ;;  %16019 = vmatprep.mubr.msk.bf16.mxu1 %vm762_vm1, %v2876_v9  ;;  %v2474_v49 = vor.u32 %v2472_v34, %v18240_v30 }
 0x165   : > { %v873_v52 = vpop.f32.mrb[1].mxu0 }
 0x166   : > { %v18202_v56 = vadd.f32 %v1133_v59, %v873_v52  ;;  %v15756_v17 = vpop.f32.mrb[2].mxu0  ;;  %v15809_v36 = vpop.f32.mrb[4].mxu1  ;;  %v2882_v52 = vsel %vm1314_vm3, %v2879_v0, %v2881_v53 }
 0x167   : > { %v18214_v16 = vadd.f32 %v15806_v42, %v15756_v17  ;;  %v876_v24 = vpop.f32.mrb[3].mxu0  ;;  %v1148_v50 = vpop.f32.mrb[5].mxu1  ;;  %v2889_v42 = vrot.slane %v18199_v46, 1  ;;  %v18405_v46 = vld [vmem:[%s17623_s16 + $0x30] sm:$0xff]  }
 0x168   : > { %v18220_v23 = vadd.f32 %v1136_v41, %v876_v24  ;;  %v15810_v12 = vpop.f32.mrb[6].mxu1  ;;  %v18257_v41 = vld [vmem:[%s17623_s16 + $0xac] sm:$0xff]   ;;  %v2492_v24 = vshll.u32 %v18248_v20, 16 }
 0x169   : > { %15966 = vmatmul.mubr.msk.bf16.gmra.mrb[108].mxu0 %vm762_vm1, %v2407_v57  ;;  %v1151_v38 = vpop.f32.mrb[7].mxu1  ;;  %v2434_v57 = vor.u32 %v2432_v60, %v18172_v22  ;;  %v2500_v0 = vshll.u32 %v18257_v41, 16  ;;  %v2893_v60 = vrot.slane %v18212_v8, 1  ;;  %v2897_v21 = vrot.slane %v18257_v41, 1 }
 0x16a   : > { %15969 = vmatprep.mubr.msk.bf16.mxu0 %vm762_vm1, %v2415_v10  ;;  %v18295_v10 = vld [vmem:[%s17623_s16 + $0xbc] sm:$0xff]   ;;  %v18301_v19 = vrot.slane %v2492_v24, 1 }
 0x16b   : > { %16020 = vmatmul.mubr.msk.bf16.gmra.mrb[112].mxu1 %vm762_vm1, %v2878_v58  ;;  %v2439_v18 = vsel %vm565_vm2, %v2434_v57, %v18175_v39  ;;  %v2447_v39 = vsel %vm565_vm2, %v2442_v11, %v18195_v33  ;;  %v18333_v57 = vld [vmem:[%s17623_s16 + $0xcc] ss:$0 sps:$4 sm:$0x11]  }
 0x16c   : > { %v15759_v63 = vpop.f32.mrb[4].mxu0  ;;  %16023 = vmatprep.mubr.msk.bf16.mxu1 %vm762_vm1, %v2880_v29  ;;  %v18304_v29 = vrot.slane %v2500_v0, 1 }
 0x16d   : > { %v18243_v44 = vadd.f32 %v15809_v36, %v15759_v63  ;;  %v888_v15 = vpop.f32.mrb[5].mxu0  ;;  %v2884_v36 = vsel %vm1314_vm3, %v2881_v53, %v2883_v48  ;;  %v2488_v53 = vshrl.u32 %v18212_v8, 16 }
 0x16e   : > { %v18250_v54 = vadd.f32 %v1148_v50, %v888_v15  ;;  %v15760_v4 = vpop.f32.mrb[6].mxu0  ;;  %v15813_v59 = vpop.f32.mrb[8].mxu1  ;;  %v18285_v50 = vld [vmem:[%s17623_s16 + $0xb4] sm:$0xff]   ;;  %v2504_v15 = vshrl.u32 %v18257_v41, 16 }
 0x16f   : > { %v18259_v35 = vadd.f32 %v15810_v12, %v15760_v4  ;;  %v891_v9 = vpop.f32.mrb[7].mxu0  ;;  %v1163_v25 = vpop.f32.mrb[9].mxu1 }
 0x170   : > { %v15814_v7 = vpop.f32.mrb[10].mxu1  ;;  %v2886_v9 = vsel %vm1314_vm3, %v2883_v48, %v2885_v26  ;;  %v2516_v25 = vshll.u32 %v18295_v10, 16  ;;  %v3709_v48 = vld [vmem:[%s17623_s16 + $0x18] sm:$0xf] }
 0x171   : > { %15970 = vmatmul.mubr.msk.bf16.gmra.mrb[112].mxu0 %vm762_vm1, %v2423_v47  ;;  %v1165_v17 = vpop.f32.mrb[11].mxu1  ;;  %v2508_v47 = vshll.u32 %v18285_v50, 16  ;;  %v2450_v7 = vor.u32 %v2448_v51, %v18195_v33 }
 0x172   : > { %15973 = vmatprep.mubr.msk.bf16.mxu0 %vm762_vm1, %v2431_v5  ;;  %v18346_v24 = vrot.slane %v2516_v25, 1  ;;  %v2532_v25 = vshll.u32 %v18333_v57, 16 }
 0x173   : > { %16024 = vmatmul.mubr.msk.bf16.gmra.mrb[116].mxu1 %vm762_vm1, %v2882_v52  ;;  %v2888_v52 = vsel %vm1314_vm3, %v2885_v26, %v2887_v43  ;;  %v18343_v51 = vrot.slane %v2508_v47, 1  ;;  %v2455_v11 = vsel %vm565_vm2, %v2450_v7, %v18205_v40  ;;  %v2463_v40 = vsel %vm565_vm2, %v2458_v45, %v18231_v32 }
 0x174   : > { %v15763_v22 = vpop.f32.mrb[8].mxu0  ;;  %16027 = vmatprep.mubr.msk.bf16.mxu1 %vm762_vm1, %v2884_v36  ;;  %v3710_v36 = vld [vmem:[%s17623_s16 + $0x1c] sm:$0xf] }
 0x175   : > { %v18297_v12 = vadd.f32 %v15813_v59, %v15763_v22  ;;  %v903_v58 = vpop.f32.mrb[9].mxu0 }
 0x176   : > { %v15764_v38 = vpop.f32.mrb[10].mxu0  ;;  %v15817_v28 = vpop.f32.mrb[12].mxu1 }
 0x177   : > { %v905_v27 = vpop.f32.mrb[11].mxu0  ;;  %v1177_v63 = vpop.f32.mrb[13].mxu1  ;;  %v2901_v38 = vrot.slane %v18295_v10, 1  ;;  %v18355_v28 = vcombine.low %v3709_v48, %v3710_v36  ;;  %v2890_v48 = vsel %vm1314_vm3, %v2887_v43, %v2889_v42  ;;  %v2466_v36 = vor.u32 %v2464_v62, %v18231_v32 }
 0x178   : > { %v18312_v4 = vadd.f32 %v1165_v17, %v905_v27  ;;  %v15818_v59 = vpop.f32.mrb[14].mxu1  ;;  %v18330_v17 = vld [vmem:[%s17623_s16 + $0xc4] sm:$0xff]  }
 0x179   : > { %15974 = vmatmul.mubr.msk.bf16.gmra.mrb[116].mxu0 %vm762_vm1, %v2439_v18  ;;  %v1180_v5 = vpop.f32.mrb[15].mxu1  ;;  %v2524_v22 = vshll.u32 %v18330_v17, 16  ;;  %v2899_v18 = vrot.slane %v18285_v50, 1  ;;  %v18358_v27 = vld [vmem:[%s17623_s16 + $0x20] sm:$0xff]   ;;  %v3886_v43 = vshll.u32 %v18355_v28, 16 }
 0x17a   : > { %15977 = vmatprep.mubr.msk.bf16.mxu0 %vm762_vm1, %v2447_v39 }
 0x17b   : > { %16028 = vmatmul.mubr.msk.bf16.gmra.mrb[120].mxu1 %vm762_vm1, %v2886_v9  ;;  %v18411_v62 = vrot.slane %v3886_v43, 1  ;;  %v2894_v43 = vsel %vm1314_vm3, %v2891_v3, %v2893_v60 }
 0x17c   : > { %v15767_v33 = vpop.f32.mrb[12].mxu0  ;;  %16031 = vmatprep.mubr.msk.bf16.mxu1 %vm762_vm1, %v2888_v52 }
 0x17d   : > { %v917_v0 = vpop.f32.mrb[13].mxu0  ;;  %v18385_v33 = vrot.slane %v2524_v22, 1 }
 0x17e   : > { %v18351_v58 = vadd.f32 %v1177_v63, %v917_v0  ;;  %v15768_v1 = vpop.f32.mrb[14].mxu0  ;;  %v15821_v37 = vpop.f32.mrb[16].mxu1  ;;  %v3891_v0 = vshll.u32 %v18358_v27, 16  ;;  %v18414_v63 = vld [vmem:[%s17623_s16 + $0x38] sm:$0xff]  }
 0x17f   : > { %v18360_v39 = vadd.f32 %v15818_v59, %v15768_v1  ;;  %v920_v47 = vpop.f32.mrb[15].mxu0  ;;  %v1192_v9 = vpop.f32.mrb[17].mxu1  ;;  %v18374_v59 = vld [vmem:[%s17623_s16 + $0x28] sm:$0xff]  }
 0x180   : > { %v18366_v7 = vadd.f32 %v1180_v5, %v920_v47  ;;  %v15822_v52 = vpop.f32.mrb[18].mxu1  ;;  %v2892_v5 = vsel %vm1314_vm3, %v2889_v42, %v2891_v3  ;;  %v18396_v42 = vrot.slane %v2532_v25, 1  ;;  %v3899_v22 = vshll.u32 %v18374_v59, 16 }
 0x181   : > { %15978 = vmatmul.mubr.msk.bf16.gmra.mrb[120].mxu0 %vm762_vm1, %v2455_v11  ;;  %v1195_v45 = vpop.f32.mrb[19].mxu1  ;;  %v2903_v11 = vrot.slane %v18330_v17, 1  ;;  %v3884_v25 = vshrl.u32 %v18355_v28, 16  ;;  %v3915_v3 = vshll.u32 %v18414_v63, 16 }
 0x182   : > { %15981 = vmatprep.mubr.msk.bf16.mxu0 %vm762_vm1, %v2463_v40  ;;  %v2471_v40 = vsel %vm565_vm2, %v2466_v36, %v18240_v30  ;;  %v2479_v30 = vsel %vm565_vm2, %v2474_v49, %v18254_v2  ;;  %v3895_v36 = vshrl.u32 %v18358_v27, 16  ;;  %v2482_v49 = vor.u32 %v2480_v6, %v18254_v2 }
 0x183   : > { %16032 = vmatmul.mubr.msk.bf16.gmra.mrb[124].mxu1 %vm762_vm1, %v2890_v48  ;;  %v3903_v2 = vshrl.u32 %v18374_v59, 16 }
 0x184   : > { %v15771_v32 = vpop.f32.mrb[16].mxu0  ;;  %16035 = vmatprep.mubr.msk.bf16.mxu1 %vm762_vm1, %v2892_v5  ;;  %v18428_v5 = vrot.slane %v3899_v22, 1  ;;  %v18443_v22 = vld [vmem:[%s17623_s16 + $0x40] sm:$0xff]   ;;  %v2487_v8 = vsel %vm565_vm2, %v2482_v49, %v18264_v13  ;;  %v18475_v49 = vld [vmem:[%s17623_s16 + $0x48] sm:$0xff]  }
 0x185   : > { %v18400_v1 = vadd.f32 %v15821_v37, %v15771_v32  ;;  %v932_v47 = vpop.f32.mrb[17].mxu0  ;;  %v3927_v41 = vshrl.u32 %v18443_v22, 16 }
 0x186   : > { %v18407_v34 = vadd.f32 %v1192_v9, %v932_v47  ;;  %v15772_v48 = vpop.f32.mrb[18].mxu0  ;;  %v15825_v45 = vpop.f32.mrb[20].mxu1  ;;  %v18420_v9 = vrot.slane %v3891_v0, 1  ;;  %v3907_v0 = vshll.u32 %v18405_v46, 16 }
 0x187   : > { %v18416_v37 = vadd.f32 %v15822_v52, %v15772_v48  ;;  %v935_v32 = vpop.f32.mrb[19].mxu0  ;;  %v1207_v26 = vpop.f32.mrb[21].mxu1 }
 0x188   : > { %v15826_v47 = vpop.f32.mrb[22].mxu1  ;;  %v2896_v26 = vsel %vm1314_vm3, %v2893_v60, %v2895_v14  ;;  %v18452_v60 = vsel %vm835_vm0, %v18129_v61, 0  ;;  %v18457_v6 = vrot.slane %v3907_v0, 1  ;;  %v3923_v61 = vshll.u32 %v18443_v22, 16  ;;  %vm19354_vm0 = vmand %vm6502_vm4, %vm6581_vm14 }
 0x189   : > { %15982 = vmatmul.mubr.msk.bf16.gmra.mrb[124].mxu0 %vm762_vm1, %v2471_v40  ;;  %v1209_v52 = vpop.f32.mrb[23].mxu1  ;;  %v2490_v40 = vor.u32 %v2488_v53, %v18264_v13  ;;  %v2898_v13 = vsel %vm1314_vm3, %v2895_v14, %v2897_v21  ;;  %v2506_v14 = vor.u32 %v2504_v15, %v18304_v29 }
 0x18a   : > { %15985 = vmatprep.mubr.msk.bf16.mxu0 %vm762_vm1, %v2479_v30 }
 0x18b   : > { %16036 = vmatmul.mubr.msk.bf16.gmra.mrb[128].mxu1 %vm762_vm1, %v2894_v43  ;;  %v18462_v43 = vrot.slane %v3915_v3, 1 }
 0x18c   : > { %v15775_v48 = vpop.f32.mrb[20].mxu0  ;;  %16039 = vmatprep.mubr.msk.bf16.mxu1 %vm762_vm1, %v2896_v26 }
 0x18d   : > { %v18454_v32 = vadd.f32 %v15825_v45, %v15775_v48  ;;  %v947_v55 = vpop.f32.mrb[21].mxu0  ;;  %v2495_v48 = vsel %vm565_vm2, %v2490_v40, %v18301_v19 }
 0x18e   : > { %v15776_v47 = vpop.f32.mrb[22].mxu0  ;;  %v15829_v53 = vpop.f32.mrb[24].mxu1 }
 0x18f   : > { %v949_v26 = vpop.f32.mrb[23].mxu0  ;;  %v1221_v45 = vpop.f32.mrb[25].mxu1  ;;  %v2498_v47 = vor.u32 %v2496_v31, %v18301_v19  ;;  %v3931_v53 = vshll.u32 %v18475_v49, 16  ;;  %v18501_v31 = vrot.slane %v3923_v61, 1 }
 0x190   : > { %v18467_v55 = vadd.f32 %v1209_v52, %v949_v26  ;;  %v15830_v0 = vpop.f32.mrb[26].mxu1  ;;  %v2900_v52 = vsel %vm1314_vm3, %v2897_v21, %v2899_v18  ;;  %v18495_v26 = vld [vmem:[%s17623_s16 + $0x50] sm:$0xff]  }
 0x191   : > { %15986 = vmatmul.mubr.msk.bf16.gmra.mrb[128].mxu0 %vm762_vm1, %v2487_v8  ;;  %v1224_v3 = vpop.f32.mrb[27].mxu1  ;;  %v2503_v20 = vsel %vm565_vm2, %v2498_v47, %v18304_v29  ;;  %v2902_v29 = vsel %vm1314_vm3, %v2899_v18, %v2901_v38  ;;  %v18515_v61 = vrot.slane %v3931_v53, 1  ;;  %v2904_v47 = vsel %vm1314_vm3, %v2901_v38, %v2903_v11 }
 0x192   : > { %15989 = vmatprep.mubr.msk.bf16.mxu0 %vm762_vm1, %v2495_v48  ;;  %v20727_v18 = vshrl.u32 %v18295_v10, 16 }
 0x193   : > { %16040 = vmatmul.mubr.msk.bf16.gmra.mrb[132].mxu1 %vm762_vm1, %v2898_v13 }
 0x194   : > { %v15779_v8 = vpop.f32.mrb[24].mxu0  ;;  %16043 = vmatprep.mubr.msk.bf16.mxu1 %vm762_vm1, %v2900_v52  ;;  %v2522_v53 = vor.u32 %v20727_v18, %v18346_v24 }
 0x195   : > { %v961_v21 = vpop.f32.mrb[25].mxu0  ;;  %v2511_v8 = vsel %vm565_vm2, %v2506_v14, %v18343_v51  ;;  %v20726_v14 = vshrl.u32 %v18285_v50, 16  ;;  %v3935_v50 = vshrl.u32 %v18475_v49, 16 }
 0x196   : > { %v18497_v40 = vadd.f32 %v1221_v45, %v961_v21  ;;  %v15780_v48 = vpop.f32.mrb[26].mxu0  ;;  %v15833_v19 = vpop.f32.mrb[28].mxu1 }
 0x197   : > { %v18504_v15 = vadd.f32 %v15830_v0, %v15780_v48  ;;  %v964_v13 = vpop.f32.mrb[27].mxu0  ;;  %v1236_v52 = vpop.f32.mrb[29].mxu1  ;;  %v2514_v21 = vor.u32 %v20726_v14, %v18343_v51 }
 0x198   : > { %v18508_v30 = vadd.f32 %v1224_v3, %v964_v13  ;;  %v15834_v45 = vpop.f32.mrb[30].mxu1  ;;  %v3939_v3 = vshll.u32 %v18495_v26, 16 }
 0x199   : > { %15990 = vmatmul.mubr.msk.bf16.gmra.mrb[132].mxu0 %vm762_vm1, %v2503_v20  ;;  %v1239_v0 = vpop.f32.mrb[31].mxu1  ;;  %v18534_v20 = vld [vmem:[%s17623_s16 + $0x58] sm:$0xff]   ;;  %v2519_v10 = vsel %vm565_vm2, %v2514_v21, %v18346_v24 }
 0x19a   : > { %15993 = vmatprep.mubr.msk.bf16.mxu0 %vm762_vm1, %v2511_v8  ;;  %v3889_v8 = vor.u32 %v18411_v62, %v3884_v25  ;;  %v2527_v62 = vsel %vm565_vm2, %v2522_v53, %v18385_v33  ;;  %v20729_v53 = vshrl.u32 %v18330_v17, 16  ;;  %v3905_v17 = vor.u32 %v3903_v2, %v18428_v5 }
 0x19b   : > { %16044 = vmatmul.mubr.msk.bf16.gmra.mrb[136].mxu1 %vm762_vm1, %v2902_v29 }
 0x19c   : > { %v15783_v48 = vpop.f32.mrb[28].mxu0  ;;  %16047 = vmatprep.mubr.msk.bf16.mxu1 %vm762_vm1, %v2904_v47  ;;  %v18546_v47 = vrot.slane %v3939_v3, 1  ;;  %v3947_v3 = vshll.u32 %v18534_v20, 16 }
 0x19d   : > { %v18536_v38 = vadd.f32 %v15833_v19, %v15783_v48  ;;  %v976_v13 = vpop.f32.mrb[29].mxu0  ;;  %v3943_v19 = vshrl.u32 %v18495_v26, 16  ;;  %v18563_v48 = vld [vmem:[%s17623_s16 + $0x60] sm:$0xff]  }
 0x19e   : > { %v18542_v51 = vadd.f32 %v1236_v52, %v976_v13  ;;  %v15784_v29 = vpop.f32.mrb[30].mxu0  ;;  %v15837_v0 = vpop.f32.mrb[32].mxu1  ;;  %v20728_v52 = vrot.slane %v18333_v57, 1  ;;  %v2530_v57 = vor.u32 %v20729_v53, %v18385_v33  ;;  %v18583_v33 = vrot.slane %v3947_v3, 1  ;;  %v16594_v53 = vld [vmem:[%s17623_s16 + $0x20] sm:$0xff]  }
 0x19f   : > { %v18549_v14 = vadd.f32 %v15834_v45, %v15784_v29  ;;  %v979_v28 = vpop.f32.mrb[31].mxu0  ;;  %v1251_v18 = vpop.f32.mrb[33].mxu1  ;;  %v3894_v45 = vsel %vm565_vm2, %v3889_v8, %v18420_v9  ;;  %v3897_v29 = vor.u32 %v3895_v36, %v18420_v9  ;;  %v3951_v36 = vshrl.u32 %v18534_v20, 16 }
 0x1a0   : > { %v15838_v25 = vpop.f32.mrb[34].mxu1  ;;  %v2906_v24 = vsel %vm1314_vm3, %v2903_v11, %v20728_v52  ;;  %v16593_v11 = vld [vmem:[%s17623_s16 + $0x18] sm:$0xff]   ;;  %v2535_v27 = vsel %vm565_vm2, %v2530_v57, %v18396_v42  ;;  %v3910_v42 = vsel %vm565_vm2, %v3905_v17, %v18457_v6  ;;  %v16598_v57 = vld [vmem:[%s17623_s16 + $0x28] sm:$0xff]   ;;  %v20731_v17 = vshrl.u32 %v18414_v63, 16 }
 0x1a1   : > { %15994 = vmatmul.mubr.msk.bf16.gmra.mrb[136].mxu0 %vm762_vm1, %v2519_v10  ;;  %v1253_v21 = vpop.f32.mrb[35].mxu1  ;;  %v18576_v10 = vld [vmem:[%s17623_s16 + $0x68] sm:$0xff]   ;;  %v3902_v2 = vsel %vm565_vm2, %v3897_v29, %v18428_v5  ;;  %v20730_v5 = vshrl.u32 %v18405_v46, 16 }
 0x1a2   : > { %15997 = vmatprep.mubr.msk.bf16.mxu0 %vm762_vm1, %v2527_v62 }
 0x1a3   : > { %16048 = vmatmul.mubr.msk.bf16.gmra.mrb[140].mxu1 %vm762_vm1, %v2906_v24  ;;  %v3963_v24 = vshll.u32 %v18576_v10, 16 }
 0x1a4   : > { %v15787_v13 = vpop.f32.mrb[32].mxu0  ;;  %16103 = vmatprep.mubr.msk.bf16.mxu1 %vm762_vm1, %v3894_v45  ;;  %v18598_v45 = vld [vmem:[%s17623_s16 + $0x70] sm:$0xff]  }
 0x1a5   : > { %v18578_v8 = vadd.f32 %v15837_v0, %v15787_v13  ;;  %v991_v28 = vpop.f32.mrb[33].mxu0  ;;  %v3955_v0 = vshll.u32 %v18563_v48, 16  ;;  %v3913_v13 = vor.u32 %v20730_v5, %v18457_v6  ;;  %v18624_v5 = vld [vmem:[%s17623_s16 + $0x78] sm:$0xff]  }
 0x1a6   : > { %v15788_v18 = vpop.f32.mrb[34].mxu0  ;;  %v15841_v9 = vpop.f32.mrb[36].mxu1 }
 0x1a7   : > { %v993_v62 = vpop.f32.mrb[35].mxu0  ;;  %v1265_v25 = vpop.f32.mrb[37].mxu1  ;;  %v18608_v29 = vrot.slane %v3955_v0, 1  ;;  %v3921_v18 = vor.u32 %v20731_v17, %v18462_v43  ;;  %v3918_v63 = vsel %vm565_vm2, %v3913_v13, %v18462_v43  ;;  %v16602_v13 = vld [vmem:[%s17623_s16 + $0x38] sm:$0xff]  }
 0x1a8   : > { %v18589_v52 = vadd.f32 %v1253_v21, %v993_v62  ;;  %v15842_v59 = vpop.f32.mrb[38].mxu1  ;;  %v18614_v62 = vrot.slane %v3963_v24, 1 }
 0x1a9   : > { %15998 = vmatmul.mubr.msk.bf16.gmra.mrb[140].mxu0 %vm762_vm1, %v2535_v27  ;;  %v1268_v3 = vpop.f32.mrb[39].mxu1 }
 0x1aa   : > { %16053 = vmatprep.mubr.msk.bf16.mxu0 %vm762_vm1, %v16593_v11  ;;  %v3959_v11 = vshrl.u32 %v18563_v48, 16 }
 0x1ab   : > { %16104 = vmatmul.mubr.msk.bf16.vlgmr.msra.gmra.mrb[144].mxu1 %vm762_vm1, %v3902_v2  ;;  %v3971_v2 = vshll.u32 %v18598_v45, 16 }
 0x1ac   : > { %v15791_v21 = vpop.f32.mrb[36].mxu0  ;;  %16107 = vmatprep.mubr.msk.bf16.mxu1 %vm762_vm1, %v3910_v42 }
 0x1ad   : > { %v1005_v28 = vpop.f32.mrb[37].mxu0 }
 0x1ae   : > { %v15792_v27 = vpop.f32.mrb[38].mxu0  ;;  %v15845_v9 = vpop.f32.mrb[40].mxu1  ;;  %v18617_v42 = vadd.f32 %v1265_v25, %v1005_v28  ;;  %v3926_v25 = vsel %vm565_vm2, %v3921_v18, %v18501_v31 }
 0x1af   : > { %v1008_v46 = vpop.f32.mrb[39].mxu0  ;;  %v1280_v6 = vpop.f32.mrb[41].mxu1  ;;  %v18619_v0 = vadd.f32 %v15842_v59, %v15792_v27  ;;  %v16599_v59 = vld [vmem:[%s17623_s16 + $0x30] sm:$0xff]   ;;  %v18646_v27 = vld [vmem:[%s17623_s16 + $0x80] sm:$0xff]  }
 0x1b0   : > { %v15846_v21 = vpop.f32.mrb[42].mxu1  ;;  %v18626_v17 = vadd.f32 %v1268_v3, %v1008_v46  ;;  %v3929_v3 = vor.u32 %v3927_v41, %v18501_v31 }
 0x1b1   : > { %16054 = vmatmul.mubr.msk.bf16.vlgmr.msra.gmra.mrb[144].mxu0 %vm762_vm1, %v16594_v53  ;;  %v1283_v24 = vpop.f32.mrb[43].mxu1  ;;  %v3979_v53 = vshll.u32 %v18624_v5, 16 }
 0x1b2   : > { %16152 = vmatpush3.bf16.msra.mxu0 %v18452_v60  ;;  %16057 = vmatprep.mubr.msk.bf16.mxu0 %vm762_vm1, %v16598_v57  ;;  %v3937_v60 = vor.u32 %v3935_v50, %v18515_v61  ;;  %v18650_v24 = vrot.slane %v3971_v2, 1  ;;  %v3934_v50 = vsel %vm565_vm2, %v3929_v3, %v18515_v61  ;;  %v3945_v61 = vor.u32 %v3943_v19, %v18546_v47 }
 0x1b3   : > { %16108 = vmatmul.mubr.msk.bf16.gmra.mrb[148].mxu1 %vm762_vm1, %v3918_v63 }
 0x1b4   : > { %v15795_v43 = vpop.f32.mrb[40].mxu0  ;;  %16111 = vmatprep.mubr.msk.bf16.mxu1 %vm762_vm1, %v3926_v25  ;;  %v3975_v25 = vshrl.u32 %v18598_v45, 16  ;;  %v3950_v20 = vsel %vm565_vm2, %v3945_v61, %v18583_v33  ;;  %v20732_v61 = vshrl.u32 %v18576_v10, 16 }
 0x1b5   : > { %v1020_v18 = vpop.f32.mrb[41].mxu0  ;;  %v18648_v57 = vadd.f32 %v15845_v9, %v15795_v43  ;;  %v18659_v9 = vrot.slane %v3979_v53, 1  ;;  %v3942_v43 = vsel %vm565_vm2, %v3937_v60, %v18546_v47  ;;  %v3953_v53 = vor.u32 %v3951_v36, %v18583_v33 }
 0x1b6   : > { %v15796_v46 = vpop.f32.mrb[42].mxu0  ;;  %v15849_v63 = vpop.f32.mrb[44].mxu1  ;;  %v18653_v22 = vadd.f32 %v1280_v6, %v1020_v18  ;;  %v3987_v6 = vshll.u32 %v18646_v27, 16  ;;  %v16603_v18 = vld [vmem:[%s17623_s16 + $0x40] sm:$0xff]   ;;  %v3961_v33 = vor.u32 %v3959_v11, %v18608_v29 }
 0x1b7   : > { %v1023_v31 = vpop.f32.mrb[43].mxu0  ;;  %v1295_v41 = vpop.f32.mrb[45].mxu1  ;;  %v18655_v28 = vadd.f32 %v15846_v21, %v15796_v46  ;;  %v16606_v46 = vld [vmem:[%s17623_s16 + $0x48] sm:$0xff]  }
 0x1b8   : > { %v15850_v49 = vpop.f32.mrb[46].mxu1 }
 0x1b9   : > { %16058 = vmatmul.mubr.msk.bf16.gmra.mrb[148].mxu0 %vm762_vm1, %v16599_v59  ;;  %v1297_v2 = vpop.f32.mrb[47].mxu1  ;;  %v18674_v59 = vld [vmem:[%s17623_s16 + $0x88] sm:$0xff]   ;;  %v18682_v49 = vrot.slane %v3987_v6, 1  ;;  %v18694_v6 = vld [vmem:[%s17623_s16 + $0x90] sm:$0xff]  }
 0x1ba   : > { %16061 = vmatprep.mubr.msk.bf16.mxu0 %vm762_vm1, %v16602_v13  ;;  %v3983_v13 = vshrl.u32 %v18624_v5, 16  ;;  %v3995_v36 = vshll.u32 %v18674_v59, 16 }
 0x1bb   : > { %16112 = vmatmul.mubr.msk.bf16.gmra.mrb[152].mxu1 %vm762_vm1, %v3934_v50 }
 0x1bc   : > { %v15799_v21 = vpop.f32.mrb[44].mxu0  ;;  %16115 = vmatprep.mubr.msk.bf16.mxu1 %vm762_vm1, %v3942_v43  ;;  %v3958_v43 = vsel %vm565_vm2, %v3953_v53, %v18608_v29  ;;  %v3969_v53 = vor.u32 %v20732_v61, %v18614_v62 }
 0x1bd   : > { %v1035_v3 = vpop.f32.mrb[45].mxu0  ;;  %v18680_v60 = vadd.f32 %v15849_v63, %v15799_v21  ;;  %v16607_v21 = vld [vmem:[%s17623_s16 + $0x50] sm:$0xff]  }
 0x1be   : > { %v15800_v31 = vpop.f32.mrb[46].mxu0  ;;  %v15905_v41 = vpop.f32.mrb[48].mxu1  ;;  %v3974_v26 = vsel %vm565_vm2, %v3969_v53, %v18650_v24 }
 0x1bf   : > { %v1037_v47 = vpop.f32.mrb[47].mxu0  ;;  %v1959_v19 = vpop.f32.mrb[49].mxu1  ;;  %v16610_v31 = vld [vmem:[%s17623_s16 + $0x58] sm:$0xff]   ;;  %v18710_v41 = vrot.slane %v3995_v36, 1  ;;  %v3966_v36 = vsel %vm565_vm2, %v3961_v33, %v18614_v62 }
 0x1c0   : > { %v15906_v50 = vpop.f32.mrb[50].mxu1  ;;  %v18688_v5 = vadd.f32 %v1297_v2, %v1037_v47  ;;  %v18705_v2 = vld [vmem:[%s17623_s16 + $0x98] sm:$0xff]  }
 0x1c1   : > { %16062 = vmatmul.mubr.msk.bf16.gmra.mrb[152].mxu0 %vm762_vm1, %v16603_v18  ;;  %v1962_v63 = vpop.f32.mrb[51].mxu1 }
 0x1c2   : > { %16065 = vmatprep.mubr.msk.bf16.mxu0 %vm762_vm1, %v16606_v46 }
 0x1c3   : > { %16116 = vmatmul.mubr.msk.bf16.gmra.mrb[156].mxu1 %vm762_vm1, %v3950_v20 }
 0x1c4   : > { %v15855_v3 = vpop.f32.mrb[48].mxu0  ;;  %16119 = vmatprep.mubr.msk.bf16.mxu1 %vm762_vm1, %v3958_v43  ;;  %v3999_v43 = vshrl.u32 %v18674_v59, 16 }
 0x1c5   : > { %v1473_v18 = vpop.f32.mrb[49].mxu0  ;;  %v4003_v3 = vshll.u32 %v18694_v6, 16 }
 0x1c6   : > { %v1648_v46 = vadd.f32 %v1473_v18, %v18202_v56  ;;  %v15856_v47 = vpop.f32.mrb[50].mxu0  ;;  %v15909_v20 = vpop.f32.mrb[52].mxu1  ;;  %v4011_v56 = vshll.u32 %v18705_v2, 16 }
 0x1c7   : > { %v1650_v48 = vadd.f32 %v15856_v47, %v18214_v16  ;;  %v1476_v29 = vpop.f32.mrb[51].mxu0  ;;  %v1974_v11 = vpop.f32.mrb[53].mxu1  ;;  %v18726_v16 = vld [vmem:[%s17623_s16 + $0xa0] sm:$0xff]   ;;  %v4005_v33 = vrot.slane %v4003_v3, 1 }
 0x1c8   : > { %v1649_v10 = vadd.f32 %v1476_v29, %v18220_v23  ;;  %v15910_v61 = vpop.f32.mrb[54].mxu1  ;;  %v18720_v18 = vadd.f32 %v1959_v19, %v1648_v46  ;;  %v16611_v29 = vld [vmem:[%s17623_s16 + $0x60] sm:$0xff]   ;;  %v16614_v19 = vld [vmem:[%s17623_s16 + $0x68] sm:$0xff]  }
 0x1c9   : > { %16066 = vmatmul.mubr.msk.bf16.gmra.mrb[156].mxu0 %vm762_vm1, %v16607_v21  ;;  %v1977_v59 = vpop.f32.mrb[55].mxu1  ;;  %v18728_v47 = vadd.f32 %v15906_v50, %v1650_v48  ;;  %v3977_v21 = vor.u32 %v3975_v25, %v18650_v24 }
 0x1ca   : > { %16069 = vmatprep.mubr.msk.bf16.mxu0 %vm762_vm1, %v16610_v31  ;;  %v18731_v23 = vadd.f32 %v1962_v63, %v1649_v10  ;;  %v3985_v31 = vor.u32 %v3983_v13, %v18659_v9  ;;  %v4007_v63 = vshrl.u32 %v18694_v6, 16  ;;  %v18753_v6 = vld [vmem:[%s17623_s16 + $0xa8] sm:$0xff]   ;;  %v4015_v59 = vshrl.u32 %v18705_v2, 16 }
 0x1cb   : > { %16120 = vmatmul.mubr.msk.bf16.gmra.mrb[160].mxu1 %vm762_vm1, %v3966_v36  ;;  %v18744_v36 = vrot.slane %v4011_v56, 1  ;;  %v3982_v13 = vsel %vm565_vm2, %v3977_v21, %v18659_v9  ;;  %v16618_v21 = vld [vmem:[%s17623_s16 + $0x78] sm:$0xff]  }
 0x1cc   : > { %v15859_v62 = vpop.f32.mrb[52].mxu0  ;;  %16123 = vmatprep.mubr.msk.bf16.mxu1 %vm762_vm1, %v3974_v26  ;;  %v4019_v26 = vshll.u32 %v18726_v16, 16 }
 0x1cd   : > { %v1652_v50 = vadd.f32 %v15859_v62, %v18243_v44  ;;  %v1488_v53 = vpop.f32.mrb[53].mxu0 }
 0x1ce   : > { %v1651_v46 = vadd.f32 %v1488_v53, %v18250_v54  ;;  %v15860_v48 = vpop.f32.mrb[54].mxu0  ;;  %v15913_v10 = vpop.f32.mrb[56].mxu1 }
 0x1cf   : > { %v1653_v45 = vadd.f32 %v15860_v48, %v18259_v35  ;;  %v1491_v24 = vpop.f32.mrb[55].mxu0  ;;  %v1989_v25 = vpop.f32.mrb[57].mxu1  ;;  %v18748_v44 = vadd.f32 %v15909_v20, %v1652_v50  ;;  %v3990_v35 = vsel %vm565_vm2, %v3985_v31, %v18682_v49  ;;  %v16615_v20 = vld [vmem:[%s17623_s16 + $0x70] sm:$0xff]   ;;  %v4027_v50 = vshll.u32 %v18753_v6, 16 }
 0x1d0   : > { %v15914_v3 = vpop.f32.mrb[58].mxu1  ;;  %v18755_v54 = vadd.f32 %v1974_v11, %v1651_v46  ;;  %v20733_v11 = vshrl.u32 %v18646_v27, 16  ;;  %v18775_v31 = vld [vmem:[%s17623_s16 + $0xb0] sm:$0xff]   ;;  %v4021_v48 = vrot.slane %v4019_v26, 1 }
 0x1d1   : > { %16070 = vmatmul.mubr.msk.bf16.gmra.mrb[160].mxu0 %vm762_vm1, %v16611_v29  ;;  %v1991_v56 = vpop.f32.mrb[59].mxu1  ;;  %v18761_v62 = vadd.f32 %v15910_v61, %v1653_v45  ;;  %v4001_v61 = vor.u32 %v3999_v43, %v18710_v41  ;;  %v4023_v45 = vshrl.u32 %v18726_v16, 16  ;;  %v4029_v3 = vrot.slane %v4027_v50, 1 }
 0x1d2   : > { %16073 = vmatprep.mubr.msk.bf16.mxu0 %vm762_vm1, %v16614_v19  ;;  %v3993_v29 = vor.u32 %v20733_v11, %v18682_v49  ;;  %v4035_v16 = vshll.u32 %v18775_v31, 16  ;;  %v4031_v11 = vshrl.u32 %v18753_v6, 16  ;;  %v4017_v50 = vor.u32 %v4015_v59, %v18744_v36 }
 0x1d3   : > { %16124 = vmatmul.mubr.msk.bf16.gmra.mrb[164].mxu1 %vm762_vm1, %v3982_v13  ;;  %v4006_v26 = vsel %vm565_vm2, %v4001_v61, %v4005_v33 }
 0x1d4   : > { %v15863_v9 = vpop.f32.mrb[56].mxu0  ;;  %16127 = vmatprep.mubr.msk.bf16.mxu1 %vm762_vm1, %v3990_v35  ;;  %v3998_v43 = vsel %vm565_vm2, %v3993_v29, %v18710_v41  ;;  %v18788_v35 = vld [vmem:[%s17623_s16 + $0xb8] sm:$0xff]   ;;  %v16622_v41 = vld [vmem:[%s17623_s16 + $0x88] sm:$0xff]   ;;  %v4037_v61 = vrot.slane %v4035_v16, 1  ;;  %v16623_v16 = vld [vmem:[%s17623_s16 + $0x90] sm:$0xff]  }
 0x1d5   : > { %v1655_v53 = vadd.f32 %v15863_v9, %v18297_v12  ;;  %v1503_v2 = vpop.f32.mrb[57].mxu0  ;;  %v4043_v59 = vshll.u32 %v18788_v35, 16 }
 0x1d6   : > { %v15864_v19 = vpop.f32.mrb[58].mxu0  ;;  %v15917_v46 = vpop.f32.mrb[60].mxu1 }
 0x1d7   : > { %v1505_v24 = vpop.f32.mrb[59].mxu0  ;;  %v2003_v25 = vpop.f32.mrb[61].mxu1  ;;  %v18778_v27 = vadd.f32 %v15913_v10, %v1655_v53  ;;  %v18799_v53 = vld [vmem:[%s17623_s16 + $0xc0] sm:$0xff]   ;;  %v4039_v19 = vshrl.u32 %v18775_v31, 16  ;;  %v4022_v31 = vsel %vm565_vm2, %v4017_v50, %v4021_v48  ;;  %v4033_v50 = vor.u32 %v4031_v11, %v4029_v3 }
 0x1d8   : > { %v1654_v49 = vadd.f32 %v1505_v24, %v18312_v4  ;;  %v15918_v12 = vpop.f32.mrb[62].mxu1  ;;  %v16619_v4 = vld [vmem:[%s17623_s16 + $0x80] sm:$0xff]   ;;  %v4055_v11 = vshrl.u32 %v18799_v53, 16 }
 0x1d9   : > { %16074 = vmatmul.mubr.msk.bf16.gmra.mrb[164].mxu0 %vm762_vm1, %v16615_v20  ;;  %v2006_v13 = vpop.f32.mrb[63].mxu1  ;;  %v4009_v20 = vor.u32 %v4007_v63, %v4005_v33 }
 0x1da   : > { %16077 = vmatprep.mubr.msk.bf16.mxu0 %vm762_vm1, %v16618_v21  ;;  %v18790_v10 = vadd.f32 %v1991_v56, %v1654_v49 }
 0x1db   : > { %16128 = vmatmul.mubr.msk.bf16.gmra.mrb[168].mxu1 %vm762_vm1, %v3998_v43  ;;  %v4014_v6 = vsel %vm565_vm2, %v4009_v20, %v18744_v36 }
 0x1dc   : > { %v15867_v9 = vpop.f32.mrb[60].mxu0  ;;  %16131 = vmatprep.mubr.msk.bf16.mxu1 %vm762_vm1, %v4006_v26 }
 0x1dd   : > { %v1517_v29 = vpop.f32.mrb[61].mxu0  ;;  %v4045_v9 = vrot.slane %v4043_v59, 1  ;;  %v4038_v59 = vsel %vm565_vm2, %v4033_v50, %v4037_v61 }
 0x1de   : > { %v1656_v21 = vadd.f32 %v1517_v29, %v18351_v58  ;;  %v15868_v2 = vpop.f32.mrb[62].mxu0  ;;  %v15921_v56 = vpop.f32.mrb[64].mxu1 }
 0x1df   : > { %v1658_v46 = vadd.f32 %v15868_v2, %v18360_v39  ;;  %v1520_v24 = vpop.f32.mrb[63].mxu0  ;;  %v2018_v49 = vpop.f32.mrb[65].mxu1  ;;  %v4051_v39 = vshll.u32 %v18799_v53, 16  ;;  %v16640_v53 = vld [vmem:[%s17623_s16 + $0xd0] sm:$0xff]  }
 0x1e0   : > { %v1657_v33 = vadd.f32 %v1520_v24, %v18366_v7  ;;  %v15922_v63 = vpop.f32.mrb[66].mxu1  ;;  %v18808_v58 = vadd.f32 %v2003_v25, %v1656_v21  ;;  %v16626_v25 = vld [vmem:[%s17623_s16 + $0x98] sm:$0xff]   ;;  %v16637_v21 = vld [vmem:[%s17623_s16 + $0xc8] sm:$0xff]  }
 0x1e1   : > { %16078 = vmatmul.mubr.msk.bf16.gmra.mrb[168].mxu0 %vm762_vm1, %v16619_v4  ;;  %v2021_v43 = vpop.f32.mrb[67].mxu1  ;;  %v18813_v26 = vadd.f32 %v15918_v12, %v1658_v46  ;;  %v4025_v4 = vor.u32 %v4023_v45, %v4021_v48  ;;  %v4053_v46 = vrot.slane %v4051_v39, 1  ;;  %v16630_v39 = vld [vmem:[%s17623_s16 + $0xa8] sm:$0xff]  }
 0x1e2   : > { %16081 = vmatprep.mubr.msk.bf16.mxu0 %vm762_vm1, %v16622_v41  ;;  %v18816_v7 = vadd.f32 %v2006_v13, %v1657_v33  ;;  %v4047_v13 = vshrl.u32 %v18788_v35, 16  ;;  %v4059_v43 = vshll.u32 %v16637_v21, 16 }
 0x1e3   : > { %16132 = vmatmul.mubr.msk.bf16.gmra.mrb[172].mxu1 %vm762_vm1, %v4014_v6 }
 0x1e4   : > { %v15871_v36 = vpop.f32.mrb[64].mxu0  ;;  %16135 = vmatprep.mubr.msk.bf16.mxu1 %vm762_vm1, %v4022_v31 }
 0x1e5   : > { %v1660_v20 = vadd.f32 %v15871_v36, %v18400_v1  ;;  %v1532_v29 = vpop.f32.mrb[65].mxu0  ;;  %v4030_v1 = vsel %vm565_vm2, %v4025_v4, %v4029_v3  ;;  %v4041_v3 = vor.u32 %v4039_v19, %v4037_v61  ;;  %v4049_v36 = vor.u32 %v4047_v13, %v4045_v9 }
 0x1e6   : > { %v1659_v12 = vadd.f32 %v1532_v29, %v18407_v34  ;;  %v15872_v2 = vpop.f32.mrb[66].mxu0  ;;  %v15925_v41 = vpop.f32.mrb[68].mxu1  ;;  %v4061_v4 = vrot.slane %v4059_v43, 1  ;;  %v4067_v19 = vshll.u32 %v16640_v53, 16 }
 0x1e7   : > { %v1661_v24 = vadd.f32 %v15872_v2, %v18416_v37  ;;  %v1535_v33 = vpop.f32.mrb[67].mxu0  ;;  %v2033_v6 = vpop.f32.mrb[69].mxu1  ;;  %v18827_v48 = vadd.f32 %v15921_v56, %v1660_v20  ;;  %v16627_v56 = vld [vmem:[%s17623_s16 + $0xa0] sm:$0xff]   ;;  %v4046_v61 = vsel %vm565_vm2, %v4041_v3, %v4045_v9  ;;  %v4054_v13 = vsel %vm565_vm2, %v4049_v36, %v4053_v46 }
 0x1e8   : > { %v15926_v45 = vpop.f32.mrb[70].mxu1  ;;  %v18831_v34 = vadd.f32 %v2018_v49, %v1659_v12  ;;  %v16641_v33 = vld [vmem:[%s17623_s16 + $0xd8] ss:$0 sps:$4 sm:$0x11]   ;;  %v4057_v9 = vor.u32 %v4055_v11, %v4053_v46 }
 0x1e9   : > { %16082 = vmatmul.mubr.msk.bf16.gmra.mrb[172].mxu0 %vm762_vm1, %v16623_v16  ;;  %v2035_v35 = vpop.f32.mrb[71].mxu1  ;;  %v18835_v37 = vadd.f32 %v15922_v63, %v1661_v24  ;;  %v4063_v24 = vshrl.u32 %v16637_v21, 16  ;;  %v16631_v45 = vld [vmem:[%s17623_s16 + $0xb0] sm:$0xff]   ;;  %v4075_v11 = vshll.u32 %v16641_v33, 16 }
 0x1ea   : > { %16085 = vmatprep.mubr.msk.bf16.mxu0 %vm762_vm1, %v16626_v25  ;;  %v4062_v46 = vsel %vm565_vm2, %v4057_v9, %v4061_v4 }
 0x1eb   : > { %16136 = vmatmul.mubr.msk.bf16.gmra.mrb[176].mxu1 %vm762_vm1, %v4030_v1  ;;  %v4069_v1 = vrot.slane %v4067_v19, 1  ;;  %v4065_v43 = vor.u32 %v4063_v24, %v4061_v4 }
 0x1ec   : > { %v15875_v31 = vpop.f32.mrb[68].mxu0  ;;  %16139 = vmatprep.mubr.msk.bf16.mxu1 %vm762_vm1, %v4038_v59 }
 0x1ed   : > { %v1663_v49 = vadd.f32 %v15875_v31, %v18454_v32  ;;  %v1547_v16 = vpop.f32.mrb[69].mxu0 }
 0x1ee   : > { %v15876_v20 = vpop.f32.mrb[70].mxu0  ;;  %v15929_v63 = vpop.f32.mrb[72].mxu1  ;;  %v4395_v16 = vld [vmem:[%s17623_s16 + $0x18] sm:$0xe] }
 0x1ef   : > { %v1549_v29 = vpop.f32.mrb[71].mxu0  ;;  %v2047_v25 = vpop.f32.mrb[73].mxu1  ;;  %v18844_v50 = vadd.f32 %v15925_v41, %v1663_v49  ;;  %v16634_v41 = vld [vmem:[%s17623_s16 + $0xb8] sm:$0xff]  }
 0x1f0   : > { %v1662_v12 = vadd.f32 %v1549_v29, %v18467_v55  ;;  %v15930_v2 = vpop.f32.mrb[74].mxu1 }
 0x1f1   : > { %16086 = vmatmul.mubr.msk.bf16.gmra.mrb[176].mxu0 %vm762_vm1, %v16627_v56  ;;  %v2050_v32 = vpop.f32.mrb[75].mxu1  ;;  %v4071_v56 = vshrl.u32 %v16640_v53, 16  ;;  %v4070_v53 = vsel %vm565_vm2, %v4065_v43, %v4069_v1 }
 0x1f2   : > { %16089 = vmatprep.mubr.msk.bf16.mxu0 %vm762_vm1, %v16630_v39  ;;  %v18852_v6 = vadd.f32 %v2035_v35, %v1662_v12 }
 0x1f3   : > { %16140 = vmatmul.mubr.msk.bf16.gmra.mrb[180].mxu1 %vm762_vm1, %v4046_v61  ;;  %v4073_v4 = vor.u32 %v4071_v56, %v4069_v1  ;;  %v17156_v61 = vld [vmem:[%s17623_s16 + $0x1c] sm:$0xf] }
 0x1f4   : > { %v15879_v55 = vpop.f32.mrb[72].mxu0  ;;  %16143 = vmatprep.mubr.msk.bf16.mxu1 %vm762_vm1, %v4054_v13  ;;  %v14073_v19 = vcombine.low %v4395_v16, %v17156_v61  ;;  %v16639_v16 = vld [vmem:[%s17623_s16 + $0xd0] sm:$0xff]  }
 0x1f5   : > { %v1561_v59 = vpop.f32.mrb[73].mxu0  ;;  %v17159_v61 = vld [vmem:[%s17623_s16 + $0x30] sm:$0xff]  }
 0x1f6   : > { %v1664_v21 = vadd.f32 %v1561_v59, %v18497_v40  ;;  %v15880_v31 = vpop.f32.mrb[74].mxu0  ;;  %v15933_v39 = vpop.f32.mrb[76].mxu1  ;;  %v4401_v56 = vrot.slane %v14073_v19, 1 }
 0x1f7   : > { %v1666_v35 = vadd.f32 %v15880_v31, %v18504_v15  ;;  %v1564_v3 = vpop.f32.mrb[75].mxu0  ;;  %v2062_v49 = vpop.f32.mrb[77].mxu1  ;;  %v17157_v31 = vld [vmem:[%s17623_s16 + $0x20] sm:$0xff]  }
 0x1f8   : > { %v1665_v36 = vadd.f32 %v1564_v3, %v18508_v30  ;;  %v15934_v20 = vpop.f32.mrb[78].mxu1  ;;  %v18863_v63 = vadd.f32 %v2047_v25, %v1664_v21  ;;  %v16635_v30 = vld [vmem:[%s17623_s16 + $0xc0] sm:$0xff]   ;;  %v4077_v25 = vrot.slane %v4075_v11, 1 }
 0x1f9   : > { %16090 = vmatmul.mubr.msk.bf16.gmra.mrb[180].mxu0 %vm762_vm1, %v16631_v45  ;;  %v2065_v40 = vpop.f32.mrb[79].mxu1  ;;  %v18867_v29 = vadd.f32 %v15930_v2, %v1666_v35  ;;  %v16638_v2 = vld [vmem:[%s17623_s16 + $0xc8] sm:$0xff]  }
 0x1fa   : > { %16093 = vmatprep.mubr.msk.bf16.mxu0 %vm762_vm1, %v16634_v41  ;;  %v18870_v15 = vadd.f32 %v2050_v32, %v1665_v36  ;;  %v4078_v43 = vsel %vm565_vm2, %v4073_v4, %v4077_v25 }
 0x1fb   : > { %16144 = vmatmul.mubr.msk.bf16.gmra.mrb[184].mxu1 %vm762_vm1, %v4062_v46 }
 0x1fc   : > { %v15883_v12 = vpop.f32.mrb[76].mxu0  ;;  %16147 = vmatprep.mubr.msk.bf16.mxu1 %vm762_vm1, %v4070_v53 }
 0x1fd   : > { %v1668_v13 = vadd.f32 %v15883_v12, %v18536_v38  ;;  %v1576_v24 = vpop.f32.mrb[77].mxu0  ;;  %v17158_v12 = vld [vmem:[%s17623_s16 + $0x28] sm:$0xff]  }
 0x1fe   : > { %v1667_v33 = vadd.f32 %v1576_v24, %v18542_v51  ;;  %v15884_v45 = vpop.f32.mrb[78].mxu0  ;;  %v15937_v32 = vpop.f32.mrb[80].mxu1  ;;  %v4402_v51 = vrot.slane %v17157_v31, 1  ;;  %v4404_v4 = vrot.slane %v17158_v12, 1 }
 0x1ff   : > { %v1669_v55 = vadd.f32 %v15884_v45, %v18549_v14  ;;  %v1579_v41 = vpop.f32.mrb[79].mxu0  ;;  %v2077_v9 = vpop.f32.mrb[81].mxu1  ;;  %v18880_v59 = vadd.f32 %v15933_v39, %v1668_v13 }
 0x200   : > { %v15938_v1 = vpop.f32.mrb[82].mxu1  ;;  %v18883_v21 = vadd.f32 %v2062_v49, %v1667_v33  ;;  %v4403_v40 = vsel %vm1314_vm3, %v4401_v56, %v4402_v51 }
 0x201   : > { %16094 = vmatmul.mubr.msk.bf16.gmra.mrb[184].mxu0 %vm762_vm1, %v16635_v30  ;;  %v2079_v38 = vpop.f32.mrb[83].mxu1  ;;  %v18887_v35 = vadd.f32 %v15934_v20, %v1669_v55 }
 0x202   : > { %16097 = vmatprep.mubr.msk.bf16.mxu0 %vm762_vm1, %v16638_v2 }
 0x203   : > { %16148 = vmatmul.mubr.msk.bf16.gmra.mrb[188].mxu1 %vm762_vm1, %v4078_v43 }
 0x204   : > { %v15887_v14 = vpop.f32.mrb[80].mxu0 }
 0x205   : > { %v1671_v39 = vadd.f32 %v15887_v14, %v18578_v8  ;;  %v1591_v3 = vpop.f32.mrb[81].mxu0  ;;  %v4406_v8 = vrot.slane %v17159_v61, 1 }
 0x206   : > { %v15888_v49 = vpop.f32.mrb[82].mxu0  ;;  %v15941_v36 = vpop.f32.mrb[84].mxu1 }
 0x207   : > { %v1593_v46 = vpop.f32.mrb[83].mxu0  ;;  %v2091_v11 = vpop.f32.mrb[85].mxu1  ;;  %v18894_v53 = vadd.f32 %v15937_v32, %v1671_v39  ;;  %v4407_v9 = vsel %vm1314_vm3, %v4404_v4, %v4406_v8 }
 0x208   : > { %v1670_v20 = vadd.f32 %v1593_v46, %v18589_v52  ;;  %v15942_v30 = vpop.f32.mrb[86].mxu1  ;;  %v4405_v52 = vsel %vm1314_vm3, %v4402_v51, %v4404_v4  ;;  %v17161_v51 = vld [vmem:[%s17623_s16 + $0x40] sm:$0xff]  }
 0x209   : > { %16098 = vmatmul.mubr.msk.bf16.gmra.mrb[188].mxu0 %vm762_vm1, %v16639_v16  ;;  %v2094_v25 = vpop.f32.mrb[87].mxu1  ;;  %v4410_v39 = vrot.slane %v17161_v51, 1 }
 0x20a   : > { %16153 = vmatprep.mubr.msk.bf16.mxu0 %vm762_vm1, %v4403_v40  ;;  %v18901_v19 = vadd.f32 %v2079_v38, %v1670_v20  ;;  %v17160_v38 = vld [vmem:[%s17623_s16 + $0x38] sm:$0xff]  }
 0x20b   : > { %v4408_v31 = vrot.slane %v17160_v38, 1 }
 0x20c   : > { %v15891_v13 = vpop.f32.mrb[84].mxu0 }
 0x20d   : > { %v1605_v24 = vpop.f32.mrb[85].mxu0  ;;  %v4409_v46 = vsel %vm1314_vm3, %v4406_v8, %v4408_v31  ;;  %v4411_v4 = vsel %vm1314_vm3, %v4408_v31, %v4410_v39  ;;  %v17163_v8 = vld [vmem:[%s17623_s16 + $0x50] sm:$0xff]  }
 0x20e   : > { %v1672_v2 = vadd.f32 %v1605_v24, %v18617_v42  ;;  %v15892_v33 = vpop.f32.mrb[86].mxu0  ;;  %v15945_v45 = vpop.f32.mrb[88].mxu1 }
 0x20f   : > { %v1674_v32 = vadd.f32 %v15892_v33, %v18619_v0  ;;  %v1608_v55 = vpop.f32.mrb[87].mxu0  ;;  %v2106_v41 = vpop.f32.mrb[89].mxu1 }
 0x210   : > { %v1673_v1 = vadd.f32 %v1608_v55, %v18626_v17  ;;  %v18908_v43 = vadd.f32 %v2091_v11, %v1672_v2  ;;  %v15946_v56 = vpop.f32.mrb[90].mxu1  ;;  %v4414_v2 = vrot.slane %v17163_v8, 1 }
 0x211   : > { %v18911_v14 = vadd.f32 %v15942_v30, %v1674_v32  ;;  %16154 = vmatmul.mubr.msk.bf16.vlgmr.msra.gmra.mrb[192].mxu0 %vm762_vm1, %v4405_v52  ;;  %v2109_v42 = vpop.f32.mrb[91].mxu1 }
 0x212   : > { %v18915_v3 = vadd.f32 %v2094_v25, %v1673_v1  ;;  %16157 = vmatprep.mubr.msk.bf16.mxu0 %vm762_vm1, %v4407_v9  ;;  %v17164_v42 = vld [vmem:[%s17623_s16 + $0x58] sm:$0xff]  }
 0x213   : > { %v4416_v51 = vrot.slane %v17164_v42, 1 }
 0x214   : > { %v15895_v0 = vpop.f32.mrb[88].mxu0 }
 0x215   : > { %v1676_v17 = vadd.f32 %v15895_v0, %v18648_v57  ;;  %v1620_v16 = vpop.f32.mrb[89].mxu0  ;;  %v17162_v57 = vld [vmem:[%s17623_s16 + $0x48] sm:$0xff]  }
 0x216   : > { %v1675_v49 = vadd.f32 %v1620_v16, %v18653_v22  ;;  %v15896_v36 = vpop.f32.mrb[90].mxu0  ;;  %v15949_v11 = vpop.f32.mrb[92].mxu1  ;;  %v4412_v13 = vrot.slane %v17162_v57, 1 }
 0x217   : > { %v1677_v40 = vadd.f32 %v15896_v36, %v18655_v28  ;;  %v18922_v20 = vadd.f32 %v15945_v45, %v1676_v17  ;;  %v1623_v30 = vpop.f32.mrb[91].mxu0  ;;  %v2121_v12 = vpop.f32.mrb[93].mxu1 }
 0x218   : > { %v18925_v25 = vadd.f32 %v2106_v41, %v1675_v49  ;;  %v15950_v61 = vpop.f32.mrb[94].mxu1  ;;  %v4413_v32 = vsel %vm1314_vm3, %v4410_v39, %v4412_v13 }
 0x219   : > { %v18928_v24 = vadd.f32 %v15946_v56, %v1677_v40  ;;  %16158 = vmatmul.mubr.msk.bf16.gmra.mrb[196].mxu0 %vm762_vm1, %v4409_v46  ;;  %v2123_v22 = vpop.f32.mrb[95].mxu1  ;;  %v4415_v56 = vsel %vm1314_vm3, %v4412_v13, %v4414_v2 }
 0x21a   : > { %16161 = vmatprep.mubr.msk.bf16.mxu0 %vm762_vm1, %v4411_v4 }
 0x21c   : > { %v15899_v28 = vpop.f32.mrb[92].mxu0 }
 0x21d   : > { %v1679_v33 = vadd.f32 %v15899_v28, %v18680_v60  ;;  %v1635_v52 = vpop.f32.mrb[93].mxu0  ;;  %v17165_v60 = vld [vmem:[%s17623_s16 + $0x60] sm:$0xff]  }
 0x21e   : > { %v15900_v45 = vpop.f32.mrb[94].mxu0  ;;  %v16005_v55 = vpop.f32.mrb[96].mxu1  ;;  %v4418_v17 = vrot.slane %v17165_v60, 1 }
 0x21f   : > { %v18935_v41 = vadd.f32 %v15949_v11, %v1679_v33  ;;  %v1637_v9 = vpop.f32.mrb[95].mxu0  ;;  %v3016_v1 = vpop.f32.mrb[97].mxu1 }
 0x220   : > { %v1678_v38 = vadd.f32 %v1637_v9, %v18688_v5  ;;  %v16006_v31 = vpop.f32.mrb[98].mxu1  ;;  %v4417_v5 = vsel %vm1314_vm3, %v4414_v2, %v4416_v51  ;;  %v4419_v4 = vsel %vm1314_vm3, %v4416_v51, %v4418_v17  ;;  %v17167_v2 = vld [vmem:[%s17623_s16 + $0x70] sm:$0xff]  }
 0x221   : > { %16162 = vmatmul.mubr.msk.bf16.gmra.mrb[200].mxu0 %vm762_vm1, %v4413_v32  ;;  %v3019_v0 = vpop.f32.mrb[99].mxu1  ;;  %v4422_v33 = vrot.slane %v17167_v2, 1 }
 0x222   : > { %v18942_v16 = vadd.f32 %v2123_v22, %v1678_v38  ;;  %16165 = vmatprep.mubr.msk.bf16.mxu0 %vm762_vm1, %v4415_v56  ;;  %v17166_v22 = vld [vmem:[%s17623_s16 + $0x68] sm:$0xff]  }
 0x223   : > { %v4420_v8 = vrot.slane %v17166_v22, 1 }
 0x224   : > { %v15955_v39 = vpop.f32.mrb[96].mxu0 }
 0x225   : > { %v2645_v49 = vpop.f32.mrb[97].mxu0  ;;  %v4421_v9 = vsel %vm1314_vm3, %v4418_v17, %v4420_v8  ;;  %v4423_v51 = vsel %vm1314_vm3, %v4420_v8, %v4422_v33  ;;  %v17169_v17 = vld [vmem:[%s17623_s16 + $0x80] sm:$0xff]  }
 0x226   : > { %v2820_v36 = vadd.f32 %v2645_v49, %v18720_v18  ;;  %v15956_v46 = vpop.f32.mrb[98].mxu0  ;;  %v16009_v11 = vpop.f32.mrb[100].mxu1 }
 0x227   : > { %v2822_v40 = vadd.f32 %v15956_v46, %v18728_v47  ;;  %v2648_v30 = vpop.f32.mrb[99].mxu0  ;;  %v3031_v12 = vpop.f32.mrb[101].mxu1 }
 0x228   : > { %v2821_v61 = vadd.f32 %v2648_v30, %v18731_v23  ;;  %v18950_v57 = vadd.f32 %v3016_v1, %v2820_v36  ;;  %v16010_v13 = vpop.f32.mrb[102].mxu1  ;;  %v4426_v36 = vrot.slane %v17169_v17, 1 }
 0x229   : > { %v18953_v28 = vadd.f32 %v16006_v31, %v2822_v40  ;;  %16166 = vmatmul.mubr.msk.bf16.gmra.mrb[204].mxu0 %vm762_vm1, %v4417_v5  ;;  %v3034_v18 = vpop.f32.mrb[103].mxu1 }
 0x22a   : > { %v18957_v52 = vadd.f32 %v3019_v0, %v2821_v61  ;;  %16169 = vmatprep.mubr.msk.bf16.mxu0 %vm762_vm1, %v4419_v4  ;;  %v17170_v18 = vld [vmem:[%s17623_s16 + $0x88] sm:$0xff]  }
 0x22b   : > { %v4428_v2 = vrot.slane %v17170_v18, 1 }
 0x22c   : > { %v15959_v47 = vpop.f32.mrb[100].mxu0 }
 0x22d   : > { %v2824_v23 = vadd.f32 %v15959_v47, %v18748_v44  ;;  %v2660_v45 = vpop.f32.mrb[101].mxu0  ;;  %v17168_v44 = vld [vmem:[%s17623_s16 + $0x78] sm:$0xff]  }
 0x22e   : > { %v2823_v32 = vadd.f32 %v2660_v45, %v18755_v54  ;;  %v15960_v55 = vpop.f32.mrb[102].mxu0  ;;  %v16013_v1 = vpop.f32.mrb[104].mxu1  ;;  %v4424_v39 = vrot.slane %v17168_v44, 1 }
 0x22f   : > { %v2825_v56 = vadd.f32 %v15960_v55, %v18761_v62  ;;  %v18964_v38 = vadd.f32 %v16009_v11, %v2824_v23  ;;  %v2663_v31 = vpop.f32.mrb[103].mxu0  ;;  %v3046_v42 = vpop.f32.mrb[105].mxu1 }
 0x230   : > { %v18967_v0 = vadd.f32 %v3031_v12, %v2823_v32  ;;  %v16014_v60 = vpop.f32.mrb[106].mxu1  ;;  %v4425_v40 = vsel %vm1314_vm3, %v4422_v33, %v4424_v39 }
 0x231   : > { %v18970_v49 = vadd.f32 %v16010_v13, %v2825_v56  ;;  %16170 = vmatmul.mubr.msk.bf16.gmra.mrb[208].mxu0 %vm762_vm1, %v4421_v9  ;;  %v3048_v54 = vpop.f32.mrb[107].mxu1  ;;  %v4427_v13 = vsel %vm1314_vm3, %v4424_v39, %v4426_v36 }
 0x232   : > { %16173 = vmatprep.mubr.msk.bf16.mxu0 %vm762_vm1, %v4423_v51 }
 0x234   : > { %v15963_v62 = vpop.f32.mrb[104].mxu0 }
 0x235   : > { %v2827_v46 = vadd.f32 %v15963_v62, %v18778_v27  ;;  %v2675_v5 = vpop.f32.mrb[105].mxu0  ;;  %v17171_v27 = vld [vmem:[%s17623_s16 + $0x90] sm:$0xff]  }
 0x236   : > { %v15964_v11 = vpop.f32.mrb[106].mxu0  ;;  %v16017_v30 = vpop.f32.mrb[108].mxu1  ;;  %v4430_v23 = vrot.slane %v17171_v27, 1 }
 0x237   : > { %v18977_v12 = vadd.f32 %v16013_v1, %v2827_v46  ;;  %v2677_v4 = vpop.f32.mrb[107].mxu0  ;;  %v3060_v61 = vpop.f32.mrb[109].mxu1 }
 0x238   : > { %v2826_v22 = vadd.f32 %v2677_v4, %v18790_v10  ;;  %v16018_v8 = vpop.f32.mrb[110].mxu1  ;;  %v4429_v10 = vsel %vm1314_vm3, %v4426_v36, %v4428_v2  ;;  %v4431_v51 = vsel %vm1314_vm3, %v4428_v2, %v4430_v23  ;;  %v17173_v36 = vld [vmem:[%s17623_s16 + $0xa0] sm:$0xff]  }
 0x239   : > { %16174 = vmatmul.mubr.msk.bf16.gmra.mrb[212].mxu0 %vm762_vm1, %v4425_v40  ;;  %v3063_v47 = vpop.f32.mrb[111].mxu1  ;;  %v4434_v46 = vrot.slane %v17173_v36, 1 }
 0x23a   : > { %v18984_v45 = vadd.f32 %v3048_v54, %v2826_v22  ;;  %16177 = vmatprep.mubr.msk.bf16.mxu0 %vm762_vm1, %v4427_v13  ;;  %v17172_v54 = vld [vmem:[%s17623_s16 + $0x98] sm:$0xff]  }
 0x23b   : > { %v4432_v17 = vrot.slane %v17172_v54, 1 }
 0x23c   : > { %v15967_v33 = vpop.f32.mrb[108].mxu0 }
 0x23d   : > { %v2689_v32 = vpop.f32.mrb[109].mxu0  ;;  %v4433_v4 = vsel %vm1314_vm3, %v4430_v23, %v4432_v17  ;;  %v4435_v2 = vsel %vm1314_vm3, %v4432_v17, %v4434_v46  ;;  %v17175_v23 = vld [vmem:[%s17623_s16 + $0xb0] sm:$0xff]  }
 0x23e   : > { %v2828_v55 = vadd.f32 %v2689_v32, %v18808_v58  ;;  %v15968_v9 = vpop.f32.mrb[110].mxu0  ;;  %v16021_v1 = vpop.f32.mrb[112].mxu1 }
 0x23f   : > { %v2830_v56 = vadd.f32 %v15968_v9, %v18813_v26  ;;  %v2692_v31 = vpop.f32.mrb[111].mxu0  ;;  %v3075_v42 = vpop.f32.mrb[113].mxu1 }
 0x240   : > { %v2829_v60 = vadd.f32 %v2692_v31, %v18816_v7  ;;  %v18992_v44 = vadd.f32 %v3060_v61, %v2828_v55  ;;  %v16022_v39 = vpop.f32.mrb[114].mxu1  ;;  %v4438_v55 = vrot.slane %v17175_v23, 1 }
 0x241   : > { %v18995_v62 = vadd.f32 %v16018_v8, %v2830_v56  ;;  %16178 = vmatmul.mubr.msk.bf16.gmra.mrb[216].mxu0 %vm762_vm1, %v4429_v10  ;;  %v3078_v58 = vpop.f32.mrb[115].mxu1 }
 0x242   : > { %v18999_v5 = vadd.f32 %v3063_v47, %v2829_v60  ;;  %16181 = vmatprep.mubr.msk.bf16.mxu0 %vm762_vm1, %v4431_v51  ;;  %v17176_v58 = vld [vmem:[%s17623_s16 + $0xb8] sm:$0xff]  }
 0x243   : > { %v4440_v36 = vrot.slane %v17176_v58, 1 }
 0x244   : > { %v15971_v26 = vpop.f32.mrb[112].mxu0 }
 0x245   : > { %v2832_v7 = vadd.f32 %v15971_v26, %v18827_v48  ;;  %v2704_v11 = vpop.f32.mrb[113].mxu0  ;;  %v17174_v48 = vld [vmem:[%s17623_s16 + $0xa8] sm:$0xff]  }
 0x246   : > { %v2831_v40 = vadd.f32 %v2704_v11, %v18831_v34  ;;  %v15972_v30 = vpop.f32.mrb[114].mxu0  ;;  %v16025_v61 = vpop.f32.mrb[116].mxu1  ;;  %v4436_v33 = vrot.slane %v17174_v48, 1 }
 0x247   : > { %v2833_v13 = vadd.f32 %v15972_v30, %v18835_v37  ;;  %v19006_v22 = vadd.f32 %v16021_v1, %v2832_v7  ;;  %v2707_v8 = vpop.f32.mrb[115].mxu0  ;;  %v3090_v18 = vpop.f32.mrb[117].mxu1 }
 0x248   : > { %v19009_v47 = vadd.f32 %v3075_v42, %v2831_v40  ;;  %v16026_v27 = vpop.f32.mrb[118].mxu1  ;;  %v4437_v56 = vsel %vm1314_vm3, %v4434_v46, %v4436_v33 }
 0x249   : > { %v19012_v32 = vadd.f32 %v16022_v39, %v2833_v13  ;;  %16182 = vmatmul.mubr.msk.bf16.gmra.mrb[220].mxu0 %vm762_vm1, %v4433_v4  ;;  %v3092_v34 = vpop.f32.mrb[119].mxu1  ;;  %v4439_v39 = vsel %vm1314_vm3, %v4436_v33, %v4438_v55 }
 0x24a   : > { %16185 = vmatprep.mubr.msk.bf16.mxu0 %vm762_vm1, %v4435_v2 }
 0x24c   : > { %v15975_v37 = vpop.f32.mrb[116].mxu0 }
 0x24d   : > { %v2835_v9 = vadd.f32 %v15975_v37, %v18844_v50  ;;  %v2719_v10 = vpop.f32.mrb[117].mxu0  ;;  %v17177_v50 = vld [vmem:[%s17623_s16 + $0xc0] sm:$0xff]  }
 0x24e   : > { %v15976_v1 = vpop.f32.mrb[118].mxu0  ;;  %v16029_v31 = vpop.f32.mrb[120].mxu1  ;;  %v4442_v7 = vrot.slane %v17177_v50, 1 }
 0x24f   : > { %v19019_v42 = vadd.f32 %v16025_v61, %v2835_v9  ;;  %v2721_v51 = vpop.f32.mrb[119].mxu0  ;;  %v3104_v60 = vpop.f32.mrb[121].mxu1 }
 0x250   : > { %v2834_v54 = vadd.f32 %v2721_v51, %v18852_v6  ;;  %v16030_v17 = vpop.f32.mrb[122].mxu1  ;;  %v4441_v6 = vsel %vm1314_vm3, %v4438_v55, %v4440_v36  ;;  %v4443_v2 = vsel %vm1314_vm3, %v4440_v36, %v4442_v7  ;;  %v17179_v55 = vld [vmem:[%s17623_s16 + $0xd0] sm:$0xff]  }
 0x251   : > { %16186 = vmatmul.mubr.msk.bf16.gmra.mrb[224].mxu0 %vm762_vm1, %v4437_v56  ;;  %v3107_v26 = vpop.f32.mrb[123].mxu1  ;;  %v4446_v9 = vrot.slane %v17179_v55, 1 }
 0x252   : > { %v19026_v11 = vadd.f32 %v3092_v34, %v2834_v54  ;;  %16189 = vmatprep.mubr.msk.bf16.mxu0 %vm762_vm1, %v4439_v39  ;;  %v17178_v34 = vld [vmem:[%s17623_s16 + $0xc8] sm:$0xff]  }
 0x253   : > { %v4444_v23 = vrot.slane %v17178_v34, 1 }
 0x254   : > { %v15979_v46 = vpop.f32.mrb[120].mxu0 }
 0x255   : > { %v2733_v40 = vpop.f32.mrb[121].mxu0  ;;  %v4445_v51 = vsel %vm1314_vm3, %v4442_v7, %v4444_v23  ;;  %v4447_v36 = vsel %vm1314_vm3, %v4444_v23, %v4446_v9  ;;  %v17180_v46 = vld [vmem:[%s17623_s16 + $0xd8] ss:$0 sps:$4 sm:$0x11]  }
 0x256   : > { %v2836_v30 = vadd.f32 %v2733_v40, %v18863_v63  ;;  %v15980_v4 = vpop.f32.mrb[122].mxu0  ;;  %v16033_v61 = vpop.f32.mrb[124].mxu1  ;;  %v4448_v40 = vrot.slane %v17180_v46, 1 }
 0x257   : > { %v2838_v13 = vadd.f32 %v15980_v4, %v18867_v29  ;;  %v2736_v8 = vpop.f32.mrb[123].mxu0  ;;  %v3119_v18 = vpop.f32.mrb[125].mxu1 }
 0x258   : > { %v2837_v27 = vadd.f32 %v2736_v8, %v18870_v15  ;;  %v19034_v48 = vadd.f32 %v3104_v60, %v2836_v30  ;;  %v16034_v33 = vpop.f32.mrb[126].mxu1 }
 0x259   : > { %v19037_v37 = vadd.f32 %v16030_v17, %v2838_v13  ;;  %16190 = vmatmul.mubr.msk.bf16.gmra.mrb[228].mxu0 %vm762_vm1, %v4441_v6  ;;  %v3122_v63 = vpop.f32.mrb[127].mxu1  ;;  %v4449_v6 = vsel %vm1314_vm3, %v4446_v9, %v4448_v40 }
 0x25a   : > { %v19041_v10 = vadd.f32 %v3107_v26, %v2837_v27  ;;  %16193 = vmatprep.mubr.msk.bf16.mxu0 %vm762_vm1, %v4443_v2 }
 0x25c   : > { %v15983_v29 = vpop.f32.mrb[124].mxu0 }
 0x25d   : > { %v2840_v1 = vadd.f32 %v15983_v29, %v18880_v59  ;;  %v2748_v15 = vpop.f32.mrb[125].mxu0 }
 0x25e   : > { %v2839_v56 = vadd.f32 %v2748_v15, %v18883_v21  ;;  %v15984_v31 = vpop.f32.mrb[126].mxu0  ;;  %v16037_v60 = vpop.f32.mrb[128].mxu1 }
 0x25f   : > { %v2841_v39 = vadd.f32 %v15984_v31, %v18887_v35  ;;  %v19048_v54 = vadd.f32 %v16033_v61, %v2840_v1  ;;  %v2751_v17 = vpop.f32.mrb[127].mxu0  ;;  %v3134_v58 = vpop.f32.mrb[129].mxu1 }
 0x260   : > { %v19051_v26 = vadd.f32 %v3119_v18, %v2839_v56  ;;  %v16038_v50 = vpop.f32.mrb[130].mxu1 }
 0x261   : > { %v19053_v59 = vadd.f32 %v16034_v33, %v2841_v39  ;;  %16194 = vmatmul.mubr.msk.bf16.gmra.mrb[232].mxu0 %vm762_vm1, %v4445_v51  ;;  %v3136_v21 = vpop.f32.mrb[131].mxu1 }
 0x262   : > { %16197 = vmatprep.mubr.msk.bf16.mxu0 %vm762_vm1, %v4447_v36 }
 0x264   : > { %v15987_v7 = vpop.f32.mrb[128].mxu0 }
 0x265   : > { %v2843_v35 = vadd.f32 %v15987_v7, %v18894_v53  ;;  %v2763_v30 = vpop.f32.mrb[129].mxu0 }
 0x266   : > { %v15988_v4 = vpop.f32.mrb[130].mxu0  ;;  %v16041_v61 = vpop.f32.mrb[132].mxu1 }
 0x267   : > { %v19060_v13 = vadd.f32 %v16037_v60, %v2843_v35  ;;  %v2765_v8 = vpop.f32.mrb[131].mxu0  ;;  %v3148_v18 = vpop.f32.mrb[133].mxu1 }
 0x268   : > { %v2842_v2 = vadd.f32 %v2765_v8, %v18901_v19  ;;  %v16042_v27 = vpop.f32.mrb[134].mxu1 }
 0x269   : > { %16198 = vmatmul.mubr.msk.bf16.gmra.mrb[236].mxu0 %vm762_vm1, %v4449_v6  ;;  %v3151_v33 = vpop.f32.mrb[135].mxu1  ;;  %vm7133_vm1 = vcmask 261120  }
 0x26a   : > { %v19064_v34 = vadd.f32 %v3136_v21, %v2842_v2 }
 0x26c   : > { %v15991_v23 = vpop.f32.mrb[132].mxu0 }
 0x26d   : > { %v2777_v63 = vpop.f32.mrb[133].mxu0 }
 0x26e   : > { %v2844_v53 = vadd.f32 %v2777_v63, %v18908_v43  ;;  %v15992_v55 = vpop.f32.mrb[134].mxu0  ;;  %v16045_v29 = vpop.f32.mrb[136].mxu1 }
 0x26f   : > { %v2846_v9 = vadd.f32 %v15992_v55, %v18911_v14  ;;  %v2780_v1 = vpop.f32.mrb[135].mxu0  ;;  %v3163_v15 = vpop.f32.mrb[137].mxu1 }
 0x270   : > { %v2845_v56 = vadd.f32 %v2780_v1, %v18915_v3  ;;  %v19069_v31 = vadd.f32 %v3148_v18, %v2844_v53  ;;  %v16046_v19 = vpop.f32.mrb[138].mxu1 }
 0x271   : > { %v19071_v51 = vadd.f32 %v16042_v27, %v2846_v9  ;;  %v3166_v60 = vpop.f32.mrb[139].mxu1 }
 0x272   : > { %v19073_v39 = vadd.f32 %v3151_v33, %v2845_v56 }
 0x274   : > { %v15995_v17 = vpop.f32.mrb[136].mxu0 }
 0x275   : > { %v2848_v58 = vadd.f32 %v15995_v17, %v18922_v20  ;;  %v2792_v43 = vpop.f32.mrb[137].mxu0 }
 0x276   : > { %v2847_v36 = vadd.f32 %v2792_v43, %v18925_v25  ;;  %v15996_v50 = vpop.f32.mrb[138].mxu0  ;;  %v16049_v14 = vpop.f32.mrb[140].mxu1 }
 0x277   : > { %v2849_v21 = vadd.f32 %v15996_v50, %v18928_v24  ;;  %v19078_v46 = vadd.f32 %v16045_v29, %v2848_v58  ;;  %v2795_v3 = vpop.f32.mrb[139].mxu0  ;;  %v3178_v40 = vpop.f32.mrb[141].mxu1 }
 0x278   : > { %v19080_v7 = vadd.f32 %v3163_v15, %v2847_v36  ;;  %v16050_v35 = vpop.f32.mrb[142].mxu1 }
 0x279   : > { %v19082_v30 = vadd.f32 %v16046_v19, %v2849_v21  ;;  %v3180_v4 = vpop.f32.mrb[143].mxu1 }
 0x27c   : > { %v15999_v6 = vpop.f32.mrb[140].mxu0 }
 0x27d   : > { %v2851_v20 = vadd.f32 %v15999_v6, %v18935_v41  ;;  %v2807_v61 = vpop.f32.mrb[141].mxu0 }
 0x27e   : > { %v16000_v8 = vpop.f32.mrb[142].mxu0  ;;  %v16105_v25 = vpop.f32.mrb[144].mxu1 }
 0x27f   : > { %v19085_v18 = vadd.f32 %v16049_v14, %v2851_v20  ;;  %v2809_v2 = vpop.f32.mrb[143].mxu0  ;;  %v4188_v24 = vpop.f32.mrb[145].mxu1 }
 0x280   : > { %v2850_v27 = vadd.f32 %v2809_v2, %v18942_v16  ;;  %v16106_v33 = vpop.f32.mrb[146].mxu1 }
 0x281   : > { %v4191_v23 = vpop.f32.mrb[147].mxu1 }
 0x282   : > { %v19088_v63 = vadd.f32 %v3180_v4, %v2850_v27 }
 0x284   : > { %v16055_v53 = vpop.f32.mrb[144].mxu0 }
 0x285   : > { %v3502_v55 = vpop.f32.mrb[145].mxu0 }
 0x286   : > { %v3677_v29 = vadd.f32 %v3502_v55, %v18950_v57  ;;  %v16056_v9 = vpop.f32.mrb[146].mxu0  ;;  %v16109_v1 = vpop.f32.mrb[148].mxu1 }
 0x287   : > { %v3679_v41 = vadd.f32 %v16056_v9, %v18953_v28  ;;  %v3505_v15 = vpop.f32.mrb[147].mxu0  ;;  %v4203_v56 = vpop.f32.mrb[149].mxu1 }
 0x288   : > { %v3678_v19 = vadd.f32 %v3505_v15, %v18957_v52  ;;  %v19093_v60 = vadd.f32 %v4188_v24, %v3677_v29  ;;  %v16110_v17 = vpop.f32.mrb[150].mxu1  ;;  %v17381_v15 = vmov 0  }
 0x289   : > { %v19095_v16 = vadd.f32 %v16106_v33, %v3679_v41  ;;  %v4206_v58 = vpop.f32.mrb[151].mxu1  ;;  %6505 = vst.msk [vmem:[#allocation2 + $0x8] sm:$0xf] %vm6502_vm4, %v17381_v15  ;;  %6506 = vst.msk [vmem:[#allocation2 + $0xc] sm:$0xf] %vm6502_vm4, %v17381_v15 }
 0x28a   : > { %v19097_v43 = vadd.f32 %v4191_v23, %v3678_v19  ;;  %6503 = vst.msk [vmem:[#allocation2] sm:$0xf] %vm6502_vm4, %v17381_v15  ;;  %6504 = vst.msk [vmem:[#allocation2 + $0x4] sm:$0xf] %vm6502_vm4, %v17381_v15 }
 0x28b   : > { %6507 = vst.msk [vmem:[#allocation2 + $0x10] sm:$0xf] %vm6502_vm4, %v17381_v15  ;;  %6508 = vst.msk [vmem:[#allocation2 + $0x14] sm:$0xf] %vm6502_vm4, %v17381_v15 }
 0x28c   : > { %v16059_v36 = vpop.f32.mrb[148].mxu0  ;;  %6509 = vst.msk [vmem:[#allocation2 + $0x18] sm:$0xf] %vm6502_vm4, %v17381_v15  ;;  %6510 = vst.msk [vmem:[#allocation2 + $0x1c] sm:$0xf] %vm6502_vm4, %v17381_v15 }
 0x28d   : > { %v3681_v50 = vadd.f32 %v16059_v36, %v18964_v38  ;;  %v3517_v57 = vpop.f32.mrb[149].mxu0  ;;  %6511 = vst.msk [vmem:[#allocation2 + $0x20] sm:$0xf] %vm6502_vm4, %v17381_v15  ;;  %6512 = vst.msk [vmem:[#allocation2 + $0x24] sm:$0xf] %vm6502_vm4, %v17381_v15 }
 0x28e   : > { %v3680_v14 = vadd.f32 %v3517_v57, %v18967_v0  ;;  %v16060_v21 = vpop.f32.mrb[150].mxu0  ;;  %v16113_v28 = vpop.f32.mrb[152].mxu1  ;;  %6513 = vst.msk [vmem:[#allocation2 + $0x28] sm:$0xf] %vm6502_vm4, %v17381_v15  ;;  %6514 = vst.msk [vmem:[#allocation2 + $0x2c] sm:$0xf] %vm6502_vm4, %v17381_v15 }
 0x28f   : > { %v3682_v3 = vadd.f32 %v16060_v21, %v18970_v49  ;;  %v19102_v40 = vadd.f32 %v16109_v1, %v3681_v50  ;;  %v3520_v52 = vpop.f32.mrb[151].mxu0  ;;  %v4218_v35 = vpop.f32.mrb[153].mxu1  ;;  %6515 = vst.msk [vmem:[#allocation2 + $0x30] sm:$0xf] %vm6502_vm4, %v17381_v15  ;;  %6516 = vst.msk [vmem:[#allocation2 + $0x34] sm:$0xf] %vm6502_vm4, %v17381_v15 }
 0x290   : > { %v19104_v4 = vadd.f32 %v4203_v56, %v3680_v14  ;;  %v16114_v6 = vpop.f32.mrb[154].mxu1  ;;  %6517 = vst.msk [vmem:[#allocation2 + $0x38] sm:$0xf] %vm6502_vm4, %v17381_v15  ;;  %6518 = vst.msk [vmem:[#allocation2 + $0x3c] sm:$0xf] %vm6502_vm4, %v17381_v15 }
 0x291   : > { %v19106_v20 = vadd.f32 %v16110_v17, %v3682_v3  ;;  %v4220_v61 = vpop.f32.mrb[155].mxu1  ;;  %6519 = vst.msk [vmem:[#allocation2 + $0x40] sm:$0xf] %vm6502_vm4, %v17381_v15  ;;  %6520 = vst.msk [vmem:[#allocation2 + $0x44] sm:$0xf] %vm6502_vm4, %v17381_v15 }
 0x292   : > { %6521 = vst.msk [vmem:[#allocation2 + $0x48] sm:$0xf] %vm6502_vm4, %v17381_v15  ;;  %6522 = vst.msk [vmem:[#allocation2 + $0x4c] sm:$0xf] %vm6502_vm4, %v17381_v15 }
 0x293   : > { %6523 = vst.msk [vmem:[#allocation2 + $0x50] sm:$0xf] %vm6502_vm4, %v17381_v15  ;;  %8830 = vst [vmem:[#allocation3] sm:$0xff] %v17381_v15  ;;  %vm17384_vm4 = vmmov 0  }
 0x294   : > { %v16063_v8 = vpop.f32.mrb[152].mxu0  ;;  %8831 = vst [vmem:[#allocation3 + $0x8] sm:$0xff] %v17381_v15  ;;  %8832 = vst [vmem:[#allocation3 + $0x10] sm:$0xff] %v17381_v15 }
 0x295   : > { %v3684_v38 = vadd.f32 %v16063_v8, %v18977_v12  ;;  %v3532_v25 = vpop.f32.mrb[153].mxu0  ;;  %8833 = vst [vmem:[#allocation3 + $0x18] sm:$0xff] %v17381_v15  ;;  %8834 = vst [vmem:[#allocation3 + $0x20] sm:$0xff] %v17381_v15 }
 0x296   : > { %v16064_v2 = vpop.f32.mrb[154].mxu0  ;;  %v16117_v0 = vpop.f32.mrb[156].mxu1  ;;  %8835 = vst [vmem:[#allocation3 + $0x28] sm:$0xff] %v17381_v15  ;;  %8836 = vst [vmem:[#allocation3 + $0x30] sm:$0xff] %v17381_v15 }
 0x297   : > { %v19109_v24 = vadd.f32 %v16113_v28, %v3684_v38  ;;  %v3534_v27 = vpop.f32.mrb[155].mxu0  ;;  %v4232_v49 = vpop.f32.mrb[157].mxu1  ;;  %8837 = vst [vmem:[#allocation3 + $0x38] sm:$0xff] %v17381_v15  ;;  %8838 = vst [vmem:[#allocation3 + $0x40] sm:$0xff] %v17381_v15 }
 0x298   : > { %v3683_v33 = vadd.f32 %v3534_v27, %v18984_v45  ;;  %v16118_v23 = vpop.f32.mrb[158].mxu1  ;;  %8839 = vst [vmem:[#allocation3 + $0x48] sm:$0xff] %v17381_v15  ;;  %8840 = vst [vmem:[#allocation3 + $0x50] sm:$0xff] %v17381_v15 }
 0x299   : > { %v19112_v53 = vpop.f32.mrb[159].mxu1  ;;  %8841 = vst [vmem:[#allocation3 + $0x58] sm:$0xff] %v17381_v15  ;;  %8842 = vst [vmem:[#allocation3 + $0x60] sm:$0xff] %v17381_v15 }
 0x29a   : > { %v19114_v55 = vadd.f32 %v4220_v61, %v3683_v33  ;;  %8843 = vst [vmem:[#allocation3 + $0x68] sm:$0xff] %v17381_v15  ;;  %8844 = vst [vmem:[#allocation3 + $0x70] sm:$0xff] %v17381_v15 }
 0x29b   : > { %8845 = vst [vmem:[#allocation3 + $0x78] sm:$0xff] %v17381_v15  ;;  %8846 = vst [vmem:[#allocation3 + $0x80] sm:$0xff] %v17381_v15 }
 0x29c   : > { %v16067_v29 = vpop.f32.mrb[156].mxu0  ;;  %8847 = vst [vmem:[#allocation3 + $0x88] sm:$0xff] %v17381_v15  ;;  %8848 = vst [vmem:[#allocation3 + $0x90] sm:$0xff] %v17381_v15 }
 0x29d   : > { %v3546_v9 = vpop.f32.mrb[157].mxu0  ;;  %8849 = vst [vmem:[#allocation3 + $0x98] sm:$0xff] %v17381_v15  ;;  %8850 = vst [vmem:[#allocation3 + $0xa0] sm:$0xff] %v17381_v15 }
 0x29e   : > { %v3685_v1 = vadd.f32 %v3546_v9, %v18992_v44  ;;  %v16068_v12 = vpop.f32.mrb[158].mxu0  ;;  %v19117_v41 = vpop.f32.mrb[160].mxu1  ;;  %8851 = vst [vmem:[#allocation3 + $0xa8] sm:$0xff] %v17381_v15  ;;  %8852 = vst [vmem:[#allocation3 + $0xb0] sm:$0xff] %v17381_v15 }
 0x29f   : > { %8853 = vst [vmem:[#allocation3 + $0xb8] sm:$0xff] %v17381_v15  ;;  %8854 = vst [vmem:[#allocation3 + $0xc0] sm:$0xf] %v17381_v15  ;;  %v3687_v45 = vadd.f32 %v16068_v12, %v18995_v62  ;;  %v3549_v44 = vpop.f32.mrb[159].mxu0  ;;  %v4247_v56 = vpop.f32.mrb[161].mxu1 }
 0x2a0   : > { %v3686_v19 = vadd.f32 %v3549_v44, %v18999_v5  ;;  %v19142_v17 = vadd.f32 %v4232_v49, %v3685_v1  ;;  %v16122_v58 = vpop.f32.mrb[162].mxu1 }
 0x2a1   : > { %v19144_v36 = vadd.f32 %v16118_v23, %v3687_v45  ;;  %v4250_v50 = vpop.f32.mrb[163].mxu1 }
 0x2a2   : > { %v19147_v57 = vadd.f32 %v19112_v53, %v3686_v19 }
 0x2a4   : > { %v16071_v14 = vpop.f32.mrb[160].mxu0 }
 0x2a5   : > { %v3689_v21 = vadd.f32 %v16071_v14, %v19006_v22  ;;  %v3561_v28 = vpop.f32.mrb[161].mxu0 }
 0x2a6   : > { %v3688_v3 = vadd.f32 %v3561_v28, %v19009_v47  ;;  %v16072_v62 = vpop.f32.mrb[162].mxu0  ;;  %v16125_v52 = vpop.f32.mrb[164].mxu1 }
 0x2a7   : > { %v3690_v35 = vadd.f32 %v16072_v62, %v19012_v32  ;;  %v19153_v5 = vadd.f32 %v19117_v41, %v3689_v21  ;;  %v3564_v6 = vpop.f32.mrb[163].mxu0  ;;  %v4262_v61 = vpop.f32.mrb[165].mxu1 }
 0x2a8   : > { %v19155_v8 = vadd.f32 %v4247_v56, %v3688_v3  ;;  %v16126_v38 = vpop.f32.mrb[166].mxu1 }
 0x2a9   : > { %v19157_v25 = vadd.f32 %v16122_v58, %v3690_v35  ;;  %v4264_v2 = vpop.f32.mrb[167].mxu1 }
 0x2ac   : > { %v16075_v0 = vpop.f32.mrb[164].mxu0 }
 0x2ad   : > { %v3692_v22 = vadd.f32 %v16075_v0, %v19019_v42  ;;  %v3576_v27 = vpop.f32.mrb[165].mxu0 }
 0x2ae   : > { %v16076_v47 = vpop.f32.mrb[166].mxu0  ;;  %v16129_v49 = vpop.f32.mrb[168].mxu1 }
 0x2af   : > { %v19160_v33 = vadd.f32 %v16125_v52, %v3692_v22  ;;  %v3578_v32 = vpop.f32.mrb[167].mxu0  ;;  %v4276_v23 = vpop.f32.mrb[169].mxu1 }
 0x2b0   : > { %v3691_v53 = vadd.f32 %v3578_v32, %v19026_v11  ;;  %v16130_v29 = vpop.f32.mrb[170].mxu1 }
 0x2b1   : > { %v4279_v9 = vpop.f32.mrb[171].mxu1 }
 0x2b2   : > { %v19163_v1 = vadd.f32 %v4264_v2, %v3691_v53 }
 0x2b4   : > { %v16079_v12 = vpop.f32.mrb[168].mxu0 }
 0x2b5   : > { %v3590_v41 = vpop.f32.mrb[169].mxu0 }
 0x2b6   : > { %v3693_v15 = vadd.f32 %v3590_v41, %v19034_v48  ;;  %v16080_v45 = vpop.f32.mrb[170].mxu0  ;;  %v16133_v44 = vpop.f32.mrb[172].mxu1 }
 0x2b7   : > { %v3695_v42 = vadd.f32 %v16080_v45, %v19037_v37  ;;  %v3593_v56 = vpop.f32.mrb[171].mxu0  ;;  %v4291_v19 = vpop.f32.mrb[173].mxu1 }
 0x2b8   : > { %v3694_v58 = vadd.f32 %v3593_v56, %v19041_v10  ;;  %v19168_v50 = vadd.f32 %v4276_v23, %v3693_v15  ;;  %v16134_v14 = vpop.f32.mrb[174].mxu1 }
 0x2b9   : > { %v19170_v11 = vadd.f32 %v16130_v29, %v3695_v42  ;;  %v4294_v21 = vpop.f32.mrb[175].mxu1 }
 0x2ba   : > { %v19172_v28 = vadd.f32 %v4279_v9, %v3694_v58 }
 0x2bc   : > { %v16083_v3 = vpop.f32.mrb[172].mxu0 }
 0x2bd   : > { %v3697_v62 = vadd.f32 %v16083_v3, %v19048_v54  ;;  %v3605_v48 = vpop.f32.mrb[173].mxu0 }
 0x2be   : > { %v3696_v52 = vadd.f32 %v3605_v48, %v19051_v26  ;;  %v16084_v35 = vpop.f32.mrb[174].mxu0  ;;  %v16137_v37 = vpop.f32.mrb[176].mxu1 }
 0x2bf   : > { %v3698_v6 = vadd.f32 %v16084_v35, %v19053_v59  ;;  %v19177_v61 = vadd.f32 %v16133_v44, %v3697_v62  ;;  %v3608_v10 = vpop.f32.mrb[175].mxu0  ;;  %v4306_v38 = vpop.f32.mrb[177].mxu1 }
 0x2c0   : > { %v19179_v2 = vadd.f32 %v4291_v19, %v3696_v52  ;;  %v16138_v0 = vpop.f32.mrb[178].mxu1 }
 0x2c1   : > { %v19181_v22 = vadd.f32 %v16134_v14, %v3698_v6  ;;  %v4308_v27 = vpop.f32.mrb[179].mxu1 }
 0x2c2   : > { %20734 = vst [vmem:[#allocation22_spill] sm:$0xff] %v19179_v2 }
 0x2c3   : > { %20735 = vst [vmem:[#allocation23_spill] sm:$0xff] %v19181_v22 }
 0x2c4   : > { %v16087_v47 = vpop.f32.mrb[176].mxu0 }
 0x2c5   : > { %v3700_v54 = vadd.f32 %v16087_v47, %v19060_v13  ;;  %v3620_v49 = vpop.f32.mrb[177].mxu0 }
 0x2c6   : > { %v16088_v32 = vpop.f32.mrb[178].mxu0  ;;  %v16141_v26 = vpop.f32.mrb[180].mxu1 }
 0x2c7   : > { %v19184_v23 = vadd.f32 %v16137_v37, %v3700_v54  ;;  %v3622_v53 = vpop.f32.mrb[179].mxu0  ;;  %v4320_v59 = vpop.f32.mrb[181].mxu1 }
 0x2c8   : > { %v3699_v29 = vadd.f32 %v3622_v53, %v19064_v34  ;;  %v16142_v9 = vpop.f32.mrb[182].mxu1  ;;  %v16643_v34 = vld [vmem:[#allocation7 + $0x10] sm:$0xff]  }
 0x2c9   : > { %20736 = vst [vmem:[#allocation24_spill] sm:$0xff] %v19184_v23  ;;  %v4323_v12 = vpop.f32.mrb[183].mxu1  ;;  %16201 = vmatprep.subr.bf16.mxu1 %v16643_v34 }
 0x2ca   : > { %v19187_v41 = vadd.f32 %v4308_v27, %v3699_v29  ;;  %16202 = vmatpush3.bf16.msra.mxu1 %v16643_v34 }
 0x2cc   : > { %20737 = vst [vmem:[#allocation25_spill] sm:$0xff] %v19187_v41  ;;  %v16091_v15 = vpop.f32.mrb[180].mxu0 }
 0x2cd   : > { %v3634_v45 = vpop.f32.mrb[181].mxu0  ;;  %v4873_v15 = vlaneseq }
 0x2ce   : > { %v3701_v44 = vadd.f32 %v3634_v45, %v19069_v31  ;;  %v16092_v42 = vpop.f32.mrb[182].mxu0  ;;  %v16145_v56 = vpop.f32.mrb[184].mxu1 }
 0x2cf   : > { %v3703_v13 = vadd.f32 %v16092_v42, %v19071_v51  ;;  %v3637_v19 = vpop.f32.mrb[183].mxu0  ;;  %v4335_v58 = vpop.f32.mrb[185].mxu1 }
 0x2d0   : > { %v3702_v14 = vadd.f32 %v3637_v19, %v19073_v39  ;;  %v19192_v21 = vadd.f32 %v4320_v59, %v3701_v44  ;;  %v16146_v3 = vpop.f32.mrb[186].mxu1 }
 0x2d1   : > { %v19194_v62 = vadd.f32 %v16142_v9, %v3703_v13  ;;  %v4338_v48 = vpop.f32.mrb[187].mxu1  ;;  %v17382_v9 = vmov 1983009808  }
 0x2d2   : > { %20738 = vst [vmem:[#allocation26_spill] sm:$0xff] %v19192_v21  ;;  %v19196_v52 = vadd.f32 %v4323_v12, %v3702_v14  ;;  %v4871_v12 = vunpack.c.l.s4 %v17382_v9 }
 0x2d3   : > { %20739 = vst [vmem:[#allocation27_spill] sm:$0xff] %v19194_v62 }
 0x2d4   : > { %20740 = vst [vmem:[#allocation28_spill] sm:$0xff] %v19196_v52  ;;  %v16095_v31 = vpop.f32.mrb[184].mxu0  ;;  %v4872_v42 = vunpack.c.0.s8 %v4871_v12 }
 0x2d5   : > { %v3705_v35 = vadd.f32 %v16095_v31, %v19078_v46  ;;  %v3649_v37 = vpop.f32.mrb[185].mxu0 }
 0x2d6   : > { %v3704_v51 = vadd.f32 %v3649_v37, %v19080_v7  ;;  %v16096_v6 = vpop.f32.mrb[186].mxu0  ;;  %v16149_v10 = vpop.f32.mrb[188].mxu1 }
 0x2d7   : > { %v3706_v39 = vadd.f32 %v16096_v6, %v19082_v30  ;;  %v19201_v38 = vadd.f32 %v16145_v56, %v3705_v35  ;;  %v3652_v0 = vpop.f32.mrb[187].mxu0  ;;  %v4350_v27 = vpop.f32.mrb[189].mxu1  ;;  %v4874_v56 = vshrl.u32 %v4873_v15, 7 }
 0x2d8   : > { %v19203_v47 = vadd.f32 %v4335_v58, %v3704_v51  ;;  %v16150_v54 = vpop.f32.mrb[190].mxu1 }
 0x2d9   : > { %20741 = vst [vmem:[#allocation29_spill] sm:$0xff] %v19201_v38  ;;  %v19205_v49 = vadd.f32 %v16146_v3, %v3706_v39  ;;  %v4352_v32 = vpop.f32.mrb[191].mxu1  ;;  %v19221_v34 = vsub.s32 %v4872_v42, %v4874_v56 }
 0x2da   : > { %20742 = vst [vmem:[#allocation30_spill] sm:$0xff] %v19203_v47 }
 0x2db   : > { %20743 = vst [vmem:[#allocation31_spill] sm:$0xff] %v19205_v49 }
 0x2dc   : > { %v16099_v26 = vpop.f32.mrb[188].mxu0 }
 0x2dd   : > { %v3708_v46 = vadd.f32 %v16099_v26, %v19085_v18  ;;  %v3664_v53 = vpop.f32.mrb[189].mxu0  ;;  %v19216_v18 = vld [vmem:[%s20693_s2] ss:$0 sm:$0xff] }
 0x2de   : > { %v16100_v59 = vpop.f32.mrb[190].mxu0 }
 0x2df   : > { %v19208_v7 = vadd.f32 %v16149_v10, %v3708_v46  ;;  %v3666_v29 = vpop.f32.mrb[191].mxu0 }
 0x2e0   : > { %v3707_v30 = vadd.f32 %v3666_v29, %v19088_v63 }
 0x2e1   : > { %20744 = vst [vmem:[#allocation32_spill] sm:$0xff] %v19208_v7 }
 0x2e2   : > { %v19211_v45 = vadd.f32 %v4352_v32, %v3707_v30 }
 0x2e4   : > { %20745 = vst [vmem:[#allocation33_spill] sm:$0xff] %v19211_v45  ;;  %v16155_v44 = vpop.f32.mrb[192].mxu0 }
 0x2e5   : > { %v4559_v13 = vpop.f32.mrb[193].mxu0 }
 0x2e6   : > { %v4734_v19 = vadd.f32 %v4559_v13, %v19093_v60  ;;  %v16156_v58 = vpop.f32.mrb[194].mxu0 }
 0x2e7   : > { %v4736_v14 = vadd.f32 %v16156_v58, %v19095_v16  ;;  %v4562_v63 = vpop.f32.mrb[195].mxu0 }
 0x2e8   : > { %v4773_v3 = vadd.f32 %v19216_v18, %v4734_v19  ;;  %v4735_v48 = vadd.f32 %v4562_v63, %v19097_v43 }
 0x2e9   : > { %v4775_v31 = vadd.f32 %v19216_v18, %v4736_v14 }
 0x2ea   : > { %v4805_v35 = vmax.f32 %v4773_v3, 0.0  ;;  %v4774_v37 = vadd.f32 %v19216_v18, %v4735_v48 }
 0x2eb   : > { %v4807_v51 = vmax.f32 %v4775_v31, 0.0 }
 0x2ec   : > { %v4869_v6 = vcombine.high %v4805_v35, %v4805_v35  ;;  %v4876_v60 = vrot.slane %v4805_v35, %v19221_v34  ;;  %v19227_v10 = vmax.f32 %v4774_v37, 0.0  ;;  %v16159_v16 = vpop.f32.mrb[196].mxu0 }
 0x2ed   : > { %v4903_v39 = vcombine.high %v4807_v51, %v4807_v51  ;;  %v4910_v0 = vrot.slane %v4807_v51, %v19221_v34  ;;  %v19231_v27 = vadd.f32 %v16159_v16, %v19102_v40  ;;  %v19233_v43 = vpop.f32.mrb[197].mxu0 }
 0x2ee   : > { %v4883_v54 = vrot.slane %v4869_v6, %v19221_v34  ;;  %v4884_v32 = vcombine.high %v4876_v60, %v4876_v60  ;;  %v5542_v26 = vsel %vm5541_vm5, %v4876_v60, -inf  ;;  %v19239_v53 = vpop.f32.mrb[198].mxu0 }
 0x2ef   : > { %v5543_v59 = vrot.slane %v5542_v26, 4  ;;  %v4917_v29 = vrot.slane %v4903_v39, %v19221_v34  ;;  %v4918_v30 = vcombine.high %v4910_v0, %v4910_v0  ;;  %v5598_v9 = vsel %vm5541_vm5, %v4910_v0, -inf  ;;  %v4577_v40 = vpop.f32.mrb[199].mxu0 }
 0x2f0   : > { %v4885_v12 = vcombine.high %v4883_v54, %v4883_v54  ;;  %v5549_v15 = vsel %vm5541_vm5, %v4884_v32, -inf  ;;  %v5556_v44 = vsel %vm5541_vm5, %v4883_v54, -inf  ;;  %v5599_v42 = vrot.slane %v5598_v9, 4 }
 0x2f1   : > { %v5544_v56 = vmax.f32 %v5542_v26, %v5543_v59  ;;  %v5550_v13 = vrot.slane %v5549_v15, 4  ;;  %v5557_v19 = vrot.slane %v5556_v44, 4  ;;  %v4919_v58 = vcombine.high %v4917_v29, %v4917_v29 }
 0x2f2   : > { %v5563_v14 = vsel %vm5541_vm5, %v4885_v12, -inf  ;;  %v5600_v63 = vmax.f32 %v5598_v9, %v5599_v42  ;;  %v5605_v3 = vsel %vm5541_vm5, %v4918_v30, -inf  ;;  %v5612_v48 = vsel %vm5541_vm5, %v4917_v29, -inf }
 0x2f3   : > { %v5545_v31 = vrot.slane %v5544_v56, 2  ;;  %v5551_v35 = vmax.f32 %v5549_v15, %v5550_v13  ;;  %v5558_v37 = vmax.f32 %v5556_v44, %v5557_v19  ;;  %v5564_v51 = vrot.slane %v5563_v14, 4 }
 0x2f4   : > { %v5601_v6 = vrot.slane %v5600_v63, 2  ;;  %v5606_v60 = vrot.slane %v5605_v3, 4  ;;  %v5613_v16 = vrot.slane %v5612_v48, 4  ;;  %v5619_v39 = vsel %vm5541_vm5, %v4919_v58, -inf  ;;  %v19249_v0 = vpop.f32.mrb[200].mxu0 }
 0x2f5   : > { %v5546_v54 = vmax.f32 %v5544_v56, %v5545_v31  ;;  %v5552_v32 = vrot.slane %v5551_v35, 2  ;;  %v5559_v26 = vrot.slane %v5558_v37, 2  ;;  %v5565_v59 = vmax.f32 %v5563_v14, %v5564_v51  ;;  %v4589_v9 = vpop.f32.mrb[201].mxu0 }
 0x2f6   : > { %v5602_v40 = vmax.f32 %v5600_v63, %v5601_v6  ;;  %v5607_v30 = vmax.f32 %v5605_v3, %v5606_v60  ;;  %v5614_v12 = vmax.f32 %v5612_v48, %v5613_v16  ;;  %v5620_v29 = vrot.slane %v5619_v39, 4  ;;  %v16164_v42 = vpop.f32.mrb[202].mxu0 }
 0x2f7   : > { %v5547_v15 = vrot.slane %v5546_v54, 1  ;;  %v5553_v44 = vmax.f32 %v5551_v35, %v5552_v32  ;;  %v5560_v13 = vmax.f32 %v5558_v37, %v5559_v26  ;;  %v5566_v19 = vrot.slane %v5565_v59, 2  ;;  %v19251_v46 = vpop.f32.mrb[203].mxu0 }
 0x2f8   : > { %v5603_v45 = vrot.slane %v5602_v40, 1  ;;  %v5608_v58 = vrot.slane %v5607_v30, 2  ;;  %v5615_v7 = vrot.slane %v5614_v12, 2  ;;  %v5621_v49 = vmax.f32 %v5619_v39, %v5620_v29 }
 0x2f9   : > { %v5548_v56 = vmax.f32 %v5546_v54, %v5547_v15  ;;  %v5554_v31 = vrot.slane %v5553_v44, 1  ;;  %v5561_v47 = vrot.slane %v5560_v13, 1  ;;  %v5567_v14 = vmax.f32 %v5565_v59, %v5566_v19 }
 0x2fa   : > { %v5604_v51 = vmax.f32 %v5602_v40, %v5603_v45  ;;  %v5609_v63 = vmax.f32 %v5607_v30, %v5608_v58  ;;  %v5616_v3 = vmax.f32 %v5614_v12, %v5615_v7  ;;  %v5622_v48 = vrot.slane %v5621_v49, 2 }
 0x2fb   : > { %v5555_v6 = vmax.f32 %v5553_v44, %v5554_v31  ;;  %v5562_v60 = vmax.f32 %v5560_v13, %v5561_v47  ;;  %v5568_v16 = vrot.slane %v5567_v14, 1  ;;  %v4893_v35 = vrot.slane %v19227_v10, %v19221_v34 }
 0x2fc   : > { %v5610_v37 = vrot.slane %v5609_v63, 1  ;;  %v5617_v32 = vrot.slane %v5616_v3, 1  ;;  %v5623_v26 = vmax.f32 %v5621_v49, %v5622_v48  ;;  %v6438_v9 = vmax.f32 %v5548_v56, %v5604_v51  ;;  %v16167_v39 = vpop.f32.mrb[204].mxu0 }
 0x2fd   : > { %v5569_v54 = vmax.f32 %v5567_v14, %v5568_v16  ;;  %v20746_v45 = vcombine.high %v19227_v10, %v19227_v10  ;;  %v4901_v59 = vcombine.high %v4893_v35, %v4893_v35  ;;  %v5570_v47 = vsel %vm5541_vm5, %v4893_v35, -inf  ;;  %v19260_v40 = vpop.f32.mrb[205].mxu0 }
 0x2fe   : > { %v5611_v30 = vmax.f32 %v5609_v63, %v5610_v37  ;;  %v5618_v12 = vmax.f32 %v5616_v3, %v5617_v32  ;;  %v5624_v29 = vrot.slane %v5623_v26, 1  ;;  %v14811_v42 = vpack.c.bf16 %v6438_v9, %v6438_v9  ;;  %v19262_v49 = vpop.f32.mrb[206].mxu0 }
 0x2ff   : > { %v4900_v7 = vrot.slane %v20746_v45, %v19221_v34  ;;  %v5571_v44 = vrot.slane %v5570_v47, 4  ;;  %v5577_v13 = vsel %vm5541_vm5, %v4901_v59, -inf  ;;  %v19266_v10 = vpop.f32.mrb[207].mxu0 }
 0x300   : > { %v5625_v58 = vmax.f32 %v5623_v26, %v5624_v29  ;;  %v6439_v56 = vmax.f32 %v5555_v6, %v5611_v30  ;;  %v6440_v31 = vmax.f32 %v5562_v60, %v5618_v12  ;;  %v6556_v14 = vunpack.c.l.b16 %v14811_v42 }
 0x301   : > { %v4902_v15 = vcombine.high %v4900_v7, %v4900_v7  ;;  %v5584_v19 = vsel %vm5541_vm5, %v4900_v7, -inf  ;;  %v5572_v51 = vmax.f32 %v5570_v47, %v5571_v44  ;;  %v5578_v63 = vrot.slane %v5577_v13, 4 }
 0x302   : > { %v5585_v3 = vrot.slane %v5584_v19, 4  ;;  %v6441_v16 = vmax.f32 %v5569_v54, %v5625_v58  ;;  %v14812_v35 = vpack.c.bf16 %v6439_v56, %v6439_v56  ;;  %v14813_v37 = vpack.c.bf16 %v6440_v31, %v6440_v31 }
 0x303   : > { %v5591_v48 = vsel %vm5541_vm5, %v4902_v15, -inf  ;;  %v5573_v9 = vrot.slane %v5572_v51, 2  ;;  %v5579_v39 = vmax.f32 %v5577_v13, %v5578_v63  ;;  %v4777_v7 = vadd.f32 %v19216_v18, %v19231_v27 }
 0x304   : > { %v5592_v32 = vrot.slane %v5591_v48, 4  ;;  %v5586_v45 = vmax.f32 %v5584_v19, %v5585_v3  ;;  %v14814_v59 = vpack.c.bf16 %v6441_v16, %v6441_v16  ;;  %v6557_v26 = vunpack.c.l.b16 %v14812_v35  ;;  %v19271_v30 = vpop.f32.mrb[208].mxu0 }
 0x305   : > { %v6558_v6 = vunpack.c.l.b16 %v14813_v37  ;;  %v5574_v47 = vmax.f32 %v5572_v51, %v5573_v9  ;;  %v5580_v12 = vrot.slane %v5579_v39, 2  ;;  %v4809_v42 = vmax.f32 %v4777_v7, 0.0  ;;  %v19273_v54 = vpop.f32.mrb[209].mxu0 }
 0x306   : > { %v5593_v60 = vmax.f32 %v5591_v48, %v5592_v32  ;;  %v5587_v29 = vrot.slane %v5586_v45, 2  ;;  %v6559_v15 = vunpack.c.l.b16 %v14814_v59  ;;  %v6565_v44 = vsel %vm6564_vm6, %v6557_v26, %v6556_v14  ;;  %v19278_v27 = vpop.f32.mrb[210].mxu0 }
 0x307   : > { %v4737_v19 = vadd.f32 %v19233_v43, %v19104_v4  ;;  %v6567_v58 = vsel %vm6566_vm7, %v6558_v6, %v6565_v44  ;;  %v5575_v56 = vrot.slane %v5574_v47, 1  ;;  %v5581_v31 = vmax.f32 %v5579_v39, %v5580_v12  ;;  %v4621_v51 = vpop.f32.mrb[211].mxu0 }
 0x308   : > { %v5594_v13 = vrot.slane %v5593_v60, 2  ;;  %v5588_v63 = vmax.f32 %v5586_v45, %v5587_v29  ;;  %v4937_v48 = vcombine.high %v4809_v42, %v4809_v42  ;;  %v4944_v16 = vrot.slane %v4809_v42, %v19221_v34 }
 0x309   : > { %v4776_v35 = vadd.f32 %v19216_v18, %v4737_v19  ;;  %v19283_v37 = vmax.f32 %v5574_v47, %v5575_v56  ;;  %v5582_v14 = vrot.slane %v5581_v31, 1  ;;  %v19286_v4 = vsel %vm6568_vm8, %v6559_v15, %v6567_v58 }
 0x30a   : > { %v5595_v3 = vmax.f32 %v5593_v60, %v5594_v13  ;;  %v5589_v32 = vrot.slane %v5588_v63, 1  ;;  %v4951_v9 = vrot.slane %v4937_v48, %v19221_v34  ;;  %v4952_v7 = vcombine.high %v4944_v16, %v4944_v16 }
 0x30b   : > { %v5654_v39 = vsel %vm5541_vm5, %v4944_v16, -inf  ;;  %v19290_v45 = vmax.f32 %v5581_v31, %v5582_v14  ;;  %v4808_v6 = vmax.f32 %v4776_v35, 0.0  ;;  %v4741_v51 = vadd.f32 %v19249_v0, %v19109_v24 }
 0x30c   : > { %v5596_v43 = vrot.slane %v5595_v3, 1  ;;  %v19292_v59 = vmax.f32 %v5588_v63, %v5589_v32  ;;  %v5655_v26 = vrot.slane %v5654_v39, 4  ;;  %v4953_v47 = vcombine.high %v4951_v9, %v4951_v9  ;;  %v19298_v42 = vpop.f32.mrb[212].mxu0 }
 0x30d   : > { %v5661_v12 = vsel %vm5541_vm5, %v4952_v7, -inf  ;;  %v5668_v29 = vsel %vm5541_vm5, %v4951_v9, -inf  ;;  %v4920_v19 = vcombine.high %v4808_v6, %v4808_v6  ;;  %v4633_v58 = vpop.f32.mrb[213].mxu0  ;;  %v4927_v31 = vrot.slane %v4808_v6, %v19221_v34 }
 0x30e   : > { %v19294_v60 = vmax.f32 %v5595_v3, %v5596_v43  ;;  %v5656_v15 = vmax.f32 %v5654_v39, %v5655_v26  ;;  %v5662_v44 = vrot.slane %v5661_v12, 4  ;;  %v5669_v13 = vrot.slane %v5668_v29, 4  ;;  %v16176_v3 = vpop.f32.mrb[214].mxu0 }
 0x30f   : > { %v5675_v56 = vsel %vm5541_vm5, %v4953_v47, -inf  ;;  %v4739_v63 = vadd.f32 %v19239_v53, %v19106_v20  ;;  %v19306_v32 = vpop.f32.mrb[215].mxu0  ;;  %v4934_v43 = vrot.slane %v4920_v19, %v19221_v34  ;;  %v4935_v9 = vcombine.high %v4927_v31, %v4927_v31 }
 0x310   : > { %v5657_v48 = vrot.slane %v5656_v15, 2  ;;  %v5663_v16 = vmax.f32 %v5661_v12, %v5662_v44  ;;  %v5670_v35 = vmax.f32 %v5668_v29, %v5669_v13  ;;  %v5676_v14 = vrot.slane %v5675_v56, 4 }
 0x311   : > { %v5626_v7 = vsel %vm5541_vm5, %v4927_v31, -inf  ;;  %v4778_v39 = vadd.f32 %v19216_v18, %v4739_v63  ;;  %v4936_v47 = vcombine.high %v4934_v43, %v4934_v43  ;;  %v5633_v0 = vsel %vm5541_vm5, %v4935_v9, -inf }
 0x312   : > { %v5658_v26 = vmax.f32 %v5656_v15, %v5657_v48  ;;  %v5664_v6 = vrot.slane %v5663_v16, 2  ;;  %v5671_v20 = vrot.slane %v5670_v35, 2  ;;  %v5677_v53 = vmax.f32 %v5675_v56, %v5676_v14 }
 0x313   : > { %v5627_v24 = vrot.slane %v5626_v7, 4  ;;  %v5640_v12 = vsel %vm5541_vm5, %v4934_v43, -inf  ;;  %v5634_v3 = vrot.slane %v5633_v0, 4  ;;  %v5647_v31 = vsel %vm5541_vm5, %v4936_v47, -inf }
 0x314   : > { %v5659_v29 = vrot.slane %v5658_v26, 1  ;;  %v5665_v44 = vmax.f32 %v5663_v16, %v5664_v6  ;;  %v5672_v13 = vmax.f32 %v5670_v35, %v5671_v20  ;;  %v5678_v58 = vrot.slane %v5677_v53, 2  ;;  %v16179_v63 = vpop.f32.mrb[216].mxu0 }
 0x315   : > { %v5628_v19 = vmax.f32 %v5626_v7, %v5627_v24  ;;  %v5641_v38 = vrot.slane %v5640_v12, 4  ;;  %v19316_v52 = vpop.f32.mrb[217].mxu0  ;;  %v5635_v62 = vmax.f32 %v5633_v0, %v5634_v3  ;;  %v5648_v21 = vrot.slane %v5647_v31, 4 }
 0x316   : > { %v19314_v15 = vmax.f32 %v5658_v26, %v5659_v29  ;;  %v5666_v48 = vrot.slane %v5665_v44, 1  ;;  %v5673_v56 = vrot.slane %v5672_v13, 1  ;;  %v5679_v14 = vmax.f32 %v5677_v53, %v5678_v58  ;;  %v19318_v16 = vpop.f32.mrb[218].mxu0 }
 0x317   : > { %v5629_v9 = vrot.slane %v5628_v19, 2  ;;  %v5642_v43 = vmax.f32 %v5640_v12, %v5641_v38  ;;  %v4810_v20 = vmax.f32 %v4778_v39, 0.0  ;;  %v5636_v26 = vrot.slane %v5635_v62, 2 }
 0x318   : > { %v19320_v35 = vmax.f32 %v5665_v44, %v5666_v48  ;;  %v19322_v7 = vmax.f32 %v5672_v13, %v5673_v56  ;;  %v5680_v6 = vrot.slane %v5679_v14, 1  ;;  %v5649_v29 = vmax.f32 %v5647_v31, %v5648_v21 }
 0x319   : > { %v5630_v47 = vmax.f32 %v5628_v19, %v5629_v9  ;;  %v5643_v24 = vrot.slane %v5642_v43, 2  ;;  %v4954_v0 = vcombine.high %v4810_v20, %v4810_v20  ;;  %v4961_v38 = vrot.slane %v4810_v20, %v19221_v34 }
 0x31a   : > { %v19324_v53 = vmax.f32 %v5679_v14, %v5680_v6  ;;  %v4780_v12 = vadd.f32 %v19216_v18, %v4741_v51  ;;  %v5637_v58 = vmax.f32 %v5635_v62, %v5636_v26  ;;  %v5650_v3 = vrot.slane %v5649_v29, 2 }
 0x31b   : > { %v5631_v44 = vrot.slane %v5630_v47, 1  ;;  %v5644_v13 = vmax.f32 %v5642_v43, %v5643_v24  ;;  %v4968_v39 = vrot.slane %v4954_v0, %v19221_v34  ;;  %v4969_v19 = vcombine.high %v4961_v38, %v4961_v38  ;;  %v19332_v43 = vpop.f32.mrb[219].mxu0 }
 0x31c   : > { %v5682_v21 = vsel %vm5541_vm5, %v4961_v38, -inf  ;;  %v4812_v31 = vmax.f32 %v4780_v12, 0.0  ;;  %v5638_v48 = vrot.slane %v5637_v58, 1  ;;  %v5651_v14 = vmax.f32 %v5649_v29, %v5650_v3 }
 0x31d   : > { %v5632_v63 = vmax.f32 %v5630_v47, %v5631_v44  ;;  %v5645_v56 = vrot.slane %v5644_v13, 1  ;;  %v4970_v9 = vcombine.high %v4968_v39, %v4968_v39  ;;  %v5683_v6 = vrot.slane %v5682_v21, 4 }
 0x31e   : > { %v5689_v51 = vsel %vm5541_vm5, %v4969_v19, -inf  ;;  %v5696_v62 = vsel %vm5541_vm5, %v4968_v39, -inf  ;;  %v5639_v20 = vmax.f32 %v5637_v58, %v5638_v48  ;;  %v5652_v24 = vrot.slane %v5651_v14, 1 }
 0x31f   : > { %v5646_v26 = vmax.f32 %v5644_v13, %v5645_v56  ;;  %v6442_v0 = vmax.f32 %v19283_v37, %v5632_v63  ;;  %v5684_v38 = vmax.f32 %v5682_v21, %v5683_v6  ;;  %v5690_v47 = vrot.slane %v5689_v51, 4  ;;  %v6589_v63 = vld [vmem:[#allocation2 + $0xc] sm:$0x1] }
 0x320   : > { %v5697_v12 = vrot.slane %v5696_v62, 4  ;;  %v5703_v29 = vsel %vm5541_vm5, %v4970_v9, -inf  ;;  %v5653_v44 = vmax.f32 %v5651_v14, %v5652_v24  ;;  %v6443_v3 = vmax.f32 %v19290_v45, %v5639_v20 }
 0x321   : > { %v6444_v41 = vmax.f32 %v19292_v59, %v5646_v26  ;;  %v14815_v19 = vpack.c.bf16 %v6442_v0, %v6442_v0  ;;  %v5685_v23 = vrot.slane %v5684_v38, 2  ;;  %v5691_v39 = vmax.f32 %v5689_v51, %v5690_v47 }
 0x322   : > { %v5698_v22 = vmax.f32 %v5696_v62, %v5697_v12  ;;  %v5704_v2 = vrot.slane %v5703_v29, 4  ;;  %v6445_v58 = vmax.f32 %v19294_v60, %v5653_v44  ;;  %v14816_v13 = vpack.c.bf16 %v6443_v3, %v6443_v3 }
 0x323   : > { %v14817_v48 = vpack.c.bf16 %v6444_v41, %v6444_v41  ;;  %v6560_v37 = vunpack.c.l.b16 %v14815_v19  ;;  %v5686_v45 = vmax.f32 %v5684_v38, %v5685_v23  ;;  %v5692_v56 = vrot.slane %v5691_v39, 2 }
 0x324   : > { %v5699_v59 = vrot.slane %v5698_v22, 2  ;;  %v5705_v14 = vmax.f32 %v5703_v29, %v5704_v2  ;;  %v6561_v9 = vunpack.c.l.b16 %v14816_v13  ;;  %v14819_v60 = vpack.c.bf16 %v6445_v58, %v6445_v58 }
 0x325   : > { %v6562_v6 = vunpack.c.l.b16 %v14817_v48  ;;  %v6571_v51 = vsel %vm6570_vm11, %v6560_v37, %v19286_v4  ;;  %v5687_v62 = vrot.slane %v5686_v45, 1  ;;  %v5693_v41 = vmax.f32 %v5691_v39, %v5692_v56  ;;  %v6583_v4 = vld [vmem:[#allocation2 + $0x8] sm:$0xf] }
 0x326   : > { %v5700_v20 = vmax.f32 %v5698_v22, %v5699_v59  ;;  %v5706_v26 = vrot.slane %v5705_v14, 2  ;;  %v6573_v24 = vsel %vm6572_vm12, %v6561_v9, %v6571_v51  ;;  %v6590_v0 = vsel %vm19341_vm15, %v14819_v60, %v6589_v63 }
 0x327   : > { %v4988_v47 = vcombine.high %v4812_v31, %v4812_v31  ;;  %v4995_v23 = vrot.slane %v4812_v31, %v19221_v34  ;;  %v6575_v2 = vsel %vm6574_vm13, %v6562_v6, %v6573_v24  ;;  %6591 = vst [vmem:[#allocation2 + $0xc] sm:$0x1] %v6590_v0  ;;  %v19358_v22 = vmax.f32 %v5686_v45, %v5687_v62  ;;  %v19379_v24 = vpop.f32.mrb[220].mxu0 }
 0x328   : > { %v5694_v12 = vrot.slane %v5693_v41, 1  ;;  %v5701_v29 = vrot.slane %v5700_v20, 1  ;;  %v6576_v44 = vpack.c.b16 %v6575_v2, %v6575_v2  ;;  %v5707_v3 = vmax.f32 %v5705_v14, %v5706_v26 }
 0x329   : > { %v5002_v19 = vrot.slane %v4988_v47, %v19221_v34  ;;  %v5003_v39 = vcombine.high %v4995_v23, %v4995_v23  ;;  %v5738_v13 = vsel %vm5541_vm5, %v4995_v23, -inf  ;;  %v4740_v48 = vadd.f32 %v19251_v46, %v19114_v55 }
 0x32a   : > { %v19361_v31 = vmax.f32 %v5693_v41, %v5694_v12  ;;  %v19363_v58 = vmax.f32 %v5700_v20, %v5701_v29  ;;  %v6584_v37 = vsel %vm19354_vm0, %v6576_v44, %v6583_v4  ;;  %v5708_v63 = vrot.slane %v5707_v3, 1 }
 0x32b   : > { %v5004_v45 = vcombine.high %v5002_v19, %v5002_v19  ;;  %v5739_v56 = vrot.slane %v5738_v13, 4  ;;  %6585 = vst [vmem:[#allocation2 + $0x8] sm:$0xf] %v6584_v37  ;;  %v5745_v59 = vsel %vm5541_vm5, %v5003_v39, -inf  ;;  %v5752_v14 = vsel %vm5541_vm5, %v5002_v19, -inf }
 0x32c   : > { %v4779_v9 = vadd.f32 %v19216_v18, %v4740_v48  ;;  %v4742_v6 = vadd.f32 %v19260_v40, %v19142_v17  ;;  %v5709_v51 = vmax.f32 %v5707_v3, %v5708_v63  ;;  %v5746_v62 = vrot.slane %v5745_v59, 4 }
 0x32d   : > { %v5740_v60 = vmax.f32 %v5738_v13, %v5739_v56  ;;  %v5753_v55 = vrot.slane %v5752_v14, 4  ;;  %v5759_v46 = vsel %vm5541_vm5, %v5004_v45, -inf  ;;  %v4744_v26 = vadd.f32 %v19262_v49, %v19144_v36  ;;  %v19391_v56 = vpop.f32.mrb[221].mxu0 }
 0x32e   : > { %v4811_v41 = vmax.f32 %v4779_v9, 0.0  ;;  %v4781_v20 = vadd.f32 %v19216_v18, %v4742_v6  ;;  %v5747_v47 = vmax.f32 %v5745_v59, %v5746_v62  ;;  %v5760_v2 = vrot.slane %v5759_v46, 4  ;;  %20751 = vst [vmem:[#allocation34_spill] sm:$0xff] %v19391_v56 }
 0x32f   : > { %v5741_v0 = vrot.slane %v5740_v60, 2  ;;  %v5754_v23 = vmax.f32 %v5752_v14, %v5753_v55  ;;  %v19385_v12 = vadd.f32 %v19216_v18, %v4744_v26 }
 0x330   : > { %v4971_v4 = vcombine.high %v4811_v41, %v4811_v41  ;;  %v4978_v17 = vrot.slane %v4811_v41, %v19221_v34  ;;  %v19382_v40 = vmax.f32 %v4781_v20, 0.0  ;;  %v5748_v44 = vrot.slane %v5747_v47, 2 }
 0x331   : > { %v5742_v29 = vmax.f32 %v5740_v60, %v5741_v0  ;;  %v5755_v3 = vrot.slane %v5754_v23, 2  ;;  %v5761_v19 = vmax.f32 %v5759_v46, %v5760_v2 }
 0x332   : > { %v4985_v36 = vrot.slane %v4971_v4, %v19221_v34  ;;  %v4986_v49 = vcombine.high %v4978_v17, %v4978_v17  ;;  %v5710_v39 = vsel %vm5541_vm5, %v4978_v17, -inf  ;;  %v5005_v13 = vcombine.high %v19382_v40, %v19382_v40 }
 0x333   : > { %v5743_v48 = vrot.slane %v5742_v29, 1  ;;  %v5749_v37 = vmax.f32 %v5747_v47, %v5748_v44  ;;  %v5756_v63 = vmax.f32 %v5754_v23, %v5755_v3  ;;  %v5762_v45 = vrot.slane %v5761_v19, 2 }
 0x334   : > { %v4987_v59 = vcombine.high %v4985_v36, %v4985_v36  ;;  %v5711_v14 = vrot.slane %v5710_v39, 4  ;;  %v5717_v9 = vsel %vm5541_vm5, %v4986_v49, -inf  ;;  %v5724_v6 = vsel %vm5541_vm5, %v4985_v36, -inf }
 0x335   : > { %v5744_v60 = vmax.f32 %v5742_v29, %v5743_v48  ;;  %v5750_v62 = vrot.slane %v5749_v37, 1  ;;  %v5757_v55 = vrot.slane %v5756_v63, 1  ;;  %v5763_v46 = vmax.f32 %v5761_v19, %v5762_v45 }
 0x336   : > { %v5712_v41 = vmax.f32 %v5710_v39, %v5711_v14  ;;  %v5718_v20 = vrot.slane %v5717_v9, 4  ;;  %v5725_v26 = vrot.slane %v5724_v6, 4  ;;  %v5731_v0 = vsel %vm5541_vm5, %v4987_v59, -inf  ;;  %v19399_v59 = vpop.f32.mrb[222].mxu0 }
 0x337   : > { %v5751_v47 = vmax.f32 %v5749_v37, %v5750_v62  ;;  %v5758_v23 = vmax.f32 %v5756_v63, %v5757_v55  ;;  %v5764_v2 = vrot.slane %v5763_v46, 1  ;;  %v6450_v4 = vmax.f32 %v19358_v22, %v5744_v60 }
 0x338   : > { %v5713_v17 = vrot.slane %v5712_v41, 2  ;;  %v5719_v44 = vmax.f32 %v5717_v9, %v5718_v20  ;;  %v5726_v3 = vmax.f32 %v5724_v6, %v5725_v26  ;;  %v5732_v49 = vrot.slane %v5731_v0, 4  ;;  %v4665_v9 = vpop.f32.mrb[223].mxu0  ;;  %v6645_v6 = vld [vmem:[#allocation2 + $0x14] sm:$0x1] }
 0x339   : > { %v5765_v56 = vmax.f32 %v5763_v46, %v5764_v2  ;;  %v6451_v29 = vmax.f32 %v19361_v31, %v5751_v47  ;;  %v6452_v36 = vmax.f32 %v19363_v58, %v5758_v23  ;;  %v14824_v19 = vpack.c.bf16 %v6450_v4, %v6450_v4 }
 0x33a   : > { %v5714_v39 = vmax.f32 %v5712_v41, %v5713_v17  ;;  %v5720_v48 = vrot.slane %v5719_v44, 2  ;;  %v5727_v45 = vrot.slane %v5726_v3, 2  ;;  %v5733_v14 = vmax.f32 %v5731_v0, %v5732_v49 }
 0x33b   : > { %v6453_v37 = vmax.f32 %v5709_v51, %v5765_v56  ;;  %v14825_v63 = vpack.c.bf16 %v6451_v29, %v6451_v29  ;;  %v14826_v62 = vpack.c.bf16 %v6452_v36, %v6452_v36  ;;  %v19401_v22 = vunpack.c.l.b16 %v14824_v19 }
 0x33c   : > { %v5715_v60 = vrot.slane %v5714_v39, 1  ;;  %v5721_v55 = vmax.f32 %v5719_v44, %v5720_v48  ;;  %v5728_v46 = vmax.f32 %v5726_v3, %v5727_v45  ;;  %v5734_v31 = vrot.slane %v5733_v14, 2 }
 0x33d   : > { %v6629_v20 = vunpack.c.l.b16 %v14825_v63  ;;  %v19403_v58 = vunpack.c.l.b16 %v14826_v62  ;;  %v14828_v41 = vpack.c.bf16 %v6453_v37, %v6453_v37  ;;  %v5012_v26 = vrot.slane %v19382_v40, %v19221_v34 }
 0x33e   : > { %v5716_v0 = vmax.f32 %v5714_v39, %v5715_v60  ;;  %v5722_v47 = vrot.slane %v5721_v55, 1  ;;  %v5729_v51 = vrot.slane %v5728_v46, 1  ;;  %v5735_v56 = vmax.f32 %v5733_v14, %v5734_v31 }
 0x33f   : > { %v6646_v23 = vsel %vm19341_vm15, %v14828_v41, %v6645_v6  ;;  %v5019_v2 = vrot.slane %v5005_v13, %v19221_v34  ;;  %v5020_v4 = vcombine.high %v5012_v26, %v5012_v26  ;;  %v5766_v17 = vsel %vm5541_vm5, %v5012_v26, -inf }
 0x340   : > { %6647 = vst [vmem:[#allocation2 + $0x14] sm:$0x1] %v6646_v23  ;;  %v5723_v44 = vmax.f32 %v5721_v55, %v5722_v47  ;;  %v5730_v3 = vmax.f32 %v5728_v46, %v5729_v51  ;;  %v5736_v49 = vrot.slane %v5735_v56, 1  ;;  %v6446_v29 = vmax.f32 %v19314_v15, %v5716_v0 }
 0x341   : > { %v5021_v36 = vcombine.high %v5019_v2, %v5019_v2  ;;  %v5767_v40 = vrot.slane %v5766_v17, 4  ;;  %v5773_v19 = vsel %vm5541_vm5, %v5020_v4, -inf  ;;  %v5780_v39 = vsel %vm5541_vm5, %v5019_v2, -inf }
 0x342   : > { %v5737_v48 = vmax.f32 %v5735_v56, %v5736_v49  ;;  %v6447_v45 = vmax.f32 %v19320_v35, %v5723_v44  ;;  %v6448_v13 = vmax.f32 %v19322_v7, %v5730_v3  ;;  %v14820_v14 = vpack.c.bf16 %v6446_v29, %v6446_v29 }
 0x343   : > { %v5768_v37 = vmax.f32 %v5766_v17, %v5767_v40  ;;  %v5774_v63 = vrot.slane %v5773_v19, 4  ;;  %v5781_v62 = vrot.slane %v5780_v39, 4  ;;  %v5787_v9 = vsel %vm5541_vm5, %v5021_v36, -inf }
 0x344   : > { %v6449_v6 = vmax.f32 %v19324_v53, %v5737_v48  ;;  %v14821_v15 = vpack.c.bf16 %v6447_v45, %v6447_v45  ;;  %v14822_v60 = vpack.c.bf16 %v6448_v13, %v6448_v13  ;;  %v6624_v55 = vunpack.c.l.b16 %v14820_v14 }
 0x345   : > { %v5769_v46 = vrot.slane %v5768_v37, 2  ;;  %v5775_v31 = vmax.f32 %v5773_v19, %v5774_v63  ;;  %v5782_v41 = vmax.f32 %v5780_v39, %v5781_v62  ;;  %v5788_v26 = vrot.slane %v5787_v9, 4 }
 0x346   : > { %v14823_v0 = vpack.c.bf16 %v6449_v6, %v6449_v6  ;;  %v6625_v47 = vunpack.c.l.b16 %v14821_v15  ;;  %v6626_v35 = vunpack.c.l.b16 %v14822_v60  ;;  %v4815_v7 = vmax.f32 %v19385_v12, 0.0  ;;  %v6642_v15 = vld [vmem:[#allocation2 + $0x10] sm:$0xf] }
 0x347   : > { %v5770_v51 = vmax.f32 %v5768_v37, %v5769_v46  ;;  %v5776_v56 = vrot.slane %v5775_v31, 2  ;;  %v5783_v23 = vrot.slane %v5782_v41, 2  ;;  %v5789_v2 = vmax.f32 %v5787_v9, %v5788_v26 }
 0x348   : > { %v6627_v4 = vunpack.c.l.b16 %v14823_v0  ;;  %v6632_v17 = vsel %vm6564_vm6, %v6625_v47, %v6624_v55  ;;  %v5039_v53 = vcombine.high %v4815_v7, %v4815_v7  ;;  %v5046_v44 = vrot.slane %v4815_v7, %v19221_v34 }
 0x349   : > { %v6633_v3 = vsel %vm6566_vm7, %v6626_v35, %v6632_v17  ;;  %v5771_v49 = vrot.slane %v5770_v51, 1  ;;  %v5777_v29 = vmax.f32 %v5775_v31, %v5776_v56  ;;  %v5784_v36 = vmax.f32 %v5782_v41, %v5783_v23 }
 0x34a   : > { %v6634_v40 = vsel %vm6568_vm8, %v6627_v4, %v6633_v3  ;;  %v5790_v19 = vrot.slane %v5789_v2, 2  ;;  %v5053_v12 = vrot.slane %v5039_v53, %v19221_v34  ;;  %v5054_v39 = vcombine.high %v5046_v44, %v5046_v44 }
 0x34b   : > { %v6635_v48 = vsel %vm6570_vm11, %v19401_v22, %v6634_v40  ;;  %v5772_v45 = vmax.f32 %v5770_v51, %v5771_v49  ;;  %v5778_v13 = vrot.slane %v5777_v29, 1  ;;  %v5785_v14 = vrot.slane %v5784_v36, 1 }
 0x34c   : > { %v6636_v37 = vsel %vm6572_vm12, %v6629_v20, %v6635_v48  ;;  %v5791_v63 = vmax.f32 %v5789_v2, %v5790_v19  ;;  %v5055_v62 = vcombine.high %v5053_v12, %v5053_v12  ;;  %v5822_v9 = vsel %vm5541_vm5, %v5046_v44, -inf }
 0x34d   : > { %v6637_v6 = vsel %vm6574_vm13, %v19403_v58, %v6636_v37  ;;  %v5779_v60 = vmax.f32 %v5777_v29, %v5778_v13  ;;  %v5786_v55 = vmax.f32 %v5784_v36, %v5785_v14  ;;  %v5823_v46 = vrot.slane %v5822_v9, 4 }
 0x34e   : > { %v6638_v31 = vpack.c.b16 %v6637_v6, %v6637_v6  ;;  %v5792_v41 = vrot.slane %v5791_v63, 1  ;;  %v5829_v22 = vsel %vm5541_vm5, %v5054_v39, -inf  ;;  %v5836_v26 = vsel %vm5541_vm5, %v5053_v12, -inf }
 0x34f   : > { %v5824_v0 = vmax.f32 %v5822_v9, %v5823_v46  ;;  %v5830_v47 = vrot.slane %v5829_v22, 4  ;;  %v5837_v20 = vrot.slane %v5836_v26, 4  ;;  %v5843_v35 = vsel %vm5541_vm5, %v5055_v62, -inf }
 0x350   : > { %v6643_v7 = vsel %vm19354_vm0, %v6638_v31, %v6642_v15  ;;  %v5793_v51 = vmax.f32 %v5791_v63, %v5792_v41  ;;  %v5844_v58 = vrot.slane %v5843_v35, 4  ;;  %v4743_v56 = vadd.f32 %v19266_v10, %v19147_v57 }
 0x351   : > { %6644 = vst [vmem:[#allocation2 + $0x10] sm:$0xf] %v6643_v7  ;;  %v5825_v23 = vrot.slane %v5824_v0, 2  ;;  %v5831_v2 = vmax.f32 %v5829_v22, %v5830_v47  ;;  %v5838_v4 = vmax.f32 %v5836_v26, %v5837_v20  ;;  %v4746_v17 = vadd.f32 %v19271_v30, %v19153_v5 }
 0x352   : > { %v5845_v53 = vmax.f32 %v5843_v35, %v5844_v58  ;;  %v4782_v44 = vadd.f32 %v19216_v18, %v4743_v56  ;;  %v4745_v3 = vadd.f32 %v19273_v54, %v19155_v8  ;;  %v4747_v49 = vadd.f32 %v19278_v27, %v19157_v25 }
 0x353   : > { %v5826_v29 = vmax.f32 %v5824_v0, %v5825_v23  ;;  %v5832_v36 = vrot.slane %v5831_v2, 2  ;;  %v5839_v40 = vrot.slane %v5838_v4, 2  ;;  %v4785_v57 = vadd.f32 %v19216_v18, %v4746_v17 }
 0x354   : > { %v5846_v10 = vrot.slane %v5845_v53, 2  ;;  %v4814_v19 = vmax.f32 %v4782_v44, 0.0  ;;  %v4784_v12 = vadd.f32 %v19216_v18, %v4745_v3  ;;  %v19447_v5 = vadd.f32 %v19216_v18, %v4747_v49 }
 0x355   : > { %v5827_v30 = vrot.slane %v5826_v29, 1  ;;  %v5833_v39 = vmax.f32 %v5831_v2, %v5832_v36  ;;  %v5840_v48 = vmax.f32 %v5838_v4, %v5839_v40  ;;  %v4817_v13 = vmax.f32 %v4785_v57, 0.0  ;;  %v16647_v57 = vld [vmem:[#allocation7 + $0x30] sm:$0xff]  }
 0x356   : > { %v5847_v8 = vmax.f32 %v5845_v53, %v5846_v10  ;;  %v5022_v54 = vcombine.high %v4814_v19, %v4814_v19  ;;  %v5029_v25 = vrot.slane %v4814_v19, %v19221_v34  ;;  %v19450_v27 = vmax.f32 %v4784_v12, 0.0  ;;  %v19457_v10 = vpop.f32.mrb[224].mxu0  ;;  %16261 = vmatprep.subr.bf16.mxu0 %v16647_v57 }
 0x357   : > { %v5828_v14 = vmax.f32 %v5826_v29, %v5827_v30  ;;  %v5834_v37 = vrot.slane %v5833_v39, 1  ;;  %v5841_v63 = vrot.slane %v5840_v48, 1  ;;  %v5073_v62 = vcombine.high %v4817_v13, %v4817_v13  ;;  %v4677_v12 = vpop.f32.mrb[225].mxu0  ;;  %16262 = vmatpush3.bf16.msra.mxu0 %v16647_v57 }
 0x358   : > { %v5848_v9 = vrot.slane %v5847_v8, 1  ;;  %v5036_v6 = vrot.slane %v5022_v54, %v19221_v34  ;;  %v5037_v15 = vcombine.high %v5029_v25, %v5029_v25  ;;  %v5794_v18 = vsel %vm5541_vm5, %v5029_v25, -inf  ;;  %v16188_v54 = vpop.f32.mrb[226].mxu0 }
 0x359   : > { %v5835_v46 = vmax.f32 %v5833_v39, %v5834_v37  ;;  %v5842_v31 = vmax.f32 %v5840_v48, %v5841_v63  ;;  %v6454_v41 = vmax.f32 %v5772_v45, %v5828_v14  ;;  %v5795_v22 = vrot.slane %v5794_v18, 4  ;;  %v19483_v57 = vpop.f32.mrb[227].mxu0 }
 0x35a   : > { %v5849_v26 = vmax.f32 %v5847_v8, %v5848_v9  ;;  %v5038_v0 = vcombine.high %v5036_v6, %v5036_v6  ;;  %v5801_v47 = vsel %vm5541_vm5, %v5037_v15, -inf  ;;  %v5808_v20 = vsel %vm5541_vm5, %v5036_v6, -inf  ;;  %v16191_v12 = vpop.f32.mrb[228].mxu0 }
 0x35b   : > { %v6455_v35 = vmax.f32 %v5779_v60, %v5835_v46  ;;  %v6456_v7 = vmax.f32 %v5786_v55, %v5842_v31  ;;  %v14829_v58 = vpack.c.bf16 %v6454_v41, %v6454_v41  ;;  %v5796_v56 = vmax.f32 %v5794_v18, %v5795_v22 }
 0x35c   : > { %v6457_v23 = vmax.f32 %v5793_v51, %v5849_v26  ;;  %v5802_v2 = vrot.slane %v5801_v47, 4  ;;  %v5809_v4 = vrot.slane %v5808_v20, 4  ;;  %v5815_v17 = vsel %vm5541_vm5, %v5038_v0, -inf }
 0x35d   : > { %v14830_v53 = vpack.c.bf16 %v6455_v35, %v6455_v35  ;;  %v14831_v44 = vpack.c.bf16 %v6456_v7, %v6456_v7  ;;  %v6680_v3 = vunpack.c.l.b16 %v14829_v58  ;;  %v5797_v45 = vrot.slane %v5796_v56, 2 }
 0x35e   : > { %v14832_v49 = vpack.c.bf16 %v6457_v23, %v6457_v23  ;;  %v5803_v29 = vmax.f32 %v5801_v47, %v5802_v2  ;;  %v5810_v36 = vmax.f32 %v5808_v20, %v5809_v4  ;;  %v5816_v40 = vrot.slane %v5815_v17, 4 }
 0x35f   : > { %v6681_v60 = vunpack.c.l.b16 %v14830_v53  ;;  %v6682_v55 = vunpack.c.l.b16 %v14831_v44  ;;  %v5798_v19 = vmax.f32 %v5796_v56, %v5797_v45  ;;  %v5080_v51 = vrot.slane %v4817_v13, %v19221_v34  ;;  %v16648_v13 = vld [vmem:[#allocation7 + $0x38] sm:$0xff]  }
 0x360   : > { %v6683_v30 = vunpack.c.l.b16 %v14832_v49  ;;  %v5804_v39 = vrot.slane %v5803_v29, 2  ;;  %v5811_v48 = vrot.slane %v5810_v36, 2  ;;  %v5817_v8 = vmax.f32 %v5815_v17, %v5816_v40  ;;  %16263 = vmatprep.subr.bf16.mxu0 %v16648_v13  ;;  %v16650_v45 = vld [vmem:[#allocation7 + $0x18] sm:$0xff]  }
 0x361   : > { %v6688_v25 = vsel %vm6564_vm6, %v6681_v60, %v6680_v3  ;;  %v5799_v14 = vrot.slane %v5798_v19, 1  ;;  %v5087_v37 = vrot.slane %v5073_v62, %v19221_v34  ;;  %v5088_v63 = vcombine.high %v5080_v51, %v5080_v51  ;;  %16264 = vmatpush3.bf16.msra.mxu0 %v16648_v13  ;;  %16203 = vmatprep.subr.bf16.mxu1 %v16650_v45 }
 0x362   : > { %v6689_v9 = vsel %vm6566_vm7, %v6682_v55, %v6688_v25  ;;  %v5805_v6 = vmax.f32 %v5803_v29, %v5804_v39  ;;  %v5812_v15 = vmax.f32 %v5810_v36, %v5811_v48  ;;  %v5818_v18 = vrot.slane %v5817_v8, 2  ;;  %16204 = vmatpush3.bf16.msra.mxu1 %v16650_v45 }
 0x363   : > { %v19463_v46 = vmax.f32 %v5798_v19, %v5799_v14  ;;  %v5089_v31 = vcombine.high %v5087_v37, %v5087_v37  ;;  %v5878_v41 = vsel %vm5541_vm5, %v5080_v51, -inf  ;;  %v5885_v22 = vsel %vm5541_vm5, %v5088_v63, -inf }
 0x364   : > { %v5806_v26 = vrot.slane %v5805_v6, 1  ;;  %v5813_v0 = vrot.slane %v5812_v15, 1  ;;  %v5819_v47 = vmax.f32 %v5817_v8, %v5818_v18  ;;  %v5879_v20 = vrot.slane %v5878_v41, 4 }
 0x365   : > { %v5886_v62 = vrot.slane %v5885_v22, 4  ;;  %v5892_v35 = vsel %vm5541_vm5, %v5087_v37, -inf  ;;  %v5899_v7 = vsel %vm5541_vm5, %v5089_v31, -inf  ;;  %v5056_v58 = vcombine.high %v19450_v27, %v19450_v27 }
 0x366   : > { %v19471_v56 = vmax.f32 %v5805_v6, %v5806_v26  ;;  %v19473_v23 = vmax.f32 %v5812_v15, %v5813_v0  ;;  %v5820_v2 = vrot.slane %v5819_v47, 1  ;;  %v5880_v4 = vmax.f32 %v5878_v41, %v5879_v20 }
 0x367   : > { %v5887_v17 = vmax.f32 %v5885_v22, %v5886_v62  ;;  %v5893_v53 = vrot.slane %v5892_v35, 4  ;;  %v5900_v44 = vrot.slane %v5899_v7, 4  ;;  %v5063_v3 = vrot.slane %v19450_v27, %v19221_v34 }
 0x368   : > { %v19477_v49 = vmax.f32 %v5819_v47, %v5820_v2  ;;  %v5881_v29 = vrot.slane %v5880_v4, 2  ;;  %v5070_v36 = vrot.slane %v5056_v58, %v19221_v34  ;;  %v19481_v40 = vsel %vm6568_vm8, %v6683_v30, %v6689_v9  ;;  %v19491_v47 = vpop.f32.mrb[229].mxu0 }
 0x369   : > { %v5888_v60 = vrot.slane %v5887_v17, 2  ;;  %v5894_v55 = vmax.f32 %v5892_v35, %v5893_v53  ;;  %v5901_v19 = vmax.f32 %v5899_v7, %v5900_v44  ;;  %v5071_v51 = vcombine.high %v5063_v3, %v5063_v3  ;;  %v19496_v53 = vpop.f32.mrb[230].mxu0 }
 0x36a   : > { %v5882_v39 = vmax.f32 %v5880_v4, %v5881_v29  ;;  %v5072_v48 = vcombine.high %v5070_v36, %v5070_v36  ;;  %v5850_v27 = vsel %vm5541_vm5, %v5063_v3, -inf  ;;  %v5864_v8 = vsel %vm5541_vm5, %v5070_v36, -inf }
 0x36b   : > { %v5889_v54 = vmax.f32 %v5887_v17, %v5888_v60  ;;  %v5895_v25 = vrot.slane %v5894_v55, 2  ;;  %v5902_v14 = vrot.slane %v5901_v19, 2  ;;  %v5851_v30 = vrot.slane %v5850_v27, 4 }
 0x36c   : > { %v5883_v37 = vrot.slane %v5882_v39, 1  ;;  %v5857_v63 = vsel %vm5541_vm5, %v5071_v51, -inf  ;;  %v5865_v9 = vrot.slane %v5864_v8, 4  ;;  %v5871_v6 = vsel %vm5541_vm5, %v5072_v48, -inf }
 0x36d   : > { %v5890_v15 = vrot.slane %v5889_v54, 1  ;;  %v5896_v18 = vmax.f32 %v5894_v55, %v5895_v25  ;;  %v5903_v13 = vmax.f32 %v5901_v19, %v5902_v14  ;;  %v5852_v31 = vmax.f32 %v5850_v27, %v5851_v30 }
 0x36e   : > { %v19489_v41 = vmax.f32 %v5882_v39, %v5883_v37  ;;  %v5858_v22 = vrot.slane %v5857_v63, 4  ;;  %v5866_v26 = vmax.f32 %v5864_v8, %v5865_v9  ;;  %v5872_v0 = vrot.slane %v5871_v6, 4 }
 0x36f   : > { %v19493_v20 = vmax.f32 %v5889_v54, %v5890_v15  ;;  %v5897_v62 = vrot.slane %v5896_v18, 1  ;;  %v5904_v35 = vrot.slane %v5903_v13, 1  ;;  %v5853_v7 = vrot.slane %v5852_v31, 2 }
 0x370   : > { %v5859_v58 = vmax.f32 %v5857_v63, %v5858_v22  ;;  %v5867_v2 = vrot.slane %v5866_v26, 2  ;;  %v5873_v4 = vmax.f32 %v5871_v6, %v5872_v0  ;;  %v4818_v17 = vmax.f32 %v19447_v5, 0.0  ;;  %v19508_v5 = vld [vmem:[%s20693_s2] ss:$0 sm:$0xff]  ;;  %v19519_v0 = vpop.f32.mrb[231].mxu0 }
 0x371   : > { %v19498_v44 = vmax.f32 %v5896_v18, %v5897_v62  ;;  %v19500_v3 = vmax.f32 %v5903_v13, %v5904_v35  ;;  %v5854_v45 = vmax.f32 %v5852_v31, %v5853_v7  ;;  %v4749_v29 = vadd.f32 %v19298_v42, %v19160_v33 }
 0x372   : > { %v5860_v36 = vrot.slane %v5859_v58, 2  ;;  %v5868_v60 = vmax.f32 %v5866_v26, %v5867_v2  ;;  %v5874_v55 = vrot.slane %v5873_v4, 2  ;;  %v5090_v19 = vcombine.high %v4818_v17, %v4818_v17 }
 0x373   : > { %v5855_v51 = vrot.slane %v5854_v45, 1  ;;  %v5097_v12 = vrot.slane %v4818_v17, %v19221_v34  ;;  %v4788_v39 = vadd.f32 %v19508_v5, %v4749_v29  ;;  %v4748_v48 = vadd.f32 %v19306_v32, %v19163_v1  ;;  %v6701_v29 = vld [vmem:[#allocation2 + $0x1c] sm:$0x1] }
 0x374   : > { %v5861_v27 = vmax.f32 %v5859_v58, %v5860_v36  ;;  %v5869_v8 = vrot.slane %v5868_v60, 1  ;;  %v5875_v33 = vmax.f32 %v5873_v4, %v5874_v55  ;;  %v5104_v42 = vrot.slane %v5090_v19, %v19221_v34 }
 0x375   : > { %v5856_v54 = vmax.f32 %v5854_v45, %v5855_v51  ;;  %v5105_v25 = vcombine.high %v5097_v12, %v5097_v12  ;;  %v5906_v14 = vsel %vm5541_vm5, %v5097_v12, -inf  ;;  %v4820_v30 = vmax.f32 %v4788_v39, 0.0 }
 0x376   : > { %v5862_v37 = vrot.slane %v5861_v27, 1  ;;  %v5870_v63 = vmax.f32 %v5868_v60, %v5869_v8  ;;  %v5876_v9 = vrot.slane %v5875_v33, 1  ;;  %v5106_v6 = vcombine.high %v5104_v42, %v5104_v42 }
 0x377   : > { %v6458_v15 = vmax.f32 %v19463_v46, %v5856_v54  ;;  %v5907_v18 = vrot.slane %v5906_v14, 4  ;;  %v5913_v13 = vsel %vm5541_vm5, %v5105_v25, -inf  ;;  %v5920_v1 = vsel %vm5541_vm5, %v5104_v42, -inf }
 0x378   : > { %v5863_v32 = vmax.f32 %v5861_v27, %v5862_v37  ;;  %v5877_v31 = vmax.f32 %v5875_v33, %v5876_v9  ;;  %v6460_v22 = vmax.f32 %v19473_v23, %v5870_v63  ;;  %v5914_v26 = vrot.slane %v5913_v13, 4 }
 0x379   : > { %v14833_v62 = vpack.c.bf16 %v6458_v15, %v6458_v15  ;;  %v5908_v35 = vmax.f32 %v5906_v14, %v5907_v18  ;;  %v5921_v7 = vrot.slane %v5920_v1, 4  ;;  %v5927_v58 = vsel %vm5541_vm5, %v5106_v6, -inf }
 0x37a   : > { %v6459_v2 = vmax.f32 %v19471_v56, %v5863_v32  ;;  %v6461_v46 = vmax.f32 %v19477_v49, %v5877_v31  ;;  %v14835_v4 = vpack.c.bf16 %v6460_v22, %v6460_v22  ;;  %v5915_v17 = vmax.f32 %v5913_v13, %v5914_v26  ;;  %v6698_v13 = vld [vmem:[#allocation2 + $0x18] sm:$0xf] }
 0x37b   : > { %v6684_v45 = vunpack.c.l.b16 %v14833_v62  ;;  %v5909_v36 = vrot.slane %v5908_v35, 2  ;;  %v5922_v60 = vmax.f32 %v5920_v1, %v5921_v7  ;;  %v5928_v55 = vrot.slane %v5927_v58, 4 }
 0x37c   : > { %v14834_v23 = vpack.c.bf16 %v6459_v2, %v6459_v2  ;;  %v6686_v19 = vunpack.c.l.b16 %v14835_v4  ;;  %v14837_v51 = vpack.c.bf16 %v6461_v46, %v6461_v46  ;;  %v5916_v12 = vrot.slane %v5915_v17, 2 }
 0x37d   : > { %v6691_v39 = vsel %vm6570_vm11, %v6684_v45, %v19481_v40  ;;  %v5910_v27 = vmax.f32 %v5908_v35, %v5909_v36  ;;  %v5923_v8 = vrot.slane %v5922_v60, 2  ;;  %v5929_v33 = vmax.f32 %v5927_v58, %v5928_v55 }
 0x37e   : > { %v6685_v56 = vunpack.c.l.b16 %v14834_v23  ;;  %v6702_v49 = vsel %vm19341_vm15, %v14837_v51, %v6701_v29  ;;  %v5917_v42 = vmax.f32 %v5915_v17, %v5916_v12  ;;  %v5124_v54 = vcombine.high %v4820_v30, %v4820_v30 }
 0x37f   : > { %6703 = vst [vmem:[#allocation2 + $0x1c] sm:$0x1] %v6702_v49  ;;  %v5911_v25 = vrot.slane %v5910_v27, 1  ;;  %v5924_v14 = vmax.f32 %v5922_v60, %v5923_v8  ;;  %v5930_v37 = vrot.slane %v5929_v33, 2  ;;  %v5131_v63 = vrot.slane %v4820_v30, %v19221_v34 }
 0x380   : > { %v6692_v9 = vsel %vm6572_vm12, %v6685_v56, %v6691_v39  ;;  %v5918_v6 = vrot.slane %v5917_v42, 1  ;;  %v5138_v40 = vrot.slane %v5124_v54, %v19221_v34  ;;  %v4787_v15 = vadd.f32 %v19508_v5, %v4748_v48 }
 0x381   : > { %v6693_v18 = vsel %vm6574_vm13, %v6686_v19, %v6692_v9  ;;  %v19533_v1 = vmax.f32 %v5910_v27, %v5911_v25  ;;  %v5925_v32 = vrot.slane %v5924_v14, 1  ;;  %v5931_v31 = vmax.f32 %v5929_v33, %v5930_v37  ;;  %v19548_v33 = vpop.f32.mrb[232].mxu0 }
 0x382   : > { %v6694_v22 = vpack.c.b16 %v6693_v18, %v6693_v18  ;;  %v5919_v26 = vmax.f32 %v5917_v42, %v5918_v6  ;;  %v5139_v62 = vcombine.high %v5131_v63, %v5131_v63  ;;  %v5140_v35 = vcombine.high %v5138_v40, %v5138_v40 }
 0x383   : > { %v5926_v7 = vmax.f32 %v5924_v14, %v5925_v32  ;;  %v5932_v30 = vrot.slane %v5931_v31, 1  ;;  %v5962_v58 = vsel %vm5541_vm5, %v5131_v63, -inf  ;;  %v5976_v2 = vsel %vm5541_vm5, %v5138_v40, -inf }
 0x384   : > { %v6699_v48 = vsel %vm19354_vm0, %v6694_v22, %v6698_v13  ;;  %v5963_v46 = vrot.slane %v5962_v58, 4  ;;  %v5969_v4 = vsel %vm5541_vm5, %v5139_v62, -inf  ;;  %v5977_v17 = vrot.slane %v5976_v2, 4 }
 0x385   : > { %6700 = vst [vmem:[#allocation2 + $0x18] sm:$0xf] %v6699_v48  ;;  %v5933_v45 = vmax.f32 %v5931_v31, %v5932_v30  ;;  %v5970_v29 = vrot.slane %v5969_v4, 4  ;;  %v5983_v36 = vsel %vm5541_vm5, %v5140_v35, -inf  ;;  %v4819_v60 = vmax.f32 %v4787_v15, 0.0 }
 0x386   : > { %v5964_v55 = vmax.f32 %v5962_v58, %v5963_v46  ;;  %v5978_v23 = vmax.f32 %v5976_v2, %v5977_v17  ;;  %v5984_v19 = vrot.slane %v5983_v36, 4  ;;  %v4750_v51 = vadd.f32 %v19316_v52, %v19168_v50 }
 0x387   : > { %v5971_v12 = vmax.f32 %v5969_v4, %v5970_v29  ;;  %v5107_v39 = vcombine.high %v4819_v60, %v4819_v60  ;;  %v5114_v27 = vrot.slane %v4819_v60, %v19221_v34  ;;  %v19546_v8 = vadd.f32 %v19318_v16, %v19170_v11  ;;  %v19556_v60 = vpop.f32.mrb[233].mxu0 }
 0x388   : > { %v5965_v56 = vrot.slane %v5964_v55, 2  ;;  %v5979_v49 = vrot.slane %v5978_v23, 2  ;;  %v5985_v42 = vmax.f32 %v5983_v36, %v5984_v19  ;;  %v4789_v54 = vadd.f32 %v19508_v5, %v4750_v51 }
 0x389   : > { %v5972_v25 = vrot.slane %v5971_v12, 2  ;;  %v5121_v14 = vrot.slane %v5107_v39, %v19221_v34  ;;  %v5122_v37 = vcombine.high %v5114_v27, %v5114_v27  ;;  %v5934_v50 = vsel %vm5541_vm5, %v5114_v27, -inf }
 0x38a   : > { %v5966_v52 = vmax.f32 %v5964_v55, %v5965_v56  ;;  %v5980_v63 = vmax.f32 %v5978_v23, %v5979_v49  ;;  %v5986_v9 = vrot.slane %v5985_v42, 2  ;;  %v5935_v6 = vrot.slane %v5934_v50, 4 }
 0x38b   : > { %v5973_v40 = vmax.f32 %v5971_v12, %v5972_v25  ;;  %v5123_v11 = vcombine.high %v5121_v14, %v5121_v14  ;;  %v5941_v16 = vsel %vm5541_vm5, %v5122_v37, -inf  ;;  %v5948_v15 = vsel %vm5541_vm5, %v5121_v14, -inf }
 0x38c   : > { %v5967_v18 = vrot.slane %v5966_v52, 1  ;;  %v5981_v13 = vrot.slane %v5980_v63, 1  ;;  %v5987_v32 = vmax.f32 %v5985_v42, %v5986_v9  ;;  %v5936_v31 = vmax.f32 %v5934_v50, %v5935_v6  ;;  %v6757_v50 = vld [vmem:[#allocation2 + $0x24] sm:$0x1] }
 0x38d   : > { %v5974_v22 = vrot.slane %v5973_v40, 1  ;;  %v5942_v62 = vrot.slane %v5941_v16, 4  ;;  %v5949_v35 = vrot.slane %v5948_v15, 4  ;;  %v5955_v30 = vsel %vm5541_vm5, %v5123_v11, -inf }
 0x38e   : > { %v5968_v58 = vmax.f32 %v5966_v52, %v5967_v18  ;;  %v5982_v2 = vmax.f32 %v5980_v63, %v5981_v13  ;;  %v5988_v48 = vrot.slane %v5987_v32, 1  ;;  %v5937_v46 = vrot.slane %v5936_v31, 2  ;;  %v19561_v18 = vpop.f32.mrb[234].mxu0 }
 0x38f   : > { %v5975_v4 = vmax.f32 %v5973_v40, %v5974_v22  ;;  %v5943_v17 = vmax.f32 %v5941_v16, %v5942_v62  ;;  %v5950_v29 = vmax.f32 %v5948_v15, %v5949_v35  ;;  %v5956_v36 = vrot.slane %v5955_v30, 4  ;;  %v4709_v22 = vpop.f32.mrb[235].mxu0 }
 0x390   : > { %v5989_v55 = vmax.f32 %v5987_v32, %v5988_v48  ;;  %v6466_v23 = vmax.f32 %v19533_v1, %v5968_v58  ;;  %v6468_v19 = vmax.f32 %v5926_v7, %v5982_v2  ;;  %v5938_v51 = vmax.f32 %v5936_v31, %v5937_v46 }
 0x391   : > { %v6467_v12 = vmax.f32 %v5919_v26, %v5975_v4  ;;  %v5944_v39 = vrot.slane %v5943_v17, 2  ;;  %v5951_v27 = vrot.slane %v5950_v29, 2  ;;  %v5957_v56 = vmax.f32 %v5955_v30, %v5956_v36 }
 0x392   : > { %v6469_v49 = vmax.f32 %v5933_v45, %v5989_v55  ;;  %v14842_v42 = vpack.c.bf16 %v6466_v23, %v6466_v23  ;;  %v14844_v25 = vpack.c.bf16 %v6468_v19, %v6468_v19  ;;  %v5939_v14 = vrot.slane %v5938_v51, 1 }
 0x393   : > { %v14843_v37 = vpack.c.bf16 %v6467_v12, %v6467_v12  ;;  %v5945_v52 = vmax.f32 %v5943_v17, %v5944_v39  ;;  %v5952_v63 = vmax.f32 %v5950_v29, %v5951_v27  ;;  %v5958_v9 = vrot.slane %v5957_v56, 2 }
 0x394   : > { %v6740_v6 = vunpack.c.l.b16 %v14842_v42  ;;  %v19559_v40 = vunpack.c.l.b16 %v14844_v25  ;;  %v14846_v11 = vpack.c.bf16 %v6469_v49, %v6469_v49  ;;  %v5940_v1 = vmax.f32 %v5938_v51, %v5939_v14 }
 0x395   : > { %v6741_v7 = vunpack.c.l.b16 %v14843_v37  ;;  %v5946_v16 = vrot.slane %v5945_v52, 1  ;;  %v5953_v26 = vrot.slane %v5952_v63, 1  ;;  %v5959_v15 = vmax.f32 %v5957_v56, %v5958_v9 }
 0x396   : > { %v6758_v45 = vsel %vm19341_vm15, %v14846_v11, %v6757_v50  ;;  %v6462_v13 = vmax.f32 %v19489_v41, %v5940_v1  ;;  %v4821_v32 = vmax.f32 %v4789_v54, 0.0  ;;  %v4791_v31 = vadd.f32 %v19508_v5, %v19546_v8 }
 0x397   : > { %6759 = vst [vmem:[#allocation2 + $0x24] sm:$0x1] %v6758_v45  ;;  %v5947_v62 = vmax.f32 %v5945_v52, %v5946_v16  ;;  %v5954_v35 = vmax.f32 %v5952_v63, %v5953_v26  ;;  %v5960_v30 = vrot.slane %v5959_v15, 1  ;;  %v4751_v58 = vadd.f32 %v19332_v43, %v19172_v28 }
 0x398   : > { %v14838_v2 = vpack.c.bf16 %v6462_v13, %v6462_v13  ;;  %v5141_v48 = vcombine.high %v4821_v32, %v4821_v32  ;;  %v5148_v46 = vrot.slane %v4821_v32, %v19221_v34  ;;  %v4823_v4 = vmax.f32 %v4791_v31, 0.0 }
 0x399   : > { %v5961_v17 = vmax.f32 %v5959_v15, %v5960_v30  ;;  %v6463_v41 = vmax.f32 %v19493_v20, %v5947_v62  ;;  %v6464_v54 = vmax.f32 %v19498_v44, %v5954_v35  ;;  %v19574_v8 = vadd.f32 %v19508_v5, %v4751_v58 }
 0x39a   : > { %v6736_v29 = vunpack.c.l.b16 %v14838_v2  ;;  %v5155_v36 = vrot.slane %v5141_v48, %v19221_v34  ;;  %v5156_v55 = vcombine.high %v5148_v46, %v5148_v46  ;;  %v5990_v23 = vsel %vm5541_vm5, %v5148_v46, -inf }
 0x39b   : > { %v6465_v28 = vmax.f32 %v19500_v3, %v5961_v17  ;;  %v14839_v43 = vpack.c.bf16 %v6463_v41, %v6463_v41  ;;  %v14840_v19 = vpack.c.bf16 %v6464_v54, %v6464_v54  ;;  %v5991_v51 = vrot.slane %v5990_v23, 4 }
 0x39c   : > { %v5157_v12 = vcombine.high %v5155_v36, %v5155_v36  ;;  %v5997_v39 = vsel %vm5541_vm5, %v5156_v55, -inf  ;;  %v6004_v20 = vsel %vm5541_vm5, %v5155_v36, -inf  ;;  %v5175_v44 = vcombine.high %v4823_v4, %v4823_v4 }
 0x39d   : > { %v14841_v27 = vpack.c.bf16 %v6465_v28, %v6465_v28  ;;  %v6737_v56 = vunpack.c.l.b16 %v14839_v43  ;;  %v6738_v49 = vunpack.c.l.b16 %v14840_v19  ;;  %v5992_v42 = vmax.f32 %v5990_v23, %v5991_v51 }
 0x39e   : > { %v5998_v25 = vrot.slane %v5997_v39, 4  ;;  %v6005_v14 = vrot.slane %v6004_v20, 4  ;;  %v6011_v37 = vsel %vm5541_vm5, %v5157_v12, -inf  ;;  %v5182_v50 = vrot.slane %v4823_v4, %v19221_v34  ;;  %v6754_v4 = vld [vmem:[#allocation2 + $0x20] sm:$0xf] }
 0x39f   : > { %v6739_v3 = vunpack.c.l.b16 %v14841_v27  ;;  %v6744_v52 = vsel %vm6564_vm6, %v6737_v56, %v6736_v29  ;;  %v5993_v63 = vrot.slane %v5992_v42, 2  ;;  %v6012_v9 = vrot.slane %v6011_v37, 4 }
 0x3a0   : > { %v6745_v11 = vsel %vm6566_vm7, %v6738_v49, %v6744_v52  ;;  %v5999_v1 = vmax.f32 %v5997_v39, %v5998_v25  ;;  %v6006_v16 = vmax.f32 %v6004_v20, %v6005_v14  ;;  %v5189_v26 = vrot.slane %v5175_v44, %v19221_v34  ;;  %v16644_v39 = vld [vmem:[#allocation2 + $0x8] sm:$0xff]   ;;  %v16649_v49 = vld [vmem:[#allocation2 + $0x10] sm:$0xff]  }
 0x3a1   : > { %v6746_v15 = vsel %vm6568_vm8, %v6739_v3, %v6745_v11  ;;  %v5994_v45 = vmax.f32 %v5992_v42, %v5993_v63  ;;  %v6013_v13 = vmax.f32 %v6011_v37, %v6012_v9  ;;  %v5190_v32 = vcombine.high %v5182_v50, %v5182_v50  ;;  %16265 = vmatprep.mubr.msk.bf16.mxu0 %vm7133_vm1, %v16644_v39 }
 0x3a2   : > { %v6747_v31 = vsel %vm6570_vm11, %v6740_v6, %v6746_v15  ;;  %v6000_v22 = vrot.slane %v5999_v1, 2  ;;  %v6007_v62 = vrot.slane %v6006_v16, 2  ;;  %v5191_v35 = vcombine.high %v5189_v26, %v5189_v26  ;;  %16266 = vmatmul.mubr.msk.bf16.vlgmr.msra.gmra.mrb[240].mxu0 %vm7133_vm1, %v16649_v49 }
 0x3a3   : > { %v6748_v30 = vsel %vm6572_vm12, %v6741_v7, %v6747_v31  ;;  %v5995_v58 = vrot.slane %v5994_v45, 1  ;;  %v6014_v2 = vrot.slane %v6013_v13, 2  ;;  %v6046_v48 = vsel %vm5541_vm5, %v5182_v50, -inf  ;;  %v16652_v50 = vld [vmem:[#allocation2 + $0x18] sm:$0xff]  }
 0x3a4   : > { %v6749_v46 = vsel %vm6574_vm13, %v19559_v40, %v6748_v30  ;;  %v6001_v17 = vmax.f32 %v5999_v1, %v6000_v22  ;;  %v6008_v41 = vmax.f32 %v6006_v16, %v6007_v62  ;;  %v6047_v54 = vrot.slane %v6046_v48, 4  ;;  %16269 = vmatprep.mubr.msk.bf16.mxu0 %vm7133_vm1, %v16652_v50 }
 0x3a5   : > { %v6750_v29 = vpack.c.b16 %v6749_v46, %v6749_v46  ;;  %v5996_v36 = vmax.f32 %v5994_v45, %v5995_v58  ;;  %v6015_v55 = vmax.f32 %v6013_v13, %v6014_v2  ;;  %v6053_v6 = vsel %vm5541_vm5, %v5190_v32, -inf  ;;  %v20752_v13 = vld [vmem:[#allocation22_spill] sm:$0xff] }
 0x3a6   : > { %v6002_v23 = vrot.slane %v6001_v17, 1  ;;  %v6009_v28 = vrot.slane %v6008_v41, 1  ;;  %v6048_v43 = vmax.f32 %v6046_v48, %v6047_v54  ;;  %v6054_v7 = vrot.slane %v6053_v6, 4 }
 0x3a7   : > { %v6755_v19 = vsel %vm19354_vm0, %v6750_v29, %v6754_v4  ;;  %v6016_v51 = vrot.slane %v6015_v55, 1  ;;  %v6060_v12 = vsel %vm5541_vm5, %v5189_v26, -inf  ;;  %v6067_v40 = vsel %vm5541_vm5, %v5191_v35, -inf }
 0x3a8   : > { %6756 = vst [vmem:[#allocation2 + $0x20] sm:$0xf] %v6755_v19  ;;  %v6003_v20 = vmax.f32 %v6001_v17, %v6002_v23  ;;  %v6010_v44 = vmax.f32 %v6008_v41, %v6009_v28  ;;  %v6049_v27 = vrot.slane %v6048_v43, 2  ;;  %v6055_v56 = vmax.f32 %v6053_v6, %v6054_v7 }
 0x3a9   : > { %v6017_v42 = vmax.f32 %v6015_v55, %v6016_v51  ;;  %v6061_v25 = vrot.slane %v6060_v12, 4  ;;  %v6068_v14 = vrot.slane %v6067_v40, 4  ;;  %v4822_v37 = vmax.f32 %v19574_v8, 0.0  ;;  %v20753_v8 = vld [vmem:[#allocation34_spill] sm:$0xff] }
 0x3aa   : > { %v6050_v3 = vmax.f32 %v6048_v43, %v6049_v27  ;;  %v6056_v52 = vrot.slane %v6055_v56, 2  ;;  %v4754_v63 = vadd.f32 %v19379_v24, %v19177_v61  ;;  %v19605_v32 = vadd.f32 %v20753_v8, %v20752_v13 }
 0x3ab   : > { %v6062_v9 = vmax.f32 %v6060_v12, %v6061_v25  ;;  %v6069_v11 = vmax.f32 %v6067_v40, %v6068_v14  ;;  %v5158_v1 = vcombine.high %v4822_v37, %v4822_v37  ;;  %v5165_v16 = vrot.slane %v4822_v37, %v19221_v34 }
 0x3ac   : > { %v6051_v26 = vrot.slane %v6050_v3, 1  ;;  %v6057_v15 = vmax.f32 %v6055_v56, %v6056_v52  ;;  %v4793_v45 = vadd.f32 %v19508_v5, %v4754_v63 }
 0x3ad   : > { %v6063_v31 = vrot.slane %v6062_v9, 2  ;;  %v6070_v22 = vrot.slane %v6069_v11, 2  ;;  %v5172_v61 = vrot.slane %v5158_v1, %v19221_v34  ;;  %v5173_v24 = vcombine.high %v5165_v16, %v5165_v16 }
 0x3ae   : > { %v6052_v62 = vmax.f32 %v6050_v3, %v6051_v26  ;;  %v6058_v35 = vrot.slane %v6057_v15, 1  ;;  %v6018_v30 = vsel %vm5541_vm5, %v5165_v16, -inf  ;;  %v4825_v58 = vmax.f32 %v4793_v45, 0.0 }
 0x3af   : > { %v6064_v2 = vmax.f32 %v6062_v9, %v6063_v31  ;;  %v6071_v48 = vmax.f32 %v6069_v11, %v6070_v22  ;;  %v5174_v46 = vcombine.high %v5172_v61, %v5172_v61  ;;  %v6019_v4 = vrot.slane %v6018_v30, 4 }
 0x3b0   : > { %v6059_v17 = vmax.f32 %v6057_v15, %v6058_v35  ;;  %v6470_v41 = vmax.f32 %v5996_v36, %v6052_v62  ;;  %v6025_v54 = vsel %vm5541_vm5, %v5173_v24, -inf  ;;  %v6032_v29 = vsel %vm5541_vm5, %v5172_v61, -inf }
 0x3b1   : > { %v6065_v55 = vrot.slane %v6064_v2, 1  ;;  %v6072_v6 = vrot.slane %v6071_v48, 1  ;;  %v6020_v23 = vmax.f32 %v6018_v30, %v6019_v4  ;;  %v6026_v28 = vrot.slane %v6025_v54, 4  ;;  %v19619_v30 = vpop.f32.mrb[236].mxu0 }
 0x3b2   : > { %v6471_v43 = vmax.f32 %v6003_v20, %v6059_v17  ;;  %v14847_v7 = vpack.c.bf16 %v6470_v41, %v6470_v41  ;;  %v6033_v19 = vrot.slane %v6032_v29, 4  ;;  %v6039_v51 = vsel %vm5541_vm5, %v5174_v46, -inf  ;;  %v4721_v4 = vpop.f32.mrb[237].mxu0  ;;  %v16654_v17 = vld [vmem:[#allocation2 + $0x20] sm:$0xff]  }
 0x3b3   : > { %v6066_v12 = vmax.f32 %v6064_v2, %v6065_v55  ;;  %v6073_v40 = vmax.f32 %v6071_v48, %v6072_v6  ;;  %v6021_v39 = vrot.slane %v6020_v23, 2  ;;  %v6027_v27 = vmax.f32 %v6025_v54, %v6026_v28  ;;  %v16200_v6 = vpop.f32.mrb[238].mxu0  ;;  %16270 = vmatmul.mubr.msk.bf16.gmra.mrb[244].mxu0 %vm7133_vm1, %v16654_v17 }
 0x3b4   : > { %v14848_v56 = vpack.c.bf16 %v6471_v43, %v6471_v43  ;;  %v6792_v49 = vunpack.c.l.b16 %v14847_v7  ;;  %v6034_v36 = vmax.f32 %v6032_v29, %v6033_v19  ;;  %v6040_v25 = vrot.slane %v6039_v51, 4  ;;  %v19634_v19 = vpop.f32.mrb[239].mxu0  ;;  %v6985_v6 = vld [vmem:[#allocation2 + $0x4] sm:$0xf] }
 0x3b5   : > { %v6472_v14 = vmax.f32 %v6010_v44, %v6066_v12  ;;  %v6473_v37 = vmax.f32 %v6017_v42, %v6073_v40  ;;  %v6022_v50 = vmax.f32 %v6020_v23, %v6021_v39  ;;  %v6028_v3 = vrot.slane %v6027_v27, 2 }
 0x3b6   : > { %v6793_v52 = vunpack.c.l.b16 %v14848_v56  ;;  %v6035_v63 = vrot.slane %v6034_v36, 2  ;;  %v6041_v9 = vmax.f32 %v6039_v51, %v6040_v25  ;;  %v5209_v20 = vcombine.high %v4825_v58, %v4825_v58 }
 0x3b7   : > { %v14849_v11 = vpack.c.bf16 %v6472_v14, %v6472_v14  ;;  %v14850_v1 = vpack.c.bf16 %v6473_v37, %v6473_v37  ;;  %v6023_v16 = vrot.slane %v6022_v50, 1  ;;  %v6029_v26 = vmax.f32 %v6027_v27, %v6028_v3 }
 0x3b8   : > { %v6800_v15 = vsel %vm6564_vm6, %v6793_v52, %v6792_v49  ;;  %v6036_v45 = vmax.f32 %v6034_v36, %v6035_v63  ;;  %v6042_v13 = vrot.slane %v6041_v9, 2  ;;  %v5216_v8 = vrot.slane %v4825_v58, %v19221_v34  ;;  %v20754_v49 = vld [vmem:[#allocation23_spill] sm:$0xff] }
 0x3b9   : > { %v6794_v31 = vunpack.c.l.b16 %v14849_v11  ;;  %v6795_v22 = vunpack.c.l.b16 %v14850_v1  ;;  %v19616_v44 = vmax.f32 %v6022_v50, %v6023_v16  ;;  %v6030_v42 = vrot.slane %v6029_v26, 1 }
 0x3ba   : > { %v6037_v61 = vrot.slane %v6036_v45, 1  ;;  %v6043_v24 = vmax.f32 %v6041_v9, %v6042_v13  ;;  %v5223_v62 = vrot.slane %v5209_v20, %v19221_v34  ;;  %v5224_v35 = vcombine.high %v5216_v8, %v5216_v8 }
 0x3bb   : > { %v6801_v2 = vsel %vm6566_vm7, %v6794_v31, %v6800_v15  ;;  %v19622_v48 = vmax.f32 %v6029_v26, %v6030_v42  ;;  %v6102_v46 = vsel %vm5541_vm5, %v5216_v8, -inf  ;;  %v4792_v58 = vadd.f32 %v19508_v5, %v19605_v32 }
 0x3bc   : > { %v19627_v41 = vmax.f32 %v6036_v45, %v6037_v61  ;;  %v6044_v54 = vrot.slane %v6043_v24, 1  ;;  %v5225_v29 = vcombine.high %v5223_v62, %v5223_v62  ;;  %v6103_v55 = vrot.slane %v6102_v46, 4 }
 0x3bd   : > { %v6109_v23 = vsel %vm5541_vm5, %v5224_v35, -inf  ;;  %v6116_v28 = vsel %vm5541_vm5, %v5223_v62, -inf  ;;  %v4824_v43 = vmax.f32 %v4792_v58, 0.0  ;;  %v19632_v7 = vsel %vm6568_vm8, %v6795_v22, %v6801_v2 }
 0x3be   : > { %v19637_v32 = vmax.f32 %v6043_v24, %v6044_v54  ;;  %v6104_v51 = vmax.f32 %v6102_v46, %v6103_v55  ;;  %v6110_v12 = vrot.slane %v6109_v23, 4  ;;  %v6117_v40 = vrot.slane %v6116_v28, 4  ;;  %v6984_v55 = vld [vmem:[#allocation2] sm:$0xf] }
 0x3bf   : > { %v6123_v39 = vsel %vm5541_vm5, %v5225_v29, -inf  ;;  %v5192_v27 = vcombine.high %v4824_v43, %v4824_v43  ;;  %v5199_v56 = vrot.slane %v4824_v43, %v19221_v34  ;;  %v4755_v36 = vadd.f32 %v19399_v59, %v20754_v49 }
 0x3c0   : > { %v6105_v25 = vrot.slane %v6104_v51, 2  ;;  %v6111_v14 = vmax.f32 %v6109_v23, %v6110_v12  ;;  %v6118_v37 = vmax.f32 %v6116_v28, %v6117_v40  ;;  %v6124_v50 = vrot.slane %v6123_v39, 4 }
 0x3c1   : > { %v5206_v3 = vrot.slane %v5192_v27, %v19221_v34  ;;  %v5207_v52 = vcombine.high %v5199_v56, %v5199_v56  ;;  %v6074_v63 = vsel %vm5541_vm5, %v5199_v56, -inf  ;;  %v4794_v9 = vadd.f32 %v19508_v5, %v4755_v36 }
 0x3c2   : > { %v6106_v20 = vmax.f32 %v6104_v51, %v6105_v25  ;;  %v6112_v11 = vrot.slane %v6111_v14, 2  ;;  %v6119_v1 = vrot.slane %v6118_v37, 2  ;;  %v6125_v16 = vmax.f32 %v6123_v39, %v6124_v50 }
 0x3c3   : > { %v5208_v26 = vcombine.high %v5206_v3, %v5206_v3  ;;  %v6075_v15 = vrot.slane %v6074_v63, 4  ;;  %v6081_v45 = vsel %vm5541_vm5, %v5207_v52, -inf  ;;  %v6088_v59 = vsel %vm5541_vm5, %v5206_v3, -inf }
 0x3c4   : > { %v6107_v13 = vrot.slane %v6106_v20, 1  ;;  %v6113_v8 = vmax.f32 %v6111_v14, %v6112_v11  ;;  %v6120_v31 = vmax.f32 %v6118_v37, %v6119_v1  ;;  %v6126_v22 = vrot.slane %v6125_v16, 2 }
 0x3c5   : > { %v6076_v42 = vmax.f32 %v6074_v63, %v6075_v15  ;;  %v6082_v61 = vrot.slane %v6081_v45, 4  ;;  %v6089_v24 = vrot.slane %v6088_v59, 4  ;;  %v6095_v62 = vsel %vm5541_vm5, %v5208_v26, -inf }
 0x3c6   : > { %v19649_v35 = vmax.f32 %v6106_v20, %v6107_v13  ;;  %v6114_v2 = vrot.slane %v6113_v8, 1  ;;  %v6121_v46 = vrot.slane %v6120_v31, 1  ;;  %v6127_v58 = vmax.f32 %v6125_v16, %v6126_v22 }
 0x3c7   : > { %v6077_v4 = vrot.slane %v6076_v42, 2  ;;  %v6083_v17 = vmax.f32 %v6081_v45, %v6082_v61  ;;  %v6090_v54 = vmax.f32 %v6088_v59, %v6089_v24  ;;  %v6096_v29 = vrot.slane %v6095_v62, 4 }
 0x3c8   : > { %v19651_v23 = vmax.f32 %v6113_v8, %v6114_v2  ;;  %v19653_v28 = vmax.f32 %v6120_v31, %v6121_v46  ;;  %v6128_v43 = vrot.slane %v6127_v58, 1  ;;  %v4826_v51 = vmax.f32 %v4794_v9, 0.0 }
 0x3c9   : > { %v6078_v12 = vmax.f32 %v6076_v42, %v6077_v4  ;;  %v6084_v40 = vrot.slane %v6083_v17, 2  ;;  %v6091_v39 = vrot.slane %v6090_v54, 2  ;;  %v6097_v27 = vmax.f32 %v6095_v62, %v6096_v29 }
 0x3ca   : > { %v19655_v56 = vmax.f32 %v6127_v58, %v6128_v43  ;;  %v5226_v49 = vcombine.high %v4826_v51, %v4826_v51  ;;  %v5233_v36 = vrot.slane %v4826_v51, %v19221_v34  ;;  %v19658_v25 = vcombine.low %v6984_v55, %v6985_v6 }
 0x3cb   : > { %v6079_v14 = vrot.slane %v6078_v12, 1  ;;  %v6085_v37 = vmax.f32 %v6083_v17, %v6084_v40  ;;  %v6092_v50 = vmax.f32 %v6090_v54, %v6091_v39  ;;  %v6098_v3 = vrot.slane %v6097_v27, 2  ;;  %v16646_v40 = vld [vmem:[#allocation2 + $0x8] sm:$0xff]  }
 0x3cc   : > { %v5240_v52 = vrot.slane %v5226_v49, %v19221_v34  ;;  %v5241_v63 = vcombine.high %v5233_v36, %v5233_v36  ;;  %v6130_v9 = vsel %vm5541_vm5, %v5233_v36, -inf  ;;  %v7054_v20 = vshrl.u32 %v19658_v25, 16  ;;  %v6813_v39 = vld [vmem:[#allocation2 + $0x2c] sm:$0x1] }
 0x3cd   : > { %v6080_v11 = vmax.f32 %v6078_v12, %v6079_v14  ;;  %v6086_v1 = vrot.slane %v6085_v37, 1  ;;  %v6093_v16 = vrot.slane %v6092_v50, 1  ;;  %v6099_v26 = vmax.f32 %v6097_v27, %v6098_v3 }
 0x3ce   : > { %v5242_v15 = vcombine.high %v5240_v52, %v5240_v52  ;;  %v6131_v45 = vrot.slane %v6130_v9, 4  ;;  %v6137_v59 = vsel %vm5541_vm5, %v5241_v63, -inf  ;;  %v6144_v13 = vsel %vm5541_vm5, %v5240_v52, -inf }
 0x3cf   : > { %v6087_v8 = vmax.f32 %v6085_v37, %v6086_v1  ;;  %v6094_v31 = vmax.f32 %v6092_v50, %v6093_v16  ;;  %v6100_v22 = vrot.slane %v6099_v26, 1  ;;  %v6474_v42 = vmax.f32 %v19616_v44, %v6080_v11 }
 0x3d0   : > { %v6132_v61 = vmax.f32 %v6130_v9, %v6131_v45  ;;  %v6138_v24 = vrot.slane %v6137_v59, 4  ;;  %v6145_v62 = vrot.slane %v6144_v13, 4  ;;  %v6151_v2 = vsel %vm5541_vm5, %v5242_v15, -inf  ;;  %v6810_v15 = vld [vmem:[#allocation2 + $0x28] sm:$0xf] }
 0x3d1   : > { %v6101_v46 = vmax.f32 %v6099_v26, %v6100_v22  ;;  %v6475_v58 = vmax.f32 %v19622_v48, %v6087_v8  ;;  %v6476_v4 = vmax.f32 %v19627_v41, %v6094_v31  ;;  %v14851_v17 = vpack.c.bf16 %v6474_v42, %v6474_v42 }
 0x3d2   : > { %v6133_v54 = vrot.slane %v6132_v61, 2  ;;  %v6139_v29 = vmax.f32 %v6137_v59, %v6138_v24  ;;  %v6146_v55 = vmax.f32 %v6144_v13, %v6145_v62  ;;  %v6152_v6 = vrot.slane %v6151_v2, 4  ;;  %v19679_v13 = vld [vmem:[#allocation2 + $0x10] sm:$0xff]  }
 0x3d3   : > { %v6477_v43 = vmax.f32 %v19637_v32, %v6101_v46  ;;  %v14852_v51 = vpack.c.bf16 %v6475_v58, %v6475_v58  ;;  %v14853_v12 = vpack.c.bf16 %v6476_v4, %v6476_v4  ;;  %v6796_v44 = vunpack.c.l.b16 %v14851_v17 }
 0x3d4   : > { %v6134_v27 = vmax.f32 %v6132_v61, %v6133_v54  ;;  %v6140_v49 = vrot.slane %v6139_v29, 2  ;;  %v6147_v36 = vrot.slane %v6146_v55, 2  ;;  %v6153_v14 = vmax.f32 %v6151_v2, %v6152_v6  ;;  %v20755_v2 = vld [vmem:[#allocation24_spill] sm:$0xff]  ;;  %v20756_v54 = vld [vmem:[#allocation25_spill] sm:$0xff] }
 0x3d5   : > { %v6797_v37 = vunpack.c.l.b16 %v14852_v51  ;;  %v6798_v48 = vunpack.c.l.b16 %v14853_v12  ;;  %v6803_v41 = vsel %vm6570_vm11, %v6796_v44, %v19632_v7  ;;  %v14855_v50 = vpack.c.bf16 %v6477_v43, %v6477_v43  ;;  %v20757_v43 = vld [vmem:[#allocation26_spill] sm:$0xff] }
 0x3d6   : > { %v6135_v3 = vrot.slane %v6134_v27, 1  ;;  %v6141_v52 = vmax.f32 %v6139_v29, %v6140_v49  ;;  %v6148_v63 = vmax.f32 %v6146_v55, %v6147_v36  ;;  %v6154_v9 = vrot.slane %v6153_v14, 2  ;;  %v20759_v36 = vld [vmem:[#allocation28_spill] sm:$0xff] }
 0x3d7   : > { %v6804_v32 = vsel %vm6572_vm12, %v6797_v37, %v6803_v41  ;;  %v6814_v11 = vsel %vm19341_vm15, %v14855_v50, %v6813_v39  ;;  %v7056_v1 = vshll.u32 %v19658_v25, 16  ;;  %v7061_v16 = vshll.u32 %v16646_v40, 16  ;;  %v20758_v39 = vld [vmem:[#allocation27_spill] sm:$0xff]  ;;  %v20760_v41 = vld [vmem:[#allocation29_spill] sm:$0xff] }
 0x3d8   : > { %v6805_v26 = vsel %vm6574_vm13, %v6798_v48, %v6804_v32  ;;  %6815 = vst [vmem:[#allocation2 + $0x2c] sm:$0x1] %v6814_v11  ;;  %v19677_v45 = vmax.f32 %v6134_v27, %v6135_v3  ;;  %v6142_v7 = vrot.slane %v6141_v52, 1  ;;  %v6149_v59 = vrot.slane %v6148_v63, 1  ;;  %v20761_v3 = vld [vmem:[#allocation30_spill] sm:$0xff] }
 0x3d9   : > { %v6806_v8 = vpack.c.b16 %v6805_v26, %v6805_v26  ;;  %v6155_v31 = vmax.f32 %v6153_v14, %v6154_v9  ;;  %v7058_v22 = vrot.slane %v7056_v1, 1  ;;  %v7063_v42 = vrot.slane %v7061_v16, 1  ;;  %v16659_v14 = vld [vmem:[#allocation7] sm:$0xff]  }
 0x3da   : > { %v19681_v61 = vmax.f32 %v6141_v52, %v6142_v7  ;;  %v19683_v24 = vmax.f32 %v6148_v63, %v6149_v59  ;;  %v7065_v62 = vshrl.u32 %v16646_v40, 16  ;;  %v4757_v46 = vadd.f32 %v19457_v10, %v20755_v2  ;;  %v16663_v52 = vld [vmem:[#allocation7 + $0x8] sm:$0xff]   ;;  %16221 = vmatprep.subr.bf16.mxu1 %v16659_v14 }
 0x3db   : > { %v6811_v58 = vsel %vm19354_vm0, %v6806_v8, %v6810_v15  ;;  %v6156_v4 = vrot.slane %v6155_v31, 1  ;;  %v7059_v17 = vor.u32 %v7058_v22, %v7054_v20  ;;  %v4756_v29 = vadd.f32 %v19483_v57, %v20756_v54 }
 0x3dc   : > { %6812 = vst [vmem:[#allocation2 + $0x28] sm:$0xf] %v6811_v58  ;;  %v7067_v55 = vor.u32 %v7065_v62, %v7063_v42  ;;  %v4796_v6 = vadd.f32 %v19508_v5, %v4757_v46  ;;  %v4758_v51 = vadd.f32 %v19491_v47, %v20757_v43  ;;  %v7069_v12 = vshll.u32 %v19679_v13, 16 }
 0x3dd   : > { %v19697_v10 = vmax.f32 %v6155_v31, %v6156_v4  ;;  %v7064_v44 = vsel %vm565_vm2, %v7059_v17, %v7063_v42  ;;  %v4795_v40 = vadd.f32 %v19508_v5, %v4756_v29  ;;  %v4760_v20 = vadd.f32 %v19496_v53, %v20758_v39  ;;  %v16665_v39 = vld [vmem:[#allocation7 + $0x50] sm:$0xff]  }
 0x3de   : > { %16205 = vmatprep.mubr.msk.bf16.mxu1 %vm7133_vm1, %v7064_v44  ;;  %v4828_v57 = vmax.f32 %v4796_v6, 0.0  ;;  %v4797_v27 = vadd.f32 %v19508_v5, %v4758_v51  ;;  %v19705_v49 = vrot.slane %v7069_v12, 1  ;;  %v4759_v47 = vadd.f32 %v19519_v0, %v20759_v36  ;;  %16301 = vmatprep.subr.bf16.mxu0 %v16665_v39 }
 0x3df   : > { %v4827_v37 = vmax.f32 %v4795_v40, 0.0  ;;  %v4799_v48 = vadd.f32 %v19508_v5, %v4760_v20  ;;  %v19712_v50 = vadd.f32 %v19548_v33, %v20760_v41  ;;  %v19716_v53 = vadd.f32 %v19556_v60, %v20761_v3  ;;  %16302 = vmatpush3.bf16.msra.mxu0 %v16665_v39 }
 0x3e0   : > { %v5260_v63 = vcombine.high %v4828_v57, %v4828_v57  ;;  %v5267_v9 = vrot.slane %v4828_v57, %v19221_v34  ;;  %v19719_v32 = vmax.f32 %v4797_v27, 0.0  ;;  %v7072_v0 = vsel %vm565_vm2, %v7067_v55, %v19705_v49 }
 0x3e1   : > { %v5243_v11 = vcombine.high %v4827_v37, %v4827_v37  ;;  %v5250_v1 = vrot.slane %v4827_v37, %v19221_v34  ;;  %16206 = vmatmul.mubr.msk.bf16.vlgmr.msra.gmra.mrb[192].mxu1 %vm7133_vm1, %v7072_v0  ;;  %v19725_v33 = vmax.f32 %v4799_v48, 0.0  ;;  %v19728_v60 = vadd.f32 %v19508_v5, %v4759_v47  ;;  %v16670_v47 = vld [vmem:[#allocation7 + $0x58] sm:$0xff]  }
 0x3e2   : > { %v5274_v16 = vrot.slane %v5260_v63, %v19221_v34  ;;  %v5275_v26 = vcombine.high %v5267_v9, %v5267_v9  ;;  %v6186_v15 = vsel %vm5541_vm5, %v5267_v9, -inf  ;;  %v5277_v7 = vcombine.high %v19719_v32, %v19719_v32  ;;  %16222 = vmatpush3.bf16.msra.mxu1 %v16659_v14  ;;  %16303 = vmatprep.subr.bf16.mxu0 %v16670_v47 }
 0x3e3   : > { %v6187_v59 = vrot.slane %v6186_v15, 4  ;;  %v5257_v8 = vrot.slane %v5243_v11, %v19221_v34  ;;  %v5258_v31 = vcombine.high %v5250_v1, %v5250_v1  ;;  %v6158_v22 = vsel %vm5541_vm5, %v5250_v1, -inf  ;;  %v16656_v42 = vld [vmem:[#allocation2 + $0x28] sm:$0xff]   ;;  %16223 = vmatprep.subr.bf16.mxu1 %v16663_v52  ;;  %16304 = vmatpush3.bf16.msra.mxu0 %v16670_v47 }
 0x3e4   : > { %v5276_v62 = vcombine.high %v5274_v16, %v5274_v16  ;;  %v6193_v5 = vsel %vm5541_vm5, %v5275_v26, -inf  ;;  %v6200_v2 = vsel %vm5541_vm5, %v5274_v16, -inf  ;;  %v6159_v46 = vrot.slane %v6158_v22, 4  ;;  %16273 = vmatprep.mubr.msk.bf16.mxu0 %vm7133_vm1, %v16656_v42 }
 0x3e5   : > { %v6188_v58 = vmax.f32 %v6186_v15, %v6187_v59  ;;  %v6194_v4 = vrot.slane %v6193_v5, 4  ;;  %v6201_v17 = vrot.slane %v6200_v2, 4  ;;  %v5259_v54 = vcombine.high %v5257_v8, %v5257_v8 }
 0x3e6   : > { %v6207_v29 = vsel %vm5541_vm5, %v5276_v62, -inf  ;;  %v6160_v55 = vmax.f32 %v6158_v22, %v6159_v46  ;;  %v6165_v6 = vsel %vm5541_vm5, %v5258_v31, -inf  ;;  %v6172_v43 = vsel %vm5541_vm5, %v5257_v8, -inf  ;;  %16224 = vmatpush3.bf16.msra.mxu1 %v16663_v52 }
 0x3e7   : > { %v6189_v51 = vrot.slane %v6188_v58, 2  ;;  %v6195_v12 = vmax.f32 %v6193_v5, %v6194_v4  ;;  %v6202_v44 = vmax.f32 %v6200_v2, %v6201_v17  ;;  %v6208_v40 = vrot.slane %v6207_v29, 4 }
 0x3e8   : > { %v6161_v20 = vrot.slane %v6160_v55, 2  ;;  %v6166_v57 = vrot.slane %v6165_v6, 4  ;;  %v6173_v27 = vrot.slane %v6172_v43, 4  ;;  %v6179_v36 = vsel %vm5541_vm5, %v5259_v54, -inf }
 0x3e9   : > { %v6190_v14 = vmax.f32 %v6188_v58, %v6189_v51  ;;  %v6196_v37 = vrot.slane %v6195_v12, 2  ;;  %v6203_v48 = vrot.slane %v6202_v44, 2  ;;  %v6209_v41 = vmax.f32 %v6207_v29, %v6208_v40 }
 0x3ea   : > { %v6162_v3 = vmax.f32 %v6160_v55, %v6161_v20  ;;  %v6167_v63 = vmax.f32 %v6165_v6, %v6166_v57  ;;  %v6174_v9 = vmax.f32 %v6172_v43, %v6173_v27  ;;  %v6180_v52 = vrot.slane %v6179_v36, 4 }
 0x3eb   : > { %v6191_v0 = vrot.slane %v6190_v14, 1  ;;  %v6197_v11 = vmax.f32 %v6195_v12, %v6196_v37  ;;  %v6204_v1 = vmax.f32 %v6202_v44, %v6203_v48  ;;  %v6210_v16 = vrot.slane %v6209_v41, 2  ;;  %v16674_v12 = vld [vmem:[#allocation7 + $0x20] sm:$0xff]  }
 0x3ec   : > { %v6163_v26 = vrot.slane %v6162_v3, 1  ;;  %v6168_v15 = vrot.slane %v6167_v63, 2  ;;  %v6175_v59 = vrot.slane %v6174_v9, 2  ;;  %v6181_v8 = vmax.f32 %v6179_v36, %v6180_v52  ;;  %16241 = vmatprep.subr.bf16.mxu1 %v16674_v12 }
 0x3ed   : > { %v6192_v31 = vmax.f32 %v6190_v14, %v6191_v0  ;;  %v6198_v22 = vrot.slane %v6197_v11, 1  ;;  %v6205_v42 = vrot.slane %v6204_v1, 1  ;;  %v6211_v62 = vmax.f32 %v6209_v41, %v6210_v16  ;;  %v6869_v41 = vld [vmem:[#allocation2 + $0x34] sm:$0x1] }
 0x3ee   : > { %v6164_v5 = vmax.f32 %v6162_v3, %v6163_v26  ;;  %v6169_v2 = vmax.f32 %v6167_v63, %v6168_v15  ;;  %v6176_v46 = vmax.f32 %v6174_v9, %v6175_v59  ;;  %v6182_v58 = vrot.slane %v6181_v8, 2 }
 0x3ef   : > { %v6199_v4 = vmax.f32 %v6197_v11, %v6198_v22  ;;  %v6206_v17 = vmax.f32 %v6204_v1, %v6205_v42  ;;  %v6212_v54 = vrot.slane %v6211_v62, 1  ;;  %v6482_v29 = vmax.f32 %v19677_v45, %v6192_v31 }
 0x3f0   : > { %v6170_v55 = vrot.slane %v6169_v2, 1  ;;  %v6177_v6 = vrot.slane %v6176_v46, 1  ;;  %v6183_v43 = vmax.f32 %v6181_v8, %v6182_v58  ;;  %v6478_v51 = vmax.f32 %v19649_v35, %v6164_v5 }
 0x3f1   : > { %v6213_v44 = vmax.f32 %v6211_v62, %v6212_v54  ;;  %v6483_v40 = vmax.f32 %v19681_v61, %v6199_v4  ;;  %v6484_v39 = vmax.f32 %v19683_v24, %v6206_v17  ;;  %v14860_v20 = vpack.c.bf16 %v6482_v29, %v6482_v29 }
 0x3f2   : > { %v6171_v57 = vmax.f32 %v6169_v2, %v6170_v55  ;;  %v6178_v27 = vmax.f32 %v6176_v46, %v6177_v6  ;;  %v6184_v36 = vrot.slane %v6183_v43, 1  ;;  %v14856_v47 = vpack.c.bf16 %v6478_v51, %v6478_v51 }
 0x3f3   : > { %v6485_v14 = vmax.f32 %v19697_v10, %v6213_v44  ;;  %v14861_v45 = vpack.c.bf16 %v6483_v40, %v6483_v40  ;;  %v14862_v37 = vpack.c.bf16 %v6484_v39, %v6484_v39  ;;  %v6852_v48 = vunpack.c.l.b16 %v14860_v20  ;;  %v6866_v39 = vld [vmem:[#allocation2 + $0x30] sm:$0xf] }
 0x3f4   : > { %v6185_v3 = vmax.f32 %v6183_v43, %v6184_v36  ;;  %v6479_v35 = vmax.f32 %v19651_v23, %v6171_v57  ;;  %v6480_v63 = vmax.f32 %v19653_v28, %v6178_v27  ;;  %v6848_v61 = vunpack.c.l.b16 %v14856_v47 }
 0x3f5   : > { %v6853_v9 = vunpack.c.l.b16 %v14861_v45  ;;  %v6854_v24 = vunpack.c.l.b16 %v14862_v37  ;;  %v14864_v52 = vpack.c.bf16 %v6485_v14, %v6485_v14  ;;  %v5284_v0 = vrot.slane %v19719_v32, %v19221_v34 }
 0x3f6   : > { %v6481_v11 = vmax.f32 %v19655_v56, %v6185_v3  ;;  %v14857_v1 = vpack.c.bf16 %v6479_v35, %v6479_v35  ;;  %v14858_v10 = vpack.c.bf16 %v6480_v63, %v6480_v63  ;;  %v5291_v16 = vrot.slane %v5277_v7, %v19221_v34 }
 0x3f7   : > { %v6870_v23 = vsel %vm19341_vm15, %v14864_v52, %v6869_v41  ;;  %v5292_v28 = vcombine.high %v5284_v0, %v5284_v0  ;;  %v6214_v26 = vsel %vm5541_vm5, %v5284_v0, -inf  ;;  %v5311_v15 = vcombine.high %v19725_v33, %v19725_v33 }
 0x3f8   : > { %6871 = vst [vmem:[#allocation2 + $0x34] sm:$0x1] %v6870_v23  ;;  %v14859_v59 = vpack.c.bf16 %v6481_v11, %v6481_v11  ;;  %v6849_v8 = vunpack.c.l.b16 %v14857_v1  ;;  %v6850_v56 = vunpack.c.l.b16 %v14858_v10  ;;  %v5293_v31 = vcombine.high %v5291_v16, %v5291_v16 }
 0x3f9   : > { %v6215_v22 = vrot.slane %v6214_v26, 4  ;;  %v6221_v42 = vsel %vm5541_vm5, %v5292_v28, -inf  ;;  %v6228_v32 = vsel %vm5541_vm5, %v5291_v16, -inf  ;;  %v5318_v7 = vrot.slane %v19725_v33, %v19221_v34 }
 0x3fa   : > { %v6851_v62 = vunpack.c.l.b16 %v14859_v59  ;;  %v6856_v5 = vsel %vm6564_vm6, %v6849_v8, %v6848_v61  ;;  %v6222_v2 = vrot.slane %v6221_v42, 4  ;;  %v6229_v46 = vrot.slane %v6228_v32, 4 }
 0x3fb   : > { %v6857_v58 = vsel %vm6566_vm7, %v6850_v56, %v6856_v5  ;;  %v6216_v4 = vmax.f32 %v6214_v26, %v6215_v22  ;;  %v6235_v17 = vsel %vm5541_vm5, %v5293_v31, -inf  ;;  %v5325_v54 = vrot.slane %v5311_v15, %v19221_v34 }
 0x3fc   : > { %v6858_v29 = vsel %vm6568_vm8, %v6851_v62, %v6857_v58  ;;  %v6223_v55 = vmax.f32 %v6221_v42, %v6222_v2  ;;  %v6230_v6 = vmax.f32 %v6228_v32, %v6229_v46  ;;  %v6236_v43 = vrot.slane %v6235_v17, 4  ;;  %v19784_v32 = vld [vmem:[%s20693_s2] ss:$0 sm:$0xff]  ;;  %v19788_v58 = vld [vmem:[#allocation7 + $0x70] sm:$0xff]  }
 0x3fd   : > { %v6859_v51 = vsel %vm6570_vm11, %v6852_v48, %v6858_v29  ;;  %v6217_v33 = vrot.slane %v6216_v4, 2  ;;  %v5326_v12 = vcombine.high %v5318_v7, %v5318_v7  ;;  %v5327_v44 = vcombine.high %v5325_v54, %v5325_v54  ;;  %16341 = vmatprep.subr.bf16.mxu0 %v19788_v58 }
 0x3fe   : > { %v6860_v40 = vsel %vm6572_vm12, %v6853_v9, %v6859_v51  ;;  %v6224_v20 = vrot.slane %v6223_v55, 2  ;;  %v6231_v57 = vrot.slane %v6230_v6, 2  ;;  %v6237_v27 = vmax.f32 %v6235_v17, %v6236_v43 }
 0x3ff   : > { %v6861_v36 = vsel %vm6574_vm13, %v6854_v24, %v6860_v40  ;;  %v6218_v47 = vmax.f32 %v6216_v4, %v6217_v33  ;;  %v6270_v14 = vsel %vm5541_vm5, %v5318_v7, -inf  ;;  %v6277_v45 = vsel %vm5541_vm5, %v5326_v12, -inf }
 0x400   : > { %v6862_v37 = vpack.c.b16 %v6861_v36, %v6861_v36  ;;  %v6225_v41 = vmax.f32 %v6223_v55, %v6224_v20  ;;  %v6232_v3 = vmax.f32 %v6230_v6, %v6231_v57  ;;  %v6238_v48 = vrot.slane %v6237_v27, 2 }
 0x401   : > { %v6219_v35 = vrot.slane %v6218_v47, 1  ;;  %v6271_v63 = vrot.slane %v6270_v14, 4  ;;  %v6278_v61 = vrot.slane %v6277_v45, 4  ;;  %v6284_v9 = vsel %vm5541_vm5, %v5325_v54, -inf }
 0x402   : > { %v6867_v52 = vsel %vm19354_vm0, %v6862_v37, %v6866_v39  ;;  %v6226_v0 = vrot.slane %v6225_v41, 1  ;;  %v6233_v11 = vrot.slane %v6232_v3, 1  ;;  %v6239_v24 = vmax.f32 %v6237_v27, %v6238_v48 }
 0x403   : > { %6868 = vst [vmem:[#allocation2 + $0x30] sm:$0xf] %v6867_v52  ;;  %v6272_v1 = vmax.f32 %v6270_v14, %v6271_v63  ;;  %v6279_v10 = vmax.f32 %v6277_v45, %v6278_v61  ;;  %v6285_v16 = vrot.slane %v6284_v9, 4  ;;  %v6220_v23 = vmax.f32 %v6218_v47, %v6219_v35 }
 0x404   : > { %v6240_v28 = vrot.slane %v6239_v24, 1  ;;  %v6291_v26 = vsel %vm5541_vm5, %v5327_v44, -inf  ;;  %v6227_v31 = vmax.f32 %v6225_v41, %v6226_v0  ;;  %v6234_v22 = vmax.f32 %v6232_v3, %v6233_v11 }
 0x405   : > { %v6273_v15 = vrot.slane %v6272_v1, 2  ;;  %v6280_v59 = vrot.slane %v6279_v10, 2  ;;  %v6286_v8 = vmax.f32 %v6284_v9, %v6285_v16  ;;  %v6292_v56 = vrot.slane %v6291_v26, 4 }
 0x406   : > { %v4830_v42 = vmax.f32 %v19728_v60, 0.0  ;;  %v4801_v7 = vadd.f32 %v19784_v32, %v19712_v50  ;;  %v6241_v4 = vmax.f32 %v6239_v24, %v6240_v28  ;;  %v4800_v12 = vadd.f32 %v19784_v32, %v19716_v53 }
 0x407   : > { %v6274_v62 = vmax.f32 %v6272_v1, %v6273_v15  ;;  %v6281_v5 = vmax.f32 %v6279_v10, %v6280_v59  ;;  %v6287_v2 = vrot.slane %v6286_v8, 2  ;;  %v6293_v46 = vmax.f32 %v6291_v26, %v6292_v56 }
 0x408   : > { %v5294_v17 = vcombine.high %v4830_v42, %v4830_v42  ;;  %v5301_v54 = vrot.slane %v4830_v42, %v19221_v34  ;;  %v4833_v29 = vmax.f32 %v4801_v7, 0.0 }
 0x409   : > { %v6275_v60 = vrot.slane %v6274_v62, 1  ;;  %v6282_v55 = vrot.slane %v6281_v5, 1  ;;  %v6288_v6 = vmax.f32 %v6286_v8, %v6287_v2  ;;  %v6294_v43 = vrot.slane %v6293_v46, 2 }
 0x40a   : > { %v5308_v51 = vrot.slane %v5294_v17, %v19221_v34  ;;  %v5309_v50 = vcombine.high %v5301_v54, %v5301_v54  ;;  %v6242_v33 = vsel %vm5541_vm5, %v5301_v54, -inf  ;;  %v16658_v44 = vld [vmem:[#allocation2 + $0x30] sm:$0xff]   ;;  %v5345_v63 = vcombine.high %v4833_v29, %v4833_v29 }
 0x40b   : > { %v6276_v40 = vmax.f32 %v6274_v62, %v6275_v60  ;;  %v6283_v39 = vmax.f32 %v6281_v5, %v6282_v55  ;;  %v6289_v20 = vrot.slane %v6288_v6, 1  ;;  %v6295_v57 = vmax.f32 %v6293_v46, %v6294_v43  ;;  %16274 = vmatmul.mubr.msk.bf16.gmra.mrb[248].mxu0 %vm7133_vm1, %v16658_v44  ;;  %v19947_v38 = vld [vmem:[#allocation2 + $0x30] sm:$0xff]  }
 0x40c   : > { %v5310_v27 = vcombine.high %v5308_v51, %v5308_v51  ;;  %v6243_v36 = vrot.slane %v6242_v33, 4  ;;  %v6249_v47 = vsel %vm5541_vm5, %v5309_v50, -inf  ;;  %v6256_v14 = vsel %vm5541_vm5, %v5308_v51, -inf }
 0x40d   : > { %v6290_v45 = vmax.f32 %v6288_v6, %v6289_v20  ;;  %v6296_v37 = vrot.slane %v6295_v57, 1  ;;  %v6486_v41 = vmax.f32 %v6220_v23, %v6276_v40  ;;  %v6487_v3 = vmax.f32 %v6227_v31, %v6283_v39 }
 0x40e   : > { %v6250_v48 = vrot.slane %v6249_v47, 4  ;;  %v6257_v35 = vrot.slane %v6256_v14, 4  ;;  %v6263_v53 = vsel %vm5541_vm5, %v5310_v27, -inf  ;;  %v6244_v11 = vmax.f32 %v6242_v33, %v6243_v36 }
 0x40f   : > { %v6297_v61 = vmax.f32 %v6295_v57, %v6296_v37  ;;  %v6488_v9 = vmax.f32 %v6234_v22, %v6290_v45  ;;  %v14865_v52 = vpack.c.bf16 %v6486_v41, %v6486_v41  ;;  %v14866_v0 = vpack.c.bf16 %v6487_v3, %v6487_v3 }
 0x410   : > { %v6251_v24 = vmax.f32 %v6249_v47, %v6250_v48  ;;  %v6258_v1 = vmax.f32 %v6256_v14, %v6257_v35  ;;  %v6264_v10 = vrot.slane %v6263_v53, 4  ;;  %v5352_v31 = vrot.slane %v4833_v29, %v19221_v34 }
 0x411   : > { %v6489_v16 = vmax.f32 %v6241_v4, %v6297_v61  ;;  %v14867_v28 = vpack.c.bf16 %v6488_v9, %v6488_v9  ;;  %v6904_v26 = vunpack.c.l.b16 %v14865_v52  ;;  %v6905_v15 = vunpack.c.l.b16 %v14866_v0 }
 0x412   : > { %v6265_v59 = vmax.f32 %v6263_v53, %v6264_v10  ;;  %v6245_v42 = vrot.slane %v6244_v11, 2  ;;  %v6252_v7 = vrot.slane %v6251_v24, 2  ;;  %v6259_v22 = vrot.slane %v6258_v1, 2 }
 0x413   : > { %v14868_v23 = vpack.c.bf16 %v6489_v16, %v6489_v16  ;;  %v6906_v8 = vunpack.c.l.b16 %v14867_v28  ;;  %v6912_v56 = vsel %vm6564_vm6, %v6905_v15, %v6904_v26  ;;  %v5359_v5 = vrot.slane %v5345_v63, %v19221_v34 }
 0x414   : > { %v5360_v2 = vcombine.high %v5352_v31, %v5352_v31  ;;  %v4832_v46 = vmax.f32 %v4800_v12, 0.0  ;;  %v6266_v17 = vrot.slane %v6265_v59, 2  ;;  %v6326_v60 = vsel %vm5541_vm5, %v5352_v31, -inf }
 0x415   : > { %v6913_v62 = vsel %vm6566_vm7, %v6906_v8, %v6912_v56  ;;  %v6907_v4 = vunpack.c.l.b16 %v14868_v23  ;;  %v5361_v54 = vcombine.high %v5359_v5, %v5359_v5  ;;  %v6340_v6 = vsel %vm5541_vm5, %v5359_v5, -inf }
 0x416   : > { %v6333_v55 = vsel %vm5541_vm5, %v5360_v2, -inf  ;;  %v6246_v43 = vmax.f32 %v6244_v11, %v6245_v42  ;;  %v6253_v29 = vmax.f32 %v6251_v24, %v6252_v7  ;;  %v6260_v51 = vmax.f32 %v6258_v1, %v6259_v22  ;;  %v19821_v42 = vld [vmem:[#allocation2 + $0x18] sm:$0xff]  }
 0x417   : > { %v6327_v50 = vrot.slane %v6326_v60, 4  ;;  %v6334_v33 = vrot.slane %v6333_v55, 4  ;;  %v6341_v44 = vrot.slane %v6340_v6, 4  ;;  %v6347_v40 = vsel %vm5541_vm5, %v5361_v54, -inf }
 0x418   : > { %v5328_v39 = vcombine.high %v4832_v46, %v4832_v46  ;;  %v6267_v20 = vmax.f32 %v6265_v59, %v6266_v17  ;;  %v6348_v57 = vrot.slane %v6347_v40, 4  ;;  %v5335_v27 = vrot.slane %v4832_v46, %v19221_v34 }
 0x419   : > { %v6328_v12 = vmax.f32 %v6326_v60, %v6327_v50  ;;  %v6335_v36 = vmax.f32 %v6333_v55, %v6334_v33  ;;  %v6342_v47 = vmax.f32 %v6340_v6, %v6341_v44  ;;  %v19811_v45 = vsel %vm6568_vm8, %v6907_v4, %v6913_v62  ;;  %v20762_v6 = vld [vmem:[#allocation31_spill] sm:$0xff] }
 0x41a   : > { %v5342_v14 = vrot.slane %v5328_v39, %v19221_v34  ;;  %v6247_v37 = vrot.slane %v6246_v43, 1  ;;  %v5343_v3 = vcombine.high %v5335_v27, %v5335_v27  ;;  %v6298_v48 = vsel %vm5541_vm5, %v5335_v27, -inf }
 0x41b   : > { %v6329_v41 = vrot.slane %v6328_v12, 2  ;;  %v6254_v35 = vrot.slane %v6253_v29, 1  ;;  %v6261_v53 = vrot.slane %v6260_v51, 1  ;;  %v6299_v61 = vrot.slane %v6298_v48, 4 }
 0x41c   : > { %v5344_v63 = vcombine.high %v5342_v14, %v5342_v14  ;;  %v6268_v9 = vrot.slane %v6267_v20, 1  ;;  %v19814_v52 = vmax.f32 %v6347_v40, %v6348_v57  ;;  %v6305_v0 = vsel %vm5541_vm5, %v5343_v3, -inf }
 0x41d   : > { %v6312_v11 = vsel %vm5541_vm5, %v5342_v14, -inf  ;;  %v6336_v24 = vrot.slane %v6335_v36, 2  ;;  %v6343_v1 = vrot.slane %v6342_v47, 2  ;;  %v6300_v10 = vmax.f32 %v6298_v48, %v6299_v61 }
 0x41e   : > { %v6306_v16 = vrot.slane %v6305_v0, 4  ;;  %v6248_v28 = vmax.f32 %v6246_v43, %v6247_v37  ;;  %v19818_v26 = vmax.f32 %v6328_v12, %v6329_v41  ;;  %v6313_v15 = vrot.slane %v6312_v11, 4 }
 0x41f   : > { %v6319_v59 = vsel %vm5541_vm5, %v5344_v63, -inf  ;;  %v6255_v23 = vmax.f32 %v6253_v29, %v6254_v35  ;;  %v6262_v8 = vmax.f32 %v6260_v51, %v6261_v53  ;;  %v6301_v56 = vrot.slane %v6300_v10, 2  ;;  %v20764_v35 = vld [vmem:[#allocation33_spill] sm:$0xff] }
 0x420   : > { %v6307_v31 = vmax.f32 %v6305_v0, %v6306_v16  ;;  %v6269_v7 = vmax.f32 %v6267_v20, %v6268_v9  ;;  %v6350_v22 = vrot.slane %v19814_v52, 2  ;;  %v6314_v62 = vmax.f32 %v6312_v11, %v6313_v15  ;;  %v20763_v20 = vld [vmem:[#allocation32_spill] sm:$0xff] }
 0x421   : > { %v6320_v5 = vrot.slane %v6319_v59, 4  ;;  %v19824_v2 = vmax.f32 %v6335_v36, %v6336_v24  ;;  %v19826_v46 = vmax.f32 %v6342_v47, %v6343_v1  ;;  %v6302_v4 = vmax.f32 %v6300_v10, %v6301_v56 }
 0x422   : > { %v6308_v17 = vrot.slane %v6307_v31, 2  ;;  %v6331_v54 = vrot.slane %v19818_v26, 1  ;;  %v6315_v60 = vrot.slane %v6314_v62, 2  ;;  %v4763_v43 = vadd.f32 %v19561_v18, %v20762_v6 }
 0x423   : > { %v6321_v55 = vmax.f32 %v6319_v59, %v6320_v5  ;;  %v6303_v29 = vrot.slane %v6302_v4, 1  ;;  %v7073_v50 = vshrl.u32 %v19679_v13, 16  ;;  %v7077_v33 = vshll.u32 %v19821_v42, 16 }
 0x424   : > { %v6309_v51 = vmax.f32 %v6307_v31, %v6308_v17  ;;  %v6316_v44 = vmax.f32 %v6314_v62, %v6315_v60  ;;  %v4802_v39 = vadd.f32 %v19784_v32, %v4763_v43  ;;  %v4765_v12 = vadd.f32 %v19619_v30, %v20763_v20 }
 0x425   : > { %v6322_v40 = vrot.slane %v6321_v55, 2  ;;  %v6304_v57 = vmax.f32 %v6302_v4, %v6303_v29  ;;  %v7075_v36 = vor.u32 %v7073_v50, %v19705_v49  ;;  %v19837_v47 = vrot.slane %v7077_v33, 1 }
 0x426   : > { %v6310_v27 = vrot.slane %v6309_v51, 1  ;;  %v6317_v18 = vrot.slane %v6316_v44, 1  ;;  %v4834_v37 = vmax.f32 %v4802_v39, 0.0  ;;  %v4804_v13 = vadd.f32 %v19784_v32, %v4765_v12 }
 0x427   : > { %v6323_v14 = vmax.f32 %v6321_v55, %v6322_v40  ;;  %v6490_v3 = vmax.f32 %v6248_v28, %v6304_v57  ;;  %v7080_v48 = vsel %vm565_vm2, %v7075_v36, %v19837_v47  ;;  %v4764_v53 = vadd.f32 %v19634_v19, %v20764_v35  ;;  %v6922_v40 = vld [vmem:[#allocation2 + $0x38] sm:$0xf] }
 0x428   : > { %v6311_v41 = vmax.f32 %v6309_v51, %v6310_v27  ;;  %v6318_v30 = vmax.f32 %v6316_v44, %v6317_v18  ;;  %v5362_v61 = vcombine.high %v4834_v37, %v4834_v37  ;;  %v5369_v49 = vrot.slane %v4834_v37, %v19221_v34  ;;  %16209 = vmatprep.mubr.msk.bf16.mxu1 %vm7133_vm1, %v7080_v48 }
 0x429   : > { %v6324_v63 = vrot.slane %v6323_v14, 1  ;;  %v14869_v0 = vpack.c.bf16 %v6490_v3, %v6490_v3  ;;  %v4836_v11 = vmax.f32 %v4804_v13, 0.0  ;;  %v19847_v24 = vadd.f32 %v19784_v32, %v4764_v53  ;;  %v6925_v32 = vld [vmem:[#allocation2 + $0x3c] sm:$0x1] }
 0x42a   : > { %v6491_v9 = vmax.f32 %v6255_v23, %v6311_v41  ;;  %v6492_v10 = vmax.f32 %v6262_v8, %v6318_v30  ;;  %v5376_v16 = vrot.slane %v5362_v61, %v19221_v34  ;;  %v5377_v28 = vcombine.high %v5369_v49, %v5369_v49 }
 0x42b   : > { %v6325_v1 = vmax.f32 %v6323_v14, %v6324_v63  ;;  %v6908_v19 = vunpack.c.l.b16 %v14869_v0  ;;  %v6354_v59 = vsel %vm5541_vm5, %v5369_v49, -inf  ;;  %v5396_v56 = vcombine.high %v4836_v11, %v4836_v11 }
 0x42c   : > { %v14870_v15 = vpack.c.bf16 %v6491_v9, %v6491_v9  ;;  %v14871_v62 = vpack.c.bf16 %v6492_v10, %v6492_v10  ;;  %v5378_v5 = vcombine.high %v5376_v16, %v5376_v16  ;;  %v6355_v4 = vrot.slane %v6354_v59, 4 }
 0x42d   : > { %v6493_v31 = vmax.f32 %v6269_v7, %v6325_v1  ;;  %v6915_v17 = vsel %vm6570_vm11, %v6908_v19, %v19811_v45  ;;  %v6361_v60 = vsel %vm5541_vm5, %v5377_v28, -inf  ;;  %v6368_v8 = vsel %vm5541_vm5, %v5376_v16, -inf }
 0x42e   : > { %v6909_v23 = vunpack.c.l.b16 %v14870_v15  ;;  %v6910_v55 = vunpack.c.l.b16 %v14871_v62  ;;  %v6356_v43 = vmax.f32 %v6354_v59, %v6355_v4  ;;  %v6362_v29 = vrot.slane %v6361_v60, 4 }
 0x42f   : > { %v14873_v6 = vpack.c.bf16 %v6493_v31, %v6493_v31  ;;  %v6369_v50 = vrot.slane %v6368_v8, 4  ;;  %v6375_v7 = vsel %vm5541_vm5, %v5378_v5, -inf  ;;  %v5403_v33 = vrot.slane %v4836_v11, %v19221_v34 }
 0x430   : > { %v6916_v51 = vsel %vm6572_vm12, %v6909_v23, %v6915_v17  ;;  %v6357_v39 = vrot.slane %v6356_v43, 2  ;;  %v6363_v20 = vmax.f32 %v6361_v60, %v6362_v29  ;;  %v6376_v27 = vrot.slane %v6375_v7, 4 }
 0x431   : > { %v6917_v44 = vsel %vm6574_vm13, %v6910_v55, %v6916_v51  ;;  %v6926_v45 = vsel %vm19341_vm15, %v14873_v6, %v6925_v32  ;;  %v6370_v57 = vmax.f32 %v6368_v8, %v6369_v50  ;;  %v5410_v36 = vrot.slane %v5396_v56, %v19221_v34 }
 0x432   : > { %v6918_v12 = vpack.c.b16 %v6917_v44, %v6917_v44  ;;  %6927 = vst [vmem:[#allocation2 + $0x3c] sm:$0x1] %v6926_v45  ;;  %v6358_v18 = vmax.f32 %v6356_v43, %v6357_v39  ;;  %v6364_v14 = vrot.slane %v6363_v20, 2  ;;  %v5411_v37 = vcombine.high %v5403_v33, %v5403_v33 }
 0x433   : > { %v6410_v13 = vsel %vm5541_vm5, %v5403_v33, -inf  ;;  %v6371_v3 = vrot.slane %v6370_v57, 2  ;;  %v6377_v48 = vmax.f32 %v6375_v7, %v6376_v27  ;;  %v5412_v35 = vcombine.high %v5410_v36, %v5410_v36 }
 0x434   : > { %v6923_v41 = vsel %vm19354_vm0, %v6918_v12, %v6922_v40  ;;  %v6359_v53 = vrot.slane %v6358_v18, 1  ;;  %v6365_v30 = vmax.f32 %v6363_v20, %v6364_v14  ;;  %v6411_v63 = vrot.slane %v6410_v13, 4 }
 0x435   : > { %6924 = vst [vmem:[#allocation2 + $0x38] sm:$0xf] %v6923_v41  ;;  %v6417_v61 = vsel %vm5541_vm5, %v5411_v37, -inf  ;;  %v6372_v49 = vmax.f32 %v6370_v57, %v6371_v3  ;;  %v6378_v9 = vrot.slane %v6377_v48, 2  ;;  %v6424_v11 = vsel %vm5541_vm5, %v5410_v36, -inf }
 0x436   : > { %v6418_v0 = vrot.slane %v6417_v61, 4  ;;  %v19870_v1 = vmax.f32 %v19814_v52, %v6350_v22  ;;  %v6366_v10 = vrot.slane %v6365_v30, 1  ;;  %v6412_v16 = vmax.f32 %v6410_v13, %v6411_v63 }
 0x437   : > { %v6425_v28 = vrot.slane %v6424_v11, 4  ;;  %v6338_v15 = vrot.slane %v19824_v2, 1  ;;  %v6373_v19 = vrot.slane %v6372_v49, 1  ;;  %v6431_v56 = vsel %vm5541_vm5, %v5412_v35, -inf }
 0x438   : > { %v6419_v59 = vmax.f32 %v6417_v61, %v6418_v0  ;;  %v6379_v31 = vmax.f32 %v6377_v48, %v6378_v9  ;;  %v6413_v62 = vrot.slane %v6412_v16, 2  ;;  %v6432_v4 = vrot.slane %v6431_v56, 4 }
 0x439   : > { %v6426_v5 = vmax.f32 %v6424_v11, %v6425_v28  ;;  %v6345_v23 = vrot.slane %v19826_v46, 1  ;;  %v6360_v17 = vmax.f32 %v6358_v18, %v6359_v53  ;;  %v4835_v52 = vmax.f32 %v19847_v24, 0.0  ;;  %v19889_v11 = vld [vmem:[#allocation2 + $0x20] sm:$0xff]  }
 0x43a   : > { %v6420_v32 = vrot.slane %v6419_v59, 2  ;;  %v6367_v22 = vmax.f32 %v6365_v30, %v6366_v10  ;;  %v6414_v60 = vmax.f32 %v6412_v16, %v6413_v62  ;;  %v6433_v55 = vmax.f32 %v6431_v56, %v6432_v4 }
 0x43b   : > { %v6427_v8 = vrot.slane %v6426_v5, 2  ;;  %v6374_v6 = vmax.f32 %v6372_v49, %v6373_v19  ;;  %v5379_v29 = vcombine.high %v4835_v52, %v4835_v52  ;;  %v5386_v51 = vrot.slane %v4835_v52, %v19221_v34 }
 0x43c   : > { %v6421_v43 = vmax.f32 %v6419_v59, %v6420_v32  ;;  %v16661_v50 = vld [vmem:[#allocation2 + $0x38] sm:$0xff]   ;;  %v6380_v7 = vrot.slane %v6379_v31, 1  ;;  %v6415_v33 = vrot.slane %v6414_v60, 1  ;;  %v6434_v40 = vrot.slane %v6433_v55, 2 }
 0x43d   : > { %v6428_v44 = vmax.f32 %v6426_v5, %v6427_v8  ;;  %v5393_v39 = vrot.slane %v5379_v29, %v19221_v34  ;;  %v5394_v20 = vcombine.high %v5386_v51, %v5386_v51  ;;  %v6382_v24 = vsel %vm5541_vm5, %v5386_v51, -inf  ;;  %16277 = vmatprep.mubr.msk.bf16.mxu0 %vm7133_vm1, %v16661_v50  ;;  %v19902_v51 = vld [vmem:[#allocation2 + $0x30] sm:$0xff]  }
 0x43e   : > { %v6422_v45 = vrot.slane %v6421_v43, 1  ;;  %v6416_v12 = vmax.f32 %v6414_v60, %v6415_v33  ;;  %v6435_v27 = vmax.f32 %v6433_v55, %v6434_v40  ;;  %v6383_v36 = vrot.slane %v6382_v24, 4 }
 0x43f   : > { %v6429_v57 = vrot.slane %v6428_v44, 1  ;;  %v5395_v14 = vcombine.high %v5393_v39, %v5393_v39  ;;  %v6389_v37 = vsel %vm5541_vm5, %v5394_v20, -inf  ;;  %v6396_v13 = vsel %vm5541_vm5, %v5393_v39, -inf }
 0x440   : > { %v6423_v18 = vmax.f32 %v6421_v43, %v6422_v45  ;;  %v6436_v3 = vrot.slane %v6435_v27, 1  ;;  %v19882_v48 = vmax.f32 %v6360_v17, %v6416_v12  ;;  %v6384_v34 = vmax.f32 %v6382_v24, %v6383_v36  ;;  %v6981_v17 = vld [vmem:[#allocation2 + $0x44] sm:$0x1]  ;;  %v19911_v12 = vld [vmem:[#allocation2 + $0x38] sm:$0xff]  }
 0x441   : > { %v6430_v41 = vmax.f32 %v6428_v44, %v6429_v57  ;;  %v6390_v53 = vrot.slane %v6389_v37, 4  ;;  %v6397_v30 = vrot.slane %v6396_v13, 4  ;;  %v6403_v63 = vsel %vm5541_vm5, %v5395_v14, -inf }
 0x442   : > { %v19884_v35 = vmax.f32 %v6367_v22, %v6423_v18  ;;  %v6381_v61 = vmax.f32 %v6379_v31, %v6380_v7  ;;  %v6437_v49 = vmax.f32 %v6435_v27, %v6436_v3  ;;  %v6385_v0 = vrot.slane %v6384_v34, 2  ;;  %v19896_v31 = vld [vmem:[#allocation2 + $0x28] sm:$0xff]  }
 0x443   : > { %v19887_v9 = vmax.f32 %v6374_v6, %v6430_v41  ;;  %v6332_v10 = vmax.f32 %v19818_v26, %v6331_v54  ;;  %v6391_v16 = vmax.f32 %v6389_v37, %v6390_v53  ;;  %v6398_v28 = vmax.f32 %v6396_v13, %v6397_v30 }
 0x444   : > { %v6404_v19 = vrot.slane %v6403_v63, 4  ;;  %v6352_v59 = vrot.slane %v19870_v1, 1  ;;  %v6501_v56 = vmax.f32 %v6381_v61, %v6437_v49  ;;  %v6386_v62 = vmax.f32 %v6384_v34, %v6385_v0 }
 0x445   : > { %v7081_v5 = vshrl.u32 %v19821_v42, 16  ;;  %v6339_v4 = vmax.f32 %v19824_v2, %v6338_v15  ;;  %v6392_v32 = vrot.slane %v6391_v16, 2  ;;  %v6399_v52 = vrot.slane %v6398_v28, 2 }
 0x446   : > { %v6405_v22 = vmax.f32 %v6403_v63, %v6404_v19  ;;  %v14882_v60 = vpack.c.bf16 %v6501_v56, %v6501_v56  ;;  %v6387_v8 = vrot.slane %v6386_v62, 1  ;;  %v7085_v54 = vshll.u32 %v19889_v11, 16 }
 0x447   : > { %v7083_v26 = vor.u32 %v7081_v5, %v19837_v47  ;;  %v6393_v55 = vmax.f32 %v6391_v16, %v6392_v32  ;;  %v6400_v6 = vmax.f32 %v6398_v28, %v6399_v52  ;;  %v7089_v29 = vshrl.u32 %v19889_v11, 16 }
 0x448   : > { %v6406_v43 = vrot.slane %v6405_v22, 2  ;;  %v6982_v2 = vsel %vm19341_vm15, %v14882_v60, %v6981_v17  ;;  %v6388_v15 = vmax.f32 %v6386_v62, %v6387_v8  ;;  %v7087_v50 = vrot.slane %v7085_v54, 1  ;;  %v6978_v54 = vld [vmem:[#allocation2 + $0x40] sm:$0xf] }
 0x449   : > { %v7093_v7 = vshll.u32 %v19896_v31, 16  ;;  %v6346_v47 = vmax.f32 %v19826_v46, %v6345_v23  ;;  %6983 = vst [vmem:[#allocation2 + $0x44] sm:$0x1] %v6982_v2  ;;  %v6394_v33 = vrot.slane %v6393_v55, 1  ;;  %v6401_v44 = vrot.slane %v6400_v6, 1 }
 0x44a   : > { %v6407_v40 = vmax.f32 %v6405_v22, %v6406_v43  ;;  %v6494_v45 = vmax.f32 %v6332_v10, %v6388_v15  ;;  %v7088_v39 = vsel %vm565_vm2, %v7083_v26, %v7087_v50  ;;  %v7091_v20 = vor.u32 %v7089_v29, %v7087_v50  ;;  %v7983_v43 = vld [vmem:[#allocation2 + $0x8] sm:$0xe]  ;;  %v16667_v29 = vld [vmem:[#allocation2 + $0x10] sm:$0xff]   ;;  %v7718_v15 = vld [vmem:[#allocation2 + $0xc] sm:$0xf] }
 0x44b   : > { %v7095_v24 = vrot.slane %v7093_v7, 1  ;;  %v6395_v21 = vmax.f32 %v6393_v55, %v6394_v33  ;;  %v6402_v57 = vmax.f32 %v6400_v6, %v6401_v44  ;;  %16210 = vmatmul.mubr.msk.bf16.gmra.mrb[196].mxu1 %vm7133_vm1, %v7088_v39  ;;  %v7101_v36 = vshll.u32 %v19902_v51, 16  ;;  %v7717_v2 = vld [vmem:[#allocation2 + $0x8] sm:$0xf]  ;;  %v19939_v7 = vld [vmem:[#allocation2 + $0x18] sm:$0xff]  }
 0x44c   : > { %v6408_v27 = vrot.slane %v6407_v40, 1  ;;  %v6353_v46 = vmax.f32 %v19870_v1, %v6352_v59  ;;  %v14874_v23 = vpack.c.bf16 %v6494_v45, %v6494_v45  ;;  %v7097_v14 = vshrl.u32 %v19896_v31, 16  ;;  %v19943_v45 = vld [vmem:[#allocation2 + $0x20] sm:$0xff]   ;;  %v19945_v39 = vld [vmem:[#allocation2 + $0x28] sm:$0xff]  }
 0x44d   : > { %v7096_v18 = vsel %vm565_vm2, %v7091_v20, %v7095_v24  ;;  %v6495_v13 = vmax.f32 %v6339_v4, %v6395_v21  ;;  %v6496_v41 = vmax.f32 %v6346_v47, %v6402_v57  ;;  %v7103_v3 = vrot.slane %v7101_v36, 1 }
 0x44e   : > { %v6409_v37 = vmax.f32 %v6407_v40, %v6408_v27  ;;  %16213 = vmatprep.mubr.msk.bf16.mxu1 %vm7133_vm1, %v7096_v18  ;;  %v7099_v34 = vor.u32 %v7097_v14, %v7095_v24  ;;  %v7105_v53 = vshrl.u32 %v19902_v51, 16  ;;  %v7109_v30 = vshll.u32 %v19911_v12, 16 }
 0x44f   : > { %v14878_v63 = vpack.c.bf16 %v19882_v48, %v19882_v48  ;;  %v14875_v61 = vpack.c.bf16 %v6495_v13, %v6495_v13  ;;  %v14876_v49 = vpack.c.bf16 %v6496_v41, %v6496_v41  ;;  %v14879_v0 = vpack.c.bf16 %v19884_v35, %v19884_v35 }
 0x450   : > { %v6497_v1 = vmax.f32 %v6353_v46, %v6409_v37  ;;  %v7104_v10 = vsel %vm565_vm2, %v7099_v34, %v7103_v3  ;;  %v7107_v16 = vor.u32 %v7105_v53, %v7103_v3  ;;  %v7111_v28 = vrot.slane %v7109_v30, 1 }
 0x451   : > { %v6960_v59 = vunpack.c.l.b16 %v14874_v23  ;;  %v6961_v56 = vunpack.c.l.b16 %v14875_v61  ;;  %v6962_v62 = vunpack.c.l.b16 %v14876_v49  ;;  %v14880_v5 = vpack.c.bf16 %v19887_v9, %v19887_v9 }
 0x452   : > { %v14877_v19 = vpack.c.bf16 %v6497_v1, %v6497_v1  ;;  %v7112_v4 = vsel %vm565_vm2, %v7107_v16, %v7111_v28  ;;  %v6964_v32 = vunpack.c.l.b16 %v14878_v63  ;;  %v6965_v52 = vunpack.c.l.b16 %v14879_v0 }
 0x453   : > { %v6968_v17 = vsel %vm6564_vm6, %v6961_v56, %v6960_v59  ;;  %16214 = vmatmul.mubr.msk.bf16.gmra.mrb[200].mxu1 %vm7133_vm1, %v7104_v10  ;;  %v6966_v60 = vunpack.c.l.b16 %v14880_v5  ;;  %v14248_v50 = vcombine.low %v7983_v43, %v7718_v15  ;;  %v7380_v47 = vrot.slane %v19889_v11, 1 }
 0x454   : > { %v6963_v48 = vunpack.c.l.b16 %v14877_v19  ;;  %v6969_v35 = vsel %vm6566_vm7, %v6962_v62, %v6968_v17  ;;  %16217 = vmatprep.mubr.msk.bf16.mxu1 %vm7133_vm1, %v7112_v4  ;;  %v7382_v33 = vrot.slane %v19896_v31, 1  ;;  %v14229_v44 = vcombine.low %v7717_v2, %v7718_v15 }
 0x455   : > { %v7993_v40 = vrot.slane %v16667_v29, 1  ;;  %v7384_v24 = vrot.slane %v19902_v51, 1  ;;  %v7386_v21 = vrot.slane %v19911_v12, 1  ;;  %v7992_v27 = vrot.slane %v14248_v50, 1 }
 0x456   : > { %v6970_v22 = vsel %vm6568_vm8, %v6963_v48, %v6969_v35  ;;  %v19952_v20 = vsel %vm1314_vm3, %v7380_v47, %v7382_v33  ;;  %v7995_v36 = vrot.slane %v19939_v7, 1  ;;  %v7113_v37 = vshrl.u32 %v19911_v12, 16 }
 0x457   : > { %v6971_v8 = vsel %vm6570_vm11, %v6964_v32, %v6970_v22  ;;  %v19958_v23 = vsel %vm1314_vm3, %v7382_v33, %v7384_v24  ;;  %v19961_v18 = vsel %vm1314_vm3, %v7384_v24, %v7386_v21  ;;  %v7994_v14 = vsel %vm1314_vm3, %v7992_v27, %v7993_v40  ;;  %v8602_v32 = vld [vmem:[#allocation2 + $0x10] sm:$0xe]  ;;  %v16684_v22 = vld [vmem:[#allocation7 + $0x78] sm:$0xff]   ;;  %v20012_v33 = vld [vmem:[#allocation2 + $0x20] sm:$0xff]  }
 0x458   : > { %v6972_v9 = vsel %vm6572_vm12, %v6965_v52, %v6971_v8  ;;  %v7997_v13 = vrot.slane %v19943_v45, 1  ;;  %v7785_v41 = vshll.u32 %v14229_v44, 16  ;;  %v7999_v34 = vrot.slane %v19945_v39, 1 }
 0x459   : > { %v6973_v26 = vsel %vm6574_vm13, %v6966_v60, %v6972_v9  ;;  %v7790_v30 = vshll.u32 %v16667_v29, 16  ;;  %v8001_v63 = vrot.slane %v19947_v38, 1  ;;  %v7783_v1 = vshrl.u32 %v14229_v44, 16 }
 0x45a   : > { %v6974_v55 = vpack.c.b16 %v6973_v26, %v6973_v26  ;;  %v7787_v61 = vrot.slane %v7785_v41, 1  ;;  %v7996_v49 = vsel %vm1314_vm3, %v7993_v40, %v7995_v36  ;;  %v7115_v0 = vor.u32 %v7113_v37, %v7111_v28  ;;  %v19982_v28 = vld [vmem:[#allocation2 + $0x38] sm:$0xff]   ;;  %v19997_v26 = vld [vmem:[#allocation2 + $0x14] sm:$0xf]  ;;  %v16679_v41 = vld [vmem:[#allocation7 + $0x28] sm:$0xff]  }
 0x45b   : > { %v7998_v19 = vsel %vm1314_vm3, %v7995_v36, %v7997_v13  ;;  %v7792_v56 = vrot.slane %v7790_v30, 1  ;;  %v7794_v62 = vshrl.u32 %v16667_v29, 16  ;;  %v19977_v4 = vsel %vm1314_vm3, %v7997_v13, %v7999_v34  ;;  %v20020_v36 = vld [vmem:[#allocation2 + $0x28] sm:$0xff]  }
 0x45c   : > { %v6979_v6 = vsel %vm19354_vm0, %v6974_v55, %v6978_v54  ;;  %v7788_v59 = vor.u32 %v7787_v61, %v7783_v1  ;;  %v7798_v48 = vshll.u32 %v19939_v7, 16  ;;  %v7806_v17 = vshll.u32 %v19943_v45, 16 }
 0x45d   : > { %6980 = vst [vmem:[#allocation2 + $0x40] sm:$0xf] %v6979_v6  ;;  %v19987_v35 = vsel %vm1314_vm3, %v7999_v34, %v8001_v63  ;;  %v7796_v8 = vor.u32 %v7794_v62, %v7792_v56  ;;  %v7802_v9 = vshrl.u32 %v19939_v7, 16  ;;  %v7810_v6 = vshrl.u32 %v19943_v45, 16  ;;  %v20010_v7 = vld [vmem:[#allocation2 + $0x18] sm:$0xff]  }
 0x45e   : > { %v19992_v60 = vsel %vm565_vm2, %v7788_v59, %v7792_v56  ;;  %v7800_v54 = vrot.slane %v7798_v48, 1  ;;  %v7808_v55 = vrot.slane %v7806_v17, 1  ;;  %v7814_v43 = vshll.u32 %v19945_v39, 16  ;;  %v20043_v56 = vld [vmem:[#allocation2 + $0x8] sm:$0xff]  }
 0x45f   : > { %v7818_v29 = vshrl.u32 %v19945_v39, 16  ;;  %v7822_v2 = vshll.u32 %v19947_v38, 16  ;;  %v7826_v15 = vshrl.u32 %v19947_v38, 16  ;;  %v14296_v50 = vcombine.low %v8602_v32, %v19997_v26  ;;  %v17184_v32 = vld [vmem:[#allocation7 + $0x20] sm:$0xff]  }
 0x460   : > { %v20015_v44 = vsel %vm565_vm2, %v7796_v8, %v7800_v54  ;;  %v7804_v40 = vor.u32 %v7802_v9, %v7800_v54  ;;  %v7812_v45 = vor.u32 %v7810_v6, %v7808_v55  ;;  %v7816_v39 = vrot.slane %v7814_v43, 1  ;;  %v8336_v8 = vld [vmem:[#allocation2 + $0x10] sm:$0xf]  ;;  %v20064_v43 = vld [vmem:[#allocation7 + $0x40] sm:$0xff]  }
 0x461   : > { %v7824_v24 = vrot.slane %v7822_v2, 1  ;;  %v8614_v59 = vrot.slane %v20012_v33, 1  ;;  %vm13632_vm5 = vcmask 73728  }
 0x462   : > { %v7820_v37 = vor.u32 %v7818_v29, %v7816_v39 }
 0x464   : > { %v16664_v57 = vld [vmem:[#allocation2 + $0x40] sm:$0xff]  }
 0x465   : > { %v16671_v46 = vld [vmem:[#allocation2 + $0x40] ss:$0 sps:$4 sm:$0x11]   ;;  %16278 = vmatmul.mubr.msk.bf16.gmra.mrb[252].mxu0 %vm7133_vm1, %v16664_v57  ;;  %v7834_v57 = vshrl.u32 %v19982_v28, 16 }
 0x466   : > { %16305 = vmatprep.mubr.msk.bf16.mxu0 %vm7133_vm1, %v7994_v14  ;;  %v7117_v3 = vshll.u32 %v16671_v46, 16  ;;  %v7388_v53 = vrot.slane %v16671_v46, 1  ;;  %v19989_v52 = vld [vmem:[#allocation2 + $0x40] sm:$0xff]   ;;  %v20025_v46 = vsel %vm565_vm2, %v7804_v40, %v7808_v55  ;;  %v20028_v14 = vsel %vm565_vm2, %v7812_v45, %v7816_v39 }
 0x467   : > { %v7838_v27 = vshll.u32 %v19989_v52, 16  ;;  %v7842_v13 = vshrl.u32 %v19989_v52, 16  ;;  %v20033_v34 = vld [vmem:[#allocation2 + $0x40] sm:$0xff]   ;;  %v8616_v55 = vrot.slane %v20020_v36, 1  ;;  %v14277_v39 = vcombine.low %v8336_v8, %v19997_v26 }
 0x468   : > { %v7119_v10 = vrot.slane %v7117_v3, 1  ;;  %v19972_v16 = vsel %vm1314_vm3, %v7386_v21, %v7388_v53  ;;  %v7830_v21 = vshll.u32 %v19982_v28, 16  ;;  %v20031_v3 = vld [vmem:[#allocation2 + $0x38] sm:$0xff]   ;;  %v7828_v53 = vor.u32 %v7826_v15, %v7824_v24 }
 0x469   : > { %v7840_v1 = vrot.slane %v7838_v27, 1  ;;  %v8620_v15 = vrot.slane %v20031_v3, 1  ;;  %v20077_v40 = vsel %vm1314_vm3, %v8614_v59, %v8616_v55  ;;  %v8005_v27 = vrot.slane %v19989_v52, 1 }
 0x46a   : > { %v7120_v5 = vsel %vm565_vm2, %v7115_v0, %v7119_v10  ;;  %v7832_v30 = vrot.slane %v7830_v21, 1  ;;  %v20039_v0 = vsel %vm565_vm2, %v7820_v37, %v7824_v24  ;;  %v8611_v10 = vrot.slane %v14296_v50, 1 }
 0x46b   : > { %16218 = vmatmul.mubr.msk.bf16.gmra.mrb[204].mxu1 %vm7133_vm1, %v7120_v5  ;;  %v7844_v48 = vor.u32 %v7842_v13, %v7840_v1  ;;  %v8622_v50 = vrot.slane %v20033_v34, 1  ;;  %v8404_v26 = vshll.u32 %v14277_v39, 16  ;;  %v8409_v13 = vshll.u32 %v20010_v7, 16 }
 0x46c   : > { %16225 = vmatprep.mubr.msk.bf16.mxu1 %vm7133_vm1, %v19658_v25  ;;  %v20007_v25 = vld [vmem:[#allocation2 + $0x48] ss:$0 sps:$4 sm:$0x11]   ;;  %v20048_v62 = vsel %vm565_vm2, %v7828_v53, %v7832_v30  ;;  %v7836_v5 = vor.u32 %v7834_v57, %v7832_v30  ;;  %v8003_v57 = vrot.slane %v19982_v28, 1 }
 0x46d   : > { %16306 = vmatmul.mubr.msk.bf16.vlgmr.msra.gmra.mrb[0].mxu0 %vm7133_vm1, %v7996_v49  ;;  %v7846_v61 = vshll.u32 %v20007_v25, 16  ;;  %v20036_v49 = vld [vmem:[#allocation2 + $0x48] sm:$0xff]   ;;  %v20088_v21 = vsel %vm1314_vm3, %v8620_v15, %v8622_v50  ;;  %v8406_v53 = vrot.slane %v8404_v26, 1  ;;  %v8007_v38 = vrot.slane %v20007_v25, 1 }
 0x46e   : > { %16309 = vmatprep.mubr.msk.bf16.mxu0 %vm7133_vm1, %v7998_v19  ;;  %16342 = vmatpush3.bf16.msra.mxu0 %v19788_v58  ;;  %v20022_v58 = vld [vmem:[#allocation2 + $0x30] sm:$0xff]   ;;  %v8612_v19 = vrot.slane %v20010_v7, 1  ;;  %v20067_v29 = vsel %vm565_vm2, %v7836_v5, %v7840_v1  ;;  %v8624_v45 = vrot.slane %v20036_v49, 1  ;;  %v8004_v37 = vsel %vm1314_vm3, %v8001_v63, %v8003_v57  ;;  %v7364_v63 = vld [vmem:[#allocation2] sm:$0xe] }
 0x46f   : > { %16343 = vmatprep.subr.bf16.mxu0 %v16684_v22  ;;  %v7848_v17 = vrot.slane %v7846_v61, 1  ;;  %v8618_v6 = vrot.slane %v20022_v58, 1  ;;  %v8006_v28 = vsel %vm1314_vm3, %v8003_v57, %v8005_v27  ;;  %v8402_v61 = vshrl.u32 %v14277_v39, 16 }
 0x470   : > { %v20055_v9 = vsel %vm1314_vm3, %v8611_v10, %v8612_v19  ;;  %v20058_v54 = vsel %vm1314_vm3, %v8612_v19, %v8614_v59  ;;  %v8411_v10 = vrot.slane %v8409_v13, 1  ;;  %v20112_v19 = vld [vmem:[#allocation2 + $0x50] ss:$0 sps:$4 sm:$0x11]   ;;  %v8417_v5 = vshll.u32 %v20012_v33, 16 }
 0x471   : > { %v20070_v2 = vsel %vm565_vm2, %v7844_v48, %v7848_v17  ;;  %v20085_v24 = vsel %vm1314_vm3, %v8618_v6, %v8620_v15  ;;  %v8407_v59 = vor.u32 %v8406_v53, %v8402_v61  ;;  %v17186_v48 = vld [vmem:[#allocation2 + $0x4] sm:$0xf]  ;;  %v8008_v8 = vsel %vm1314_vm3, %v8005_v27, %v8007_v38 }
 0x472   : > { %16344 = vmatpush3.bf16.msra.mxu0 %v16684_v22  ;;  %v20050_v22 = vld [vmem:[#allocation2 + $0x10] sm:$0xff]   ;;  %v14200_v17 = vcombine.low %v7364_v63, %v17186_v48  ;;  %v8413_v39 = vshrl.u32 %v20010_v7, 16  ;;  %v8421_v57 = vshrl.u32 %v20012_v33, 16  ;;  %v8441_v33 = vshll.u32 %v20031_v3, 16 }
 0x473   : > { %16226 = vmatmul.mubr.msk.bf16.vlgmr.msra.gmra.mrb[208].mxu1 %vm7133_vm1, %v20043_v56  ;;  %v8412_v25 = vsel %vm565_vm2, %v8407_v59, %v8411_v10  ;;  %v7378_v53 = vrot.slane %v19821_v42, 1  ;;  %v8429_v38 = vshrl.u32 %v20020_v36, 16  ;;  %v16693_v59 = vld [vmem:[#allocation7 + $0x48] sm:$0xff]  }
 0x474   : > { %16242 = vmatpush3.bf16.msra.mxu1 %v17184_v32  ;;  %16229 = vmatprep.mubr.msk.bf16.mxu1 %vm7133_vm1, %v20050_v22  ;;  %v8626_v32 = vrot.slane %v20112_v19, 1  ;;  %v7373_v15 = vrot.slane %v14200_v17, 1  ;;  %v8415_v27 = vor.u32 %v8413_v39, %v8411_v10  ;;  %v8443_v61 = vrot.slane %v8441_v33, 1 }
 0x475   : > { %16310 = vmatmul.mubr.msk.bf16.gmra.mrb[4].mxu0 %vm7133_vm1, %v19977_v4  ;;  %16243 = vmatprep.subr.bf16.mxu1 %v16679_v41  ;;  %v20080_v4 = vsel %vm1314_vm3, %v8616_v55, %v8618_v6  ;;  %v20106_v52 = vpop.f32.mrb[240].mxu0  ;;  %v8425_v55 = vshll.u32 %v20020_v36, 16  ;;  %v8419_v6 = vrot.slane %v8417_v5, 1  ;;  %v8449_v10 = vshll.u32 %v20033_v34, 16 }
 0x476   : > { %16313 = vmatprep.mubr.msk.bf16.mxu0 %vm7133_vm1, %v19987_v35  ;;  %v20092_v35 = vsel %vm1314_vm3, %v8622_v50, %v8624_v45  ;;  %v7374_v50 = vrot.slane %v20043_v56, 1  ;;  %v7376_v56 = vrot.slane %v20050_v22, 1  ;;  %v7381_v39 = vsel %vm1314_vm3, %v7378_v53, %v7380_v47  ;;  %v16695_v47 = vld [vmem:[#allocation7 + $0x68] sm:$0xff]  }
 0x478   : > { %16244 = vmatpush3.bf16.msra.mxu1 %v16679_v41  ;;  %v20109_v41 = vpop.f32.mrb[241].mxu0  ;;  %v7375_v26 = vsel %vm1314_vm3, %v7373_v15, %v7374_v50  ;;  %v7377_v22 = vsel %vm1314_vm3, %v7374_v50, %v7376_v56  ;;  %v7379_v17 = vsel %vm1314_vm3, %v7376_v56, %v7378_v53 }
 0x479   : > { %16281 = vmatprep.subr.bf16.mxu1 %v20064_v43  ;;  %v16268_v30 = vpop.f32.mrb[242].mxu0 }
 0x47a   : > { %v7657_v1 = vpop.f32.mrb[243].mxu0 }
 0x47b   : > { %16230 = vmatmul.mubr.msk.bf16.gmra.mrb[212].mxu1 %vm7133_vm1, %v19821_v42  ;;  %v8437_v1 = vshrl.u32 %v20022_v58, 16 }
 0x47c   : > { %16233 = vmatprep.mubr.msk.bf16.mxu1 %vm7133_vm1, %v19889_v11 }
 0x47d   : > { %16314 = vmatmul.mubr.msk.bf16.gmra.mrb[8].mxu0 %vm7133_vm1, %v8004_v37  ;;  %v8423_v37 = vor.u32 %v8421_v57, %v8419_v6  ;;  %v8461_v57 = vshrl.u32 %v20036_v49, 16 }
 0x47e   : > { %16317 = vmatprep.mubr.msk.bf16.mxu0 %vm7133_vm1, %v8006_v28  ;;  %v8420_v28 = vsel %vm565_vm2, %v8415_v27, %v8419_v6  ;;  %v8445_v6 = vshrl.u32 %v20031_v3, 16 }
 0x480   : > { %v8447_v50 = vor.u32 %v8445_v6, %v8443_v61 }
 0x483   : > { %16234 = vmatmul.mubr.msk.bf16.gmra.mrb[216].mxu1 %vm7133_vm1, %v19896_v31  ;;  %v20125_v31 = vsel %vm1314_vm3, %v8624_v45, %v8626_v32  ;;  %v8433_v45 = vshll.u32 %v20022_v58, 16  ;;  %v8451_v58 = vrot.slane %v8449_v10, 1 }
 0x484   : > { %16237 = vmatprep.mubr.msk.bf16.mxu1 %vm7133_vm1, %v19902_v51  ;;  %v8427_v51 = vrot.slane %v8425_v55, 1  ;;  %v8453_v55 = vshrl.u32 %v20033_v34, 16 }
 0x485   : > { %16318 = vmatmul.mubr.msk.bf16.gmra.mrb[12].mxu0 %vm7133_vm1, %v8008_v8  ;;  %v8435_v13 = vrot.slane %v8433_v45, 1  ;;  %v8457_v8 = vshll.u32 %v20036_v49, 16  ;;  %v8452_v27 = vsel %vm565_vm2, %v8447_v50, %v8451_v58  ;;  %v16703_v45 = vld [vmem:[#allocation2 + $0x38] sm:$0xff]  }
 0x486   : > { %16345 = vmatprep.mubr.msk.bf16.mxu0 %vm7133_vm1, %v8412_v25  ;;  %v8428_v7 = vsel %vm565_vm2, %v8423_v37, %v8427_v51  ;;  %v8431_v48 = vor.u32 %v8429_v38, %v8427_v51  ;;  %v16694_v25 = vld [vmem:[#allocation7 + $0x60] sm:$0xff]   ;;  %v8455_v15 = vor.u32 %v8453_v55, %v8451_v58  ;;  %v8465_v51 = vshll.u32 %v20112_v19, 16 }
 0x487   : > { %v8439_v42 = vor.u32 %v8437_v1, %v8435_v13 }
 0x488   : > { %v8436_v32 = vsel %vm565_vm2, %v8431_v48, %v8435_v13  ;;  %v16707_v48 = vld [vmem:[#allocation9 + $0x40] sm:$0xff]  }
 0x489   : > { %v8444_v36 = vsel %vm565_vm2, %v8439_v42, %v8443_v61  ;;  %15205 = vmatprep.subr.bf16.mxu0 %v16707_v48 }
 0x48b   : > { %16238 = vmatmul.mubr.msk.bf16.gmra.mrb[220].mxu1 %vm7133_vm1, %v19911_v12  ;;  %v20142_v12 = vpop.f32.mrb[244].mxu0 }
 0x48c   : > { %16245 = vmatprep.mubr.msk.bf16.mxu1 %vm7133_vm1, %v7375_v26  ;;  %v20145_v30 = vpop.f32.mrb[245].mxu0  ;;  %v8467_v26 = vrot.slane %v8465_v51, 1 }
 0x48d   : > { %16346 = vmatmul.mubr.msk.bf16.vlgmr.msra.gmra.mrb[16].mxu0 %vm7133_vm1, %v8420_v28  ;;  %v16272_v63 = vpop.f32.mrb[246].mxu0  ;;  %v16704_v28 = vld [vmem:[#allocation2 + $0x40] sm:$0xff]  }
 0x48e   : > { %16349 = vmatprep.mubr.msk.bf16.mxu0 %vm7133_vm1, %v8428_v7  ;;  %v7671_v5 = vpop.f32.mrb[247].mxu0  ;;  %v16705_v7 = vld [vmem:[#allocation2 + $0x48] sm:$0xff]  }
 0x493   : > { %16246 = vmatmul.mubr.msk.bf16.vlgmr.msra.gmra.mrb[224].mxu1 %vm7133_vm1, %v7377_v22 }
 0x494   : > { %16282 = vmatpush3.bf16.msra.mxu1 %v20064_v43  ;;  %16249 = vmatprep.mubr.msk.bf16.mxu1 %vm7133_vm1, %v7379_v17  ;;  %v8459_v43 = vrot.slane %v8457_v8, 1 }
 0x495   : > { %16350 = vmatmul.mubr.msk.bf16.gmra.mrb[20].mxu0 %vm7133_vm1, %v8436_v32  ;;  %16283 = vmatprep.subr.bf16.mxu1 %v16693_v59 }
 0x496   : > { %16353 = vmatprep.mubr.msk.bf16.mxu0 %vm7133_vm1, %v8444_v36  ;;  %v8460_v3 = vsel %vm565_vm2, %v8455_v15, %v8459_v43  ;;  %v8463_v34 = vor.u32 %v8461_v57, %v8459_v43  ;;  %v16708_v57 = vld [vmem:[#allocation9] sm:$0xff]  }
 0x497   : > { %15206 = vmatpush3.bf16.msra.mxu0 %v16708_v57  ;;  %v16718_v57 = vld [vmem:[#allocation9 + $0x90] sm:$0xff]  }
 0x498   : > { %16284 = vmatpush3.bf16.msra.mxu1 %v16693_v59  ;;  %v8468_v11 = vsel %vm565_vm2, %v8463_v34, %v8467_v26  ;;  %vm8856_vm2 = vcmask 1040384  }
 0x499   : > { %16321 = vmatprep.subr.bf16.mxu1 %v16694_v25  ;;  %vm20336_vm3 = vmand %vm8856_vm2, %vm6587_vm10 }
 0x49b   : > { %16250 = vmatmul.mubr.msk.bf16.gmra.mrb[228].mxu1 %vm7133_vm1, %v7381_v39 }
 0x49c   : > { %16253 = vmatprep.mubr.msk.bf16.mxu1 %vm7133_vm1, %v19952_v20 }
 0x49d   : > { %16354 = vmatmul.mubr.msk.bf16.gmra.mrb[24].mxu0 %vm7133_vm1, %v8452_v27 }
 0x49e   : > { %16357 = vmatprep.mubr.msk.bf16.mxu0 %vm7133_vm1, %v8460_v3 }
 0x4a3   : > { %16254 = vmatmul.mubr.msk.bf16.gmra.mrb[232].mxu1 %vm7133_vm1, %v19958_v23 }
 0x4a4   : > { %16257 = vmatprep.mubr.msk.bf16.mxu1 %vm7133_vm1, %v19961_v18  ;;  %v16697_v18 = vld [vmem:[#allocation7 + $0x80] sm:$0xff]  }
 0x4a5   : > { %16358 = vmatmul.mubr.msk.bf16.gmra.mrb[28].mxu0 %vm7133_vm1, %v8468_v11 }
 0x4ab   : > { %16258 = vmatmul.mubr.msk.bf16.gmra.mrb[236].mxu1 %vm7133_vm1, %v19972_v16  ;;  %v16696_v16 = vld [vmem:[#allocation2 + $0x10] sm:$0xff]  }
 0x4ac   : > { %16285 = vmatprep.mubr.msk.bf16.mxu1 %vm7133_vm1, %v19992_v60  ;;  %v16698_v60 = vld [vmem:[#allocation2 + $0x18] sm:$0xff]  }
 0x4b3   : > { %16286 = vmatmul.mubr.msk.bf16.vlgmr.msra.gmra.mrb[240].mxu1 %vm7133_vm1, %v20015_v44  ;;  %v16702_v44 = vld [vmem:[#allocation7 + $0x88] sm:$0xff]  }
 0x4b4   : > { %v20184_v20 = vpop.f32.mrb[192].mxu1  ;;  %16322 = vmatpush3.bf16.msra.mxu1 %v16694_v25  ;;  %16289 = vmatprep.mubr.msk.bf16.mxu1 %vm7133_vm1, %v20025_v46  ;;  %v16699_v46 = vld [vmem:[#allocation2 + $0x20] sm:$0xff]  }
 0x4b5   : > { %v20188_v49 = vpop.f32.mrb[193].mxu1  ;;  %16323 = vmatprep.subr.bf16.mxu1 %v16695_v47 }
 0x4b6   : > { %v16208_v23 = vpop.f32.mrb[194].mxu1 }
 0x4b7   : > { %v7195_v19 = vpop.f32.mrb[195].mxu1 }
 0x4b8   : > { %16324 = vmatpush3.bf16.msra.mxu1 %v16695_v47 }
 0x4b9   : > { %16361 = vmatprep.subr.bf16.mxu1 %v16697_v18 }
 0x4bb   : > { %16290 = vmatmul.mubr.msk.bf16.gmra.mrb[244].mxu1 %vm7133_vm1, %v20028_v14  ;;  %v16700_v14 = vld [vmem:[#allocation2 + $0x28] sm:$0xff]  }
 0x4bc   : > { %16293 = vmatprep.mubr.msk.bf16.mxu1 %vm7133_vm1, %v20039_v0  ;;  %v16701_v0 = vld [vmem:[#allocation2 + $0x30] sm:$0xff]  }
 0x4c3   : > { %16294 = vmatmul.mubr.msk.bf16.gmra.mrb[248].mxu1 %vm7133_vm1, %v20048_v62 }
 0x4c4   : > { %16297 = vmatprep.mubr.msk.bf16.mxu1 %vm7133_vm1, %v20067_v29 }
 0x4cb   : > { %16298 = vmatmul.mubr.msk.bf16.gmra.mrb[252].mxu1 %vm7133_vm1, %v20070_v2 }
 0x4cc   : > { %16325 = vmatprep.mubr.msk.bf16.mxu1 %vm7133_vm1, %v16696_v16 }
 0x4d3   : > { %16326 = vmatmul.mubr.msk.bf16.vlgmr.msra.gmra.mrb[0].mxu1 %vm7133_vm1, %v16698_v60 }
 0x4d4   : > { %16362 = vmatpush3.bf16.msra.mxu1 %v16697_v18  ;;  %16329 = vmatprep.mubr.msk.bf16.mxu1 %vm7133_vm1, %v16699_v46 }
 0x4d5   : > { %16363 = vmatprep.subr.bf16.mxu1 %v16702_v44 }
 0x4d8   : > { %16364 = vmatpush3.bf16.msra.mxu1 %v16702_v44 }
 0x4db   : > { %16330 = vmatmul.mubr.msk.bf16.gmra.mrb[4].mxu1 %vm7133_vm1, %v16700_v14 }
 0x4dc   : > { %16333 = vmatprep.mubr.msk.bf16.mxu1 %vm7133_vm1, %v16701_v0 }
 0x4de   : > { %v20207_v62 = vpop.f32.mrb[248].mxu0 }
 0x4df   : > { %v20209_v29 = vpop.f32.mrb[249].mxu0 }
 0x4e0   : > { %v16276_v2 = vpop.f32.mrb[250].mxu0 }
 0x4e1   : > { %v7685_v37 = vpop.f32.mrb[251].mxu0  ;;  %v16709_v2 = vld [vmem:[#allocation9 + $0xc0] sm:$0xff]  }
 0x4e2   : > { %v16710_v37 = vld [vmem:[#allocation9 + $0x80] sm:$0xff]   ;;  %15227 = vmatprep.subr.bf16.mxu1 %v16709_v2 }
 0x4e3   : > { %16334 = vmatmul.mubr.msk.bf16.gmra.mrb[8].mxu1 %vm7133_vm1, %v16703_v45 }
 0x4e4   : > { %16337 = vmatprep.mubr.msk.bf16.mxu1 %vm7133_vm1, %v16704_v28 }
 0x4eb   : > { %16338 = vmatmul.mubr.msk.bf16.gmra.mrb[12].mxu1 %vm7133_vm1, %v16705_v7  ;;  %v16711_v7 = vld [vmem:[#allocation9 + $0x48] sm:$0xff]  }
 0x4ec   : > { %16365 = vmatprep.mubr.msk.bf16.mxu1 %vm7133_vm1, %v20055_v9  ;;  %15207 = vmatprep.subr.bf16.mxu0 %v16711_v7  ;;  %v16725_v7 = vld [vmem:[#allocation9 + $0xe0] sm:$0xff]  }
 0x4f3   : > { %16366 = vmatmul.mubr.msk.bf16.vlgmr.msra.gmra.mrb[16].mxu1 %vm7133_vm1, %v20058_v54 }
 0x4f4   : > { %16369 = vmatprep.mubr.msk.bf16.mxu1 %vm7133_vm1, %v20077_v40  ;;  %15228 = vmatpush3.bf16.msra.mxu1 %v16710_v37 }
 0x4fb   : > { %16370 = vmatmul.mubr.msk.bf16.gmra.mrb[20].mxu1 %vm7133_vm1, %v20080_v4 }
 0x4fc   : > { %16373 = vmatprep.mubr.msk.bf16.mxu1 %vm7133_vm1, %v20085_v24 }
 0x503   : > { %16374 = vmatmul.mubr.msk.bf16.gmra.mrb[24].mxu1 %vm7133_vm1, %v20088_v21 }
 0x504   : > { %16377 = vmatprep.mubr.msk.bf16.mxu1 %vm7133_vm1, %v20092_v35 }
 0x50b   : > { %16378 = vmatmul.mubr.msk.bf16.gmra.mrb[28].mxu1 %vm7133_vm1, %v20125_v31 }
 0x51e   : > { %v16211_v9 = vpop.f32.mrb[196].mxu1 }
 0x51f   : > { %v7206_v54 = vpop.f32.mrb[197].mxu1 }
 0x520   : > { %v16212_v33 = vpop.f32.mrb[198].mxu1 }
 0x521   : > { %v7209_v56 = vpop.f32.mrb[199].mxu1 }
 0x526   : > { %v16215_v40 = vpop.f32.mrb[200].mxu1 }
 0x527   : > { %v7220_v13 = vpop.f32.mrb[201].mxu1 }
 0x528   : > { %v16216_v53 = vpop.f32.mrb[202].mxu1 }
 0x529   : > { %v7223_v4 = vpop.f32.mrb[203].mxu1 }
 0x538   : > { %v20230_v38 = vpop.f32.mrb[252].mxu0 }
 0x539   : > { %v20232_v24 = vpop.f32.mrb[253].mxu0 }
 0x53a   : > { %v16280_v63 = vpop.f32.mrb[254].mxu0 }
 0x53b   : > { %v7699_v21 = vpop.f32.mrb[255].mxu0  ;;  %v16714_v63 = vld [vmem:[#allocation9 + $0x88] sm:$0xff]  }
 0x53e   : > { %v16219_v1 = vpop.f32.mrb[204].mxu1 }
 0x53f   : > { %v7234_v61 = vpop.f32.mrb[205].mxu1 }
 0x540   : > { %v16220_v35 = vpop.f32.mrb[206].mxu1  ;;  %v20234_v10 = vpop.f32.mrb[0].mxu0 }
 0x541   : > { %v7237_v31 = vpop.f32.mrb[207].mxu1  ;;  %v20236_v59 = vpop.f32.mrb[1].mxu0 }
 0x542   : > { %v16308_v5 = vpop.f32.mrb[2].mxu0 }
 0x543   : > { %v8082_v22 = vpop.f32.mrb[3].mxu0 }
 0x546   : > { %v16227_v17 = vpop.f32.mrb[208].mxu1 }
 0x547   : > { %v7317_v42 = vadd.f32 %v16227_v17, %v20184_v20  ;;  %v7309_v32 = vpop.f32.mrb[209].mxu1 }
 0x548   : > { %v7310_v36 = vadd.f32 %v7309_v32, %v20188_v49  ;;  %v16228_v58 = vpop.f32.mrb[210].mxu1  ;;  %v20240_v8 = vpop.f32.mrb[4].mxu0 }
 0x549   : > { %v7312_v25 = vpop.f32.mrb[211].mxu1  ;;  %v20242_v55 = vpop.f32.mrb[5].mxu0 }
 0x54a   : > { %v16312_v6 = vpop.f32.mrb[6].mxu0 }
 0x54b   : > { %v8096_v15 = vpop.f32.mrb[7].mxu0 }
 0x54e   : > { %v16231_v43 = vpop.f32.mrb[212].mxu1 }
 0x54f   : > { %v20244_v50 = vadd.f32 %v16231_v43, %v16211_v9  ;;  %v7323_v39 = vpop.f32.mrb[213].mxu1  ;;  %v16712_v9 = vld [vmem:[#allocation9 + $0x8] sm:$0xff]   ;;  %v16717_v43 = vld [vmem:[#allocation9 + $0xd0] sm:$0xff]  }
 0x550   : > { %v20246_v51 = vadd.f32 %v7323_v39, %v7206_v54  ;;  %v16232_v27 = vpop.f32.mrb[214].mxu1  ;;  %v20248_v3 = vpop.f32.mrb[8].mxu0  ;;  %v16713_v54 = vld [vmem:[#allocation9 + $0xc8] sm:$0xff]   ;;  %15208 = vmatpush3.bf16.msra.mxu0 %v16712_v9 }
 0x551   : > { %v7326_v34 = vpop.f32.mrb[215].mxu1  ;;  %v20250_v26 = vpop.f32.mrb[9].mxu0  ;;  %15229 = vmatprep.subr.bf16.mxu1 %v16713_v54  ;;  %v16719_v27 = vld [vmem:[#allocation9 + $0x58] sm:$0xff]   ;;  %v16726_v54 = vld [vmem:[#allocation9 + $0xa0] sm:$0xff]  }
 0x552   : > { %v16316_v11 = vpop.f32.mrb[10].mxu0  ;;  %15230 = vmatpush3.bf16.msra.mxu1 %v16714_v63  ;;  %v16723_v34 = vld [vmem:[#allocation9 + $0x60] sm:$0xff]  }
 0x553   : > { %v8110_v47 = vpop.f32.mrb[11].mxu0  ;;  %15231 = vmatprep.subr.bf16.mxu1 %v16717_v43  ;;  %v16722_v11 = vld [vmem:[#allocation9 + $0x98] sm:$0xff]  }
 0x556   : > { %v16235_v20 = vpop.f32.mrb[216].mxu1  ;;  %15232 = vmatpush3.bf16.msra.mxu1 %v16718_v57 }
 0x557   : > { %v20252_v49 = vadd.f32 %v16235_v20, %v16215_v40  ;;  %v7337_v23 = vpop.f32.mrb[217].mxu1 }
 0x558   : > { %v20254_v18 = vadd.f32 %v7337_v23, %v7220_v13  ;;  %v16236_v19 = vpop.f32.mrb[218].mxu1  ;;  %v20256_v16 = vpop.f32.mrb[12].mxu0  ;;  %v16715_v13 = vld [vmem:[#allocation9 + $0x50] sm:$0xff]  }
 0x559   : > { %v7340_v60 = vpop.f32.mrb[219].mxu1  ;;  %v20258_v44 = vpop.f32.mrb[13].mxu0  ;;  %15209 = vmatprep.subr.bf16.mxu0 %v16715_v13  ;;  %v16728_v13 = vld [vmem:[#allocation9 + $0x28] sm:$0xff]  }
 0x55a   : > { %v16320_v46 = vpop.f32.mrb[14].mxu0 }
 0x55b   : > { %v8124_v14 = vpop.f32.mrb[15].mxu0 }
 0x55e   : > { %v16239_v0 = vpop.f32.mrb[220].mxu1 }
 0x55f   : > { %v20260_v45 = vadd.f32 %v16239_v0, %v16219_v1  ;;  %v7351_v28 = vpop.f32.mrb[221].mxu1  ;;  %v16716_v1 = vld [vmem:[#allocation9 + $0x10] sm:$0xff]  }
 0x560   : > { %v20262_v33 = vadd.f32 %v7351_v28, %v7234_v61  ;;  %v16240_v56 = vpop.f32.mrb[222].mxu1  ;;  %v20264_v40 = vpop.f32.mrb[16].mxu0  ;;  %15210 = vmatpush3.bf16.msra.mxu0 %v16716_v1  ;;  %v16731_v1 = vld [vmem:[#allocation9 + $0x70] sm:$0xff]  }
 0x561   : > { %v7354_v53 = vpop.f32.mrb[223].mxu1  ;;  %v20266_v4 = vpop.f32.mrb[17].mxu0  ;;  %15211 = vmatprep.subr.bf16.mxu0 %v16719_v27  ;;  %v16727_v56 = vld [vmem:[#allocation9 + $0x68] sm:$0xff]   ;;  %v16733_v27 = vld [vmem:[#allocation9 + $0xf0] sm:$0xff]  }
 0x562   : > { %v16348_v21 = vpop.f32.mrb[18].mxu0 }
 0x563   : > { %v8542_v35 = vpop.f32.mrb[19].mxu0  ;;  %v16729_v21 = vld [vmem:[#allocation9 + $0xe8] sm:$0xff]  }
 0x566   : > { %v16247_v61 = vpop.f32.mrb[224].mxu1 }
 0x567   : > { %v7516_v31 = vadd.f32 %v16247_v61, %v7317_v42  ;;  %v7460_v5 = vpop.f32.mrb[225].mxu1  ;;  %v16720_v42 = vld [vmem:[#allocation9 + $0x18] sm:$0xff]  }
 0x568   : > { %v7515_v48 = vadd.f32 %v7460_v5, %v7310_v36  ;;  %v16248_v22 = vpop.f32.mrb[226].mxu1  ;;  %v20268_v17 = vpop.f32.mrb[20].mxu0  ;;  %v16721_v36 = vld [vmem:[#allocation9 + $0xd8] sm:$0xff]   ;;  %15212 = vmatpush3.bf16.msra.mxu0 %v16720_v42  ;;  %v16732_v5 = vld [vmem:[#allocation9 + $0x30] sm:$0xff]  }
 0x569   : > { %v7463_v32 = vpop.f32.mrb[227].mxu1  ;;  %v20270_v58 = vpop.f32.mrb[21].mxu0  ;;  %v20273_v25 = vadd.f32 %v20106_v52, %v7516_v31  ;;  %15233 = vmatprep.subr.bf16.mxu1 %v16721_v36  ;;  %v16724_v52 = vld [vmem:[#allocation9 + $0x20] sm:$0xff]   ;;  %15213 = vmatprep.subr.bf16.mxu0 %v16723_v34  ;;  %v16734_v42 = vld [vmem:[#allocation9 + $0xb0] sm:$0xff]   ;;  %v16735_v36 = vld [vmem:[#allocation9 + $0x78] sm:$0xff]  }
 0x56a   : > { %v16352_v6 = vpop.f32.mrb[22].mxu0  ;;  %v20276_v15 = vadd.f32 %v20109_v41, %v7515_v48  ;;  %15234 = vmatpush3.bf16.msra.mxu1 %v16722_v11  ;;  %v16736_v34 = vld [vmem:[#allocation9 + $0x38] sm:$0xff]  }
 0x56b   : > { %v8556_v39 = vpop.f32.mrb[23].mxu0  ;;  %15235 = vmatprep.subr.bf16.mxu1 %v16725_v7  ;;  %v16737_v11 = vld [vmem:[#allocation9 + $0xf8] sm:$0xff]  }
 0x56c   : > { %15214 = vmatpush3.bf16.msra.mxu0 %v16724_v52  ;;  %v16741_v52 = vld [vmem:[#allocation9 + $0x140] sm:$0xff]  }
 0x56d   : > { %15215 = vmatprep.subr.bf16.mxu0 %v16727_v56 }
 0x56e   : > { %v16251_v47 = vpop.f32.mrb[228].mxu1  ;;  %15236 = vmatpush3.bf16.msra.mxu1 %v16726_v54 }
 0x56f   : > { %v7518_v20 = vadd.f32 %v16251_v47, %v20244_v50  ;;  %v7474_v23 = vpop.f32.mrb[229].mxu1  ;;  %15237 = vmatprep.subr.bf16.mxu1 %v16729_v21  ;;  %v16738_v47 = vld [vmem:[#allocation9 + $0xb8] sm:$0xff]  }
 0x570   : > { %v7517_v41 = vadd.f32 %v7474_v23, %v20246_v51  ;;  %v16252_v19 = vpop.f32.mrb[230].mxu1  ;;  %v20280_v60 = vpop.f32.mrb[24].mxu0  ;;  %15216 = vmatpush3.bf16.msra.mxu0 %v16728_v13 }
 0x571   : > { %v7477_v46 = vpop.f32.mrb[231].mxu1  ;;  %v20282_v14 = vpop.f32.mrb[25].mxu0  ;;  %v20285_v0 = vadd.f32 %v20142_v12, %v7518_v20  ;;  %15217 = vmatprep.subr.bf16.mxu0 %v16731_v1 }
 0x572   : > { %v16356_v2 = vpop.f32.mrb[26].mxu0  ;;  %v20288_v37 = vadd.f32 %v20145_v30, %v7517_v41 }
 0x573   : > { %v8570_v50 = vpop.f32.mrb[27].mxu0 }
 0x574   : > { %15218 = vmatpush3.bf16.msra.mxu0 %v16732_v5 }
 0x575   : > { %15219 = vmatprep.subr.bf16.mxu0 %v16735_v36 }
 0x576   : > { %v16255_v28 = vpop.f32.mrb[232].mxu1 }
 0x577   : > { %v7520_v51 = vadd.f32 %v16255_v28, %v20252_v49  ;;  %v7488_v9 = vpop.f32.mrb[233].mxu1  ;;  %v16730_v49 = vld [vmem:[#allocation9 + $0xa8] sm:$0xff]  }
 0x578   : > { %v7519_v53 = vadd.f32 %v7488_v9, %v20254_v18  ;;  %v16256_v63 = vpop.f32.mrb[234].mxu1  ;;  %v20292_v12 = vpop.f32.mrb[28].mxu0  ;;  %15238 = vmatpush3.bf16.msra.mxu1 %v16730_v49  ;;  %15220 = vmatpush3.bf16.msra.mxu0 %v16736_v34 }
 0x579   : > { %v7491_v30 = vpop.f32.mrb[235].mxu1  ;;  %v7714_v35 = vadd.f32 %v20207_v62, %v7520_v51  ;;  %v20295_v61 = vpop.f32.mrb[29].mxu0  ;;  %15239 = vmatprep.subr.bf16.mxu1 %v16733_v27  ;;  %15249 = vmatprep.subr.bf16.mxu0 %v16741_v52 }
 0x57a   : > { %v7713_v31 = vadd.f32 %v20209_v29, %v7519_v53  ;;  %v16360_v18 = vpop.f32.mrb[30].mxu0 }
 0x57b   : > { %v8584_v48 = vpop.f32.mrb[31].mxu0 }
 0x57c   : > { %15240 = vmatpush3.bf16.msra.mxu1 %v16734_v42 }
 0x57d   : > { %15241 = vmatprep.subr.bf16.mxu1 %v16737_v11 }
 0x57e   : > { %v16259_v22 = vpop.f32.mrb[236].mxu1 }
 0x57f   : > { %v7522_v32 = vadd.f32 %v16259_v22, %v20260_v45  ;;  %v7502_v6 = vpop.f32.mrb[237].mxu1  ;;  %v16747_v45 = vld [vmem:[#allocation9 + $0x1c0] sm:$0xff]  }
 0x580   : > { %v7521_v62 = vadd.f32 %v7502_v6, %v20262_v33  ;;  %v16260_v43 = vpop.f32.mrb[238].mxu1  ;;  %15242 = vmatpush3.bf16.msra.mxu1 %v16738_v47 }
 0x581   : > { %v7505_v39 = vpop.f32.mrb[239].mxu1  ;;  %v7716_v57 = vadd.f32 %v20230_v38, %v7522_v32  ;;  %15271 = vmatprep.subr.bf16.mxu1 %v16747_v45 }
 0x582   : > { %v7715_v29 = vadd.f32 %v20232_v24, %v7521_v62 }
 0x586   : > { %v16287_v20 = vpop.f32.mrb[240].mxu1 }
 0x587   : > { %v7976_v33 = vadd.f32 %v16287_v20, %v20273_v25  ;;  %v7920_v23 = vpop.f32.mrb[241].mxu1 }
 0x588   : > { %v7975_v38 = vadd.f32 %v7920_v23, %v20276_v15  ;;  %v16288_v24 = vpop.f32.mrb[242].mxu1 }
 0x589   : > { %v7923_v41 = vpop.f32.mrb[243].mxu1  ;;  %v8135_v19 = vadd.f32 %v20234_v10, %v7976_v33 }
 0x58a   : > { %v8134_v46 = vadd.f32 %v20236_v59, %v7975_v38  ;;  %v20329_v41 = vld [vmem:[%s20695_s4] ss:$0 sm:$0xff] }
 0x58e   : > { %v16291_v2 = vpop.f32.mrb[244].mxu1 }
 0x58f   : > { %v7978_v50 = vadd.f32 %v16291_v2, %v20285_v0  ;;  %v7934_v28 = vpop.f32.mrb[245].mxu1 }
 0x590   : > { %v7977_v7 = vadd.f32 %v7934_v28, %v20288_v37  ;;  %v16292_v51 = vpop.f32.mrb[246].mxu1 }
 0x591   : > { %v7937_v25 = vpop.f32.mrb[247].mxu1  ;;  %v8137_v9 = vadd.f32 %v20240_v8, %v7978_v50 }
 0x592   : > { %v8136_v15 = vadd.f32 %v20242_v55, %v7977_v7 }
 0x596   : > { %v16295_v54 = vpop.f32.mrb[248].mxu1 }
 0x597   : > { %v7980_v56 = vadd.f32 %v16295_v54, %v7714_v35  ;;  %v7948_v13 = vpop.f32.mrb[249].mxu1 }
 0x598   : > { %v7979_v53 = vadd.f32 %v7948_v13, %v7713_v31  ;;  %v16296_v10 = vpop.f32.mrb[250].mxu1 }
 0x599   : > { %v7951_v63 = vpop.f32.mrb[251].mxu1  ;;  %v8139_v59 = vadd.f32 %v20248_v3, %v7980_v56 }
 0x59a   : > { %v8138_v21 = vadd.f32 %v20250_v26, %v7979_v53 }
 0x59e   : > { %v16299_v0 = vpop.f32.mrb[252].mxu1 }
 0x59f   : > { %v7982_v1 = vadd.f32 %v16299_v0, %v7716_v57  ;;  %v7962_v30 = vpop.f32.mrb[253].mxu1 }
 0x5a0   : > { %v7981_v37 = vadd.f32 %v7962_v30, %v7715_v29  ;;  %v16300_v49 = vpop.f32.mrb[254].mxu1 }
 0x5a1   : > { %v7965_v5 = vpop.f32.mrb[255].mxu1  ;;  %v8141_v8 = vadd.f32 %v20256_v16, %v7982_v1  ;;  %v8858_v49 = vld [vmem:[#allocation3] sm:$0x1] }
 0x5a2   : > { %v8140_v55 = vadd.f32 %v20258_v44, %v7981_v37 }
 0x5a6   : > { %v16327_v18 = vpop.f32.mrb[0].mxu1 }
 0x5a7   : > { %v8329_v35 = vadd.f32 %v16327_v18, %v8135_v19  ;;  %v8273_v48 = vpop.f32.mrb[1].mxu1 }
 0x5a8   : > { %v8328_v31 = vadd.f32 %v8273_v48, %v8134_v46  ;;  %v16328_v22 = vpop.f32.mrb[2].mxu1  ;;  %v8876_v48 = vld [vmem:[#allocation3 + $0x8] sm:$0x1] }
 0x5a9   : > { %v8276_v32 = vpop.f32.mrb[3].mxu1  ;;  %v8595_v3 = vadd.f32 %v20264_v40, %v8329_v35 }
 0x5aa   : > { %v8594_v26 = vadd.f32 %v20266_v4, %v8328_v31  ;;  %v8888_v31 = vld [vmem:[#allocation3 + $0x10] sm:$0x1] }
 0x5ae   : > { %v16331_v6 = vpop.f32.mrb[4].mxu1 }
 0x5af   : > { %v8331_v62 = vadd.f32 %v16331_v6, %v8137_v9  ;;  %v8287_v43 = vpop.f32.mrb[5].mxu1 }
 0x5b0   : > { %v8330_v39 = vadd.f32 %v8287_v43, %v8136_v15  ;;  %v16332_v57 = vpop.f32.mrb[6].mxu1 }
 0x5b1   : > { %v8290_v27 = vpop.f32.mrb[7].mxu1  ;;  %v8597_v16 = vadd.f32 %v20268_v17, %v8331_v62 }
 0x5b2   : > { %v8596_v44 = vadd.f32 %v20270_v58, %v8330_v39  ;;  %v8900_v39 = vld [vmem:[#allocation3 + $0x18] sm:$0x1]  ;;  %v8882_v27 = vld [vmem:[#allocation3 + $0xc] sm:$0x1] }
 0x5b6   : > { %v16335_v29 = vpop.f32.mrb[8].mxu1 }
 0x5b7   : > { %v8333_v42 = vadd.f32 %v16335_v29, %v8139_v59  ;;  %v8301_v36 = vpop.f32.mrb[9].mxu1 }
 0x5b8   : > { %v8332_v34 = vadd.f32 %v8301_v36, %v8138_v21  ;;  %v16336_v11 = vpop.f32.mrb[10].mxu1 }
 0x5b9   : > { %v8304_v47 = vpop.f32.mrb[11].mxu1  ;;  %v8599_v40 = vadd.f32 %v20280_v60, %v8333_v42 }
 0x5ba   : > { %v8598_v4 = vadd.f32 %v20282_v14, %v8332_v34 }
 0x5be   : > { %v16339_v52 = vpop.f32.mrb[12].mxu1 }
 0x5bf   : > { %v8335_v45 = vadd.f32 %v16339_v52, %v8141_v8  ;;  %v8315_v20 = vpop.f32.mrb[13].mxu1  ;;  %v8894_v52 = vld [vmem:[#allocation3 + $0x14] sm:$0x1] }
 0x5c0   : > { %v8334_v33 = vadd.f32 %v8315_v20, %v8140_v55  ;;  %v16340_v23 = vpop.f32.mrb[14].mxu1  ;;  %v8870_v55 = vld [vmem:[#allocation3 + $0x4] sm:$0x1] }
 0x5c1   : > { %v20321_v38 = vadd.f32 %v20292_v12, %v8335_v45  ;;  %v8318_v17 = vpop.f32.mrb[15].mxu1 }
 0x5c2   : > { %v20324_v58 = vadd.f32 %v20295_v61, %v8334_v33 }
 0x5c6   : > { %v16367_v24 = vpop.f32.mrb[16].mxu1 }
 0x5c7   : > { %v8754_v60 = vadd.f32 %v16367_v24, %v8595_v3  ;;  %v8698_v14 = vpop.f32.mrb[17].mxu1 }
 0x5c8   : > { %v8753_v19 = vadd.f32 %v8698_v14, %v8594_v26  ;;  %v16368_v46 = vpop.f32.mrb[18].mxu1 }
 0x5c9   : > { %v8769_v2 = vadd.f32 %v20329_v41, %v8754_v60  ;;  %v8701_v50 = vpop.f32.mrb[19].mxu1  ;;  %v8904_v46 = vld [vmem:[#allocation3 + $0x1c] sm:$0x1] }
 0x5ca   : > { %v8768_v12 = vadd.f32 %v20329_v41, %v8753_v19  ;;  %v8922_v50 = vld [vmem:[#allocation3 + $0x24] sm:$0x1] }
 0x5cb   : > { %v8777_v28 = vmax.f32 %v8769_v2, 0.0  ;;  %v8916_v2 = vld [vmem:[#allocation3 + $0x20] sm:$0x1] }
 0x5cc   : > { %v8776_v7 = vmax.f32 %v8768_v12, 0.0 }
 0x5cd   : > { %v8793_v51 = vrot.slane %v8777_v28, 1 }
 0x5ce   : > { %v8792_v61 = vrot.slane %v8776_v7, 1  ;;  %v16371_v25 = vpop.f32.mrb[20].mxu1 }
 0x5cf   : > { %v8809_v9 = vadd.f32 %v8793_v51, %v8777_v28  ;;  %v8756_v15 = vadd.f32 %v16371_v25, %v8597_v16  ;;  %v8712_v54 = vpop.f32.mrb[21].mxu1 }
 0x5d0   : > { %v8808_v56 = vadd.f32 %v8792_v61, %v8776_v7  ;;  %v8755_v13 = vadd.f32 %v8712_v54, %v8596_v44  ;;  %v16372_v53 = vpop.f32.mrb[22].mxu1  ;;  %v8934_v61 = vld [vmem:[#allocation3 + $0x2c] sm:$0x1] }
 0x5d1   : > { %v8771_v10 = vadd.f32 %v20329_v41, %v8756_v15  ;;  %v8715_v63 = vpop.f32.mrb[23].mxu1 }
 0x5d2   : > { %v8816_v59 = vadd.f32 %v8809_v9, %v8808_v56  ;;  %v8770_v21 = vadd.f32 %v20329_v41, %v8755_v13  ;;  %v8946_v56 = vld [vmem:[#allocation3 + $0x34] sm:$0x1]  ;;  %v8962_v13 = vld [vmem:[#allocation3 + $0x3c] sm:$0x1] }
 0x5d3   : > { %v8779_v0 = vmax.f32 %v8771_v10, 0.0 }
 0x5d4   : > { %v8823_v1 = vmul.f32 0.25, %v8816_v59  ;;  %v8778_v30 = vmax.f32 %v8770_v21, 0.0 }
 0x5d5   : > { %v8795_v5 = vrot.slane %v8779_v0, 1 }
 0x5d6   : > { %v8855_v8 = vpack.c.bf16 %v8823_v1, %v8823_v1  ;;  %v8794_v18 = vrot.slane %v8778_v30, 1  ;;  %v16375_v35 = vpop.f32.mrb[24].mxu1 }
 0x5d7   : > { %v20340_v22 = vadd.f32 %v8795_v5, %v8779_v0  ;;  %v8758_v32 = vadd.f32 %v16375_v35, %v8599_v40  ;;  %v8726_v3 = vpop.f32.mrb[25].mxu1 }
 0x5d8   : > { %v8859_v26 = vsel %vm20336_vm3, %v8855_v8, %v8858_v49  ;;  %v8865_v6 = vshrl.u32 %v8855_v8, 16  ;;  %v14310_v62 = vrot.slane %v8855_v8, 9  ;;  %v14312_v43 = vrot.slane %v8855_v8, 10  ;;  %v16376_v57 = vpop.f32.mrb[26].mxu1  ;;  %v8968_v49 = vld [vmem:[#allocation3 + $0x40] sm:$0x1] }
 0x5d9   : > { %8860 = vst [vmem:[#allocation3] sm:$0x1] %v8859_v26  ;;  %v14314_v16 = vrot.slane %v8855_v8, 11  ;;  %v8810_v44 = vadd.f32 %v8794_v18, %v8778_v30  ;;  %v8773_v29 = vadd.f32 %v20329_v41, %v8758_v32  ;;  %v8757_v42 = vadd.f32 %v8726_v3, %v8598_v4  ;;  %v8729_v36 = vpop.f32.mrb[27].mxu1  ;;  %v8928_v8 = vld [vmem:[#allocation3 + $0x28] sm:$0x1] }
 0x5da   : > { %v8871_v34 = vsel %vm20336_vm3, %v8865_v6, %v8870_v55  ;;  %v8877_v11 = vsel %vm20336_vm3, %v14310_v62, %v8876_v48  ;;  %v14311_v47 = vrot.slane %v8865_v6, 9  ;;  %v8889_v40 = vsel %vm20336_vm3, %v14312_v43, %v8888_v31  ;;  %v8940_v3 = vld [vmem:[#allocation3 + $0x30] sm:$0x1]  ;;  %v8974_v26 = vld [vmem:[#allocation3 + $0x44] sm:$0x1] }
 0x5db   : > { %8872 = vst [vmem:[#allocation3 + $0x4] sm:$0x1] %v8871_v34  ;;  %8878 = vst [vmem:[#allocation3 + $0x8] sm:$0x1] %v8877_v11  ;;  %v14313_v45 = vrot.slane %v8865_v6, 10  ;;  %v8901_v20 = vsel %vm20336_vm3, %v14314_v16, %v8900_v39  ;;  %v8817_v4 = vadd.f32 %v8810_v44, %v8809_v9  ;;  %v8818_v33 = vadd.f32 %v20340_v22, %v8810_v44 }
 0x5dc   : > { %8890 = vst [vmem:[#allocation3 + $0x10] sm:$0x1] %v8889_v40  ;;  %v8883_v23 = vsel %vm20336_vm3, %v14311_v47, %v8882_v27  ;;  %8902 = vst [vmem:[#allocation3 + $0x18] sm:$0x1] %v8901_v20  ;;  %v8781_v17 = vmax.f32 %v8773_v29, 0.0  ;;  %v20357_v24 = vadd.f32 %v20329_v41, %v8757_v42 }
 0x5dd   : > { %8884 = vst [vmem:[#allocation3 + $0xc] sm:$0x1] %v8883_v23  ;;  %v8895_v60 = vsel %vm20336_vm3, %v14313_v45, %v8894_v52  ;;  %v8824_v14 = vmul.f32 0.25, %v8817_v4  ;;  %v8825_v19 = vmul.f32 0.25, %v8818_v33  ;;  %v8950_v9 = vld [vmem:[#allocation3 + $0x38] sm:$0x1] }
 0x5de   : > { %8896 = vst [vmem:[#allocation3 + $0x14] sm:$0x1] %v8895_v60  ;;  %v8797_v12 = vrot.slane %v8781_v17, 1  ;;  %v8780_v28 = vmax.f32 %v20357_v24, 0.0  ;;  %v16379_v7 = vpop.f32.mrb[28].mxu1 }
 0x5df   : > { %v8903_v51 = vpack.c.bf16 %v8824_v14, %v8824_v14  ;;  %v20362_v25 = vpack.c.bf16 %v8825_v19, %v8825_v19  ;;  %v8760_v15 = vadd.f32 %v16379_v7, %v20321_v38  ;;  %v8740_v54 = vpop.f32.mrb[29].mxu1  ;;  %v8980_v57 = vld [vmem:[#allocation3 + $0x48] sm:$0x1]  ;;  %v8986_v27 = vld [vmem:[#allocation3 + $0x4c] sm:$0x1] }
 0x5e0   : > { %v20365_v53 = vadd.f32 %v8797_v12, %v8781_v17  ;;  %v8796_v10 = vrot.slane %v8780_v28, 1  ;;  %v8759_v63 = vadd.f32 %v8740_v54, %v20324_v58  ;;  %v16380_v59 = vpop.f32.mrb[30].mxu1  ;;  %v8992_v36 = vld [vmem:[#allocation3 + $0x50] sm:$0x1]  ;;  %v9014_v54 = vld [vmem:[#allocation3 + $0x5c] sm:$0x1] }
 0x5e1   : > { %v8905_v21 = vsel %vm20336_vm3, %v8903_v51, %v8904_v46  ;;  %v8911_v0 = vshrl.u32 %v8903_v51, 16  ;;  %v14317_v1 = vrot.slane %v8903_v51, 9  ;;  %v14319_v30 = vrot.slane %v8903_v51, 10  ;;  %v8743_v5 = vpop.f32.mrb[31].mxu1  ;;  %v8996_v46 = vld [vmem:[#allocation3 + $0x54] sm:$0x1] }
 0x5e2   : > { %8906 = vst [vmem:[#allocation3 + $0x1c] sm:$0x1] %v8905_v21  ;;  %v14321_v38 = vrot.slane %v8903_v51, 11  ;;  %v8951_v55 = vsel %vm20336_vm3, %v20362_v25, %v8950_v9  ;;  %v8957_v18 = vshrl.u32 %v20362_v25, 16  ;;  %v14324_v58 = vrot.slane %v20362_v25, 9  ;;  %v9179_v52 = vld [vmem:[#allocation3] sm:$0xff] }
 0x5e3   : > { %v8917_v35 = vsel %vm20336_vm3, %v8911_v0, %v8916_v2  ;;  %v8923_v48 = vsel %vm20336_vm3, %v14317_v1, %v8922_v50  ;;  %v14318_v31 = vrot.slane %v8911_v0, 9  ;;  %v8935_v32 = vsel %vm20336_vm3, %v14319_v30, %v8934_v61  ;;  %8952 = vst [vmem:[#allocation3 + $0x38] sm:$0x1] %v8951_v55  ;;  %v16749_v9 = vld [vmem:[#allocation9 + $0x148] sm:$0xff]   ;;  %v9038_v30 = vld [vmem:[#allocation3 + $0x6c] sm:$0x1] }
 0x5e4   : > { %8918 = vst [vmem:[#allocation3 + $0x20] sm:$0x1] %v8917_v35  ;;  %8924 = vst [vmem:[#allocation3 + $0x24] sm:$0x1] %v8923_v48  ;;  %v14320_v6 = vrot.slane %v8911_v0, 10  ;;  %v8947_v62 = vsel %vm20336_vm3, %v14321_v38, %v8946_v56  ;;  %v8963_v43 = vsel %vm20336_vm3, %v8957_v18, %v8962_v13  ;;  %v8969_v39 = vsel %vm20336_vm3, %v14324_v58, %v8968_v49  ;;  %v9180_v45 = vld [vmem:[#allocation3 + $0x8] sm:$0xff] }
 0x5e5   : > { %8936 = vst [vmem:[#allocation3 + $0x2c] sm:$0x1] %v8935_v32  ;;  %v8929_v16 = vsel %vm20336_vm3, %v14318_v31, %v8928_v8  ;;  %8948 = vst [vmem:[#allocation3 + $0x34] sm:$0x1] %v8947_v62  ;;  %v14325_v44 = vrot.slane %v8957_v18, 9  ;;  %v14326_v29 = vrot.slane %v20362_v25, 10  ;;  %v8812_v47 = vadd.f32 %v8796_v10, %v8780_v28 }
 0x5e6   : > { %8964 = vst [vmem:[#allocation3 + $0x3c] sm:$0x1] %v8963_v43  ;;  %8970 = vst [vmem:[#allocation3 + $0x40] sm:$0x1] %v8969_v39  ;;  %v14327_v42 = vrot.slane %v8957_v18, 10  ;;  %v8941_v34 = vsel %vm20336_vm3, %v14320_v6, %v8940_v3  ;;  %v14328_v11 = vrot.slane %v20362_v25, 11  ;;  %v8775_v40 = vadd.f32 %v20329_v41, %v8760_v15 }
 0x5e7   : > { %8930 = vst [vmem:[#allocation3 + $0x28] sm:$0x1] %v8929_v16  ;;  %8942 = vst [vmem:[#allocation3 + $0x30] sm:$0x1] %v8941_v34  ;;  %v8975_v20 = vsel %vm20336_vm3, %v14325_v44, %v8974_v26  ;;  %v8981_v4 = vsel %vm20336_vm3, %v14326_v29, %v8980_v57  ;;  %v8774_v23 = vadd.f32 %v20329_v41, %v8759_v63  ;;  %v20405_v19 = vld [vmem:[#allocation3 + $0x10] sm:$0xff]  ;;  %v16742_v28 = vld [vmem:[#allocation9 + $0x100] sm:$0xff]  }
 0x5e8   : > { %v8987_v33 = vsel %vm20336_vm3, %v14327_v42, %v8986_v27  ;;  %8976 = vst [vmem:[#allocation3 + $0x44] sm:$0x1] %v8975_v20  ;;  %8982 = vst [vmem:[#allocation3 + $0x48] sm:$0x1] %v8981_v4  ;;  %v8993_v17 = vsel %vm20336_vm3, %v14328_v11, %v8992_v36  ;;  %v8819_v24 = vadd.f32 %v8812_v47, %v20340_v22  ;;  %v8783_v14 = vmax.f32 %v8775_v40, 0.0  ;;  %v16748_v10 = vld [vmem:[#allocation9 + $0x180] sm:$0xff]  }
 0x5e9   : > { %8988 = vst [vmem:[#allocation3 + $0x4c] sm:$0x1] %v8987_v33  ;;  %v8820_v60 = vadd.f32 %v20365_v53, %v8812_v47  ;;  %8994 = vst [vmem:[#allocation3 + $0x50] sm:$0x1] %v8993_v17  ;;  %v8782_v2 = vmax.f32 %v8774_v23, 0.0  ;;  %v14358_v50 = vcombine.low %v9179_v52, %v9179_v52  ;;  %v14359_v12 = vcombine.high %v9179_v52, %v9179_v52  ;;  %v20407_v15 = vld [vmem:[#allocation3 + $0x18] sm:$0xff] }
 0x5ea   : > { %v14360_v41 = vcombine.low %v9180_v45, %v9180_v45  ;;  %v8826_v7 = vmul.f32 0.25, %v8819_v24  ;;  %v8799_v61 = vrot.slane %v8783_v14, 1  ;;  %v14361_v25 = vcombine.high %v9180_v45, %v9180_v45  ;;  %v9008_v22 = vld [vmem:[#allocation3 + $0x58] sm:$0x1]  ;;  %v9026_v59 = vld [vmem:[#allocation3 + $0x64] sm:$0x1] }
 0x5eb   : > { %v8827_v51 = vmul.f32 0.25, %v8820_v60  ;;  %v8798_v56 = vrot.slane %v8782_v2, 1  ;;  %12551 = vmatprep.mubr.bf16.mxu0 %v14359_v12  ;;  %v14363_v13 = vcombine.high %v20405_v19, %v20405_v19  ;;  %v9042_v0 = vld [vmem:[#allocation3 + $0x70] sm:$0x1]  ;;  %v16751_v1 = vld [vmem:[#allocation9 + $0x1c8] sm:$0xff]   ;;  %v14365_v55 = vcombine.high %v20407_v15, %v20407_v15  ;;  %v16755_v32 = vld [vmem:[#allocation9 + $0x150] sm:$0xff]  }
 0x5ec   : > { %v8995_v63 = vpack.c.bf16 %v8826_v7, %v8826_v7  ;;  %12552 = vmatmul.mubr.bf16.vlgmr.msra.gmra.mrb[32].mxu0 %v14358_v50  ;;  %12591 = vmatprep.mubr.bf16.mxu1 %v14361_v25  ;;  %v9054_v49 = vld [vmem:[#allocation3 + $0x74] sm:$0x1]  ;;  %v8815_v5 = vadd.f32 %v8799_v61, %v8783_v14  ;;  %v16750_v38 = vld [vmem:[#allocation9 + $0x108] sm:$0xff]   ;;  %v9060_v31 = vld [vmem:[#allocation3 + $0x78] sm:$0x1] }
 0x5ed   : > { %v20411_v21 = vpack.c.bf16 %v8827_v51, %v8827_v51  ;;  %v8814_v8 = vadd.f32 %v8798_v56, %v8782_v2  ;;  %15250 = vmatpush3.bf16.msra.mxu0 %v16742_v28  ;;  %12631 = vmatprep.mubr.bf16.mxu0 %v14363_v13  ;;  %v9020_v3 = vld [vmem:[#allocation3 + $0x60] sm:$0x1]  ;;  %v9032_v29 = vld [vmem:[#allocation3 + $0x68] sm:$0x1]  ;;  %v9066_v42 = vld [vmem:[#allocation3 + $0x7c] sm:$0x1] }
 0x5ee   : > { %v8997_v18 = vsel %vm20336_vm3, %v8995_v63, %v8996_v46  ;;  %v9003_v58 = vshrl.u32 %v8995_v63, 16  ;;  %v14331_v35 = vrot.slane %v8995_v63, 9  ;;  %v14333_v48 = vrot.slane %v8995_v63, 10  ;;  %12592 = vmatmul.mubr.bf16.vlgmr.msra.gmra.mrb[32].mxu1 %v14360_v41  ;;  %15251 = vmatprep.subr.bf16.mxu0 %v16749_v9  ;;  %v16754_v39 = vld [vmem:[#allocation9 + $0x188] sm:$0xff]   ;;  %v16757_v36 = vld [vmem:[#allocation9 + $0x1d0] sm:$0xff]   ;;  %v16759_v60 = vld [vmem:[#allocation9 + $0x158] sm:$0xff]  }
 0x5ef   : > { %8998 = vst [vmem:[#allocation3 + $0x54] sm:$0x1] %v8997_v18  ;;  %v14335_v26 = vrot.slane %v8995_v63, 11  ;;  %v9043_v6 = vsel %vm20336_vm3, %v20411_v21, %v9042_v0  ;;  %v9049_v62 = vshrl.u32 %v20411_v21, 16  ;;  %v14338_v43 = vrot.slane %v20411_v21, 9  ;;  %15272 = vmatpush3.bf16.msra.mxu1 %v16748_v10  ;;  %12671 = vmatprep.mubr.bf16.mxu1 %v14365_v55  ;;  %v16756_v20 = vld [vmem:[#allocation9 + $0x110] sm:$0xff]  }
 0x5f0   : > { %v9009_v57 = vsel %vm20336_vm3, %v9003_v58, %v9008_v22  ;;  %v9015_v27 = vsel %vm20336_vm3, %v14331_v35, %v9014_v54  ;;  %v14332_v16 = vrot.slane %v9003_v58, 9  ;;  %v9027_v44 = vsel %vm20336_vm3, %v14333_v48, %v9026_v59  ;;  %9044 = vst [vmem:[#allocation3 + $0x70] sm:$0x1] %v9043_v6  ;;  %15273 = vmatprep.subr.bf16.mxu1 %v16751_v1  ;;  %v9072_v52 = vld [vmem:[#allocation3 + $0x80] sm:$0x1]  ;;  %v16758_v12 = vld [vmem:[#allocation9 + $0x190] sm:$0xff]  }
 0x5f1   : > { %9010 = vst [vmem:[#allocation3 + $0x58] sm:$0x1] %v9009_v57  ;;  %9016 = vst [vmem:[#allocation3 + $0x5c] sm:$0x1] %v9015_v27  ;;  %v14334_v34 = vrot.slane %v9003_v58, 10  ;;  %v9039_v11 = vsel %vm20336_vm3, %v14335_v26, %v9038_v30  ;;  %v9055_v47 = vsel %vm20336_vm3, %v9049_v62, %v9054_v49  ;;  %v9061_v40 = vsel %vm20336_vm3, %v14338_v43, %v9060_v31  ;;  %v16761_v51 = vld [vmem:[#allocation9 + $0x1d8] sm:$0xff]  }
 0x5f2   : > { %9028 = vst [vmem:[#allocation3 + $0x64] sm:$0x1] %v9027_v44  ;;  %v9078_v45 = vld [vmem:[#allocation3 + $0x84] sm:$0x1]  ;;  %15252 = vmatpush3.bf16.msra.mxu0 %v16750_v38  ;;  %v9021_v4 = vsel %vm20336_vm3, %v14332_v16, %v9020_v3  ;;  %9040 = vst [vmem:[#allocation3 + $0x6c] sm:$0x1] %v9039_v11  ;;  %v8821_v2 = vadd.f32 %v8814_v8, %v20365_v53  ;;  %v8822_v50 = vadd.f32 %v8815_v5, %v8814_v8 }
 0x5f3   : > { %9056 = vst [vmem:[#allocation3 + $0x74] sm:$0x1] %v9055_v47  ;;  %9062 = vst [vmem:[#allocation3 + $0x78] sm:$0x1] %v9061_v40  ;;  %v14339_v33 = vrot.slane %v9049_v62, 9  ;;  %v14340_v23 = vrot.slane %v20411_v21, 10  ;;  %15253 = vmatprep.subr.bf16.mxu0 %v16755_v32  ;;  %v9033_v14 = vsel %vm20336_vm3, %v14334_v34, %v9032_v29  ;;  %15274 = vmatpush3.bf16.msra.mxu1 %v16754_v39 }
 0x5f4   : > { %v14341_v17 = vrot.slane %v9049_v62, 10  ;;  %v9084_v24 = vld [vmem:[#allocation3 + $0x88] sm:$0x1]  ;;  %9022 = vst [vmem:[#allocation3 + $0x60] sm:$0x1] %v9021_v4  ;;  %v14342_v46 = vrot.slane %v20411_v21, 11  ;;  %15275 = vmatprep.subr.bf16.mxu1 %v16757_v36 }
 0x5f5   : > { %9034 = vst [vmem:[#allocation3 + $0x68] sm:$0x1] %v9033_v14  ;;  %v9067_v28 = vsel %vm20336_vm3, %v14339_v33, %v9066_v42  ;;  %v9073_v41 = vsel %vm20336_vm3, %v14340_v23, %v9072_v52  ;;  %v8828_v61 = vmul.f32 0.25, %v8821_v2  ;;  %v8829_v25 = vmul.f32 0.25, %v8822_v50  ;;  %v9088_v9 = vld [vmem:[#allocation3 + $0x8c] sm:$0x1] }
 0x5f6   : > { %v9079_v7 = vsel %vm20336_vm3, %v14341_v17, %v9078_v45  ;;  %9068 = vst [vmem:[#allocation3 + $0x7c] sm:$0x1] %v9067_v28  ;;  %9074 = vst [vmem:[#allocation3 + $0x80] sm:$0x1] %v9073_v41  ;;  %v9085_v53 = vsel %vm20336_vm3, %v14342_v46, %v9084_v24  ;;  %15254 = vmatpush3.bf16.msra.mxu0 %v16756_v20  ;;  %v16760_v22 = vld [vmem:[#allocation9 + $0x118] sm:$0xff]   ;;  %v16763_v13 = vld [vmem:[#allocation9 + $0x160] sm:$0xff]  }
 0x5f7   : > { %9080 = vst [vmem:[#allocation3 + $0x84] sm:$0x1] %v9079_v7  ;;  %9086 = vst [vmem:[#allocation3 + $0x88] sm:$0x1] %v9085_v53  ;;  %v9100_v54 = vld [vmem:[#allocation3 + $0x90] sm:$0x1]  ;;  %15255 = vmatprep.subr.bf16.mxu0 %v16759_v60  ;;  %v9087_v10 = vpack.c.bf16 %v8828_v61, %v8828_v61  ;;  %v20449_v59 = vpack.c.bf16 %v8829_v25, %v8829_v25  ;;  %15276 = vmatpush3.bf16.msra.mxu1 %v16758_v12 }
 0x5f8   : > { %v9106_v56 = vld [vmem:[#allocation3 + $0x94] sm:$0x1]  ;;  %v9118_v63 = vld [vmem:[#allocation3 + $0x9c] sm:$0x1]  ;;  %v9134_v21 = vld [vmem:[#allocation3 + $0xa8] sm:$0x1]  ;;  %15277 = vmatprep.subr.bf16.mxu1 %v16761_v51 }
 0x5f9   : > { %v16762_v0 = vld [vmem:[#allocation9 + $0x198] sm:$0xff]   ;;  %v9130_v1 = vld [vmem:[#allocation3 + $0xa4] sm:$0x1]  ;;  %v9146_v30 = vld [vmem:[#allocation3 + $0xac] sm:$0x1]  ;;  %v9089_v5 = vsel %vm20336_vm3, %v9087_v10, %v9088_v9  ;;  %v9095_v8 = vshrl.u32 %v9087_v10, 16  ;;  %v9135_v31 = vsel %vm20336_vm3, %v20449_v59, %v9134_v21 }
 0x5fa   : > { %v16765_v49 = vld [vmem:[#allocation9 + $0x1e0] sm:$0xff]   ;;  %v14345_v38 = vrot.slane %v9087_v10, 9  ;;  %v14347_v55 = vrot.slane %v9087_v10, 10  ;;  %v9152_v18 = vld [vmem:[#allocation3 + $0xb0] sm:$0x1]  ;;  %15256 = vmatpush3.bf16.msra.mxu0 %v16760_v22  ;;  %v14349_v48 = vrot.slane %v9087_v10, 11 }
 0x5fb   : > { %v16764_v58 = vld [vmem:[#allocation9 + $0x120] sm:$0xff]   ;;  %9090 = vst [vmem:[#allocation3 + $0x8c] sm:$0x1] %v9089_v5  ;;  %v9141_v32 = vshrl.u32 %v20449_v59, 16  ;;  %v14352_v3 = vrot.slane %v20449_v59, 9  ;;  %15257 = vmatprep.subr.bf16.mxu0 %v16763_v13  ;;  %v16767_v26 = vld [vmem:[#allocation9 + $0x168] sm:$0xff]   ;;  %v9101_v6 = vsel %vm20336_vm3, %v9095_v8, %v9100_v54  ;;  %15278 = vmatpush3.bf16.msra.mxu1 %v16762_v0  ;;  %v14362_v54 = vcombine.low %v20405_v19, %v20405_v19 }
 0x5fc   : > { %v9112_v35 = vld [vmem:[#allocation3 + $0x98] sm:$0x1]  ;;  %v9107_v62 = vsel %vm20336_vm3, %v14345_v38, %v9106_v56  ;;  %v14346_v43 = vrot.slane %v9095_v8, 9  ;;  %v9119_v39 = vsel %vm20336_vm3, %v14347_v55, %v9118_v63  ;;  %v9124_v57 = vld [vmem:[#allocation3 + $0xa0] sm:$0x1]  ;;  %v14348_v44 = vrot.slane %v9095_v8, 10  ;;  %15279 = vmatprep.subr.bf16.mxu1 %v16765_v49 }
 0x5fd   : > { %9136 = vst [vmem:[#allocation3 + $0xa8] sm:$0x1] %v9135_v31  ;;  %v9158_v27 = vld [vmem:[#allocation3 + $0xb4] sm:$0x1]  ;;  %v16766_v16 = vld [vmem:[#allocation9 + $0x1a0] sm:$0xff]   ;;  %v9131_v29 = vsel %vm20336_vm3, %v14349_v48, %v9130_v1  ;;  %v9147_v42 = vsel %vm20336_vm3, %v9141_v32, %v9146_v30  ;;  %v9153_v36 = vsel %vm20336_vm3, %v14352_v3, %v9152_v18  ;;  %v16769_v47 = vld [vmem:[#allocation9 + $0x1e8] sm:$0xff]  }
 0x5fe   : > { %9102 = vst [vmem:[#allocation3 + $0x90] sm:$0x1] %v9101_v6  ;;  %9108 = vst [vmem:[#allocation3 + $0x94] sm:$0x1] %v9107_v62  ;;  %v9164_v34 = vld [vmem:[#allocation3 + $0xb8] sm:$0x1]  ;;  %v9113_v40 = vsel %vm20336_vm3, %v14346_v43, %v9112_v35  ;;  %15258 = vmatpush3.bf16.msra.mxu0 %v16764_v58  ;;  %v9125_v23 = vsel %vm20336_vm3, %v14348_v44, %v9124_v57 }
 0x5ff   : > { %9120 = vst [vmem:[#allocation3 + $0x9c] sm:$0x1] %v9119_v39  ;;  %v9170_v11 = vld [vmem:[#allocation3 + $0xbc] sm:$0x1]  ;;  %9132 = vst [vmem:[#allocation3 + $0xa4] sm:$0x1] %v9131_v29  ;;  %15259 = vmatprep.subr.bf16.mxu0 %v16767_v26  ;;  %15280 = vmatpush3.bf16.msra.mxu1 %v16766_v16 }
 0x600   : > { %9148 = vst [vmem:[#allocation3 + $0xac] sm:$0x1] %v9147_v42  ;;  %9154 = vst [vmem:[#allocation3 + $0xb0] sm:$0x1] %v9153_v36  ;;  %v14353_v52 = vrot.slane %v9141_v32, 9  ;;  %v14354_v45 = vrot.slane %v20449_v59, 10  ;;  %15281 = vmatprep.subr.bf16.mxu1 %v16769_v47 }
 0x601   : > { %v14355_v20 = vrot.slane %v9141_v32, 10  ;;  %v9176_v4 = vld [vmem:[#allocation3 + $0xc0] sm:$0x1]  ;;  %9114 = vst [vmem:[#allocation3 + $0x98] sm:$0x1] %v9113_v40  ;;  %v14356_v17 = vrot.slane %v20449_v59, 11  ;;  %v14364_v59 = vcombine.low %v20407_v15, %v20407_v15 }
 0x602   : > { %v16768_v33 = vld [vmem:[#allocation9 + $0x128] sm:$0xff]   ;;  %v16771_v24 = vld [vmem:[#allocation9 + $0x170] sm:$0xff]   ;;  %9126 = vst [vmem:[#allocation3 + $0xa0] sm:$0x1] %v9125_v23  ;;  %v9159_v60 = vsel %vm20336_vm3, %v14353_v52, %v9158_v27  ;;  %v9165_v14 = vsel %vm20336_vm3, %v14354_v45, %v9164_v34  ;;  %v16775_v41 = vld [vmem:[#allocation9 + $0x178] sm:$0xff]  }
 0x603   : > { %v9171_v46 = vsel %vm20336_vm3, %v14355_v20, %v9170_v11  ;;  %v16770_v2 = vld [vmem:[#allocation9 + $0x1a8] sm:$0xff]   ;;  %9160 = vst [vmem:[#allocation3 + $0xb4] sm:$0x1] %v9159_v60  ;;  %9166 = vst [vmem:[#allocation3 + $0xb8] sm:$0x1] %v9165_v14  ;;  %v9177_v50 = vsel %vm20336_vm3, %v14356_v17, %v9176_v4  ;;  %v16773_v12 = vld [vmem:[#allocation9 + $0x1f0] sm:$0xff]   ;;  %15260 = vmatpush3.bf16.msra.mxu0 %v16768_v33 }
 0x604   : > { %9172 = vst [vmem:[#allocation3 + $0xbc] sm:$0x1] %v9171_v46  ;;  %9178 = vst [vmem:[#allocation3 + $0xc0] sm:$0x1] %v9177_v50  ;;  %v16772_v28 = vld [vmem:[#allocation9 + $0x130] sm:$0xff]   ;;  %15261 = vmatprep.subr.bf16.mxu0 %v16771_v24  ;;  %15282 = vmatpush3.bf16.msra.mxu1 %v16770_v2  ;;  %v16777_v51 = vld [vmem:[#allocation9 + $0x1f8] sm:$0xff]  }
 0x605   : > { %v16774_v7 = vld [vmem:[#allocation9 + $0x1b0] sm:$0xff]   ;;  %15283 = vmatprep.subr.bf16.mxu1 %v16773_v12  ;;  %v16776_v53 = vld [vmem:[#allocation9 + $0x138] sm:$0xff]   ;;  %v16779_v61 = vld [vmem:[#allocation9 + $0x240] sm:$0xff]  }
 0x606   : > { %v16778_v25 = vld [vmem:[#allocation9 + $0x1b8] sm:$0xff]   ;;  %v20484_v37 = vld [vmem:[#allocation3 + $0x20] sm:$0xff]  ;;  %v16783_v9 = vld [vmem:[#allocation9 + $0x2c0] sm:$0xff]  }
 0x607   : > { %15262 = vmatpush3.bf16.msra.mxu0 %v16772_v28  ;;  %v16780_v22 = vld [vmem:[#allocation9 + $0x200] sm:$0xff]   ;;  %v20488_v56 = vld [vmem:[#allocation3 + $0x28] sm:$0xff]  ;;  %v16787_v13 = vld [vmem:[#allocation9 + $0x248] sm:$0xff]   ;;  %v14367_v10 = vcombine.high %v20484_v37, %v20484_v37  ;;  %v14366_v47 = vcombine.low %v20484_v37, %v20484_v37 }
 0x608   : > { %15263 = vmatprep.subr.bf16.mxu0 %v16775_v41  ;;  %15284 = vmatpush3.bf16.msra.mxu1 %v16774_v7  ;;  %v16784_v63 = vld [vmem:[#allocation9 + $0x280] sm:$0xff]   ;;  %v16789_v21 = vld [vmem:[#allocation9 + $0x2c8] sm:$0xff]   ;;  %v14369_v19 = vcombine.high %v20488_v56, %v20488_v56  ;;  %v16791_v1 = vld [vmem:[#allocation9 + $0x250] sm:$0xff]   ;;  %v14368_v4 = vcombine.low %v20488_v56, %v20488_v56 }
 0x609   : > { %15285 = vmatprep.subr.bf16.mxu1 %v16777_v51  ;;  %v16788_v0 = vld [vmem:[#allocation9 + $0x208] sm:$0xff]   ;;  %v16793_v49 = vld [vmem:[#allocation9 + $0x2d0] sm:$0xff]   ;;  %v16795_v15 = vld [vmem:[#allocation9 + $0x258] sm:$0xff]  }
 0x60a   : > { %v16790_v30 = vld [vmem:[#allocation9 + $0x288] sm:$0xff]   ;;  %v16792_v5 = vld [vmem:[#allocation9 + $0x210] sm:$0xff]   ;;  %v16797_v38 = vld [vmem:[#allocation9 + $0x2d8] sm:$0xff]  }
 0x60b   : > { %15264 = vmatpush3.bf16.msra.mxu0 %v16776_v53  ;;  %v16794_v8 = vld [vmem:[#allocation9 + $0x290] sm:$0xff]   ;;  %v16796_v55 = vld [vmem:[#allocation9 + $0x218] sm:$0xff]   ;;  %v16799_v18 = vld [vmem:[#allocation9 + $0x260] sm:$0xff]  }
 0x60c   : > { %15293 = vmatprep.subr.bf16.mxu0 %v16779_v61  ;;  %15286 = vmatpush3.bf16.msra.mxu1 %v16778_v25  ;;  %v16798_v58 = vld [vmem:[#allocation9 + $0x298] sm:$0xff]   ;;  %v16801_v35 = vld [vmem:[#allocation9 + $0x2e0] sm:$0xff]   ;;  %v16803_v31 = vld [vmem:[#allocation9 + $0x268] sm:$0xff]  }
 0x60d   : > { %15315 = vmatprep.subr.bf16.mxu1 %v16783_v9  ;;  %v16800_v48 = vld [vmem:[#allocation9 + $0x220] sm:$0xff]   ;;  %v16805_v3 = vld [vmem:[#allocation9 + $0x2e8] sm:$0xff]   ;;  %v16807_v6 = vld [vmem:[#allocation9 + $0x270] sm:$0xff]  }
 0x60e   : > { %12632 = vmatmul.mubr.bf16.vlgmr.msra.gmra.mrb[36].mxu0 %v14362_v54  ;;  %v16802_v32 = vld [vmem:[#allocation9 + $0x2a0] sm:$0xff]   ;;  %v16804_v26 = vld [vmem:[#allocation9 + $0x228] sm:$0xff]   ;;  %v16809_v43 = vld [vmem:[#allocation9 + $0x2f0] sm:$0xff]  }
 0x60f   : > { %15294 = vmatpush3.bf16.msra.mxu0 %v16780_v22  ;;  %12711 = vmatprep.mubr.bf16.mxu0 %v14367_v10  ;;  %v16806_v62 = vld [vmem:[#allocation9 + $0x2a8] sm:$0xff]   ;;  %v16808_v39 = vld [vmem:[#allocation9 + $0x230] sm:$0xff]   ;;  %v16811_v57 = vld [vmem:[#allocation9 + $0x278] sm:$0xff]  }
 0x610   : > { %12672 = vmatmul.mubr.bf16.vlgmr.msra.gmra.mrb[36].mxu1 %v14364_v59  ;;  %15295 = vmatprep.subr.bf16.mxu0 %v16787_v13  ;;  %v16810_v27 = vld [vmem:[#allocation9 + $0x2b0] sm:$0xff]   ;;  %v16813_v16 = vld [vmem:[#allocation9 + $0x2f8] sm:$0xff]   ;;  %v16815_v29 = vld [vmem:[#allocation9 + $0x340] sm:$0xff]  }
 0x611   : > { %15316 = vmatpush3.bf16.msra.mxu1 %v16784_v63  ;;  %12751 = vmatprep.mubr.bf16.mxu1 %v14369_v19  ;;  %v16812_v44 = vld [vmem:[#allocation9 + $0x238] sm:$0xff]   ;;  %v16819_v34 = vld [vmem:[#allocation9 + $0x3c0] sm:$0xff]   ;;  %v16823_v52 = vld [vmem:[#allocation9 + $0x348] sm:$0xff]  }
 0x612   : > { %15317 = vmatprep.subr.bf16.mxu1 %v16789_v21  ;;  %v16814_v42 = vld [vmem:[#allocation9 + $0x2b8] sm:$0xff]   ;;  %v16816_v11 = vld [vmem:[#allocation9 + $0x300] sm:$0xff]   ;;  %v16825_v33 = vld [vmem:[#allocation9 + $0x3c8] sm:$0xff]  }
 0x613   : > { %15296 = vmatpush3.bf16.msra.mxu0 %v16788_v0  ;;  %v20496_v36 = vld [vmem:[#allocation3 + $0x30] sm:$0xff]  ;;  %v20500_v40 = vld [vmem:[#allocation3 + $0x38] sm:$0xff]  ;;  %v16824_v17 = vld [vmem:[#allocation9 + $0x308] sm:$0xff]  }
 0x614   : > { %15297 = vmatprep.subr.bf16.mxu0 %v16791_v1  ;;  %v14371_v45 = vcombine.high %v20496_v36, %v20496_v36  ;;  %v16820_v20 = vld [vmem:[#allocation9 + $0x380] sm:$0xff]   ;;  %v14373_v23 = vcombine.high %v20500_v40, %v20500_v40  ;;  %v16827_v24 = vld [vmem:[#allocation9 + $0x350] sm:$0xff]   ;;  %v16826_v60 = vld [vmem:[#allocation9 + $0x388] sm:$0xff]  }
 0x615   : > { %15318 = vmatpush3.bf16.msra.mxu1 %v16790_v30  ;;  %v16829_v14 = vld [vmem:[#allocation9 + $0x3d0] sm:$0xff]   ;;  %v16831_v2 = vld [vmem:[#allocation9 + $0x358] sm:$0xff]   ;;  %v16835_v41 = vld [vmem:[#allocation9 + $0x360] sm:$0xff]  }
 0x616   : > { %15319 = vmatprep.subr.bf16.mxu1 %v16793_v49  ;;  %v16828_v46 = vld [vmem:[#allocation9 + $0x310] sm:$0xff]   ;;  %v16833_v12 = vld [vmem:[#allocation9 + $0x3d8] sm:$0xff]   ;;  %v16837_v51 = vld [vmem:[#allocation9 + $0x3e0] sm:$0xff]  }
 0x617   : > { %15298 = vmatpush3.bf16.msra.mxu0 %v16792_v5  ;;  %v16830_v50 = vld [vmem:[#allocation9 + $0x390] sm:$0xff]   ;;  %v16832_v28 = vld [vmem:[#allocation9 + $0x318] sm:$0xff]   ;;  %v16836_v53 = vld [vmem:[#allocation9 + $0x320] sm:$0xff]   ;;  %v14370_v5 = vcombine.low %v20496_v36, %v20496_v36 }
 0x618   : > { %15299 = vmatprep.subr.bf16.mxu0 %v16795_v15  ;;  %v16834_v7 = vld [vmem:[#allocation9 + $0x398] sm:$0xff]   ;;  %v16839_v61 = vld [vmem:[#allocation9 + $0x368] sm:$0xff]   ;;  %v16838_v25 = vld [vmem:[#allocation9 + $0x3a0] sm:$0xff]  }
 0x619   : > { %15320 = vmatpush3.bf16.msra.mxu1 %v16794_v8  ;;  %v16841_v37 = vld [vmem:[#allocation9 + $0x3e8] sm:$0xff]   ;;  %v16843_v22 = vld [vmem:[#allocation9 + $0x370] sm:$0xff]   ;;  %v16847_v10 = vld [vmem:[#allocation9 + $0x378] sm:$0xff]  }
 0x61a   : > { %15321 = vmatprep.subr.bf16.mxu1 %v16797_v38  ;;  %v16840_v9 = vld [vmem:[#allocation9 + $0x328] sm:$0xff]   ;;  %v16845_v56 = vld [vmem:[#allocation9 + $0x3f0] sm:$0xff]   ;;  %v16849_v59 = vld [vmem:[#allocation9 + $0x3f8] sm:$0xff]  }
 0x61b   : > { %15300 = vmatpush3.bf16.msra.mxu0 %v16796_v55  ;;  %v16842_v54 = vld [vmem:[#allocation9 + $0x3a8] sm:$0xff]   ;;  %v16844_v13 = vld [vmem:[#allocation9 + $0x330] sm:$0xff]   ;;  %v16848_v21 = vld [vmem:[#allocation9 + $0x338] sm:$0xff]  }
 0x61c   : > { %15301 = vmatprep.subr.bf16.mxu0 %v16799_v18  ;;  %v16846_v63 = vld [vmem:[#allocation9 + $0x3b0] sm:$0xff]   ;;  %v16851_v19 = vld [vmem:[#allocation9 + $0x440] sm:$0xff]   ;;  %v16850_v0 = vld [vmem:[#allocation9 + $0x3b8] sm:$0xff]   ;;  %v14372_v18 = vcombine.low %v20500_v40, %v20500_v40 }
 0x61d   : > { %15322 = vmatpush3.bf16.msra.mxu1 %v16798_v58  ;;  %v20508_v1 = vld [vmem:[#allocation3 + $0x40] sm:$0xff]  ;;  %v16855_v30 = vld [vmem:[#allocation9 + $0x4c0] sm:$0xff]   ;;  %v20512_v15 = vld [vmem:[#allocation3 + $0x48] sm:$0xff] }
 0x61e   : > { %15323 = vmatprep.subr.bf16.mxu1 %v16801_v35  ;;  %v16852_v49 = vld [vmem:[#allocation9 + $0x400] sm:$0xff]   ;;  %v16859_v8 = vld [vmem:[#allocation9 + $0x448] sm:$0xff]   ;;  %v14375_v38 = vcombine.high %v20508_v1, %v20508_v1  ;;  %v14377_v35 = vcombine.high %v20512_v15, %v20512_v15  ;;  %v16881_v40 = vld [vmem:[#allocation9 + $0x4f0] sm:$0xff]  }
 0x61f   : > { %15302 = vmatpush3.bf16.msra.mxu0 %v16800_v48  ;;  %v16856_v55 = vld [vmem:[#allocation9 + $0x480] sm:$0xff]   ;;  %v16861_v58 = vld [vmem:[#allocation9 + $0x4c8] sm:$0xff]  }
 0x620   : > { %15303 = vmatprep.subr.bf16.mxu0 %v16803_v31  ;;  %v16860_v48 = vld [vmem:[#allocation9 + $0x408] sm:$0xff]   ;;  %v16863_v31 = vld [vmem:[#allocation9 + $0x450] sm:$0xff]  }
 0x621   : > { %15324 = vmatpush3.bf16.msra.mxu1 %v16802_v32  ;;  %v16862_v32 = vld [vmem:[#allocation9 + $0x488] sm:$0xff]  }
 0x622   : > { %15325 = vmatprep.subr.bf16.mxu1 %v16805_v3  ;;  %v16865_v3 = vld [vmem:[#allocation9 + $0x4d0] sm:$0xff]   ;;  %v16877_v36 = vld [vmem:[#allocation9 + $0x4e8] sm:$0xff]  }
 0x623   : > { %15304 = vmatpush3.bf16.msra.mxu0 %v16804_v26  ;;  %v16864_v26 = vld [vmem:[#allocation9 + $0x410] sm:$0xff]  }
 0x624   : > { %15305 = vmatprep.subr.bf16.mxu0 %v16807_v6  ;;  %v16867_v6 = vld [vmem:[#allocation9 + $0x458] sm:$0xff]  }
 0x625   : > { %15326 = vmatpush3.bf16.msra.mxu1 %v16806_v62  ;;  %v16866_v62 = vld [vmem:[#allocation9 + $0x490] sm:$0xff]  }
 0x626   : > { %15327 = vmatprep.subr.bf16.mxu1 %v16809_v43  ;;  %v16869_v43 = vld [vmem:[#allocation9 + $0x4d8] sm:$0xff]  }
 0x627   : > { %15306 = vmatpush3.bf16.msra.mxu0 %v16808_v39  ;;  %v16868_v39 = vld [vmem:[#allocation9 + $0x418] sm:$0xff]  }
 0x628   : > { %15307 = vmatprep.subr.bf16.mxu0 %v16811_v57  ;;  %v16871_v57 = vld [vmem:[#allocation9 + $0x460] sm:$0xff]  }
 0x629   : > { %15328 = vmatpush3.bf16.msra.mxu1 %v16810_v27  ;;  %v16870_v27 = vld [vmem:[#allocation9 + $0x498] sm:$0xff]  }
 0x62a   : > { %15329 = vmatprep.subr.bf16.mxu1 %v16813_v16  ;;  %v16873_v16 = vld [vmem:[#allocation9 + $0x4e0] sm:$0xff]  }
 0x62b   : > { %15308 = vmatpush3.bf16.msra.mxu0 %v16812_v44  ;;  %v16872_v44 = vld [vmem:[#allocation9 + $0x420] sm:$0xff]  }
 0x62c   : > { %15337 = vmatprep.subr.bf16.mxu0 %v16815_v29  ;;  %v16875_v29 = vld [vmem:[#allocation9 + $0x468] sm:$0xff]  }
 0x62d   : > { %15330 = vmatpush3.bf16.msra.mxu1 %v16814_v42  ;;  %v16874_v42 = vld [vmem:[#allocation9 + $0x4a0] sm:$0xff]  }
 0x62e   : > { %12712 = vmatmul.mubr.bf16.vlgmr.msra.gmra.mrb[40].mxu0 %v14366_v47  ;;  %15359 = vmatprep.subr.bf16.mxu1 %v16819_v34  ;;  %v16876_v34 = vld [vmem:[#allocation9 + $0x428] sm:$0xff]  }
 0x62f   : > { %15338 = vmatpush3.bf16.msra.mxu0 %v16816_v11  ;;  %12791 = vmatprep.mubr.bf16.mxu0 %v14371_v45  ;;  %v16879_v11 = vld [vmem:[#allocation9 + $0x470] sm:$0xff]   ;;  %v16878_v47 = vld [vmem:[#allocation9 + $0x4a8] sm:$0xff]   ;;  %v16883_v45 = vld [vmem:[#allocation9 + $0x478] sm:$0xff]  }
 0x630   : > { %12752 = vmatmul.mubr.bf16.vlgmr.msra.gmra.mrb[40].mxu1 %v14368_v4  ;;  %15339 = vmatprep.subr.bf16.mxu0 %v16823_v52  ;;  %v16880_v52 = vld [vmem:[#allocation9 + $0x430] sm:$0xff]   ;;  %v16885_v4 = vld [vmem:[#allocation9 + $0x4f8] sm:$0xff]  }
 0x631   : > { %15360 = vmatpush3.bf16.msra.mxu1 %v16820_v20  ;;  %12831 = vmatprep.mubr.bf16.mxu1 %v14373_v23  ;;  %v16882_v20 = vld [vmem:[#allocation9 + $0x4b0] sm:$0xff]   ;;  %v16887_v23 = vld [vmem:[#allocation9 + $0x540] sm:$0xff]  }
 0x632   : > { %15361 = vmatprep.subr.bf16.mxu1 %v16825_v33  ;;  %v16884_v33 = vld [vmem:[#allocation9 + $0x438] sm:$0xff]  }
 0x633   : > { %15340 = vmatpush3.bf16.msra.mxu0 %v16824_v17  ;;  %v16886_v17 = vld [vmem:[#allocation9 + $0x4b8] sm:$0xff]  }
 0x634   : > { %15341 = vmatprep.subr.bf16.mxu0 %v16827_v24  ;;  %v20520_v24 = vld [vmem:[#allocation3 + $0x50] sm:$0xff] }
 0x635   : > { %15362 = vmatpush3.bf16.msra.mxu1 %v16826_v60  ;;  %v16891_v60 = vld [vmem:[#allocation9 + $0x5c0] sm:$0xff]  }
 0x636   : > { %15363 = vmatprep.subr.bf16.mxu1 %v16829_v14  ;;  %v16888_v14 = vld [vmem:[#allocation9 + $0x500] sm:$0xff]  }
 0x637   : > { %15342 = vmatpush3.bf16.msra.mxu0 %v16828_v46  ;;  %v14374_v46 = vcombine.low %v20508_v1, %v20508_v1  ;;  %v16913_v1 = vld [vmem:[#allocation9 + $0x5e8] sm:$0xff]  }
 0x638   : > { %15343 = vmatprep.subr.bf16.mxu0 %v16831_v2  ;;  %v20524_v2 = vld [vmem:[#allocation3 + $0x58] sm:$0xff] }
 0x639   : > { %15364 = vmatpush3.bf16.msra.mxu1 %v16830_v50  ;;  %v16895_v50 = vld [vmem:[#allocation9 + $0x548] sm:$0xff]  }
 0x63a   : > { %15365 = vmatprep.subr.bf16.mxu1 %v16833_v12  ;;  %v14379_v12 = vcombine.high %v20520_v24, %v20520_v24 }
 0x63b   : > { %15344 = vmatpush3.bf16.msra.mxu0 %v16832_v28  ;;  %v16892_v28 = vld [vmem:[#allocation9 + $0x580] sm:$0xff]  }
 0x63c   : > { %15345 = vmatprep.subr.bf16.mxu0 %v16835_v41  ;;  %v14376_v41 = vcombine.low %v20512_v15, %v20512_v15  ;;  %v16917_v15 = vld [vmem:[#allocation9 + $0x5f0] sm:$0xff]  }
 0x63d   : > { %15366 = vmatpush3.bf16.msra.mxu1 %v16834_v7  ;;  %v16897_v7 = vld [vmem:[#allocation9 + $0x5c8] sm:$0xff]  }
 0x63e   : > { %15367 = vmatprep.subr.bf16.mxu1 %v16837_v51  ;;  %v14381_v51 = vcombine.high %v20524_v2, %v20524_v2 }
 0x63f   : > { %15346 = vmatpush3.bf16.msra.mxu0 %v16836_v53  ;;  %v16896_v53 = vld [vmem:[#allocation9 + $0x508] sm:$0xff]  }
 0x640   : > { %15347 = vmatprep.subr.bf16.mxu0 %v16839_v61  ;;  %v16899_v61 = vld [vmem:[#allocation9 + $0x550] sm:$0xff]  }
 0x641   : > { %15368 = vmatpush3.bf16.msra.mxu1 %v16838_v25  ;;  %v16898_v25 = vld [vmem:[#allocation9 + $0x588] sm:$0xff]  }
 0x642   : > { %15369 = vmatprep.subr.bf16.mxu1 %v16841_v37  ;;  %v16901_v37 = vld [vmem:[#allocation9 + $0x5d0] sm:$0xff]  }
 0x643   : > { %15348 = vmatpush3.bf16.msra.mxu0 %v16840_v9  ;;  %v16900_v9 = vld [vmem:[#allocation9 + $0x510] sm:$0xff]  }
 0x644   : > { %15349 = vmatprep.subr.bf16.mxu0 %v16843_v22  ;;  %v16903_v22 = vld [vmem:[#allocation9 + $0x558] sm:$0xff]  }
 0x645   : > { %15370 = vmatpush3.bf16.msra.mxu1 %v16842_v54  ;;  %v16902_v54 = vld [vmem:[#allocation9 + $0x590] sm:$0xff]  }
 0x646   : > { %15371 = vmatprep.subr.bf16.mxu1 %v16845_v56  ;;  %v16905_v56 = vld [vmem:[#allocation9 + $0x5d8] sm:$0xff]  }
 0x647   : > { %15350 = vmatpush3.bf16.msra.mxu0 %v16844_v13  ;;  %v16904_v13 = vld [vmem:[#allocation9 + $0x518] sm:$0xff]  }
 0x648   : > { %15351 = vmatprep.subr.bf16.mxu0 %v16847_v10  ;;  %v16907_v10 = vld [vmem:[#allocation9 + $0x560] sm:$0xff]  }
 0x649   : > { %15372 = vmatpush3.bf16.msra.mxu1 %v16846_v63  ;;  %v16906_v63 = vld [vmem:[#allocation9 + $0x598] sm:$0xff]  }
 0x64a   : > { %15373 = vmatprep.subr.bf16.mxu1 %v16849_v59  ;;  %v16909_v59 = vld [vmem:[#allocation9 + $0x5e0] sm:$0xff]  }
 0x64b   : > { %15352 = vmatpush3.bf16.msra.mxu0 %v16848_v21  ;;  %v16908_v21 = vld [vmem:[#allocation9 + $0x520] sm:$0xff]  }
 0x64c   : > { %15381 = vmatprep.subr.bf16.mxu0 %v16851_v19  ;;  %v16911_v19 = vld [vmem:[#allocation9 + $0x568] sm:$0xff]  }
 0x64d   : > { %15374 = vmatpush3.bf16.msra.mxu1 %v16850_v0  ;;  %v16910_v0 = vld [vmem:[#allocation9 + $0x5a0] sm:$0xff]  }
 0x64e   : > { %12792 = vmatmul.mubr.bf16.vlgmr.msra.gmra.mrb[44].mxu0 %v14370_v5  ;;  %15403 = vmatprep.subr.bf16.mxu1 %v16855_v30  ;;  %v16912_v30 = vld [vmem:[#allocation9 + $0x528] sm:$0xff]  }
 0x64f   : > { %15382 = vmatpush3.bf16.msra.mxu0 %v16852_v49  ;;  %12871 = vmatprep.mubr.bf16.mxu0 %v14375_v38  ;;  %v16915_v49 = vld [vmem:[#allocation9 + $0x570] sm:$0xff]   ;;  %v16914_v5 = vld [vmem:[#allocation9 + $0x5a8] sm:$0xff]   ;;  %v16919_v38 = vld [vmem:[#allocation9 + $0x578] sm:$0xff]  }
 0x650   : > { %12832 = vmatmul.mubr.bf16.vlgmr.msra.gmra.mrb[44].mxu1 %v14372_v18  ;;  %15383 = vmatprep.subr.bf16.mxu0 %v16859_v8  ;;  %v16916_v8 = vld [vmem:[#allocation9 + $0x530] sm:$0xff]   ;;  %v16921_v18 = vld [vmem:[#allocation9 + $0x5f8] sm:$0xff]  }
 0x651   : > { %15404 = vmatpush3.bf16.msra.mxu1 %v16856_v55  ;;  %12911 = vmatprep.mubr.bf16.mxu1 %v14377_v35  ;;  %v16918_v55 = vld [vmem:[#allocation9 + $0x5b0] sm:$0xff]   ;;  %v16923_v35 = vld [vmem:[#allocation9 + $0x640] sm:$0xff]  }
 0x652   : > { %15405 = vmatprep.subr.bf16.mxu1 %v16861_v58  ;;  %v16920_v58 = vld [vmem:[#allocation9 + $0x538] sm:$0xff]  }
 0x653   : > { %15384 = vmatpush3.bf16.msra.mxu0 %v16860_v48  ;;  %v16922_v48 = vld [vmem:[#allocation9 + $0x5b8] sm:$0xff]  }
 0x654   : > { %15385 = vmatprep.subr.bf16.mxu0 %v16863_v31  ;;  %v20532_v31 = vld [vmem:[#allocation3 + $0x60] sm:$0xff] }
 0x655   : > { %15406 = vmatpush3.bf16.msra.mxu1 %v16862_v32  ;;  %v16927_v32 = vld [vmem:[#allocation9 + $0x6c0] sm:$0xff]  }
 0x656   : > { %15407 = vmatprep.subr.bf16.mxu1 %v16865_v3  ;;  %v16924_v3 = vld [vmem:[#allocation9 + $0x600] sm:$0xff]  }
 0x657   : > { %15386 = vmatpush3.bf16.msra.mxu0 %v16864_v26  ;;  %v14378_v26 = vcombine.low %v20520_v24, %v20520_v24  ;;  %v16949_v24 = vld [vmem:[#allocation9 + $0x6e8] sm:$0xff]  }
 0x658   : > { %15387 = vmatprep.subr.bf16.mxu0 %v16867_v6  ;;  %v20536_v6 = vld [vmem:[#allocation3 + $0x68] sm:$0xff] }
 0x659   : > { %15408 = vmatpush3.bf16.msra.mxu1 %v16866_v62  ;;  %v16931_v62 = vld [vmem:[#allocation9 + $0x648] sm:$0xff]  }
 0x65a   : > { %15409 = vmatprep.subr.bf16.mxu1 %v16869_v43  ;;  %v14383_v43 = vcombine.high %v20532_v31, %v20532_v31 }
 0x65b   : > { %15388 = vmatpush3.bf16.msra.mxu0 %v16868_v39  ;;  %v16928_v39 = vld [vmem:[#allocation9 + $0x680] sm:$0xff]  }
 0x65c   : > { %15389 = vmatprep.subr.bf16.mxu0 %v16871_v57  ;;  %v14380_v57 = vcombine.low %v20524_v2, %v20524_v2  ;;  %v16953_v2 = vld [vmem:[#allocation9 + $0x6f0] sm:$0xff]  }
 0x65d   : > { %15410 = vmatpush3.bf16.msra.mxu1 %v16870_v27  ;;  %v16933_v27 = vld [vmem:[#allocation9 + $0x6c8] sm:$0xff]  }
 0x65e   : > { %15411 = vmatprep.subr.bf16.mxu1 %v16873_v16  ;;  %v14385_v16 = vcombine.high %v20536_v6, %v20536_v6 }
 0x65f   : > { %15390 = vmatpush3.bf16.msra.mxu0 %v16872_v44  ;;  %v16932_v44 = vld [vmem:[#allocation9 + $0x608] sm:$0xff]  }
 0x660   : > { %15391 = vmatprep.subr.bf16.mxu0 %v16875_v29  ;;  %v16935_v29 = vld [vmem:[#allocation9 + $0x650] sm:$0xff]  }
 0x661   : > { %15412 = vmatpush3.bf16.msra.mxu1 %v16874_v42  ;;  %v16934_v42 = vld [vmem:[#allocation9 + $0x688] sm:$0xff]  }
 0x662   : > { %15413 = vmatprep.subr.bf16.mxu1 %v16877_v36  ;;  %v16937_v36 = vld [vmem:[#allocation9 + $0x6d0] sm:$0xff]  }
 0x663   : > { %15392 = vmatpush3.bf16.msra.mxu0 %v16876_v34  ;;  %v16936_v34 = vld [vmem:[#allocation9 + $0x610] sm:$0xff]  }
 0x664   : > { %15393 = vmatprep.subr.bf16.mxu0 %v16879_v11  ;;  %v16939_v11 = vld [vmem:[#allocation9 + $0x658] sm:$0xff]  }
 0x665   : > { %15414 = vmatpush3.bf16.msra.mxu1 %v16878_v47  ;;  %v16938_v47 = vld [vmem:[#allocation9 + $0x690] sm:$0xff]  }
 0x666   : > { %15415 = vmatprep.subr.bf16.mxu1 %v16881_v40  ;;  %v16941_v40 = vld [vmem:[#allocation9 + $0x6d8] sm:$0xff]  }
 0x667   : > { %15394 = vmatpush3.bf16.msra.mxu0 %v16880_v52  ;;  %v16940_v52 = vld [vmem:[#allocation9 + $0x618] sm:$0xff]  }
 0x668   : > { %15395 = vmatprep.subr.bf16.mxu0 %v16883_v45  ;;  %v16943_v45 = vld [vmem:[#allocation9 + $0x660] sm:$0xff]  }
 0x669   : > { %15416 = vmatpush3.bf16.msra.mxu1 %v16882_v20  ;;  %v16942_v20 = vld [vmem:[#allocation9 + $0x698] sm:$0xff]  }
 0x66a   : > { %15417 = vmatprep.subr.bf16.mxu1 %v16885_v4  ;;  %v16945_v4 = vld [vmem:[#allocation9 + $0x6e0] sm:$0xff]  }
 0x66b   : > { %15396 = vmatpush3.bf16.msra.mxu0 %v16884_v33  ;;  %v16944_v33 = vld [vmem:[#allocation9 + $0x620] sm:$0xff]  }
 0x66c   : > { %15425 = vmatprep.subr.bf16.mxu0 %v16887_v23  ;;  %v16947_v23 = vld [vmem:[#allocation9 + $0x668] sm:$0xff]  }
 0x66d   : > { %15418 = vmatpush3.bf16.msra.mxu1 %v16886_v17  ;;  %v16946_v17 = vld [vmem:[#allocation9 + $0x6a0] sm:$0xff]  }
 0x66e   : > { %12872 = vmatmul.mubr.bf16.vlgmr.msra.gmra.mrb[48].mxu0 %v14374_v46  ;;  %15447 = vmatprep.subr.bf16.mxu1 %v16891_v60  ;;  %v16948_v60 = vld [vmem:[#allocation9 + $0x628] sm:$0xff]  }
 0x66f   : > { %15426 = vmatpush3.bf16.msra.mxu0 %v16888_v14  ;;  %12951 = vmatprep.mubr.bf16.mxu0 %v14379_v12  ;;  %v16951_v14 = vld [vmem:[#allocation9 + $0x670] sm:$0xff]   ;;  %v16950_v46 = vld [vmem:[#allocation9 + $0x6a8] sm:$0xff]   ;;  %v16955_v12 = vld [vmem:[#allocation9 + $0x678] sm:$0xff]  }
 0x670   : > { %12912 = vmatmul.mubr.bf16.vlgmr.msra.gmra.mrb[48].mxu1 %v14376_v41  ;;  %15427 = vmatprep.subr.bf16.mxu0 %v16895_v50  ;;  %v16952_v50 = vld [vmem:[#allocation9 + $0x630] sm:$0xff]   ;;  %v16957_v41 = vld [vmem:[#allocation9 + $0x6f8] sm:$0xff]  }
 0x671   : > { %15448 = vmatpush3.bf16.msra.mxu1 %v16892_v28  ;;  %12991 = vmatprep.mubr.bf16.mxu1 %v14381_v51  ;;  %v16954_v28 = vld [vmem:[#allocation9 + $0x6b0] sm:$0xff]   ;;  %v16959_v51 = vld [vmem:[#allocation9 + $0x740] sm:$0xff]  }
 0x672   : > { %15449 = vmatprep.subr.bf16.mxu1 %v16897_v7  ;;  %v16956_v7 = vld [vmem:[#allocation9 + $0x638] sm:$0xff]  }
 0x673   : > { %15428 = vmatpush3.bf16.msra.mxu0 %v16896_v53  ;;  %v16958_v53 = vld [vmem:[#allocation9 + $0x6b8] sm:$0xff]  }
 0x674   : > { %15429 = vmatprep.subr.bf16.mxu0 %v16899_v61  ;;  %v20544_v61 = vld [vmem:[#allocation3 + $0x70] sm:$0xff] }
 0x675   : > { %15450 = vmatpush3.bf16.msra.mxu1 %v16898_v25  ;;  %v16963_v25 = vld [vmem:[#allocation9 + $0x7c0] sm:$0xff]  }
 0x676   : > { %15451 = vmatprep.subr.bf16.mxu1 %v16901_v37  ;;  %v16960_v37 = vld [vmem:[#allocation9 + $0x700] sm:$0xff]  }
 0x677   : > { %15430 = vmatpush3.bf16.msra.mxu0 %v16900_v9  ;;  %v14382_v9 = vcombine.low %v20532_v31, %v20532_v31  ;;  %v16985_v31 = vld [vmem:[#allocation9 + $0x7e8] sm:$0xff]  }
 0x678   : > { %15431 = vmatprep.subr.bf16.mxu0 %v16903_v22  ;;  %v20548_v22 = vld [vmem:[#allocation3 + $0x78] sm:$0xff] }
 0x679   : > { %15452 = vmatpush3.bf16.msra.mxu1 %v16902_v54  ;;  %v16967_v54 = vld [vmem:[#allocation9 + $0x748] sm:$0xff]  }
 0x67a   : > { %15453 = vmatprep.subr.bf16.mxu1 %v16905_v56  ;;  %v14387_v56 = vcombine.high %v20544_v61, %v20544_v61 }
 0x67b   : > { %15432 = vmatpush3.bf16.msra.mxu0 %v16904_v13  ;;  %v16964_v13 = vld [vmem:[#allocation9 + $0x780] sm:$0xff]  }
 0x67c   : > { %15433 = vmatprep.subr.bf16.mxu0 %v16907_v10  ;;  %v14384_v10 = vcombine.low %v20536_v6, %v20536_v6  ;;  %v16986_v6 = vld [vmem:[#allocation9 + $0x7a8] sm:$0xff]  }
 0x67d   : > { %15454 = vmatpush3.bf16.msra.mxu1 %v16906_v63  ;;  %v16969_v63 = vld [vmem:[#allocation9 + $0x7c8] sm:$0xff]  }
 0x67e   : > { %15455 = vmatprep.subr.bf16.mxu1 %v16909_v59  ;;  %v14389_v59 = vcombine.high %v20548_v22, %v20548_v22 }
 0x67f   : > { %15434 = vmatpush3.bf16.msra.mxu0 %v16908_v21  ;;  %v16968_v21 = vld [vmem:[#allocation9 + $0x708] sm:$0xff]  }
 0x680   : > { %15435 = vmatprep.subr.bf16.mxu0 %v16911_v19  ;;  %v16971_v19 = vld [vmem:[#allocation9 + $0x750] sm:$0xff]  }
 0x681   : > { %15456 = vmatpush3.bf16.msra.mxu1 %v16910_v0  ;;  %v16970_v0 = vld [vmem:[#allocation9 + $0x788] sm:$0xff]  }
 0x682   : > { %15457 = vmatprep.subr.bf16.mxu1 %v16913_v1  ;;  %v16973_v1 = vld [vmem:[#allocation9 + $0x7d0] sm:$0xff]  }
 0x683   : > { %15436 = vmatpush3.bf16.msra.mxu0 %v16912_v30  ;;  %v16972_v30 = vld [vmem:[#allocation9 + $0x710] sm:$0xff]  }
 0x684   : > { %15437 = vmatprep.subr.bf16.mxu0 %v16915_v49  ;;  %v16975_v49 = vld [vmem:[#allocation9 + $0x758] sm:$0xff]  }
 0x685   : > { %15458 = vmatpush3.bf16.msra.mxu1 %v16914_v5  ;;  %v16974_v5 = vld [vmem:[#allocation9 + $0x790] sm:$0xff]  }
 0x686   : > { %15459 = vmatprep.subr.bf16.mxu1 %v16917_v15  ;;  %v16977_v15 = vld [vmem:[#allocation9 + $0x7d8] sm:$0xff]  }
 0x687   : > { %15438 = vmatpush3.bf16.msra.mxu0 %v16916_v8  ;;  %v16976_v8 = vld [vmem:[#allocation9 + $0x718] sm:$0xff]  }
 0x688   : > { %15439 = vmatprep.subr.bf16.mxu0 %v16919_v38  ;;  %v16979_v38 = vld [vmem:[#allocation9 + $0x760] sm:$0xff]  }
 0x689   : > { %15460 = vmatpush3.bf16.msra.mxu1 %v16918_v55  ;;  %v16978_v55 = vld [vmem:[#allocation9 + $0x798] sm:$0xff]  }
 0x68a   : > { %15461 = vmatprep.subr.bf16.mxu1 %v16921_v18  ;;  %v16981_v18 = vld [vmem:[#allocation9 + $0x7e0] sm:$0xff]  }
 0x68b   : > { %15440 = vmatpush3.bf16.msra.mxu0 %v16920_v58  ;;  %v16980_v58 = vld [vmem:[#allocation9 + $0x720] sm:$0xff]  }
 0x68c   : > { %15469 = vmatprep.subr.bf16.mxu0 %v16923_v35  ;;  %v16983_v35 = vld [vmem:[#allocation9 + $0x768] sm:$0xff]  }
 0x68d   : > { %15462 = vmatpush3.bf16.msra.mxu1 %v16922_v48  ;;  %v16982_v48 = vld [vmem:[#allocation9 + $0x7a0] sm:$0xff]  }
 0x68e   : > { %12952 = vmatmul.mubr.bf16.vlgmr.msra.gmra.mrb[52].mxu0 %v14378_v26  ;;  %15491 = vmatprep.subr.bf16.mxu1 %v16927_v32  ;;  %v16984_v32 = vld [vmem:[#allocation9 + $0x728] sm:$0xff]  }
 0x68f   : > { %15470 = vmatpush3.bf16.msra.mxu0 %v16924_v3  ;;  %13031 = vmatprep.mubr.bf16.mxu0 %v14383_v43  ;;  %v16987_v3 = vld [vmem:[#allocation9 + $0x770] sm:$0xff]  }
 0x690   : > { %12992 = vmatmul.mubr.bf16.vlgmr.msra.gmra.mrb[52].mxu1 %v14380_v57  ;;  %15471 = vmatprep.subr.bf16.mxu0 %v16931_v62  ;;  %v14357_v62 = vld [vmem:[%s20697_s6] ss:$0 sm:$0xff] }
 0x691   : > { %15492 = vmatpush3.bf16.msra.mxu1 %v16928_v39  ;;  %13071 = vmatprep.mubr.bf16.mxu1 %v14385_v16  ;;  %v16989_v39 = vld [vmem:[#allocation9 + $0x7f0] sm:$0xff]  }
 0x692   : > { %15493 = vmatprep.subr.bf16.mxu1 %v16933_v27 }
 0x693   : > { %15472 = vmatpush3.bf16.msra.mxu0 %v16932_v44  ;;  %v16988_v44 = vld [vmem:[#allocation9 + $0x730] sm:$0xff]  }
 0x694   : > { %15473 = vmatprep.subr.bf16.mxu0 %v16935_v29 }
 0x695   : > { %15494 = vmatpush3.bf16.msra.mxu1 %v16934_v42 }
 0x696   : > { %15495 = vmatprep.subr.bf16.mxu1 %v16937_v36  ;;  %v16991_v36 = vld [vmem:[#allocation9 + $0x778] sm:$0xff]  }
 0x697   : > { %15474 = vmatpush3.bf16.msra.mxu0 %v16936_v34 }
 0x698   : > { %15475 = vmatprep.subr.bf16.mxu0 %v16939_v11 }
 0x699   : > { %15496 = vmatpush3.bf16.msra.mxu1 %v16938_v47 }
 0x69a   : > { %15497 = vmatprep.subr.bf16.mxu1 %v16941_v40  ;;  %v16990_v40 = vld [vmem:[#allocation9 + $0x7b0] sm:$0xff]  }
 0x69b   : > { %15476 = vmatpush3.bf16.msra.mxu0 %v16940_v52 }
 0x69c   : > { %15477 = vmatprep.subr.bf16.mxu0 %v16943_v45  ;;  %v16993_v45 = vld [vmem:[#allocation9 + $0x7f8] sm:$0xff]  }
 0x69d   : > { %15498 = vmatpush3.bf16.msra.mxu1 %v16942_v20 }
 0x69e   : > { %15499 = vmatprep.subr.bf16.mxu1 %v16945_v4  ;;  %v16992_v4 = vld [vmem:[#allocation9 + $0x738] sm:$0xff]  }
 0x69f   : > { %15478 = vmatpush3.bf16.msra.mxu0 %v16944_v33  ;;  %v16995_v33 = vld [vmem:[#allocation9 + $0x840] sm:$0xff]  }
 0x6a0   : > { %15479 = vmatprep.subr.bf16.mxu0 %v16947_v23  ;;  %v16994_v23 = vld [vmem:[#allocation9 + $0x7b8] sm:$0xff]  }
 0x6a1   : > { %15500 = vmatpush3.bf16.msra.mxu1 %v16946_v17  ;;  %v20561_v17 = vld [vmem:[#allocation3 + $0x80] sm:$0xff] }
 0x6a2   : > { %15501 = vmatprep.subr.bf16.mxu1 %v16949_v24  ;;  %v16999_v24 = vld [vmem:[#allocation9 + $0x8c0] sm:$0xff]  }
 0x6a3   : > { %15480 = vmatpush3.bf16.msra.mxu0 %v16948_v60  ;;  %v16996_v60 = vld [vmem:[#allocation9 + $0x800] sm:$0xff]  }
 0x6a4   : > { %15481 = vmatprep.subr.bf16.mxu0 %v16951_v14  ;;  %v14386_v14 = vcombine.low %v20544_v61, %v20544_v61  ;;  %v17006_v61 = vld [vmem:[#allocation9 + $0x888] sm:$0xff]  }
 0x6a5   : > { %15502 = vmatpush3.bf16.msra.mxu1 %v16950_v46  ;;  %v20565_v46 = vld [vmem:[#allocation3 + $0x88] sm:$0xff] }
 0x6a6   : > { %15503 = vmatprep.subr.bf16.mxu1 %v16953_v2  ;;  %v17003_v2 = vld [vmem:[#allocation9 + $0x848] sm:$0xff]  }
 0x6a7   : > { %15482 = vmatpush3.bf16.msra.mxu0 %v16952_v50  ;;  %v14391_v50 = vcombine.high %v20561_v17, %v20561_v17 }
 0x6a8   : > { %15483 = vmatprep.subr.bf16.mxu0 %v16955_v12  ;;  %v17000_v12 = vld [vmem:[#allocation9 + $0x880] sm:$0xff]  }
 0x6a9   : > { %15504 = vmatpush3.bf16.msra.mxu1 %v16954_v28  ;;  %v14388_v28 = vcombine.low %v20548_v22, %v20548_v22  ;;  %v17010_v22 = vld [vmem:[#allocation9 + $0x890] sm:$0xff]  }
 0x6aa   : > { %15505 = vmatprep.subr.bf16.mxu1 %v16957_v41  ;;  %v17005_v41 = vld [vmem:[#allocation9 + $0x8c8] sm:$0xff]  }
 0x6ab   : > { %15484 = vmatpush3.bf16.msra.mxu0 %v16956_v7  ;;  %v14393_v7 = vcombine.high %v20565_v46, %v20565_v46 }
 0x6ac   : > { %15513 = vmatprep.subr.bf16.mxu0 %v16959_v51  ;;  %v17004_v51 = vld [vmem:[#allocation9 + $0x808] sm:$0xff]  }
 0x6ad   : > { %15506 = vmatpush3.bf16.msra.mxu1 %v16958_v53  ;;  %v17007_v53 = vld [vmem:[#allocation9 + $0x850] sm:$0xff]  }
 0x6ae   : > { %13032 = vmatmul.mubr.bf16.vlgmr.msra.gmra.mrb[56].mxu0 %v14382_v9  ;;  %15535 = vmatprep.subr.bf16.mxu1 %v16963_v25  ;;  %v17009_v25 = vld [vmem:[#allocation9 + $0x8d0] sm:$0xff]   ;;  %v17011_v9 = vld [vmem:[#allocation9 + $0x858] sm:$0xff]  }
 0x6af   : > { %15514 = vmatpush3.bf16.msra.mxu0 %v16960_v37  ;;  %13111 = vmatprep.mubr.bf16.mxu0 %v14387_v56  ;;  %v17008_v37 = vld [vmem:[#allocation9 + $0x810] sm:$0xff]   ;;  %v17012_v56 = vld [vmem:[#allocation9 + $0x818] sm:$0xff]  }
 0x6b0   : > { %13072 = vmatmul.mubr.bf16.vlgmr.msra.gmra.mrb[56].mxu1 %v14384_v10  ;;  %15515 = vmatprep.subr.bf16.mxu0 %v16967_v54  ;;  %v17013_v54 = vld [vmem:[#allocation9 + $0x8d8] sm:$0xff]  }
 0x6b1   : > { %15536 = vmatpush3.bf16.msra.mxu1 %v16964_v13  ;;  %13151 = vmatprep.mubr.bf16.mxu1 %v14389_v59  ;;  %v17015_v13 = vld [vmem:[#allocation9 + $0x860] sm:$0xff]   ;;  %v17014_v10 = vld [vmem:[#allocation9 + $0x898] sm:$0xff]  }
 0x6b2   : > { %15537 = vmatprep.subr.bf16.mxu1 %v16969_v63  ;;  %v17017_v63 = vld [vmem:[#allocation9 + $0x8e0] sm:$0xff]  }
 0x6b3   : > { %15516 = vmatpush3.bf16.msra.mxu0 %v16968_v21  ;;  %v17016_v59 = vld [vmem:[#allocation9 + $0x820] sm:$0xff]   ;;  %v17019_v21 = vld [vmem:[#allocation9 + $0x868] sm:$0xff]  }
 0x6b4   : > { %15517 = vmatprep.subr.bf16.mxu0 %v16971_v19  ;;  %v17018_v19 = vld [vmem:[#allocation9 + $0x8a0] sm:$0xff]  }
 0x6b5   : > { %15538 = vmatpush3.bf16.msra.mxu1 %v16970_v0  ;;  %v17021_v0 = vld [vmem:[#allocation9 + $0x8e8] sm:$0xff]  }
 0x6b6   : > { %15539 = vmatprep.subr.bf16.mxu1 %v16973_v1  ;;  %v17020_v1 = vld [vmem:[#allocation9 + $0x828] sm:$0xff]  }
 0x6b7   : > { %15518 = vmatpush3.bf16.msra.mxu0 %v16972_v30  ;;  %v17023_v30 = vld [vmem:[#allocation9 + $0x870] sm:$0xff]  }
 0x6b8   : > { %15519 = vmatprep.subr.bf16.mxu0 %v16975_v49 }
 0x6b9   : > { %15540 = vmatpush3.bf16.msra.mxu1 %v16974_v5  ;;  %v17022_v5 = vld [vmem:[#allocation9 + $0x8a8] sm:$0xff]  }
 0x6ba   : > { %15541 = vmatprep.subr.bf16.mxu1 %v16977_v15 }
 0x6bb   : > { %15520 = vmatpush3.bf16.msra.mxu0 %v16976_v8  ;;  %v17025_v8 = vld [vmem:[#allocation9 + $0x8f0] sm:$0xff]  }
 0x6bc   : > { %15521 = vmatprep.subr.bf16.mxu0 %v16979_v38 }
 0x6bd   : > { %15542 = vmatpush3.bf16.msra.mxu1 %v16978_v55 }
 0x6be   : > { %15543 = vmatprep.subr.bf16.mxu1 %v16981_v18 }
 0x6bf   : > { %15522 = vmatpush3.bf16.msra.mxu0 %v16980_v58  ;;  %v15221_v26 = vpop.f32.mrb[32].mxu0  ;;  %v17024_v58 = vld [vmem:[#allocation9 + $0x830] sm:$0xff]  }
 0x6c0   : > { %15523 = vmatprep.subr.bf16.mxu0 %v16983_v35  ;;  %v15222_v43 = vpop.f32.mrb[33].mxu0 }
 0x6c1   : > { %15544 = vmatpush3.bf16.msra.mxu1 %v16982_v48  ;;  %v15223_v57 = vadd.f32 %v15222_v43, %v15221_v26  ;;  %v15224_v27 = vpop.f32.mrb[34].mxu0  ;;  %v15243_v16 = vpop.f32.mrb[32].mxu1  ;;  %v17029_v43 = vld [vmem:[#allocation9 + $0x8f8] sm:$0xff]  }
 0x6c2   : > { %15545 = vmatprep.subr.bf16.mxu1 %v16985_v31  ;;  %v15225_v29 = vpop.f32.mrb[35].mxu0  ;;  %v15244_v42 = vpop.f32.mrb[33].mxu1  ;;  %v17027_v31 = vld [vmem:[#allocation9 + $0x878] sm:$0xff]   ;;  %v17031_v27 = vld [vmem:[#allocation9 + $0x940] sm:$0xff]  }
 0x6c3   : > { %15524 = vmatpush3.bf16.msra.mxu0 %v16984_v32  ;;  %v12554_v34 = vadd.f32 %v15223_v57, %v14357_v62  ;;  %v15245_v11 = vadd.f32 %v15244_v42, %v15243_v16  ;;  %v15246_v47 = vpop.f32.mrb[34].mxu1  ;;  %v17028_v57 = vld [vmem:[#allocation9 + $0x838] sm:$0xff]   ;;  %v17035_v29 = vld [vmem:[#allocation9 + $0x9c0] sm:$0xff]  }
 0x6c4   : > { %15525 = vmatprep.subr.bf16.mxu0 %v16987_v3  ;;  %v15247_v52 = vpop.f32.mrb[35].mxu1  ;;  %v17030_v16 = vld [vmem:[#allocation9 + $0x8b8] sm:$0xff]   ;;  %v17032_v42 = vld [vmem:[#allocation9 + $0x900] sm:$0xff]  }
 0x6c5   : > { %15546 = vmatpush3.bf16.msra.mxu1 %v16986_v6  ;;  %v20559_v20 = vadd.f32 %v15245_v11, %v12554_v34  ;;  %v17026_v6 = vld [vmem:[#allocation9 + $0x8b0] sm:$0xff]   ;;  %v20580_v34 = vld [vmem:[#allocation3 + $0x98] sm:$0xff]  ;;  %v17039_v11 = vld [vmem:[#allocation9 + $0x948] sm:$0xff]   ;;  %v14392_v52 = vcombine.low %v20565_v46, %v20565_v46 }
 0x6c6   : > { %15547 = vmatprep.subr.bf16.mxu1 %v16989_v39  ;;  %v17049_v46 = vld [vmem:[#allocation9 + $0x9d8] sm:$0xff]  }
 0x6c7   : > { %15526 = vmatpush3.bf16.msra.mxu0 %v16988_v44  ;;  %v20576_v44 = vld [vmem:[#allocation3 + $0x90] sm:$0xff] }
 0x6c8   : > { %15527 = vmatprep.subr.bf16.mxu0 %v16991_v36  ;;  %v14390_v36 = vcombine.low %v20561_v17, %v20561_v17  ;;  %v14395_v47 = vcombine.high %v20576_v44, %v20576_v44  ;;  %v17045_v17 = vld [vmem:[#allocation9 + $0x9d0] sm:$0xff]  }
 0x6c9   : > { %15548 = vmatpush3.bf16.msra.mxu1 %v16990_v40  ;;  %v17036_v40 = vld [vmem:[#allocation9 + $0x980] sm:$0xff]  }
 0x6ca   : > { %15549 = vmatprep.subr.bf16.mxu1 %v16993_v45  ;;  %v17041_v45 = vld [vmem:[#allocation9 + $0x9c8] sm:$0xff]  }
 0x6cb   : > { %15528 = vmatpush3.bf16.msra.mxu0 %v16992_v4  ;;  %v17040_v4 = vld [vmem:[#allocation9 + $0x908] sm:$0xff]  }
 0x6cc   : > { %15557 = vmatprep.subr.bf16.mxu0 %v16995_v33  ;;  %v17043_v33 = vld [vmem:[#allocation9 + $0x950] sm:$0xff]  }
 0x6cd   : > { %15550 = vmatpush3.bf16.msra.mxu1 %v16994_v23  ;;  %v17042_v23 = vld [vmem:[#allocation9 + $0x988] sm:$0xff]  }
 0x6ce   : > { %13112 = vmatmul.mubr.bf16.vlgmr.msra.gmra.mrb[60].mxu0 %v14386_v14  ;;  %15579 = vmatprep.subr.bf16.mxu1 %v16999_v24  ;;  %v17044_v24 = vld [vmem:[#allocation9 + $0x910] sm:$0xff]  }
 0x6cf   : > { %15558 = vmatpush3.bf16.msra.mxu0 %v16996_v60  ;;  %13191 = vmatprep.mubr.bf16.mxu0 %v14391_v50  ;;  %v17047_v60 = vld [vmem:[#allocation9 + $0x958] sm:$0xff]   ;;  %v17046_v14 = vld [vmem:[#allocation9 + $0x990] sm:$0xff]   ;;  %v17051_v50 = vld [vmem:[#allocation9 + $0x960] sm:$0xff]  }
 0x6d0   : > { %13152 = vmatmul.mubr.bf16.vlgmr.msra.gmra.mrb[60].mxu1 %v14388_v28  ;;  %15559 = vmatprep.subr.bf16.mxu0 %v17003_v2  ;;  %v17048_v2 = vld [vmem:[#allocation9 + $0x918] sm:$0xff]   ;;  %v17053_v28 = vld [vmem:[#allocation9 + $0x9e0] sm:$0xff]  }
 0x6d1   : > { %15580 = vmatpush3.bf16.msra.mxu1 %v17000_v12  ;;  %13231 = vmatprep.mubr.bf16.mxu1 %v14393_v7  ;;  %v17050_v12 = vld [vmem:[#allocation9 + $0x998] sm:$0xff]   ;;  %v17055_v7 = vld [vmem:[#allocation9 + $0x968] sm:$0xff]  }
 0x6d2   : > { %15581 = vmatprep.subr.bf16.mxu1 %v17005_v41  ;;  %v17052_v41 = vld [vmem:[#allocation9 + $0x920] sm:$0xff]  }
 0x6d3   : > { %15560 = vmatpush3.bf16.msra.mxu0 %v17004_v51  ;;  %v17054_v51 = vld [vmem:[#allocation9 + $0x9a0] sm:$0xff]  }
 0x6d4   : > { %15561 = vmatprep.subr.bf16.mxu0 %v17007_v53  ;;  %v17057_v53 = vld [vmem:[#allocation9 + $0x9e8] sm:$0xff]  }
 0x6d5   : > { %15582 = vmatpush3.bf16.msra.mxu1 %v17006_v61  ;;  %v17056_v61 = vld [vmem:[#allocation9 + $0x928] sm:$0xff]  }
 0x6d6   : > { %15583 = vmatprep.subr.bf16.mxu1 %v17009_v25  ;;  %v17059_v25 = vld [vmem:[#allocation9 + $0x970] sm:$0xff]  }
 0x6d7   : > { %15562 = vmatpush3.bf16.msra.mxu0 %v17008_v37 }
 0x6d8   : > { %15563 = vmatprep.subr.bf16.mxu0 %v17011_v9  ;;  %v17058_v9 = vld [vmem:[#allocation9 + $0x9a8] sm:$0xff]  }
 0x6d9   : > { %15584 = vmatpush3.bf16.msra.mxu1 %v17010_v22 }
 0x6da   : > { %15585 = vmatprep.subr.bf16.mxu1 %v17013_v54  ;;  %v17061_v54 = vld [vmem:[#allocation9 + $0x9f0] sm:$0xff]  }
 0x6db   : > { %15564 = vmatpush3.bf16.msra.mxu0 %v17012_v56 }
 0x6dc   : > { %15565 = vmatprep.subr.bf16.mxu0 %v17015_v13 }
 0x6dd   : > { %15586 = vmatpush3.bf16.msra.mxu1 %v17014_v10 }
 0x6de   : > { %15587 = vmatprep.subr.bf16.mxu1 %v17017_v63  ;;  %v17060_v63 = vld [vmem:[#allocation9 + $0x930] sm:$0xff]  }
 0x6df   : > { %15566 = vmatpush3.bf16.msra.mxu0 %v17016_v59 }
 0x6e0   : > { %15567 = vmatprep.subr.bf16.mxu0 %v17019_v21 }
 0x6e1   : > { %v15265_v49 = vpop.f32.mrb[36].mxu0  ;;  %15588 = vmatpush3.bf16.msra.mxu1 %v17018_v19  ;;  %v17063_v19 = vld [vmem:[#allocation9 + $0x978] sm:$0xff]  }
 0x6e2   : > { %v15266_v15 = vpop.f32.mrb[37].mxu0  ;;  %15589 = vmatprep.subr.bf16.mxu1 %v17021_v0 }
 0x6e3   : > { %v15267_v38 = vadd.f32 %v15266_v15, %v15265_v49  ;;  %v15268_v55 = vpop.f32.mrb[38].mxu0  ;;  %v15287_v18 = vpop.f32.mrb[36].mxu1  ;;  %15568 = vmatpush3.bf16.msra.mxu0 %v17020_v1  ;;  %v17062_v49 = vld [vmem:[#allocation9 + $0x9b0] sm:$0xff]   ;;  %v17065_v15 = vld [vmem:[#allocation9 + $0x9f8] sm:$0xff]  }
 0x6e4   : > { %v15269_v35 = vpop.f32.mrb[39].mxu0  ;;  %v15288_v48 = vpop.f32.mrb[37].mxu1  ;;  %15569 = vmatprep.subr.bf16.mxu0 %v17023_v30  ;;  %v17067_v55 = vld [vmem:[#allocation9 + $0xa40] sm:$0xff]  }
 0x6e5   : > { %v12634_v32 = vadd.f32 %v15267_v38, %v20559_v20  ;;  %v15289_v3 = vadd.f32 %v15288_v48, %v15287_v18  ;;  %v15290_v26 = vpop.f32.mrb[38].mxu1  ;;  %15590 = vmatpush3.bf16.msra.mxu1 %v17022_v5  ;;  %v14397_v20 = vcombine.high %v20580_v34, %v20580_v34  ;;  %v17064_v38 = vld [vmem:[#allocation9 + $0x938] sm:$0xff]   ;;  %v17071_v35 = vld [vmem:[#allocation9 + $0xac0] sm:$0xff]  }
 0x6e6   : > { %v15291_v62 = vpop.f32.mrb[39].mxu1  ;;  %15591 = vmatprep.subr.bf16.mxu1 %v17025_v8  ;;  %v17066_v18 = vld [vmem:[#allocation9 + $0x9b8] sm:$0xff]   ;;  %v17068_v48 = vld [vmem:[#allocation9 + $0xa00] sm:$0xff]  }
 0x6e7   : > { %v20574_v39 = vadd.f32 %v15289_v3, %v12634_v32  ;;  %15570 = vmatpush3.bf16.msra.mxu0 %v17024_v58  ;;  %v20591_v58 = vld [vmem:[#allocation3 + $0xa0] sm:$0xff]  ;;  %v20595_v32 = vld [vmem:[#allocation3 + $0xa8] sm:$0xff]  ;;  %v14396_v62 = vcombine.low %v20580_v34, %v20580_v34  ;;  %v17085_v34 = vld [vmem:[#allocation9 + $0xad8] sm:$0xff]  }
 0x6e8   : > { %15571 = vmatprep.subr.bf16.mxu0 %v17027_v31  ;;  %v14394_v31 = vcombine.low %v20576_v44, %v20576_v44  ;;  %v17075_v3 = vld [vmem:[#allocation9 + $0xa48] sm:$0xff]   ;;  %v14399_v26 = vcombine.high %v20591_v58, %v20591_v58  ;;  %v17081_v44 = vld [vmem:[#allocation9 + $0xad0] sm:$0xff]  }
 0x6e9   : > { %15592 = vmatpush3.bf16.msra.mxu1 %v17026_v6  ;;  %v17072_v6 = vld [vmem:[#allocation9 + $0xa80] sm:$0xff]  }
 0x6ea   : > { %15593 = vmatprep.subr.bf16.mxu1 %v17029_v43  ;;  %v17077_v43 = vld [vmem:[#allocation9 + $0xac8] sm:$0xff]  }
 0x6eb   : > { %15572 = vmatpush3.bf16.msra.mxu0 %v17028_v57  ;;  %v17076_v57 = vld [vmem:[#allocation9 + $0xa08] sm:$0xff]  }
 0x6ec   : > { %15601 = vmatprep.subr.bf16.mxu0 %v17031_v27  ;;  %v17079_v27 = vld [vmem:[#allocation9 + $0xa50] sm:$0xff]  }
 0x6ed   : > { %15594 = vmatpush3.bf16.msra.mxu1 %v17030_v16  ;;  %v17078_v16 = vld [vmem:[#allocation9 + $0xa88] sm:$0xff]  }
 0x6ee   : > { %13192 = vmatmul.mubr.bf16.vlgmr.msra.gmra.mrb[64].mxu0 %v14390_v36  ;;  %15623 = vmatprep.subr.bf16.mxu1 %v17035_v29  ;;  %v17080_v29 = vld [vmem:[#allocation9 + $0xa10] sm:$0xff]  }
 0x6ef   : > { %15602 = vmatpush3.bf16.msra.mxu0 %v17032_v42  ;;  %13271 = vmatprep.mubr.bf16.mxu0 %v14395_v47  ;;  %v17083_v42 = vld [vmem:[#allocation9 + $0xa58] sm:$0xff]   ;;  %v17082_v36 = vld [vmem:[#allocation9 + $0xa90] sm:$0xff]   ;;  %v17087_v47 = vld [vmem:[#allocation9 + $0xa60] sm:$0xff]  }
 0x6f0   : > { %13232 = vmatmul.mubr.bf16.vlgmr.msra.gmra.mrb[64].mxu1 %v14392_v52  ;;  %15603 = vmatprep.subr.bf16.mxu0 %v17039_v11  ;;  %v17084_v11 = vld [vmem:[#allocation9 + $0xa18] sm:$0xff]   ;;  %v17089_v52 = vld [vmem:[#allocation9 + $0xae0] sm:$0xff]  }
 0x6f1   : > { %15624 = vmatpush3.bf16.msra.mxu1 %v17036_v40  ;;  %13311 = vmatprep.mubr.bf16.mxu1 %v14397_v20  ;;  %v17086_v40 = vld [vmem:[#allocation9 + $0xa98] sm:$0xff]   ;;  %v17091_v20 = vld [vmem:[#allocation9 + $0xa68] sm:$0xff]  }
 0x6f2   : > { %15625 = vmatprep.subr.bf16.mxu1 %v17041_v45  ;;  %v17088_v45 = vld [vmem:[#allocation9 + $0xa20] sm:$0xff]  }
 0x6f3   : > { %15604 = vmatpush3.bf16.msra.mxu0 %v17040_v4  ;;  %v17090_v4 = vld [vmem:[#allocation9 + $0xaa0] sm:$0xff]  }
 0x6f4   : > { %15605 = vmatprep.subr.bf16.mxu0 %v17043_v33  ;;  %v17093_v33 = vld [vmem:[#allocation9 + $0xae8] sm:$0xff]  }
 0x6f5   : > { %15626 = vmatpush3.bf16.msra.mxu1 %v17042_v23  ;;  %v17092_v23 = vld [vmem:[#allocation9 + $0xa28] sm:$0xff]  }
 0x6f6   : > { %15627 = vmatprep.subr.bf16.mxu1 %v17045_v17  ;;  %v17095_v17 = vld [vmem:[#allocation9 + $0xa70] sm:$0xff]  }
 0x6f7   : > { %15606 = vmatpush3.bf16.msra.mxu0 %v17044_v24 }
 0x6f8   : > { %15607 = vmatprep.subr.bf16.mxu0 %v17047_v60  ;;  %v17094_v60 = vld [vmem:[#allocation9 + $0xaa8] sm:$0xff]  }
 0x6f9   : > { %15628 = vmatpush3.bf16.msra.mxu1 %v17046_v14 }
 0x6fa   : > { %15629 = vmatprep.subr.bf16.mxu1 %v17049_v46  ;;  %v17097_v46 = vld [vmem:[#allocation9 + $0xaf0] sm:$0xff]  }
 0x6fb   : > { %15608 = vmatpush3.bf16.msra.mxu0 %v17048_v2 }
 0x6fc   : > { %15609 = vmatprep.subr.bf16.mxu0 %v17051_v50 }
 0x6fd   : > { %15630 = vmatpush3.bf16.msra.mxu1 %v17050_v12 }
 0x6fe   : > { %15631 = vmatprep.subr.bf16.mxu1 %v17053_v28  ;;  %v17096_v28 = vld [vmem:[#allocation9 + $0xa30] sm:$0xff]  }
 0x6ff   : > { %15610 = vmatpush3.bf16.msra.mxu0 %v17052_v41 }
 0x700   : > { %15611 = vmatprep.subr.bf16.mxu0 %v17055_v7 }
 0x701   : > { %v15309_v37 = vpop.f32.mrb[40].mxu0  ;;  %15632 = vmatpush3.bf16.msra.mxu1 %v17054_v51  ;;  %v17099_v51 = vld [vmem:[#allocation9 + $0xa78] sm:$0xff]  }
 0x702   : > { %v15310_v22 = vpop.f32.mrb[41].mxu0  ;;  %15633 = vmatprep.subr.bf16.mxu1 %v17057_v53 }
 0x703   : > { %v15311_v56 = vadd.f32 %v15310_v22, %v15309_v37  ;;  %v15312_v13 = vpop.f32.mrb[42].mxu0  ;;  %v15331_v10 = vpop.f32.mrb[40].mxu1  ;;  %15612 = vmatpush3.bf16.msra.mxu0 %v17056_v61  ;;  %v17098_v37 = vld [vmem:[#allocation9 + $0xab0] sm:$0xff]   ;;  %v17101_v22 = vld [vmem:[#allocation9 + $0xaf8] sm:$0xff]  }
 0x704   : > { %v15313_v59 = vpop.f32.mrb[43].mxu0  ;;  %v15332_v21 = vpop.f32.mrb[41].mxu1  ;;  %15613 = vmatprep.subr.bf16.mxu0 %v17059_v25  ;;  %v17103_v13 = vld [vmem:[#allocation9 + $0xb40] sm:$0xff]  }
 0x705   : > { %v12714_v0 = vadd.f32 %v15311_v56, %v20574_v39  ;;  %v15333_v1 = vadd.f32 %v15332_v21, %v15331_v10  ;;  %v15334_v30 = vpop.f32.mrb[42].mxu1  ;;  %15634 = vmatpush3.bf16.msra.mxu1 %v17058_v9  ;;  %v14401_v39 = vcombine.high %v20595_v32, %v20595_v32  ;;  %v17100_v56 = vld [vmem:[#allocation9 + $0xa38] sm:$0xff]   ;;  %v17107_v59 = vld [vmem:[#allocation9 + $0xbc0] sm:$0xff]  }
 0x706   : > { %v15335_v5 = vpop.f32.mrb[43].mxu1  ;;  %15635 = vmatprep.subr.bf16.mxu1 %v17061_v54  ;;  %v17102_v10 = vld [vmem:[#allocation9 + $0xab8] sm:$0xff]   ;;  %v17104_v21 = vld [vmem:[#allocation9 + $0xb00] sm:$0xff]  }
 0x707   : > { %v20589_v8 = vadd.f32 %v15333_v1, %v12714_v0  ;;  %15614 = vmatpush3.bf16.msra.mxu0 %v17060_v63  ;;  %v20606_v63 = vld [vmem:[#allocation3 + $0xb0] sm:$0xff]  ;;  %v20610_v0 = vld [vmem:[#allocation3 + $0xb8] sm:$0xff]  ;;  %v17111_v1 = vld [vmem:[#allocation9 + $0xb48] sm:$0xff]   ;;  %v14400_v5 = vcombine.low %v20595_v32, %v20595_v32 }
 0x708   : > { %15615 = vmatprep.subr.bf16.mxu0 %v17063_v19  ;;  %v14398_v19 = vcombine.low %v20591_v58, %v20591_v58  ;;  %v14403_v30 = vcombine.high %v20606_v63, %v20606_v63  ;;  %v17117_v58 = vld [vmem:[#allocation9 + $0xbd0] sm:$0xff]   ;;  %v17121_v32 = vld [vmem:[#allocation9 + $0xbd8] sm:$0xff]  }
 0x709   : > { %15636 = vmatpush3.bf16.msra.mxu1 %v17062_v49  ;;  %v17108_v49 = vld [vmem:[#allocation9 + $0xb80] sm:$0xff]  }
 0x70a   : > { %15637 = vmatprep.subr.bf16.mxu1 %v17065_v15  ;;  %v17113_v15 = vld [vmem:[#allocation9 + $0xbc8] sm:$0xff]  }
 0x70b   : > { %15616 = vmatpush3.bf16.msra.mxu0 %v17064_v38  ;;  %v17112_v38 = vld [vmem:[#allocation9 + $0xb08] sm:$0xff]  }
 0x70c   : > { %15645 = vmatprep.subr.bf16.mxu0 %v17067_v55  ;;  %v17115_v55 = vld [vmem:[#allocation9 + $0xb50] sm:$0xff]  }
 0x70d   : > { %15638 = vmatpush3.bf16.msra.mxu1 %v17066_v18  ;;  %v17114_v18 = vld [vmem:[#allocation9 + $0xb88] sm:$0xff]  }
 0x70e   : > { %13272 = vmatmul.mubr.bf16.vlgmr.msra.gmra.mrb[68].mxu0 %v14394_v31  ;;  %15667 = vmatprep.subr.bf16.mxu1 %v17071_v35  ;;  %v17116_v35 = vld [vmem:[#allocation9 + $0xb10] sm:$0xff]  }
 0x70f   : > { %15646 = vmatpush3.bf16.msra.mxu0 %v17068_v48  ;;  %13351 = vmatprep.mubr.bf16.mxu0 %v14399_v26  ;;  %v17119_v48 = vld [vmem:[#allocation9 + $0xb58] sm:$0xff]   ;;  %v17118_v31 = vld [vmem:[#allocation9 + $0xb90] sm:$0xff]   ;;  %v17123_v26 = vld [vmem:[#allocation9 + $0xb60] sm:$0xff]  }
 0x710   : > { %13312 = vmatmul.mubr.bf16.vlgmr.msra.gmra.mrb[68].mxu1 %v14396_v62  ;;  %15647 = vmatprep.subr.bf16.mxu0 %v17075_v3  ;;  %v17120_v3 = vld [vmem:[#allocation9 + $0xb18] sm:$0xff]   ;;  %v17125_v62 = vld [vmem:[#allocation9 + $0xbe0] sm:$0xff]  }
 0x711   : > { %15668 = vmatpush3.bf16.msra.mxu1 %v17072_v6  ;;  %13391 = vmatprep.mubr.bf16.mxu1 %v14401_v39  ;;  %v17122_v6 = vld [vmem:[#allocation9 + $0xb98] sm:$0xff]   ;;  %v17127_v39 = vld [vmem:[#allocation9 + $0xb68] sm:$0xff]  }
 0x712   : > { %15669 = vmatprep.subr.bf16.mxu1 %v17077_v43  ;;  %v17124_v43 = vld [vmem:[#allocation9 + $0xb20] sm:$0xff]  }
 0x713   : > { %15648 = vmatpush3.bf16.msra.mxu0 %v17076_v57  ;;  %v17126_v57 = vld [vmem:[#allocation9 + $0xba0] sm:$0xff]  }
 0x714   : > { %15649 = vmatprep.subr.bf16.mxu0 %v17079_v27  ;;  %v17129_v27 = vld [vmem:[#allocation9 + $0xbe8] sm:$0xff]  }
 0x715   : > { %15670 = vmatpush3.bf16.msra.mxu1 %v17078_v16  ;;  %v17128_v16 = vld [vmem:[#allocation9 + $0xb28] sm:$0xff]  }
 0x716   : > { %15671 = vmatprep.subr.bf16.mxu1 %v17081_v44  ;;  %v17131_v44 = vld [vmem:[#allocation9 + $0xb70] sm:$0xff]  }
 0x717   : > { %15650 = vmatpush3.bf16.msra.mxu0 %v17080_v29 }
 0x718   : > { %15651 = vmatprep.subr.bf16.mxu0 %v17083_v42  ;;  %v17130_v42 = vld [vmem:[#allocation9 + $0xba8] sm:$0xff]  }
 0x719   : > { %15672 = vmatpush3.bf16.msra.mxu1 %v17082_v36 }
 0x71a   : > { %15673 = vmatprep.subr.bf16.mxu1 %v17085_v34  ;;  %v17133_v34 = vld [vmem:[#allocation9 + $0xbf0] sm:$0xff]  }
 0x71b   : > { %15652 = vmatpush3.bf16.msra.mxu0 %v17084_v11 }
 0x71c   : > { %15653 = vmatprep.subr.bf16.mxu0 %v17087_v47 }
 0x71d   : > { %15674 = vmatpush3.bf16.msra.mxu1 %v17086_v40 }
 0x71e   : > { %15675 = vmatprep.subr.bf16.mxu1 %v17089_v52  ;;  %v17132_v52 = vld [vmem:[#allocation9 + $0xb30] sm:$0xff]  }
 0x71f   : > { %15654 = vmatpush3.bf16.msra.mxu0 %v17088_v45 }
 0x720   : > { %15655 = vmatprep.subr.bf16.mxu0 %v17091_v20 }
 0x721   : > { %v15353_v24 = vpop.f32.mrb[44].mxu0  ;;  %15676 = vmatpush3.bf16.msra.mxu1 %v17090_v4  ;;  %v17135_v4 = vld [vmem:[#allocation9 + $0xb78] sm:$0xff]  }
 0x722   : > { %v15354_v14 = vpop.f32.mrb[45].mxu0  ;;  %15677 = vmatprep.subr.bf16.mxu1 %v17093_v33 }
 0x723   : > { %v15355_v2 = vadd.f32 %v15354_v14, %v15353_v24  ;;  %v15356_v50 = vpop.f32.mrb[46].mxu0  ;;  %v15375_v12 = vpop.f32.mrb[44].mxu1  ;;  %15656 = vmatpush3.bf16.msra.mxu0 %v17092_v23  ;;  %v17134_v24 = vld [vmem:[#allocation9 + $0xbb0] sm:$0xff]   ;;  %v17137_v14 = vld [vmem:[#allocation9 + $0xbf8] sm:$0xff]  }
 0x724   : > { %v15357_v41 = vpop.f32.mrb[47].mxu0  ;;  %v15376_v7 = vpop.f32.mrb[45].mxu1  ;;  %15657 = vmatprep.subr.bf16.mxu0 %v17095_v17  ;;  %v17138_v50 = vld [vmem:[#allocation9 + $0xbb8] sm:$0xff]  }
 0x725   : > { %v12794_v53 = vadd.f32 %v15355_v2, %v20589_v8  ;;  %v15377_v61 = vadd.f32 %v15376_v7, %v15375_v12  ;;  %v15378_v25 = vpop.f32.mrb[46].mxu1  ;;  %15678 = vmatpush3.bf16.msra.mxu1 %v17094_v60  ;;  %v14405_v8 = vcombine.high %v20610_v0, %v20610_v0  ;;  %v17136_v2 = vld [vmem:[#allocation9 + $0xb38] sm:$0xff]   ;;  %v17139_v12 = vld [vmem:[#allocation9 + $0xc00] sm:$0xff]   ;;  %v17383_v41 = vmov 0.0  }
 0x726   : > { %v15379_v9 = vpop.f32.mrb[47].mxu1  ;;  %15679 = vmatprep.subr.bf16.mxu1 %v17097_v46  ;;  %v14404_v7 = vcombine.low %v20610_v0, %v20610_v0  ;;  %v17143_v25 = vld [vmem:[#allocation9 + $0xc20] sm:$0xff]  }
 0x727   : > { %v20604_v54 = vadd.f32 %v15377_v61, %v12794_v53  ;;  %15658 = vmatpush3.bf16.msra.mxu0 %v17096_v28  ;;  %v14402_v28 = vcombine.low %v20606_v63, %v20606_v63  ;;  %v17141_v53 = vld [vmem:[#allocation9 + $0xc10] sm:$0xff]   ;;  %v17142_v61 = vld [vmem:[#allocation9 + $0xc18] sm:$0xff]  }
 0x728   : > { %15659 = vmatprep.subr.bf16.mxu0 %v17099_v51  ;;  %v17140_v51 = vld [vmem:[#allocation9 + $0xc08] sm:$0xff]  }
 0x729   : > { %15680 = vmatpush3.bf16.msra.mxu1 %v17098_v37  ;;  %v17144_v37 = vld [vmem:[#allocation9 + $0xc28] sm:$0xff]  }
 0x72a   : > { %15681 = vmatprep.subr.bf16.mxu1 %v17101_v22 }
 0x72b   : > { %15660 = vmatpush3.bf16.msra.mxu0 %v17100_v56 }
 0x72c   : > { %15689 = vmatprep.subr.bf16.mxu0 %v17103_v13 }
 0x72d   : > { %15682 = vmatpush3.bf16.msra.mxu1 %v17102_v10  ;;  %v17145_v10 = vld [vmem:[#allocation9 + $0xc30] sm:$0xff]  }
 0x72e   : > { %13352 = vmatmul.mubr.bf16.vlgmr.msra.gmra.mrb[72].mxu0 %v14398_v19  ;;  %15711 = vmatprep.subr.bf16.mxu1 %v17107_v59 }
 0x72f   : > { %15690 = vmatpush3.bf16.msra.mxu0 %v17104_v21  ;;  %13431 = vmatprep.mubr.bf16.mxu0 %v14403_v30 }
 0x730   : > { %13392 = vmatmul.mubr.bf16.vlgmr.msra.gmra.mrb[72].mxu1 %v14400_v5  ;;  %15691 = vmatprep.subr.bf16.mxu0 %v17111_v1  ;;  %v17147_v5 = vld [vmem:[#allocation3 + $0xc0] ss:$0 sps:$4 sm:$0xff]  }
 0x731   : > { %15712 = vmatpush3.bf16.msra.mxu1 %v17108_v49  ;;  %13471 = vmatprep.mubr.bf16.mxu1 %v14405_v8  ;;  %v17146_v49 = vld [vmem:[#allocation9 + $0xc38] sm:$0xff]  }
 0x732   : > { %15713 = vmatprep.subr.bf16.mxu1 %v17113_v15 }
 0x733   : > { %15692 = vmatpush3.bf16.msra.mxu0 %v17112_v38 }
 0x734   : > { %15693 = vmatprep.subr.bf16.mxu0 %v17115_v55 }
 0x735   : > { %15714 = vmatpush3.bf16.msra.mxu1 %v17114_v18 }
 0x736   : > { %15715 = vmatprep.subr.bf16.mxu1 %v17117_v58 }
 0x737   : > { %15694 = vmatpush3.bf16.msra.mxu0 %v17116_v35 }
 0x738   : > { %15695 = vmatprep.subr.bf16.mxu0 %v17119_v48 }
 0x739   : > { %15716 = vmatpush3.bf16.msra.mxu1 %v17118_v31 }
 0x73a   : > { %15717 = vmatprep.subr.bf16.mxu1 %v17121_v32 }
 0x73b   : > { %15696 = vmatpush3.bf16.msra.mxu0 %v17120_v3 }
 0x73c   : > { %15697 = vmatprep.subr.bf16.mxu0 %v17123_v26 }
 0x73d   : > { %15718 = vmatpush3.bf16.msra.mxu1 %v17122_v6 }
 0x73e   : > { %15719 = vmatprep.subr.bf16.mxu1 %v17125_v62 }
 0x73f   : > { %15698 = vmatpush3.bf16.msra.mxu0 %v17124_v43 }
 0x740   : > { %15699 = vmatprep.subr.bf16.mxu0 %v17127_v39 }
 0x741   : > { %v15397_v29 = vpop.f32.mrb[48].mxu0  ;;  %15720 = vmatpush3.bf16.msra.mxu1 %v17126_v57 }
 0x742   : > { %v15398_v36 = vpop.f32.mrb[49].mxu0  ;;  %15721 = vmatprep.subr.bf16.mxu1 %v17129_v27 }
 0x743   : > { %v15399_v11 = vadd.f32 %v15398_v36, %v15397_v29  ;;  %v15400_v47 = vpop.f32.mrb[50].mxu0  ;;  %v15419_v40 = vpop.f32.mrb[48].mxu1  ;;  %15700 = vmatpush3.bf16.msra.mxu0 %v17128_v16 }
 0x744   : > { %v15401_v45 = vpop.f32.mrb[51].mxu0  ;;  %v15420_v20 = vpop.f32.mrb[49].mxu1  ;;  %15701 = vmatprep.subr.bf16.mxu0 %v17131_v44  ;;  %v17149_v47 = vld [vmem:[#allocation10 + $0x8] sm:$0xff]  }
 0x745   : > { %v12874_v33 = vadd.f32 %v15399_v11, %v20604_v54  ;;  %v15421_v23 = vadd.f32 %v15420_v20, %v15419_v40  ;;  %v15422_v17 = vpop.f32.mrb[50].mxu1  ;;  %15722 = vmatpush3.bf16.msra.mxu1 %v17130_v42  ;;  %v17150_v40 = vld [vmem:[#allocation10 + $0x10] sm:$0xff]   ;;  %v17152_v45 = vld [vmem:[#allocation10 + $0x20] sm:$0xff]   ;;  %v17153_v20 = vld [vmem:[#allocation10 + $0x28] sm:$0xff]  }
 0x746   : > { %v15423_v60 = vpop.f32.mrb[51].mxu1  ;;  %15723 = vmatprep.subr.bf16.mxu1 %v17133_v34  ;;  %v17148_v34 = vld [vmem:[#allocation10] sm:$0xff]  }
 0x747   : > { %v12914_v46 = vadd.f32 %v15421_v23, %v12874_v33  ;;  %15702 = vmatpush3.bf16.msra.mxu0 %v17132_v52  ;;  %v17151_v52 = vld [vmem:[#allocation10 + $0x18] sm:$0xff]  }
 0x748   : > { %15703 = vmatprep.subr.bf16.mxu0 %v17135_v4 }
 0x749   : > { %15724 = vmatpush3.bf16.msra.mxu1 %v17134_v24 }
 0x74a   : > { %15725 = vmatprep.subr.bf16.mxu1 %v17137_v14 }
 0x74b   : > { %15704 = vmatpush3.bf16.msra.mxu0 %v17136_v2 }
 0x74c   : > { %16381 = vmatprep.subr.bf16.mxu0 %v17383_v41 }
 0x74d   : > { %15726 = vmatpush3.bf16.msra.mxu1 %v17138_v50 }
 0x74e   : > { %13432 = vmatmul.mubr.bf16.vlgmr.msra.gmra.mrb[76].mxu0 %v14402_v28  ;;  %16401 = vmatprep.subr.bf16.mxu1 %v17383_v41  ;;  %v17154_v28 = vld [vmem:[#allocation10 + $0x30] sm:$0xff]  }
 0x74f   : > { %16382 = vmatpush3.bf16.msra.mxu0 %v17139_v12  ;;  %16397 = vmatprep.mubr.msk.bf16.mxu0 %vm17384_vm4, %v17383_v41 }
 0x750   : > { %13472 = vmatmul.mubr.bf16.vlgmr.msra.gmra.mrb[76].mxu1 %v14404_v7  ;;  %16383 = vmatprep.subr.bf16.mxu0 %v17383_v41 }
 0x751   : > { %16417 = vmatprep.mubr.msk.bf16.mxu1 %vm17384_vm4, %v17383_v41  ;;  %16402 = vmatpush3.bf16.msra.mxu1 %v17148_v34  ;;  %v14799_v34 = vld [vmem:[%s20699_s8] ss:$0 sm:$0xff] }
 0x752   : > { %16403 = vmatprep.subr.bf16.mxu1 %v17383_v41 }
 0x753   : > { %16384 = vmatpush3.bf16.msra.mxu0 %v17140_v51  ;;  %v17155_v51 = vld [vmem:[#allocation10 + $0x38] sm:$0xff]  }
 0x754   : > { %16385 = vmatprep.subr.bf16.mxu0 %v17383_v41 }
 0x755   : > { %16404 = vmatpush3.bf16.msra.mxu1 %v17149_v47 }
 0x756   : > { %16405 = vmatprep.subr.bf16.mxu1 %v17383_v41 }
 0x757   : > { %16386 = vmatpush3.bf16.msra.mxu0 %v17141_v53 }
 0x758   : > { %16387 = vmatprep.subr.bf16.mxu0 %v17383_v41 }
 0x759   : > { %16406 = vmatpush3.bf16.msra.mxu1 %v17150_v40 }
 0x75a   : > { %16407 = vmatprep.subr.bf16.mxu1 %v17383_v41 }
 0x75b   : > { %16388 = vmatpush3.bf16.msra.mxu0 %v17142_v61 }
 0x75c   : > { %16389 = vmatprep.subr.bf16.mxu0 %v17383_v41 }
 0x75d   : > { %16408 = vmatpush3.bf16.msra.mxu1 %v17151_v52 }
 0x75e   : > { %16409 = vmatprep.subr.bf16.mxu1 %v17383_v41 }
 0x75f   : > { %16390 = vmatpush3.bf16.msra.mxu0 %v17143_v25 }
 0x760   : > { %16391 = vmatprep.subr.bf16.mxu0 %v17383_v41 }
 0x761   : > { %v15441_v9 = vpop.f32.mrb[52].mxu0  ;;  %16410 = vmatpush3.bf16.msra.mxu1 %v17152_v45 }
 0x762   : > { %v15442_v22 = vpop.f32.mrb[53].mxu0  ;;  %16411 = vmatprep.subr.bf16.mxu1 %v17383_v41 }
 0x763   : > { %v15443_v54 = vadd.f32 %v15442_v22, %v15441_v9  ;;  %v15444_v56 = vpop.f32.mrb[54].mxu0  ;;  %v15463_v13 = vpop.f32.mrb[52].mxu1  ;;  %16392 = vmatpush3.bf16.msra.mxu0 %v17144_v37 }
 0x764   : > { %v15445_v63 = vpop.f32.mrb[55].mxu0  ;;  %v15464_v59 = vpop.f32.mrb[53].mxu1  ;;  %16393 = vmatprep.subr.bf16.mxu0 %v17383_v41 }
 0x765   : > { %v12954_v21 = vadd.f32 %v15443_v54, %v12914_v46  ;;  %v15465_v19 = vadd.f32 %v15464_v59, %v15463_v13  ;;  %v15466_v0 = vpop.f32.mrb[54].mxu1  ;;  %16412 = vmatpush3.bf16.msra.mxu1 %v17153_v20 }
 0x766   : > { %v15467_v1 = vpop.f32.mrb[55].mxu1  ;;  %16413 = vmatprep.subr.bf16.mxu1 %v17383_v41 }
 0x767   : > { %v12994_v30 = vadd.f32 %v15465_v19, %v12954_v21  ;;  %16394 = vmatpush3.bf16.msra.mxu0 %v17145_v10 }
 0x768   : > { %16395 = vmatprep.subr.bf16.mxu0 %v17383_v41 }
 0x769   : > { %16414 = vmatpush3.bf16.msra.mxu1 %v17154_v28 }
 0x76a   : > { %16415 = vmatprep.subr.bf16.mxu1 %v17383_v41 }
 0x76b   : > { %16396 = vmatpush3.bf16.msra.mxu0 %v17146_v49 }
 0x76d   : > { %16416 = vmatpush3.bf16.msra.mxu1 %v17155_v51 }
 0x76e   : > { %16398 = vmatmul.mubr.bf16.vlgmr.msra.gmra.mrb[80].mxu0 %v17147_v5 }
 0x781   : > { %v15485_v15 = vpop.f32.mrb[56].mxu0 }
 0x782   : > { %v15486_v8 = vpop.f32.mrb[57].mxu0 }
 0x783   : > { %v15487_v38 = vadd.f32 %v15486_v8, %v15485_v15  ;;  %v15488_v55 = vpop.f32.mrb[58].mxu0  ;;  %v15507_v18 = vpop.f32.mrb[56].mxu1 }
 0x784   : > { %v15489_v58 = vpop.f32.mrb[59].mxu0  ;;  %v15508_v35 = vpop.f32.mrb[57].mxu1 }
 0x785   : > { %v13034_v48 = vadd.f32 %v15487_v38, %v12994_v30  ;;  %v15509_v31 = vadd.f32 %v15508_v35, %v15507_v18  ;;  %v15510_v32 = vpop.f32.mrb[58].mxu1 }
 0x786   : > { %v15511_v3 = vpop.f32.mrb[59].mxu1 }
 0x787   : > { %v13074_v26 = vadd.f32 %v15509_v31, %v13034_v48 }
 0x7a1   : > { %v15529_v6 = vpop.f32.mrb[60].mxu0 }
 0x7a2   : > { %v15530_v62 = vpop.f32.mrb[61].mxu0 }
 0x7a3   : > { %v15531_v43 = vadd.f32 %v15530_v62, %v15529_v6  ;;  %v15532_v39 = vpop.f32.mrb[62].mxu0  ;;  %v15551_v57 = vpop.f32.mrb[60].mxu1 }
 0x7a4   : > { %v15533_v27 = vpop.f32.mrb[63].mxu0  ;;  %v15552_v16 = vpop.f32.mrb[61].mxu1 }
 0x7a5   : > { %v13114_v44 = vadd.f32 %v15531_v43, %v13074_v26  ;;  %v15553_v29 = vadd.f32 %v15552_v16, %v15551_v57  ;;  %v15554_v42 = vpop.f32.mrb[62].mxu1 }
 0x7a6   : > { %v15555_v36 = vpop.f32.mrb[63].mxu1 }
 0x7a7   : > { %v13154_v11 = vadd.f32 %v15553_v29, %v13114_v44 }
 0x7c1   : > { %v15573_v4 = vpop.f32.mrb[64].mxu0 }
 0x7c2   : > { %v15574_v33 = vpop.f32.mrb[65].mxu0 }
 0x7c3   : > { %v15575_v23 = vadd.f32 %v15574_v33, %v15573_v4  ;;  %v15576_v17 = vpop.f32.mrb[66].mxu0  ;;  %v15595_v24 = vpop.f32.mrb[64].mxu1 }
 0x7c4   : > { %v15577_v60 = vpop.f32.mrb[67].mxu0  ;;  %v15596_v14 = vpop.f32.mrb[65].mxu1 }
 0x7c5   : > { %v13194_v46 = vadd.f32 %v15575_v23, %v13154_v11  ;;  %v15597_v2 = vadd.f32 %v15596_v14, %v15595_v24  ;;  %v15598_v50 = vpop.f32.mrb[66].mxu1 }
 0x7c6   : > { %v15599_v12 = vpop.f32.mrb[67].mxu1 }
 0x7c7   : > { %v13234_v7 = vadd.f32 %v15597_v2, %v13194_v46 }
 0x7e1   : > { %v15617_v53 = vpop.f32.mrb[68].mxu0 }
 0x7e2   : > { %v15618_v61 = vpop.f32.mrb[69].mxu0 }
 0x7e3   : > { %v15619_v25 = vadd.f32 %v15618_v61, %v15617_v53  ;;  %v15620_v37 = vpop.f32.mrb[70].mxu0  ;;  %v15639_v9 = vpop.f32.mrb[68].mxu1 }
 0x7e4   : > { %v15621_v22 = vpop.f32.mrb[71].mxu0  ;;  %v15640_v54 = vpop.f32.mrb[69].mxu1 }
 0x7e5   : > { %v13274_v56 = vadd.f32 %v15619_v25, %v13234_v7  ;;  %v15641_v13 = vadd.f32 %v15640_v54, %v15639_v9  ;;  %v15642_v10 = vpop.f32.mrb[70].mxu1 }
 0x7e6   : > { %v15643_v63 = vpop.f32.mrb[71].mxu1 }
 0x7e7   : > { %v13314_v59 = vadd.f32 %v15641_v13, %v13274_v56 }
 0x801   : > { %v15661_v21 = vpop.f32.mrb[72].mxu0 }
 0x802   : > { %v15662_v19 = vpop.f32.mrb[73].mxu0 }
 0x803   : > { %v15663_v0 = vadd.f32 %v15662_v19, %v15661_v21  ;;  %v15664_v1 = vpop.f32.mrb[74].mxu0  ;;  %v15683_v30 = vpop.f32.mrb[72].mxu1 }
 0x804   : > { %v15665_v49 = vpop.f32.mrb[75].mxu0  ;;  %v15684_v41 = vpop.f32.mrb[73].mxu1 }
 0x805   : > { %v13354_v5 = vadd.f32 %v15663_v0, %v13314_v59  ;;  %v15685_v15 = vadd.f32 %v15684_v41, %v15683_v30  ;;  %v15686_v8 = vpop.f32.mrb[74].mxu1 }
 0x806   : > { %v15687_v38 = vpop.f32.mrb[75].mxu1 }
 0x807   : > { %v13394_v55 = vadd.f32 %v15685_v15, %v13354_v5 }
 0x821   : > { %v15705_v18 = vpop.f32.mrb[76].mxu0 }
 0x822   : > { %v15706_v58 = vpop.f32.mrb[77].mxu0 }
 0x823   : > { %v15707_v35 = vadd.f32 %v15706_v58, %v15705_v18  ;;  %v15708_v48 = vpop.f32.mrb[78].mxu0  ;;  %v15727_v31 = vpop.f32.mrb[76].mxu1 }
 0x824   : > { %v15709_v32 = vpop.f32.mrb[79].mxu0  ;;  %v15728_v3 = vpop.f32.mrb[77].mxu1 }
 0x825   : > { %v13434_v26 = vadd.f32 %v15707_v35, %v13394_v55  ;;  %v15729_v6 = vadd.f32 %v15728_v3, %v15727_v31  ;;  %v15730_v62 = vpop.f32.mrb[78].mxu1 }
 0x826   : > { %v15731_v43 = vpop.f32.mrb[79].mxu1 }
 0x827   : > { %v13474_v39 = vadd.f32 %v15729_v6, %v13434_v26 }
 0x841   : > { %v13513_v57 = vpop.f32.mrb[80].mxu0 }
 0x842   : > { %v13514_v27 = vadd.f32 %v13513_v57, %v13474_v39  ;;  %v16399_v16 = vpop.f32.mrb[81].mxu0 }
 0x843   : > { %v13516_v44 = vpop.f32.mrb[82].mxu0 }
 0x844   : > { %v13519_v29 = vmax.f32 %v13514_v27, 0.0  ;;  %v16400_v42 = vpop.f32.mrb[83].mxu0 }
 0x846   : > { %v13520_v36 = vpack.c.bf16 %v13519_v29, %v13519_v29 }
 0x848   : > { %16418 = vmatmul.mubr.bf16.vlgmr.msra.gmra.mrb[80].mxu1 %v13520_v36 }
 0x91b   : > { %v13626_v11 = vpop.f32.mrb[80].mxu1 }
 0x91c   : > { %v13627_v47 = vadd.f32 %v14799_v34, %v13626_v11  ;;  %v16419_v40 = vpop.f32.mrb[81].mxu1 }
 0x91d   : > { %v13629_v52 = vpop.f32.mrb[82].mxu1 }
 0x91e   : > { %v16420_v45 = vpop.f32.mrb[83].mxu1  ;;  %13633 = vst.msk [vmem:[%s383_s24] sm:$0x1] %vm13632_vm5, %v13627_v47 }
 0x91f   : > { %17312 = shalt.err (!%p17309_p0)
}
 0x920   : > { %s17313_s27 = scalar_lea.hbm %s20649_s15, 16  ;;  %s17317_s28 = scalar_lea.hbm %s20700_s9, 32 }
 0x921   : > { %p17314_p10 = scmp.ne.s32.totalorder %s20649_s15, %s17313_s27  ;;  %p17318_p4 = scmp.lt.u32.totalorder %s20649_s15, %s20700_s9 }
 0x922   : > { %p17319_p12 = scmp.lt.u32.totalorder %s17317_s28, %s17313_s27  ;;  %p17321_p8 = scmp.lt.u32.totalorder %s17313_s27, %s20649_s15 }
 0x923   : > { %p17315_p2 = pnand %p17314_p10, %p20767_p11 }
 0x924   : > { %p17320_p7 = por %p17319_p12, %p17318_p4 }
 0x925   : > { %p17316_p3 = pneg %p17315_p2 }
 0x926   : > { %p17322_p13 = por %p17321_p8, %p17320_p7 }
 0x928   : > { %p17323_p1 = pnand %p17322_p13, %p17316_p3 }
 0x92a   : > { %17326 = shalt.err (!%p17323_p1)
}
 0x92b   : > { %16447 = dma.vmem_to_hbm [thread:$0]  (%p20767_p11), %s20651_s14, 16, %s20649_s15, %s13635_s13  }
 0x92c PF: > { %s20768_s18 = sld [smem:[#allocation17_spill]]  ;;  %s20769_s21 = sld [smem:[#allocation21_spill]] }
 0x92d   : > { %p16474_p6 = scmp.ge.s32.totalorder %s17373_s12, 2 }
 0x932   : > { %s13659_s24 = sand.u32 1, %s20768_s18   ;;  %p20770_p9 = scmp.ne.s32.totalorder %s20769_s21, 0 }
 0x933   : > { %s13660_s16 = scalar_lea.sflag [#allocation6], %s13659_s24 }
 0x934   : > { %p16463_p5 = pnand %p16474_p6, %p20770_p9 }
 0x936   : > { %17356 = dma.done.wait (!%p16463_p5), %s13660_s16, 16  }
 0x937   : > { %17358 = vsyncadd (!%p16463_p5), %s13660_s16, 4294967280  ;;  %s20771_s12 = sld [smem:[#allocation19_spill]]  ;;  %s20772_s11 = sld [smem:[#allocation18_spill]] }
 0x938   : > { %s20773_s20 = sld [smem:[#allocation20_spill]]  ;;  %s20774_s30 = smov %s17365_s10 }
 0x93d   : > { %p22_p0 = scmp.ge.s32.totalorder %s20771_s12, 4   ;;  %s20775_s10 = smov %s20772_s11 }
 0x93e   : > { %s20776_s11 = smov %s20773_s20 }
 0x93f   :  { %24 = sbr.rel (!%p22_p0) target bundleno = 6 (0x6), region = 124 }
 0x946   :  { %13664 = vsyncpa [#allocation5], 1 }
 0x947   :  { %13666 = vsyncpa [#allocation5 + $0x1], 1 }
 0x948   :  { %13667 = vsyncpa [#allocation8], 1 }
 0x949   :  { %13668 = vsyncpa [#allocation11], 1 }
 0x94a   :  { %13669 = vsyncpa [#allocation6], 1 }
 0x94b   :  { %13671 = vsyncpa [#allocation6 + $0x1], 1 }

</bundles_post_ra>
